<compile_context>
chip_gen: v7x
topology: tpu7x:2x2x1
jax: 0.10.0
libtpu: 0.0.40
codegen_flags: <defaults>
</compile_context>

<pallas_src>
import numpy as np

import jax
import jax.numpy as jnp
from jax.experimental import pallas as pl
from jax.experimental.pallas import tpu as pltpu


# ----------------------------------------------------------------------------
# helpers
# ----------------------------------------------------------------------------
def _round_up(v, m):
    return -(-v // m) * m


def _tile(dim, maxt):
    """Largest multiple-of-128 tile <= maxt that divides dim (dim itself if small)."""
    if dim <= maxt:
        return dim
    t = (maxt // 128) * 128
    while t > 128 and dim % t != 0:
        t -= 128
    return t if dim % t == 0 else dim


# ----------------------------------------------------------------------------
# K1: fused pairwise-distance + kNN selection + incidence build + linear
# ----------------------------------------------------------------------------
def _make_build_kernel(k1, m_real, m_pad):
    padded = m_pad > m_real

    def kernel(xb_ref, xall_ref, sqi_ref, sqall_ref, loc_ref,
               xf_ref, dv2_ref, wt_ref, b_ref, h_ref, y_ref):
        tm = xb_ref.shape[0]
        # squared distances of this row tile against all (padded) nodes
        inner = jax.lax.dot_general(
            xb_ref[...], xall_ref[...],
            dimension_numbers=(((1,), (1,)), ((), ())),
            preferred_element_type=jnp.float32)
        d = sqi_ref[...] - 2.0 * inner + sqall_ref[...]

        col = jax.lax.broadcasted_iota(jnp.int32, (tm, m_pad), 1)
        colf = col.astype(jnp.float32)
        if padded:                              # never select a padded column
            d = jnp.where(col < m_real, d, 1e30)

        # iterative (k+1)-nearest selection: row-min, mark, knock out, repeat.
        hit = jnp.zeros((tm, m_pad), jnp.float32)
        for _ in range(k1):                     # k1 = k+1 is small and static
            cur = jnp.min(d, axis=1, keepdims=True)
            cand = jnp.where(d == cur, colf, float(m_pad))
            sel = jnp.min(cand, axis=1, keepdims=True)   # lowest tied index
            pick = colf == sel
            hit = jnp.where(pick, 1.0, hit)
            d = jnp.where(pick, 1e30, d)

        if padded:                              # padded rows contribute nothing
            row = (pl.program_id(0) * tm
                   + jax.lax.broadcasted_iota(jnp.int32, (tm, 1), 0))
            hit = jnp.where(row < m_real, hit, 0.0)

        h_ref[:, :m_pad] = hit.astype(jnp.bfloat16)
        h_ref[:, m_pad:] = loc_ref[...]

        # fused Linear + DV^-1/2 scaling (x tile already resident)
        y = jnp.dot(xf_ref[...], wt_ref[...],
                    preferred_element_type=jnp.float32) + b_ref[...]
        y_ref[...] = (y * dv2_ref[...]).astype(jnp.bfloat16)

    return kernel


# ----------------------------------------------------------------------------
# K2: hyperedge gather  t_raw = H^T y  (+ edge degrees), accumulated over nodes
# ----------------------------------------------------------------------------
def _gather_kernel(h_ref, y_ref, t_ref, de_ref):
    @pl.when(pl.program_id(1) == 0)
    def _():
        t_ref[...] = jnp.zeros_like(t_ref)
        de_ref[...] = jnp.zeros_like(de_ref)

    h = h_ref[...]
    # H^T @ y without materialising H^T: contract the node (sublane) axis.
    t_ref[...] += jax.lax.dot_general(
        h, y_ref[...], dimension_numbers=(((0,), (0,)), ((), ())),
        preferred_element_type=jnp.float32)
    # edge degrees DE accumulated in the same pass
    de_ref[...] += jnp.sum(h.astype(jnp.float32), axis=0, keepdims=True)


# ----------------------------------------------------------------------------
# K3: node scatter  z = DV^-1/2 * (H t)  + fused BN partial statistics
# ----------------------------------------------------------------------------
def _scatter_kernel(h_ref, t_ref, dv2_ref, z_ref, stats_ref):
    z = jax.lax.dot_general(
        h_ref[...], t_ref[...], dimension_numbers=(((1,), (0,)), ((), ())),
        preferred_element_type=jnp.float32) * dv2_ref[...]
    z_ref[...] = z
    zs = jnp.sum(z, axis=0, keepdims=True)
    zq = jnp.sum(z * z, axis=0, keepdims=True)
    riota = jax.lax.broadcasted_iota(jnp.int32, (8, z.shape[1]), 0)
    stats_ref[...] = jnp.where(riota == 0, zs, jnp.where(riota == 1, zq, 0.0))


# ----------------------------------------------------------------------------
# K4: BN affine + relu + residual (elementwise, lane-dense layout)
# ----------------------------------------------------------------------------
def _bn_relu_res_kernel(z_ref, x_ref, scale_ref, bias_ref, o_ref):
    o_ref[...] = (jnp.maximum(z_ref[...] * scale_ref[...] + bias_ref[...], 0.0)
                  + x_ref[...])


# ----------------------------------------------------------------------------
# static local hypergraph (G_HGNN_layer.local_kernel / build_block_diagonal)
# ----------------------------------------------------------------------------
def _local_incidence(size, kernel_size, stride):
    idx = np.arange(size * size).reshape(size, size)
    cols = []
    for r in range(0, size - kernel_size + 1, stride):
        for c in range(0, size - kernel_size + 1, stride):
            cols.append(idx[r:r + kernel_size, c:c + kernel_size].reshape(-1))
    h = np.zeros((size * size, len(cols)), np.float32)
    for e, pix in enumerate(cols):
        h[pix, e] = 1.0
    return h


# ----------------------------------------------------------------------------
# module-equivalent forward
# ----------------------------------------------------------------------------
def g_hgnn_layer_forward(x, params, *, k_neig, node, kernel_size=5, stride=2,
                         eps=1e-5, return_aux=False):
    """Forward pass of G_HGNN_layer. x: (B, N, C) with N == node*node."""
    B, N, C = x.shape
    assert N == node * node
    M = B * N
    M_pad = _round_up(M, 128)
    k1 = k_neig + 1

    xm = x.reshape(M, C).astype(jnp.float32)
    if M_pad != M:
        xm_p = jnp.concatenate(
            [xm, jnp.zeros((M_pad - M, C), jnp.float32)], axis=0)
    else:
        xm_p = xm

    # --- static local hypergraph + analytic node degrees (host-side) --------
    loc1 = _local_incidence(node, kernel_size, stride)         # (N, E1)
    E1 = loc1.shape[1]
    E_loc_pad = _round_up(B * E1, 128)
    loc_bd = np.zeros((M_pad, E_loc_pad), np.float32)
    for i in range(B):
        loc_bd[i * N:(i + 1) * N, i * E1:(i + 1) * E1] = loc1
    loc_bf = jnp.asarray(loc_bd).astype(jnp.bfloat16)

    # DV = (k+1) distinct kNN edges (weight 1, incl. self) + local window count
    dv = np.ones(M_pad, np.float32)
    dv[:M] = (k1 + np.tile(loc1.sum(axis=1), B)).astype(np.float32)
    dv2 = jnp.asarray(dv ** -0.5).reshape(M_pad, 1)

    E_pad = M_pad + E_loc_pad

    # --- K1: fused pdist + kNN + incidence + linear --------------------------
    xb = xm_p.astype(jnp.bfloat16)             # ranking-only -> bf16 MXU path
    sq = jnp.sum(jnp.square(xb.astype(jnp.float32)), axis=1)
    wt = params["wt"].astype(jnp.float32)
    b = params["b"].reshape(1, C).astype(jnp.float32)

    tmb = _tile(M_pad, 128)                    # (tm, M_pad) f32 temps stay small
    H, y_bf = pl.pallas_call(
        _make_build_kernel(k1, M, M_pad),
        out_shape=(jax.ShapeDtypeStruct((M_pad, E_pad), jnp.bfloat16),
                   jax.ShapeDtypeStruct((M_pad, C), jnp.bfloat16)),
        grid=(M_pad // tmb,),
        in_specs=[
            pl.BlockSpec((tmb, C), lambda i: (i, 0)),
            pl.BlockSpec((M_pad, C), lambda i: (0, 0)),        # resident
            pl.BlockSpec((tmb, 1), lambda i: (i, 0)),
            pl.BlockSpec((1, M_pad), lambda i: (0, 0)),        # resident
            pl.BlockSpec((tmb, E_loc_pad), lambda i: (i, 0)),
            pl.BlockSpec((tmb, C), lambda i: (i, 0)),
            pl.BlockSpec((tmb, 1), lambda i: (i, 0)),
            pl.BlockSpec((C, C), lambda i: (0, 0)),            # resident
            pl.BlockSpec((1, C), lambda i: (0, 0)),            # resident
        ],
        out_specs=(pl.BlockSpec((tmb, E_pad), lambda i: (i, 0)),
                   pl.BlockSpec((tmb, C), lambda i: (i, 0))),
        compiler_params=pltpu.CompilerParams(
            dimension_semantics=("parallel",)),
    )(xb, xb, sq.reshape(M_pad, 1), sq.reshape(1, M_pad), loc_bf,
      xm_p, dv2, wt, b)

    # --- K2: t_raw = H^T y and DE, 2-D grid (E-tiles parallel, node tiles acc)
    te = _tile(E_pad, 256)
    tm3 = _tile(M_pad, 256)
    t_raw, de = pl.pallas_call(
        _gather_kernel,
        out_shape=(jax.ShapeDtypeStruct((E_pad, C), jnp.float32),
                   jax.ShapeDtypeStruct((1, E_pad), jnp.float32)),
        grid=(E_pad // te, M_pad // tm3),
        in_specs=[
            pl.BlockSpec((tm3, te), lambda e, i: (i, e)),
            pl.BlockSpec((tm3, C), lambda e, i: (i, 0)),
        ],
        out_specs=(pl.BlockSpec((te, C), lambda e, i: (e, 0)),
                   pl.BlockSpec((1, te), lambda e, i: (0, e))),
        compiler_params=pltpu.CompilerParams(
            dimension_semantics=("parallel", "arbitrary")),
    )(H, y_bf)

    # tiny (E,C) glue: per-edge invDE scaling + one-time bf16 cast
    inv_de = 1.0 / jnp.maximum(de, 1e-8)
    t_bf = (t_raw * inv_de.reshape(E_pad, 1)).astype(jnp.bfloat16)

    # --- K3: z = DV^-1/2 (H t) with fused BN partial sums --------------------
    cap = max(128, min(512, ((8 << 20) // (4 * E_pad)) // 128 * 128))
    tm4 = _tile(M_pad, cap)
    gm4 = M_pad // tm4
    z, stats = pl.pallas_call(
        _scatter_kernel,
        out_shape=(jax.ShapeDtypeStruct((M_pad, C), jnp.float32),
                   jax.ShapeDtypeStruct((gm4 * 8, C), jnp.float32)),
        grid=(gm4,),
        in_specs=[
            pl.BlockSpec((tm4, E_pad), lambda i: (i, 0)),
            pl.BlockSpec((E_pad, C), lambda i: (0, 0)),        # resident
            pl.BlockSpec((tm4, 1), lambda i: (i, 0)),
        ],
        out_specs=(pl.BlockSpec((tm4, C), lambda i: (i, 0)),
                   pl.BlockSpec((8, C), lambda i: (i, 0))),
        compiler_params=pltpu.CompilerParams(
            dimension_semantics=("parallel",)),
    )(H, t_bf, dv2)

    # BN scale/bias from the tiny partial-stat array (padded rows are exact 0)
    stats3 = stats.reshape(gm4, 8, C)
    mean = jnp.sum(stats3[:, 0, :], axis=0) / M
    var = jnp.maximum(jnp.sum(stats3[:, 1, :], axis=0) / M - mean * mean, 0.0)
    scale = params["gamma"] / jnp.sqrt(var + eps)
    bias = params["beta"] - mean * scale

    # --- K4: BN + relu + residual, on a lane-dense 128-wide view -------------
    if C % 128 != 0 and 128 % C == 0:
        reps = 128 // C
        rows, width = M_pad * C // 128, 128
        z5, x5 = z.reshape(rows, width), xm_p.reshape(rows, width)
        scale5 = jnp.tile(scale, reps).reshape(1, width)
        bias5 = jnp.tile(bias, reps).reshape(1, width)
    else:                                      # C already lane-dense (or odd)
        rows, width = M_pad, C
        z5, x5 = z, xm_p
        scale5, bias5 = scale.reshape(1, C), bias.reshape(1, C)

    tm5 = _tile(rows, 512)
    out5 = pl.pallas_call(
        _bn_relu_res_kernel,
        out_shape=jax.ShapeDtypeStruct((rows, width), jnp.float32),
        grid=(rows // tm5,),
        in_specs=[
            pl.BlockSpec((tm5, width), lambda i: (i, 0)),
            pl.BlockSpec((tm5, width), lambda i: (i, 0)),
            pl.BlockSpec((1, width), lambda i: (0, 0)),
            pl.BlockSpec((1, width), lambda i: (0, 0)),
        ],
        out_specs=pl.BlockSpec((tm5, width), lambda i: (i, 0)),
        compiler_params=pltpu.CompilerParams(
            dimension_semantics=("parallel",)),
    )(z5, x5, scale5, bias5)

    out = out5.reshape(M_pad, C)[:M].reshape(B, N, C)
    if return_aux:
        return out, {"H": H, "M_pad": M_pad, "E_pad": E_pad}
    return out


# ----------------------------------------------------------------------------
# deterministic synthetic parameters
# ----------------------------------------------------------------------------
def init_params(key, c):
    k1, k2, k3, k4 = jax.random.split(key, 4)
    return dict(
        # nn.Linear(in_ch, in_ch): stored transposed (in x out) so x @ wt + b.
        wt=jax.random.normal(k1, (c, c), jnp.float32) / jnp.sqrt(c),
        b=jax.random.normal(k2, (c,), jnp.float32) * 0.01,
        gamma=jax.random.uniform(k3, (c,), jnp.float32, minval=0.5, maxval=1.5),
        beta=jax.random.normal(k4, (c,), jnp.float32) * 0.1,
    )


# ----------------------------------------------------------------------------
# pure-JAX dense-G reference (shares the kernel-built incidence)
# ----------------------------------------------------------------------------
def _reference_from_H(xm, H, params, eps=1e-5):
    dv = jnp.sum(H, axis=1)
    de = jnp.maximum(jnp.sum(H, axis=0), 1e-8)
    G = (jnp.diag(dv ** -0.5) @ H @ jnp.diag(1.0 / de) @ H.T
         @ jnp.diag(dv ** -0.5))
    y = xm @ params["wt"] + params["b"]
    z = G @ y
    mean = z.mean(axis=0)
    var = ((z - mean) ** 2).mean(axis=0)
    zn = (z - mean) / jnp.sqrt(var + eps) * params["gamma"] + params["beta"]
    return jnp.maximum(zn, 0.0) + xm


def _run_case(key, *, B, node, C, k_neig, kernel_size, stride):
    kx, kp = jax.random.split(key)
    N = node * node
    M = B * N
    x = jax.random.normal(kx, (B, N, C), jnp.float32)
    params = init_params(kp, C)

    out, aux = g_hgnn_layer_forward(
        x, params, k_neig=k_neig, node=node, kernel_size=kernel_size,
        stride=stride, return_aux=True)
    out = jax.block_until_ready(out)
    assert out.shape == (B, N, C), out.shape
    assert bool(jnp.all(jnp.isfinite(out)))

    M_pad = aux["M_pad"]
    H = aux["H"].astype(jnp.float32)
    knn = H[:M, :M_pad]

    # structural checks on the in-kernel k-nearest selection
    assert bool(jnp.all(jnp.sum(knn, axis=1) == float(k_neig + 1)))
    assert bool(jnp.all(knn[jnp.arange(M), jnp.arange(M)] == 1.0))
    if M_pad > M:
        assert float(jnp.sum(knn[:, M:])) == 0.0      # no padded column picked
        assert float(jnp.sum(H[M:, :])) == 0.0        # padded rows are empty

    xm = x.reshape(M, C)
    with jax.default_matmul_precision("highest"):
        # selection cross-check against lax.top_k on the same bf16-rounded inputs
        xb32 = xm.astype(jnp.bfloat16).astype(jnp.float32)
        sq = jnp.sum(xb32 * xb32, axis=1)
        d = sq[:, None] - 2.0 * (xb32 @ xb32.T) + sq[None, :]
        _, inds = jax.lax.top_k(-d, k_neig + 1)
        knn_ref = jnp.zeros((M, M), jnp.float32).at[
            jnp.arange(M)[:, None], inds].set(1.0)
        mismatch = float(jnp.sum(jnp.abs(knn[:, :M] - knn_ref)))
        assert mismatch <= 0.01 * M * (k_neig + 1) + 1e-6, mismatch

        ref = _reference_from_H(xm, H[:M, :], params)
    max_err = float(jnp.max(jnp.abs(out.reshape(M, C) - ref)))
    assert max_err < 0.2, max_err
    return max_err


# ----------------------------------------------------------------------------
if __name__ == "__main__":
    key = jax.random.PRNGKey(0)
    k0, k1 = jax.random.split(key)

    # main config: B=2, 16x16 spatial grid, C=32 -> M = 512 (multiple of 128)
    _run_case(k0, B=2, node=16, C=32, k_neig=4, kernel_size=5, stride=2)
    # padding path: B=1, 12x12 grid -> M = 144, zero-padded to 256
    _run_case(k1, B=1, node=12, C=32, k_neig=3, kernel_size=5, stride=2)

    print("KERNEL_OK")
</pallas_src>

<mosaic_0001>
module attributes {stable_mosaic.version = 11 : i64} {
  func.func @kernel(%arg0: i32, %arg1: memref<128x32xbf16, #tpu.memory_space<vmem>>, %arg2: memref<512x32xbf16, #tpu.memory_space<vmem>>, %arg3: memref<128x1xf32, #tpu.memory_space<vmem>>, %arg4: memref<1x512xf32, #tpu.memory_space<vmem>>, %arg5: memref<128x128xbf16, #tpu.memory_space<vmem>>, %arg6: memref<128x32xf32, #tpu.memory_space<vmem>>, %arg7: memref<128x1xf32, #tpu.memory_space<vmem>>, %arg8: memref<32x32xf32, #tpu.memory_space<vmem>>, %arg9: memref<1x32xf32, #tpu.memory_space<vmem>>, %arg10: memref<128x640xbf16, #tpu.memory_space<vmem>>, %arg11: memref<128x32xbf16, #tpu.memory_space<vmem>>) attributes {dimension_semantics = [#tpu.dimension_semantics<parallel>], iteration_bounds = array<i64: 4>, scalar_prefetch = 0 : i64, scratch_operands = 0 : i64, tpu.core_type = #tpu.core_type<tc>, window_params = [{transform_indices = @transform_0, window_bounds = array<i64: 128, 32>}, {pipeline_mode = #tpu.pipeline_mode<synchronous>, transform_indices = @transform_1, window_bounds = array<i64: 512, 32>}, {transform_indices = @transform_2, window_bounds = array<i64: 128, 1>}, {pipeline_mode = #tpu.pipeline_mode<synchronous>, transform_indices = @transform_3, window_bounds = array<i64: 1, 512>}, {transform_indices = @transform_4, window_bounds = array<i64: 128, 128>}, {transform_indices = @transform_5, window_bounds = array<i64: 128, 32>}, {transform_indices = @transform_6, window_bounds = array<i64: 128, 1>}, {pipeline_mode = #tpu.pipeline_mode<synchronous>, transform_indices = @transform_7, window_bounds = array<i64: 32, 32>}, {pipeline_mode = #tpu.pipeline_mode<synchronous>, transform_indices = @transform_8, window_bounds = array<i64: 1, 32>}, {transform_indices = @transform_9, window_bounds = array<i64: 128, 640>}, {transform_indices = @transform_10, window_bounds = array<i64: 128, 32>}]} {
    %c0 = arith.constant 0 : index
    %c0_0 = arith.constant 0 : index
    %0 = vector.load %arg1[%c0, %c0_0] : memref<128x32xbf16, #tpu.memory_space<vmem>>, vector<128x32xbf16>
    %c0_1 = arith.constant 0 : index
    %c0_2 = arith.constant 0 : index
    %1 = vector.load %arg2[%c0_1, %c0_2] : memref<512x32xbf16, #tpu.memory_space<vmem>>, vector<512x32xbf16>
    %cst = arith.constant dense<0.000000e+00> : vector<128x512xf32>
    %2 = tpu.matmul %0, %1, %cst {dimension_numbers = #tpu.dot_dimension_numbers<[1], [1], [0], [0], [0, 0, 1, 0], [], []>} : vector<128x32xbf16>, vector<512x32xbf16>, vector<128x512xf32> -> vector<128x512xf32>
    %c0_3 = arith.constant 0 : index
    %c0_4 = arith.constant 0 : index
    %3 = vector.load %arg3[%c0_3, %c0_4] : memref<128x1xf32, #tpu.memory_space<vmem>>, vector<128x1xf32>
    %cst_5 = arith.constant 2.000000e+00 : f32
    %4 = vector.broadcast %cst_5 : f32 to vector<128x512xf32>
    %5 = arith.mulf %4, %2 : vector<128x512xf32>
    %6 = vector.broadcast %3 : vector<128x1xf32> to vector<128x512xf32>
    %7 = arith.subf %6, %5 : vector<128x512xf32>
    %c0_6 = arith.constant 0 : index
    %c0_7 = arith.constant 0 : index
    %8 = vector.load %arg4[%c0_6, %c0_7] : memref<1x512xf32, #tpu.memory_space<vmem>>, vector<1x512xf32>
    %9 = vector.broadcast %8 : vector<1x512xf32> to vector<128x512xf32>
    %10 = arith.addf %7, %9 : vector<128x512xf32>
    %11 = tpu.iota {dimensions = array<i32: 1>} : vector<128x512xi32>
    %12 = arith.sitofp %11 : vector<128x512xi32> to vector<128x512xf32>
    %cst_8 = arith.constant 0.000000e+00 : f32
    %13 = vector.broadcast %cst_8 : f32 to vector<128x512xf32>
    %cst_9 = arith.constant dense<0x7F800000> : vector<128xf32>
    %14 = vector.multi_reduction <minimumf>, %10, %cst_9 [1] : vector<128x512xf32> to vector<128xf32>
    %15 = vector.shape_cast %14 : vector<128xf32> to vector<128x1xf32>
    %16 = vector.broadcast %15 : vector<128x1xf32> to vector<128x512xf32>
    %17 = arith.cmpf oeq, %10, %16 : vector<128x512xf32>
    %cst_10 = arith.constant 5.120000e+02 : f32
    %18 = vector.broadcast %cst_10 : f32 to vector<128x512xf32>
    %19 = arith.select %17, %12, %18 : vector<128x512xi1>, vector<128x512xf32>
    %cst_11 = arith.constant dense<0x7F800000> : vector<128xf32>
    %20 = vector.multi_reduction <minimumf>, %19, %cst_11 [1] : vector<128x512xf32> to vector<128xf32>
    %21 = vector.shape_cast %20 : vector<128xf32> to vector<128x1xf32>
    %22 = vector.broadcast %21 : vector<128x1xf32> to vector<128x512xf32>
    %23 = arith.cmpf oeq, %12, %22 : vector<128x512xf32>
    %cst_12 = arith.constant 1.000000e+00 : f32
    %24 = vector.broadcast %cst_12 : f32 to vector<128x512xf32>
    %25 = arith.select %23, %24, %13 : vector<128x512xi1>, vector<128x512xf32>
    %cst_13 = arith.constant 1.000000e+30 : f32
    %26 = vector.broadcast %cst_13 : f32 to vector<128x512xf32>
    %27 = arith.select %23, %26, %10 : vector<128x512xi1>, vector<128x512xf32>
    %cst_14 = arith.constant dense<0x7F800000> : vector<128xf32>
    %28 = vector.multi_reduction <minimumf>, %27, %cst_14 [1] : vector<128x512xf32> to vector<128xf32>
    %29 = vector.shape_cast %28 : vector<128xf32> to vector<128x1xf32>
    %30 = vector.broadcast %29 : vector<128x1xf32> to vector<128x512xf32>
    %31 = arith.cmpf oeq, %27, %30 : vector<128x512xf32>
    %cst_15 = arith.constant 5.120000e+02 : f32
    %32 = vector.broadcast %cst_15 : f32 to vector<128x512xf32>
    %33 = arith.select %31, %12, %32 : vector<128x512xi1>, vector<128x512xf32>
    %cst_16 = arith.constant dense<0x7F800000> : vector<128xf32>
    %34 = vector.multi_reduction <minimumf>, %33, %cst_16 [1] : vector<128x512xf32> to vector<128xf32>
    %35 = vector.shape_cast %34 : vector<128xf32> to vector<128x1xf32>
    %36 = vector.broadcast %35 : vector<128x1xf32> to vector<128x512xf32>
    %37 = arith.cmpf oeq, %12, %36 : vector<128x512xf32>
    %cst_17 = arith.constant 1.000000e+00 : f32
    %38 = vector.broadcast %cst_17 : f32 to vector<128x512xf32>
    %39 = arith.select %37, %38, %25 : vector<128x512xi1>, vector<128x512xf32>
    %cst_18 = arith.constant 1.000000e+30 : f32
    %40 = vector.broadcast %cst_18 : f32 to vector<128x512xf32>
    %41 = arith.select %37, %40, %27 : vector<128x512xi1>, vector<128x512xf32>
    %cst_19 = arith.constant dense<0x7F800000> : vector<128xf32>
    %42 = vector.multi_reduction <minimumf>, %41, %cst_19 [1] : vector<128x512xf32> to vector<128xf32>
    %43 = vector.shape_cast %42 : vector<128xf32> to vector<128x1xf32>
    %44 = vector.broadcast %43 : vector<128x1xf32> to vector<128x512xf32>
    %45 = arith.cmpf oeq, %41, %44 : vector<128x512xf32>
    %cst_20 = arith.constant 5.120000e+02 : f32
    %46 = vector.broadcast %cst_20 : f32 to vector<128x512xf32>
    %47 = arith.select %45, %12, %46 : vector<128x512xi1>, vector<128x512xf32>
    %cst_21 = arith.constant dense<0x7F800000> : vector<128xf32>
    %48 = vector.multi_reduction <minimumf>, %47, %cst_21 [1] : vector<128x512xf32> to vector<128xf32>
    %49 = vector.shape_cast %48 : vector<128xf32> to vector<128x1xf32>
    %50 = vector.broadcast %49 : vector<128x1xf32> to vector<128x512xf32>
    %51 = arith.cmpf oeq, %12, %50 : vector<128x512xf32>
    %cst_22 = arith.constant 1.000000e+00 : f32
    %52 = vector.broadcast %cst_22 : f32 to vector<128x512xf32>
    %53 = arith.select %51, %52, %39 : vector<128x512xi1>, vector<128x512xf32>
    %cst_23 = arith.constant 1.000000e+30 : f32
    %54 = vector.broadcast %cst_23 : f32 to vector<128x512xf32>
    %55 = arith.select %51, %54, %41 : vector<128x512xi1>, vector<128x512xf32>
    %cst_24 = arith.constant dense<0x7F800000> : vector<128xf32>
    %56 = vector.multi_reduction <minimumf>, %55, %cst_24 [1] : vector<128x512xf32> to vector<128xf32>
    %57 = vector.shape_cast %56 : vector<128xf32> to vector<128x1xf32>
    %58 = vector.broadcast %57 : vector<128x1xf32> to vector<128x512xf32>
    %59 = arith.cmpf oeq, %55, %58 : vector<128x512xf32>
    %cst_25 = arith.constant 5.120000e+02 : f32
    %60 = vector.broadcast %cst_25 : f32 to vector<128x512xf32>
    %61 = arith.select %59, %12, %60 : vector<128x512xi1>, vector<128x512xf32>
    %cst_26 = arith.constant dense<0x7F800000> : vector<128xf32>
    %62 = vector.multi_reduction <minimumf>, %61, %cst_26 [1] : vector<128x512xf32> to vector<128xf32>
    %63 = vector.shape_cast %62 : vector<128xf32> to vector<128x1xf32>
    %64 = vector.broadcast %63 : vector<128x1xf32> to vector<128x512xf32>
    %65 = arith.cmpf oeq, %12, %64 : vector<128x512xf32>
    %cst_27 = arith.constant 1.000000e+00 : f32
    %66 = vector.broadcast %cst_27 : f32 to vector<128x512xf32>
    %67 = arith.select %65, %66, %53 : vector<128x512xi1>, vector<128x512xf32>
    %cst_28 = arith.constant 1.000000e+30 : f32
    %68 = vector.broadcast %cst_28 : f32 to vector<128x512xf32>
    %69 = arith.select %65, %68, %55 : vector<128x512xi1>, vector<128x512xf32>
    %cst_29 = arith.constant dense<0x7F800000> : vector<128xf32>
    %70 = vector.multi_reduction <minimumf>, %69, %cst_29 [1] : vector<128x512xf32> to vector<128xf32>
    %71 = vector.shape_cast %70 : vector<128xf32> to vector<128x1xf32>
    %72 = vector.broadcast %71 : vector<128x1xf32> to vector<128x512xf32>
    %73 = arith.cmpf oeq, %69, %72 : vector<128x512xf32>
    %cst_30 = arith.constant 5.120000e+02 : f32
    %74 = vector.broadcast %cst_30 : f32 to vector<128x512xf32>
    %75 = arith.select %73, %12, %74 : vector<128x512xi1>, vector<128x512xf32>
    %cst_31 = arith.constant dense<0x7F800000> : vector<128xf32>
    %76 = vector.multi_reduction <minimumf>, %75, %cst_31 [1] : vector<128x512xf32> to vector<128xf32>
    %77 = vector.shape_cast %76 : vector<128xf32> to vector<128x1xf32>
    %78 = vector.broadcast %77 : vector<128x1xf32> to vector<128x512xf32>
    %79 = arith.cmpf oeq, %12, %78 : vector<128x512xf32>
    %cst_32 = arith.constant 1.000000e+00 : f32
    %80 = vector.broadcast %cst_32 : f32 to vector<128x512xf32>
    %81 = arith.select %79, %80, %67 : vector<128x512xi1>, vector<128x512xf32>
    %82 = arith.truncf %81 : vector<128x512xf32> to vector<128x512xbf16>
    %c0_33 = arith.constant 0 : index
    %c0_34 = arith.constant 0 : index
    %83 = vector.load %arg10[%c0_33, %c0_34] : memref<128x640xbf16, #tpu.memory_space<vmem>>, vector<128x512xbf16>
    tpu.vector_store %arg10[%c0_33, %c0_34], %82 {strides = array<i32>} : memref<128x640xbf16, #tpu.memory_space<vmem>>, vector<128x512xbf16>,
    %c0_35 = arith.constant 0 : index
    %c0_36 = arith.constant 0 : index
    %84 = vector.load %arg5[%c0_35, %c0_36] : memref<128x128xbf16, #tpu.memory_space<vmem>>, vector<128x128xbf16>
    %c0_37 = arith.constant 0 : index
    %c512 = arith.constant 512 : index
    %85 = vector.load %arg10[%c0_37, %c512] : memref<128x640xbf16, #tpu.memory_space<vmem>>, vector<128x128xbf16>
    tpu.vector_store %arg10[%c0_37, %c512], %84 {strides = array<i32>} : memref<128x640xbf16, #tpu.memory_space<vmem>>, vector<128x128xbf16>,
    %c0_38 = arith.constant 0 : index
    %c0_39 = arith.constant 0 : index
    %86 = vector.load %arg6[%c0_38, %c0_39] : memref<128x32xf32, #tpu.memory_space<vmem>>, vector<128x32xf32>
    %c0_40 = arith.constant 0 : index
    %c0_41 = arith.constant 0 : index
    %87 = vector.load %arg8[%c0_40, %c0_41] : memref<32x32xf32, #tpu.memory_space<vmem>>, vector<32x32xf32>
    %cst_42 = arith.constant dense<0.000000e+00> : vector<128x32xf32>
    %88 = tpu.matmul %86, %87, %cst_42 {dimension_numbers = #tpu.dot_dimension_numbers<[1], [0], [0], [1], [0, 0, 1, 1], [], []>} : vector<128x32xf32>, vector<32x32xf32>, vector<128x32xf32> -> vector<128x32xf32>
    %c0_43 = arith.constant 0 : index
    %c0_44 = arith.constant 0 : index
    %89 = vector.load %arg9[%c0_43, %c0_44] : memref<1x32xf32, #tpu.memory_space<vmem>>, vector<1x32xf32>
    %90 = vector.broadcast %89 : vector<1x32xf32> to vector<128x32xf32>
    %91 = arith.addf %88, %90 : vector<128x32xf32>
    %c0_45 = arith.constant 0 : index
    %c0_46 = arith.constant 0 : index
    %92 = vector.load %arg7[%c0_45, %c0_46] : memref<128x1xf32, #tpu.memory_space<vmem>>, vector<128x1xf32>
    %93 = vector.broadcast %92 : vector<128x1xf32> to vector<128x32xf32>
    %94 = arith.mulf %91, %93 : vector<128x32xf32>
    %95 = arith.truncf %94 : vector<128x32xf32> to vector<128x32xbf16>
    %c0_47 = arith.constant 0 : index
    %c0_48 = arith.constant 0 : index
    %96 = vector.load %arg11[%c0_47, %c0_48] : memref<128x32xbf16, #tpu.memory_space<vmem>>, vector<128x32xbf16>
    tpu.vector_store %arg11[%c0_47, %c0_48], %95 {strides = array<i32>} : memref<128x32xbf16, #tpu.memory_space<vmem>>, vector<128x32xbf16>,
    return
  }
  func.func @transform_0(%arg0: i32) -> (i32, i32) {
    %c0_i32 = arith.constant 0 : i32
    %c0_i32_0 = arith.constant 0 : i32
    return %arg0, %c0_i32 : i32, i32
  }
  func.func @transform_1(%arg0: i32) -> (i32, i32) {
    %c0_i32 = arith.constant 0 : i32
    %c0_i32_0 = arith.constant 0 : i32
    %c0_i32_1 = arith.constant 0 : i32
    return %c0_i32, %c0_i32_0 : i32, i32
  }
  func.func @transform_2(%arg0: i32) -> (i32, i32) {
    %c0_i32 = arith.constant 0 : i32
    %c0_i32_0 = arith.constant 0 : i32
    return %arg0, %c0_i32 : i32, i32
  }
  func.func @transform_3(%arg0: i32) -> (i32, i32) {
    %c0_i32 = arith.constant 0 : i32
    %c0_i32_0 = arith.constant 0 : i32
    %c0_i32_1 = arith.constant 0 : i32
    return %c0_i32, %c0_i32_0 : i32, i32
  }
  func.func @transform_4(%arg0: i32) -> (i32, i32) {
    %c0_i32 = arith.constant 0 : i32
    %c0_i32_0 = arith.constant 0 : i32
    return %arg0, %c0_i32 : i32, i32
  }
  func.func @transform_5(%arg0: i32) -> (i32, i32) {
    %c0_i32 = arith.constant 0 : i32
    %c0_i32_0 = arith.constant 0 : i32
    return %arg0, %c0_i32 : i32, i32
  }
  func.func @transform_6(%arg0: i32) -> (i32, i32) {
    %c0_i32 = arith.constant 0 : i32
    %c0_i32_0 = arith.constant 0 : i32
    return %arg0, %c0_i32 : i32, i32
  }
  func.func @transform_7(%arg0: i32) -> (i32, i32) {
    %c0_i32 = arith.constant 0 : i32
    %c0_i32_0 = arith.constant 0 : i32
    %c0_i32_1 = arith.constant 0 : i32
    return %c0_i32, %c0_i32_0 : i32, i32
  }
  func.func @transform_8(%arg0: i32) -> (i32, i32) {
    %c0_i32 = arith.constant 0 : i32
    %c0_i32_0 = arith.constant 0 : i32
    %c0_i32_1 = arith.constant 0 : i32
    return %c0_i32, %c0_i32_0 : i32, i32
  }
  func.func @transform_9(%arg0: i32) -> (i32, i32) {
    %c0_i32 = arith.constant 0 : i32
    %c0_i32_0 = arith.constant 0 : i32
    return %arg0, %c0_i32 : i32, i32
  }
  func.func @transform_10(%arg0: i32) -> (i32, i32) {
    %c0_i32 = arith.constant 0 : i32
    %c0_i32_0 = arith.constant 0 : i32
    return %arg0, %c0_i32 : i32, i32
  }
}

</mosaic_0001>

<bundles_post_ra>
// kernel: tpu_custom_call.1
= control target key start
LH: loop header
LB: loop body
LE: loop exit
PB: predicated region body
PF: predicated region fallthrough
CT: control target
= control target key end

     0   :  { %s9536_s0 = inlined_call_operand.vmem [shape: bf16[512,32], index: 0, kind: input, shape index: {}]   ;;  %s9537_s1 = inlined_call_operand.vmem [shape: bf16[512,32], index: 1, kind: input, shape index: {}]   ;;  %s9538_s2 = inlined_call_operand.vmem [shape: f32[512,1], index: 2, kind: input, shape index: {}]   ;;  %s9539_s3 = inlined_call_operand.vmem [shape: f32[1,512], index: 3, kind: input, shape index: {}]   ;;  %s9540_s4 = inlined_call_operand.vmem [shape: bf16[512,128], index: 4, kind: input, shape index: {}]   ;;  %s9541_s5 = inlined_call_operand.vmem [shape: f32[512,32], index: 5, kind: input, shape index: {}]   ;;  %s9542_s6 = inlined_call_operand.vmem [shape: f32[512,1], index: 6, kind: input, shape index: {}]   ;;  %s9543_s7 = inlined_call_operand.vmem [shape: f32[32,32], index: 7, kind: input, shape index: {}]   ;;  %s9544_s8 = inlined_call_operand.vmem [shape: f32[1,32], index: 8, kind: input, shape index: {}]   ;;  %s9545_s9 = inlined_call_operand.hbm [shape: bf16[512,640], index: 9, kind: output, shape index: {0}]   ;;  %s9546_s10 = inlined_call_operand.vmem [shape: bf16[512,32], index: 10, kind: output, shape index: {1}]  }
   0x1   :  { %9856 = sst [smem:[#allocation105_spill]] %s9536_s0 }
   0x2   :  { %16 = vsyncpa [#allocation3], 0 }
   0x3   :  { %18 = vsyncpa [#allocation3 + $0x1], 0  ;;  %s5122_s13 = smov 0   ;;  %s5124_s14 = smov 0  }
   0x4   :  { %s5126_s15 = smov 0   ;;  %s5128_s16 = smov 0  }
   0x5 LB: > { %9857 = sst [smem:[#allocation5_spill]] %s5056_s15  ;;  %s5143_s17 = sadd.s32 4294967295, %s5060_s16   ;;  %s5060_s16 = sphi %s5128_s16, %s10744_s16   ;;  %s5056_s15 = sphi %s5126_s15, %s10741_s15   ;;  %s5052_s14 = sphi %s5124_s14, %s10743_s14   ;;  %s5048_s13 = sphi %s5122_s13, %s10742_s13  }
   0x6   : > { %s4574_s18 = sadd.s32 4294967294, %s5060_s16   ;;  %s5147_s19 = sadd.s32 1, %s5060_s16  }
   0x7   : > { %s245_s20 = sadd.s32 1, %s5056_s15  ;;  %s242_s21 = ssub.s32 %s5060_s16, %s5147_s19 }
   0x8   : > { %p255_p0 = scmp.ne.s32.totalorder %s5056_s15, %s5052_s14  ;;  %p243_p1 = scmp.eq.s32.totalorder %s242_s21, 0 }
   0x9   : > { %p256_p2 = scmp.eq.s32.totalorder %s5143_s17, 3  ;;  %p261_p3 = scmp.ne.s32.totalorder %s5052_s14, %s5048_s13 }
   0xa   : > { %p262_p4 = scmp.eq.s32.totalorder %s4574_s18, 3  ;;  %p4577_p7 = scmp.ge.s32.totalorder %s5060_s16, 1 }
   0xb   : > { %s5158_s22 = scalar_select %p243_p1, %s5056_s15, %s245_s20  }
   0xc   : > { %p5160_p5 = por %p256_p2, %p255_p0  ;;  %p5164_p6 = por %p262_p4, %p261_p3 }
   0xd   : > { %9858 = sst [smem:[#allocation6_spill]] %s5158_s22  ;;  %p363_p8 = scmp.lt.s32.totalorder %s5060_s16, 5 }
   0xf   : > { %p364_p9 = pnand %p4577_p7, %p363_p8 }
  0x11   : > { %367 = sbr.rel (%p364_p9) target bundleno = 1918 (0x77e), region = 56 }
  0x18   : > { %v4955_v0 = vld [vmem:[%s9537_s1 + $0x40] sm:$0xff]   ;;  %vm744_vm0 = vcmask 261120   ;;  %v4959_v5 = vld [vmem:[%s9537_s1 + $0x48] sm:$0xff]   ;;  %v4963_v12 = vld [vmem:[%s9537_s1 + $0x50] sm:$0xff]   ;;  %v5062_v14 = vmov 0   ;;  %s4578_s25 = sshll.u32 %s5143_s17, 4 }
  0x19   : > { %v4956_v1 = vld [vmem:[%s9537_s1 + $0xc0] sm:$0xff]   ;;  %4892 = vmatprep.subr.msk.bf16.mxu0 %vm744_vm0, %v4955_v0  ;;  %v4960_v7 = vld [vmem:[%s9537_s1 + $0xc8] sm:$0xff]   ;;  %v4964_v13 = vld [vmem:[%s9537_s1 + $0xd0] sm:$0xff]   ;;  %4953 = vset.pattern.permute.xlu0 %v5062_v14  ;;  %p427_p10 = scmp.lt.s32.totalorder %s4578_s25, 63  ;;  %s9547_s20 = sand.u32 1, %s5052_s14  }
  0x1a   : > { %v4957_v2 = vld [vmem:[%s9537_s1] sm:$0xff]   ;;  %4900 = vmatprep.subr.msk.bf16.mxu1 %vm744_vm0, %v4956_v1  ;;  %v4961_v8 = vld [vmem:[%s9537_s1 + $0x8] sm:$0xff]   ;;  %4954 = vset.pattern.permute.xlu1 %v5062_v14  ;;  %v4965_v15 = vld [vmem:[%s9537_s1 + $0x10] sm:$0xff]   ;;  %s4908_s27 = smul.u32 320, %s9547_s20  ;;  %s9861_s0 = sld [smem:[#allocation105_spill]] }
  0x1b   : > { %v4958_v3 = vld [vmem:[%s9537_s1 + $0x80] sm:$0xff]   ;;  %v770_v4 = vsel %vm744_vm0, %v4957_v2, 0  ;;  %v4962_v9 = vld [vmem:[%s9537_s1 + $0x88] sm:$0xff]   ;;  %v773_v10 = vsel %vm744_vm0, %v4961_v8, 0  ;;  %v4966_v16 = vld [vmem:[%s9537_s1 + $0x90] sm:$0xff]   ;;  %v776_v17 = vsel %vm744_vm0, %v4965_v15, 0 }
  0x1c   : > { %4765 = vmatpush3.bf16.xpose.msra.mxu0 %v770_v4  ;;  %v818_v6 = vsel %vm744_vm0, %v4958_v3, 0  ;;  %v821_v11 = vsel %vm744_vm0, %v4962_v9, 0  ;;  %v4967_v18 = vld [vmem:[%s9537_s1 + $0x58] sm:$0xff]   ;;  %v824_v19 = vsel %vm744_vm0, %v4966_v16, 0  ;;  %s10746_s25 = smov (!%p427_p10, %s4578_s25), 63  ;;  %v4971_v24 = vld [vmem:[%s9537_s1 + $0x60] sm:$0xff]  }
  0x1d   : > { %4797 = vmatpush3.bf16.xpose.msra.mxu1 %v818_v6  ;;  %4893 = vmatprep.subr.msk.bf16.mxu0 %vm744_vm0, %v4959_v5  ;;  %v4968_v20 = vld [vmem:[%s9537_s1 + $0xd8] sm:$0xff]   ;;  %s5236_s28 = sshll.u32 %s10746_s25, 2  ;;  %v4972_v26 = vld [vmem:[%s9537_s1 + $0xe0] sm:$0xff]   ;;  %s5266_s20 = sshll.u32 %s10746_s25, 3  ;;  %v4975_v30 = vld [vmem:[%s9537_s1 + $0x68] sm:$0xff]  }
  0x1e   : > { %4901 = vmatprep.subr.msk.bf16.mxu1 %vm744_vm0, %v4960_v7  ;;  %v4969_v21 = vld [vmem:[%s9537_s1 + $0x18] sm:$0xff]   ;;  %v4973_v27 = vld [vmem:[%s9537_s1 + $0x20] sm:$0xff]   ;;  %s5263_s12 = scalar_lea.vmem %s9540_s4, %s5236_s28  ;;  %v4976_v33 = vld [vmem:[%s9537_s1 + $0xe8] sm:$0xff]   ;;  %s5286_s25 = scalar_lea.vmem [#allocation2], %s4908_s27 }
  0x1f   : > { %v4970_v22 = vld [vmem:[%s9537_s1 + $0x98] sm:$0xff]   ;;  %v779_v23 = vsel %vm744_vm0, %v4969_v21, 0  ;;  %v4974_v28 = vld [vmem:[%s9537_s1 + $0xa0] sm:$0xff]   ;;  %v782_v29 = vsel %vm744_vm0, %v4973_v27, 0  ;;  %v3972_v36 = vld [vmem:[%s5263_s12 + $0x8] sm:$0xf]  ;;  %s5333_s27 = scalar_lea.vmem %s9538_s2, %s5266_s20  ;;  %s6487_s21 = scalar_lea.vmem %s9542_s6, %s5266_s20 }
  0x20   : > { %v827_v25 = vsel %vm744_vm0, %v4970_v22, 0  ;;  %s5256_s29 = scalar_lea.vmem %s9861_s0, %s5236_s28  ;;  %v830_v32 = vsel %vm744_vm0, %v4974_v28, 0  ;;  %v3970_v34 = vld [vmem:[%s5263_s12] sm:$0xf]  ;;  %v3971_v35 = vld [vmem:[%s5263_s12 + $0x4] sm:$0xf]  ;;  %s6633_s11 = scalar_lea.vmem %s9546_s10, %s5236_s28 }
  0x21   : > { %v5273_v31 = vld [vmem:[%s5256_s29] sm:$0xff]   ;;  %v3973_v37 = vld [vmem:[%s5263_s12 + $0xc] sm:$0xf]  ;;  %v3974_v38 = vld [vmem:[%s5263_s12 + $0x10] sm:$0xf]  ;;  %s10739_s26 = sand.u32 1, %s5052_s14  }
  0x22   : > { %4780 = vmatprep.mubr.msk.bf16.mxu0 %vm744_vm0, %v5273_v31  ;;  %3986 = vst [vmem:[%s5286_s25 + $0x10] sm:$0xf] %v3970_v34  ;;  %3987 = vst [vmem:[%s5286_s25 + $0x24] sm:$0xf] %v3971_v35  ;;  %4812 = vmatprep.mubr.msk.bf16.mxu1 %vm744_vm0, %v5273_v31  ;;  %v3975_v39 = vld [vmem:[%s5263_s12 + $0x14] sm:$0xf] }
  0x23   : > { %v3976_v40 = vld [vmem:[%s5263_s12 + $0x18] sm:$0xf]  ;;  %v3977_v41 = vld [vmem:[%s5263_s12 + $0x1c] sm:$0xf]  ;;  %3988 = vst [vmem:[%s5286_s25 + $0x38] sm:$0xf] %v3972_v36 }
  0x24   : > { %4767 = vmatpush3.bf16.xpose.msra.mxu0 %v773_v10  ;;  %3989 = vst [vmem:[%s5286_s25 + $0x4c] sm:$0xf] %v3973_v37  ;;  %3990 = vst [vmem:[%s5286_s25 + $0x60] sm:$0xf] %v3974_v38  ;;  %v4977_v42 = vld [vmem:[%s9537_s1 + $0x28] sm:$0xff]   ;;  %v4979_v53 = vld [vmem:[%s9537_s1 + $0x70] sm:$0xff]  }
  0x25   : > { %4799 = vmatpush3.bf16.xpose.msra.mxu1 %v821_v11  ;;  %4894 = vmatprep.subr.msk.bf16.mxu0 %vm744_vm0, %v4963_v12  ;;  %v3978_v43 = vld [vmem:[%s5263_s12 + $0x20] sm:$0xf]  ;;  %v3979_v44 = vld [vmem:[%s5263_s12 + $0x24] sm:$0xf]  ;;  %v3980_v45 = vld [vmem:[%s5263_s12 + $0x28] sm:$0xf] }
  0x26   : > { %4902 = vmatprep.subr.msk.bf16.mxu1 %vm744_vm0, %v4964_v13  ;;  %3991 = vst [vmem:[%s5286_s25 + $0x74] sm:$0xf] %v3975_v39  ;;  %3992 = vst [vmem:[%s5286_s25 + $0x88] sm:$0xf] %v3976_v40  ;;  %v4978_v46 = vld [vmem:[%s9537_s1 + $0xa8] sm:$0xff]   ;;  %v785_v52 = vsel %vm744_vm0, %v4977_v42, 0 }
  0x27   : > { %3993 = vst [vmem:[%s5286_s25 + $0x9c] sm:$0xf] %v3977_v41  ;;  %v3981_v47 = vld [vmem:[%s5263_s12 + $0x2c] sm:$0xf]  ;;  %v3982_v48 = vld [vmem:[%s5263_s12 + $0x30] sm:$0xf] }
  0x28   : > { %v3983_v49 = vld [vmem:[%s5263_s12 + $0x34] sm:$0xf]  ;;  %3994 = vst [vmem:[%s5286_s25 + $0xb0] sm:$0xf] %v3978_v43  ;;  %3995 = vst [vmem:[%s5286_s25 + $0xc4] sm:$0xf] %v3979_v44 }
  0x29   : > { %3996 = vst [vmem:[%s5286_s25 + $0xd8] sm:$0xf] %v3980_v45  ;;  %v3984_v50 = vld [vmem:[%s5263_s12 + $0x38] sm:$0xf]  ;;  %v3985_v51 = vld [vmem:[%s5263_s12 + $0x3c] sm:$0xf] }
  0x2a   : > { %3997 = vst [vmem:[%s5286_s25 + $0xec] sm:$0xf] %v3981_v47  ;;  %3998 = vst [vmem:[%s5286_s25 + $0x100] sm:$0xf] %v3982_v48  ;;  %v833_v54 = vsel %vm744_vm0, %v4978_v46, 0  ;;  %v4980_v55 = vld [vmem:[%s9537_s1 + $0xf0] sm:$0xff]  }
  0x2b   : > { %3999 = vst [vmem:[%s5286_s25 + $0x114] sm:$0xf] %v3983_v49  ;;  %4000 = vst [vmem:[%s5286_s25 + $0x128] sm:$0xf] %v3984_v50  ;;  %v1091_v56 = vld [vmem:[%s5333_s27] sm:$0xff]  ;;  %v4981_v57 = vld [vmem:[%s9537_s1 + $0x30] sm:$0xff]  }
  0x2c   : > { %4769 = vmatpush3.bf16.xpose.msra.mxu0 %v776_v17  ;;  %4001 = vst [vmem:[%s5286_s25 + $0x13c] sm:$0xf] %v3985_v51  ;;  %v1093_v58 = vld [vmem:[%s5333_s27 + $0x10] sm:$0xff]  ;;  %1173 = vperm.xlu0 %4953, %v1091_v56   ;;  %v1092_v60 = vld [vmem:[%s5333_s27 + $0x8] sm:$0xff]  ;;  %v1094_v61 = vld [vmem:[%s5333_s27 + $0x18] sm:$0xff]  ;;  %v788_v62 = vsel %vm744_vm0, %v4981_v57, 0 }
  0x2d   : > { %4801 = vmatpush3.bf16.xpose.msra.mxu1 %v824_v19  ;;  %4895 = vmatprep.subr.msk.bf16.mxu0 %vm744_vm0, %v4967_v18  ;;  %v4982_v59 = vld [vmem:[%s9537_s1 + $0xb0] sm:$0xff]   ;;  %v4983_v63 = vld [vmem:[%s9537_s1 + $0x78] sm:$0xff]   ;;  %v1095_v2 = vld [vmem:[%s5333_s27 + $0x20] sm:$0xff]  ;;  %s9491_s30 = scalar_lea.sflag [#allocation3], %s10739_s26  ;;  %s5064_s15 = smov [#allocation2]  }
  0x2e   : > { %4903 = vmatprep.subr.msk.bf16.mxu1 %vm744_vm0, %v4968_v20  ;;  %1183 = vperm.xlu1 %4954, %v1093_v58   ;;  %v836_v0 = vsel %vm744_vm0, %v4982_v59, 0  ;;  %v4984_v1 = vld [vmem:[%s9537_s1 + $0xf8] sm:$0xff]   ;;  %v1096_v3 = vld [vmem:[%s5333_s27 + $0x28] sm:$0xff]  ;;  %v1097_v6 = vld [vmem:[%s5333_s27 + $0x30] sm:$0xff]  ;;  %s5002_s22 = sshll.u32 %s5064_s15, 4  ;;  %s5003_s22 = int_to_ptr.vmem [resolvable:$false] %s5002_s22 }
  0x2f   : > { %v4985_v4 = vld [vmem:[%s9537_s1 + $0x38] sm:$0xff]   ;;  %v1099_v10 = vld [vmem:[%s5333_s27 + $0x40] sm:$0xff]  ;;  %v1100_v11 = vld [vmem:[%s5333_s27 + $0x48] sm:$0xff]  ;;  %s5004_s18 = scalar_lea.vmem %s5003_s22, 10240 }
  0x30   : > { %1178 = vperm.xlu0 %4953, %v1092_v60   ;;  %v4986_v5 = vld [vmem:[%s9537_s1 + $0xb8] sm:$0xff]   ;;  %v791_v8 = vsel %vm744_vm0, %v4985_v4, 0  ;;  %v1101_v12 = vld [vmem:[%s5333_s27 + $0x50] sm:$0xff]  ;;  %v4988_v13 = vld [vmem:[%s5256_s29 + $0x8] sm:$0xff]  }
  0x31   : > { %v1098_v7 = vld [vmem:[%s5333_s27 + $0x38] sm:$0xff]  ;;  %v839_v9 = vsel %vm744_vm0, %v4986_v5, 0  ;;  %v1103_v15 = vld [vmem:[%s5333_s27 + $0x60] sm:$0xff]  ;;  %v1104_v16 = vld [vmem:[%s5333_s27 + $0x68] sm:$0xff] }
  0x32   : > { %1188 = vperm.xlu1 %4954, %v1094_v61   ;;  %v1102_v14 = vld [vmem:[%s5333_s27 + $0x58] sm:$0xff]  ;;  %v1105_v17 = vld [vmem:[%s5333_s27 + $0x70] sm:$0xff]  ;;  %v4991_v21 = vld [vmem:[%s5256_s29 + $0x20] sm:$0xff]  }
  0x33   : > { %v4989_v18 = vld [vmem:[%s5256_s29 + $0x10] sm:$0xff]   ;;  %v1106_v19 = vld [vmem:[%s5333_s27 + $0x78] sm:$0xff]  ;;  %v4992_v22 = vld [vmem:[%s5256_s29 + $0x28] sm:$0xff]   ;;  %s5707_s27 = scalar_lea.vmem %s9541_s5, %s5266_s20 }
  0x34   : > { %4771 = vmatpush3.bf16.xpose.msra.mxu0 %v779_v23  ;;  %1193 = vperm.xlu0 %4953, %v1095_v2   ;;  %v4990_v20 = vld [vmem:[%s5256_s29 + $0x18] sm:$0xff]   ;;  %v4993_v23 = vld [vmem:[%s5256_s29 + $0x30] sm:$0xff]  }
  0x35   : > { %4803 = vmatpush3.bf16.xpose.msra.mxu1 %v827_v25  ;;  %4896 = vmatprep.subr.msk.bf16.mxu0 %vm744_vm0, %v4971_v24  ;;  %v4994_v24 = vld [vmem:[%s5256_s29 + $0x38] sm:$0xff]   ;;  %v9549_v25 = vlaneseq  ;;  %s4909_s29 = smul.u32 5120, %s5143_s17  ;;  %s4435_s17 = sshll.u32 %s5286_s25, 4  ;;  %s9483_s17 = int_to_ptr.vmem [resolvable:$true] %s4435_s17 }
  0x36   : > { %4904 = vmatprep.subr.msk.bf16.mxu1 %vm744_vm0, %v4972_v26  ;;  %1198 = vperm.xlu1 %4954, %v1096_v3   ;;  %s4998_s28 = scalar_lea.vmem %s9483_s17, 5120  ;;  %p5005_p0 = scmp.lt.s32.totalorder %s9483_s17, %s5003_s22 }
  0x37   : > { %v1318_v26 = vshrl.u32 %v9549_v25, 7  ;;  %s9480_s12 = scalar_lea.hbm %s9545_s9, %s4909_s29  ;;  %p4999_p11 = scmp.ne.s32.totalorder %s9483_s17, %s4998_s28 }
  0x38   : > { %1203 = vperm.xlu0 %4953, %v1097_v6   ;;  %p5006_p1 = scmp.lt.s32.totalorder %s5004_s18, %s4998_s28 }
  0x39   : > { %v1319_v28 = vsub.s32 0, %v1318_v26  ;;  %p5000_p12 = pnand %p4999_p11, %p5160_p5 }
  0x3a   : > { %1208 = vperm.xlu1 %4954, %v1098_v7   ;;  %p5007_p2 = por %p5006_p1, %p5005_p0 }
  0x3b   : > { %p5001_p13 = pneg %p5000_p12 }
  0x3c   : > { %4773 = vmatpush3.bf16.xpose.msra.mxu0 %v782_v29  ;;  %1213 = vperm.xlu0 %4953, %v1099_v10   ;;  %v1315_v29 = vld [vmem:[%s9539_s3] sm:$0xf] }
  0x3d   : > { %4805 = vmatpush3.bf16.xpose.msra.mxu1 %v830_v32  ;;  %4897 = vmatprep.subr.msk.bf16.mxu0 %vm744_vm0, %v4975_v30  ;;  %v1327_v30 = vsub.s32 2, %v1318_v26  ;;  %v5426_v36 = vrot.slane %v1315_v29, %v1319_v28  ;;  %p5008_p3 = pnand %p5007_p2, %p5001_p13 }
  0x3e   : > { %4905 = vmatprep.subr.msk.bf16.mxu1 %vm744_vm0, %v4976_v33  ;;  %1218 = vperm.xlu1 %4954, %v1100_v11   ;;  %v1331_v33 = vsub.s32 3, %v1318_v26 }
  0x3f   : > { %v5428_v40 = vrot.slane %v1315_v29, %v1327_v30 }
  0x40   : > { %1223 = vperm.xlu0 %4953, %v1101_v12  }
  0x42   : > { %1228 = vperm.xlu1 %4954, %v1102_v14  }
  0x44   : > { %4775 = vmatpush3.bf16.xpose.msra.mxu0 %v785_v52  ;;  %1233 = vperm.xlu0 %4953, %v1103_v15   ;;  %v5432_v52 = vrot.slane %v1315_v29, %v1331_v33 }
  0x45   : > { %4807 = vmatpush3.bf16.xpose.msra.mxu1 %v833_v54  ;;  %4898 = vmatprep.subr.msk.bf16.mxu0 %vm744_vm0, %v4979_v53 }
  0x46   : > { %4906 = vmatprep.subr.msk.bf16.mxu1 %vm744_vm0, %v4980_v55  ;;  %1238 = vperm.xlu1 %4954, %v1104_v16  }
  0x48   : > { %1243 = vperm.xlu0 %4953, %v1105_v17  }
  0x4a   : > { %1248 = vperm.xlu1 %4954, %v1106_v19  }
  0x4c   : > { %4777 = vmatpush3.bf16.xpose.msra.mxu0 %v788_v62 }
  0x4d   : > { %4809 = vmatpush3.bf16.xpose.msra.mxu1 %v836_v0  ;;  %4899 = vmatprep.subr.msk.bf16.mxu0 %vm744_vm0, %v4983_v63 }
  0x4e   : > { %4907 = vmatprep.subr.msk.bf16.mxu1 %vm744_vm0, %v4984_v1 }
  0x54   : > { %4779 = vmatpush3.bf16.xpose.msra.mxu0 %v791_v8 }
  0x55   : > { %4811 = vmatpush3.bf16.xpose.msra.mxu1 %v839_v9 }
  0x5b   : > { %4781 = vmatmul.mubr.msk.bf16.vlgmr.msra.gmra.mrb[0].mxu0 %vm744_vm0, %v5273_v31 }
  0x5c   : > { %4813 = vmatmul.mubr.msk.bf16.vlgmr.msra.gmra.mrb[0].mxu1 %vm744_vm0, %v5273_v31  ;;  %4782 = vmatprep.mubr.msk.bf16.mxu0 %vm744_vm0, %v4988_v13  ;;  %v1323_v31 = vsub.s32 1, %v1318_v26 }
  0x5d   : > { %4814 = vmatprep.mubr.msk.bf16.mxu1 %vm744_vm0, %v4988_v13 }
  0x5e   : > { %v5430_v42 = vrot.slane %v1315_v29, %v1323_v31 }
  0x63   : > { %4783 = vmatmul.mubr.msk.bf16.gmra.mrb[4].mxu0 %vm744_vm0, %v4988_v13 }
  0x64   : > { %4815 = vmatmul.mubr.msk.bf16.gmra.mrb[4].mxu1 %vm744_vm0, %v4988_v13  ;;  %4784 = vmatprep.mubr.msk.bf16.mxu0 %vm744_vm0, %v4989_v18 }
  0x65   : > { %4816 = vmatprep.mubr.msk.bf16.mxu1 %vm744_vm0, %v4989_v18 }
  0x6b   : > { %4785 = vmatmul.mubr.msk.bf16.gmra.mrb[8].mxu0 %vm744_vm0, %v4989_v18 }
  0x6c   : > { %4817 = vmatmul.mubr.msk.bf16.gmra.mrb[8].mxu1 %vm744_vm0, %v4989_v18  ;;  %4786 = vmatprep.mubr.msk.bf16.mxu0 %vm744_vm0, %v4990_v20 }
  0x6d   : > { %4818 = vmatprep.mubr.msk.bf16.mxu1 %vm744_vm0, %v4990_v20 }
  0x73   : > { %4787 = vmatmul.mubr.msk.bf16.gmra.mrb[12].mxu0 %vm744_vm0, %v4990_v20 }
  0x74   : > { %4819 = vmatmul.mubr.msk.bf16.gmra.mrb[12].mxu1 %vm744_vm0, %v4990_v20  ;;  %4788 = vmatprep.mubr.msk.bf16.mxu0 %vm744_vm0, %v4991_v21 }
  0x75   : > { %4820 = vmatprep.mubr.msk.bf16.mxu1 %vm744_vm0, %v4991_v21 }
  0x7b   : > { %4789 = vmatmul.mubr.msk.bf16.gmra.mrb[16].mxu0 %vm744_vm0, %v4991_v21 }
  0x7c   : > { %4821 = vmatmul.mubr.msk.bf16.gmra.mrb[16].mxu1 %vm744_vm0, %v4991_v21  ;;  %4790 = vmatprep.mubr.msk.bf16.mxu0 %vm744_vm0, %v4992_v22 }
  0x7d   : > { %4822 = vmatprep.mubr.msk.bf16.mxu1 %vm744_vm0, %v4992_v22 }
  0x83   : > { %4791 = vmatmul.mubr.msk.bf16.gmra.mrb[20].mxu0 %vm744_vm0, %v4992_v22 }
  0x84   : > { %4823 = vmatmul.mubr.msk.bf16.gmra.mrb[20].mxu1 %vm744_vm0, %v4992_v22  ;;  %4792 = vmatprep.mubr.msk.bf16.mxu0 %vm744_vm0, %v4993_v23 }
  0x85   : > { %4824 = vmatprep.mubr.msk.bf16.mxu1 %vm744_vm0, %v4993_v23 }
  0x8b   : > { %4793 = vmatmul.mubr.msk.bf16.gmra.mrb[24].mxu0 %vm744_vm0, %v4993_v23 }
  0x8c   : > { %4825 = vmatmul.mubr.msk.bf16.gmra.mrb[24].mxu1 %vm744_vm0, %v4993_v23  ;;  %4794 = vmatprep.mubr.msk.bf16.mxu0 %vm744_vm0, %v4994_v24 }
  0x8d   : > { %4826 = vmatprep.mubr.msk.bf16.mxu1 %vm744_vm0, %v4994_v24 }
  0x93   : > { %4795 = vmatmul.mubr.msk.bf16.gmra.mrb[28].mxu0 %vm744_vm0, %v4994_v24 }
  0x94   : > { %4827 = vmatmul.mubr.msk.bf16.gmra.mrb[28].mxu1 %vm744_vm0, %v4994_v24 }
  0xab   : > { %v1174_v27 = vpop.permute.xlu0 %1173 }
  0xad   : > { %v1184_v63 = vpop.permute.xlu1 %1183 }
  0xaf   : > { %v5424_v34 = vpop.permute.xlu0 %1178 }
  0xb1   : > { %v1189_v22 = vpop.permute.xlu1 %1188 }
 0x12e   : > { %v899_v32 = vpop.f32.mrb[0].mxu0 }
 0x12f   : > { %v1107_v35 = vmul.f32 2.0, %v899_v32  ;;  %v1012_v37 = vpop.f32.mrb[0].mxu1  ;;  %v901_v38 = vpop.f32.mrb[1].mxu0 }
 0x130   : > { %v1109_v39 = vmul.f32 2.0, %v1012_v37  ;;  %v1108_v41 = vmul.f32 2.0, %v901_v38  ;;  %v1014_v43 = vpop.f32.mrb[1].mxu1  ;;  %v903_v44 = vpop.f32.mrb[2].mxu0 }
 0x131   : > { %v1251_v45 = vsub.f32 %v1174_v27, %v1107_v35  ;;  %v1110_v46 = vmul.f32 2.0, %v1014_v43  ;;  %v1111_v47 = vmul.f32 2.0, %v903_v44  ;;  %v1016_v48 = vpop.f32.mrb[2].mxu1  ;;  %v905_v49 = vpop.f32.mrb[3].mxu0 }
 0x132   : > { %v1253_v50 = vsub.f32 %v1174_v27, %v1109_v39  ;;  %v1252_v51 = vsub.f32 %v1174_v27, %v1108_v41  ;;  %v1112_v53 = vmul.f32 2.0, %v905_v49  ;;  %v1018_v54 = vpop.f32.mrb[3].mxu1  ;;  %v1113_v57 = vmul.f32 2.0, %v1016_v48  ;;  %v1194_v39 = vpop.permute.xlu0 %1193 }
 0x133   : > { %v5435_v55 = vadd.f32 %v5426_v36, %v1251_v45  ;;  %v1254_v56 = vsub.f32 %v1174_v27, %v1110_v46  ;;  %v1255_v58 = vsub.f32 %v5424_v34, %v1111_v47  ;;  %v1114_v61 = vmul.f32 2.0, %v1018_v54 }
 0x134   : > { %v5439_v59 = vadd.f32 %v5428_v40, %v1253_v50  ;;  %v5442_v60 = vadd.f32 %v5430_v42, %v1252_v51  ;;  %v1256_v62 = vsub.f32 %v5424_v34, %v1112_v53  ;;  %v1257_v5 = vsub.f32 %v5424_v34, %v1113_v57 }
 0x135   : > { %v5446_v0 = vadd.f32 %v5426_v36, %v1255_v58  ;;  %v5454_v4 = vadd.f32 %v5432_v52, %v1254_v56  ;;  %v1258_v14 = vsub.f32 %v5424_v34, %v1114_v61 }
 0x136   : > { %v909_v1 = vpop.f32.mrb[4].mxu0  ;;  %v1410_v2 = vmin.f32 %v5435_v55, %v5442_v60  ;;  %v5451_v3 = vadd.f32 %v5430_v42, %v1256_v62  ;;  %v5471_v35 = vadd.f32 %v5428_v40, %v1257_v5 }
 0x137   : > { %v1115_v6 = vmul.f32 2.0, %v909_v1  ;;  %v1022_v7 = vpop.f32.mrb[4].mxu1  ;;  %v911_v8 = vpop.f32.mrb[5].mxu0  ;;  %v5481_v43 = vadd.f32 %v5432_v52, %v1258_v14 }
 0x138   : > { %v1117_v9 = vmul.f32 2.0, %v1022_v7  ;;  %v1116_v10 = vmul.f32 2.0, %v911_v8  ;;  %v1024_v11 = vpop.f32.mrb[5].mxu1  ;;  %v913_v12 = vpop.f32.mrb[6].mxu0  ;;  %v1411_v13 = vmin.f32 %v1410_v2, %v5439_v59  ;;  %v1415_v20 = vmin.f32 %v5446_v0, %v5451_v3 }
 0x139   : > { %v1259_v15 = vsub.f32 %v1184_v63, %v1115_v6  ;;  %v1118_v16 = vmul.f32 2.0, %v1024_v11  ;;  %v1119_v17 = vmul.f32 2.0, %v913_v12  ;;  %v1026_v18 = vpop.f32.mrb[6].mxu1  ;;  %v915_v19 = vpop.f32.mrb[7].mxu0 }
 0x13a   : > { %v1261_v21 = vsub.f32 %v1184_v63, %v1117_v9  ;;  %v1260_v23 = vsub.f32 %v1184_v63, %v1116_v10  ;;  %v1121_v24 = vmul.f32 2.0, %v1026_v18  ;;  %v1120_v26 = vmul.f32 2.0, %v915_v19  ;;  %v1028_v27 = vpop.f32.mrb[7].mxu1  ;;  %v1199_v8 = vpop.permute.xlu1 %1198 }
 0x13b   : > { %v5462_v28 = vadd.f32 %v5426_v36, %v1259_v15  ;;  %v1262_v29 = vsub.f32 %v1184_v63, %v1118_v16  ;;  %v1263_v30 = vsub.f32 %v1189_v22, %v1119_v17  ;;  %v1122_v31 = vmul.f32 2.0, %v1028_v27 }
 0x13c   : > { %v5465_v32 = vadd.f32 %v5428_v40, %v1261_v21  ;;  %v5468_v33 = vadd.f32 %v5430_v42, %v1260_v23  ;;  %v1264_v34 = vsub.f32 %v1189_v22, %v1120_v26  ;;  %v1412_v38 = vmin.f32 %v1411_v13, %v5454_v4  ;;  %v1204_v26 = vpop.permute.xlu0 %1203 }
 0x13d   : > { %v5474_v37 = vadd.f32 %v5426_v36, %v1263_v30  ;;  %v1416_v44 = vmin.f32 %v1415_v20, %v5471_v35  ;;  %v5487_v47 = vadd.f32 %v5432_v52, %v1262_v29  ;;  %v1265_v48 = vsub.f32 %v1189_v22, %v1121_v24 }
 0x13e   : > { %v5478_v41 = vadd.f32 %v5430_v42, %v1264_v34  ;;  %v919_v45 = vpop.f32.mrb[8].mxu0  ;;  %v1420_v46 = vmin.f32 %v5462_v28, %v5468_v33  ;;  %v1266_v49 = vsub.f32 %v1189_v22, %v1122_v31  ;;  %1413 = vmin.xlane.f32.xlu0 %v1412_v38 }
 0x13f   : > { %v1032_v50 = vpop.f32.mrb[8].mxu1  ;;  %v1123_v51 = vmul.f32 2.0, %v919_v45  ;;  %v921_v53 = vpop.f32.mrb[9].mxu0  ;;  %v1417_v56 = vmin.f32 %v1416_v44, %v5481_v43  ;;  %v5497_v18 = vadd.f32 %v5428_v40, %v1265_v48 }
 0x140   : > { %v1125_v54 = vmul.f32 2.0, %v1032_v50  ;;  %v1124_v57 = vmul.f32 2.0, %v921_v53  ;;  %v1034_v58 = vpop.f32.mrb[9].mxu1  ;;  %v923_v61 = vpop.f32.mrb[10].mxu0  ;;  %v1421_v62 = vmin.f32 %v1420_v46, %v5465_v32  ;;  %v1425_v7 = vmin.f32 %v5474_v37, %v5478_v41 }
 0x141   : > { %v1267_v63 = vsub.f32 %v1194_v39, %v1123_v51  ;;  %v1126_v1 = vmul.f32 2.0, %v1034_v58  ;;  %v1127_v2 = vmul.f32 2.0, %v923_v61  ;;  %v1036_v5 = vpop.f32.mrb[10].mxu1  ;;  %v925_v6 = vpop.f32.mrb[11].mxu0  ;;  %1418 = vmin.xlane.f32.xlu1 %v1417_v56  ;;  %v5510_v24 = vadd.f32 %v5432_v52, %v1266_v49 }
 0x142   : > { %v1269_v9 = vsub.f32 %v1194_v39, %v1125_v54  ;;  %v1268_v10 = vsub.f32 %v1194_v39, %v1124_v57  ;;  %v1129_v11 = vmul.f32 2.0, %v1036_v5  ;;  %v1128_v12 = vmul.f32 2.0, %v925_v6  ;;  %v1038_v13 = vpop.f32.mrb[11].mxu1 }
 0x143   : > { %v5494_v14 = vadd.f32 %v5426_v36, %v1267_v63  ;;  %v1270_v15 = vsub.f32 %v1194_v39, %v1126_v1  ;;  %v1271_v16 = vsub.f32 %v1199_v8, %v1127_v2  ;;  %v1130_v17 = vmul.f32 2.0, %v1038_v13  ;;  %v1209_v1 = vpop.permute.xlu1 %1208 }
 0x144   : > { %v5500_v19 = vadd.f32 %v5428_v40, %v1269_v9  ;;  %v5503_v20 = vadd.f32 %v5430_v42, %v1268_v10  ;;  %v1272_v21 = vsub.f32 %v1199_v8, %v1128_v12  ;;  %v1422_v23 = vmin.f32 %v1421_v62, %v5487_v47 }
 0x145   : > { %v5506_v22 = vadd.f32 %v5426_v36, %v1271_v16  ;;  %v1426_v30 = vmin.f32 %v1425_v7, %v5497_v18  ;;  %v5519_v34 = vadd.f32 %v5432_v52, %v1270_v15  ;;  %v1273_v38 = vsub.f32 %v1199_v8, %v1129_v11 }
 0x146   : > { %v5513_v27 = vadd.f32 %v5430_v42, %v1272_v21  ;;  %v929_v29 = vpop.f32.mrb[12].mxu0  ;;  %v1430_v31 = vmin.f32 %v5494_v14, %v5503_v20  ;;  %v1274_v39 = vsub.f32 %v1199_v8, %v1130_v17  ;;  %1423 = vmin.xlane.f32.xlu0 %v1422_v23 }
 0x147   : > { %v1131_v44 = vmul.f32 2.0, %v929_v29  ;;  %v1042_v45 = vpop.f32.mrb[12].mxu1  ;;  %v931_v46 = vpop.f32.mrb[13].mxu0  ;;  %v1427_v51 = vmin.f32 %v1426_v30, %v5510_v24  ;;  %v5529_v13 = vadd.f32 %v5428_v40, %v1273_v38 }
 0x148   : > { %v1133_v48 = vmul.f32 2.0, %v1042_v45  ;;  %v1132_v49 = vmul.f32 2.0, %v931_v46  ;;  %v1044_v50 = vpop.f32.mrb[13].mxu1  ;;  %v933_v53 = vpop.f32.mrb[14].mxu0  ;;  %v1431_v54 = vmin.f32 %v1430_v31, %v5500_v19  ;;  %v1435_v63 = vmin.f32 %v5506_v22, %v5513_v27 }
 0x149   : > { %v1275_v56 = vsub.f32 %v1204_v26, %v1131_v44  ;;  %v1134_v57 = vmul.f32 2.0, %v1044_v50  ;;  %v1046_v58 = vpop.f32.mrb[14].mxu1  ;;  %v1135_v61 = vmul.f32 2.0, %v933_v53  ;;  %v935_v62 = vpop.f32.mrb[15].mxu0 }
 0x14a   : > { %v1277_v2 = vsub.f32 %v1204_v26, %v1133_v48  ;;  %v1276_v5 = vsub.f32 %v1204_v26, %v1132_v49  ;;  %v1137_v6 = vmul.f32 2.0, %v1046_v58  ;;  %v1136_v7 = vmul.f32 2.0, %v935_v62  ;;  %v1048_v8 = vpop.f32.mrb[15].mxu1  ;;  %1428 = vmin.xlane.f32.xlu0 %v1427_v51  ;;  %v1214_v29 = vpop.permute.xlu0 %1213 }
 0x14b   : > { %v5526_v9 = vadd.f32 %v5426_v36, %v1275_v56  ;;  %v1278_v10 = vsub.f32 %v1204_v26, %v1134_v57  ;;  %v1279_v11 = vsub.f32 %v1209_v1, %v1135_v61  ;;  %v1138_v12 = vmul.f32 2.0, %v1048_v8 }
 0x14c   : > { %v5532_v15 = vadd.f32 %v5428_v40, %v1277_v2  ;;  %v5535_v16 = vadd.f32 %v5430_v42, %v1276_v5  ;;  %v1280_v17 = vsub.f32 %v1209_v1, %v1136_v7  ;;  %v1432_v23 = vmin.f32 %v1431_v54, %v5519_v34 }
 0x14d   : > { %v5538_v21 = vadd.f32 %v5426_v36, %v1279_v11  ;;  %v5542_v26 = vadd.f32 %v5432_v52, %v1274_v39  ;;  %v1436_v31 = vmin.f32 %v1435_v63, %v5529_v13  ;;  %v5551_v45 = vadd.f32 %v5432_v52, %v1278_v10 }
 0x14e   : > { %v5545_v30 = vadd.f32 %v5430_v42, %v1280_v17  ;;  %v939_v38 = vpop.f32.mrb[16].mxu0  ;;  %v1440_v44 = vmin.f32 %v5526_v9, %v5535_v16  ;;  %v1281_v46 = vsub.f32 %v1209_v1, %v1137_v6  ;;  %v1282_v48 = vsub.f32 %v1209_v1, %v1138_v12  ;;  %1433 = vmin.xlane.f32.xlu1 %v1432_v23  ;;  %v1219_v6 = vpop.permute.xlu1 %1218 }
 0x14f   : > { %v1052_v49 = vpop.f32.mrb[16].mxu1  ;;  %v1139_v50 = vmul.f32 2.0, %v939_v38  ;;  %v941_v51 = vpop.f32.mrb[17].mxu0  ;;  %v1437_v53 = vmin.f32 %v1436_v31, %v5542_v26 }
 0x150   : > { %v1141_v39 = vmul.f32 2.0, %v1052_v49  ;;  %v1140_v54 = vmul.f32 2.0, %v941_v51  ;;  %v1054_v56 = vpop.f32.mrb[17].mxu1  ;;  %v943_v57 = vpop.f32.mrb[18].mxu0  ;;  %v1441_v58 = vmin.f32 %v1440_v44, %v5532_v15  ;;  %v1445_v1 = vmin.f32 %v5538_v21, %v5545_v30 }
 0x151   : > { %v1283_v61 = vsub.f32 %v1214_v29, %v1139_v50  ;;  %v1142_v62 = vmul.f32 2.0, %v1054_v56  ;;  %v1143_v63 = vmul.f32 2.0, %v943_v57  ;;  %v1056_v2 = vpop.f32.mrb[18].mxu1  ;;  %v945_v5 = vpop.f32.mrb[19].mxu0  ;;  %1438 = vmin.xlane.f32.xlu0 %v1437_v53  ;;  %v5561_v44 = vadd.f32 %v5428_v40, %v1281_v46 }
 0x152   : > { %v1285_v7 = vsub.f32 %v1214_v29, %v1141_v39  ;;  %v1284_v8 = vsub.f32 %v1214_v29, %v1140_v54  ;;  %v1145_v10 = vmul.f32 2.0, %v1056_v2  ;;  %v1144_v11 = vmul.f32 2.0, %v945_v5  ;;  %v1058_v12 = vpop.f32.mrb[19].mxu1  ;;  %v1224_v54 = vpop.permute.xlu0 %1223 }
 0x153   : > { %v5558_v17 = vadd.f32 %v5426_v36, %v1283_v61  ;;  %v1286_v23 = vsub.f32 %v1214_v29, %v1142_v62  ;;  %v1287_v31 = vsub.f32 %v1219_v6, %v1143_v63  ;;  %v1146_v38 = vmul.f32 2.0, %v1058_v12 }
 0x154   : > { %v5564_v49 = vadd.f32 %v5430_v42, %v1284_v8  ;;  %v1288_v50 = vsub.f32 %v1219_v6, %v1144_v11  ;;  %v5567_v51 = vadd.f32 %v5432_v52, %v1282_v48  ;;  %v1442_v53 = vmin.f32 %v1441_v58, %v5551_v45 }
 0x155   : > { %9862 = vst [vmem:[#allocation7_spill] sm:$0xff] %v5558_v17  ;;  %v5570_v39 = vadd.f32 %v5426_v36, %v1287_v31  ;;  %v5574_v29 = vadd.f32 %v5428_v40, %v1285_v7  ;;  %v1446_v46 = vmin.f32 %v1445_v1, %v5561_v44  ;;  %v5583_v48 = vadd.f32 %v5432_v52, %v1286_v23 }
 0x156   : > { %9863 = vst [vmem:[#allocation8_spill] sm:$0xff] %v5564_v49  ;;  %9864 = vst [vmem:[#allocation9_spill] sm:$0xff] %v5567_v51  ;;  %v5577_v56 = vadd.f32 %v5430_v42, %v1288_v50  ;;  %v949_v57 = vpop.f32.mrb[20].mxu0  ;;  %v1450_v61 = vmin.f32 %v5558_v17, %v5564_v49  ;;  %v1289_v62 = vsub.f32 %v1219_v6, %v1145_v10  ;;  %1443 = vmin.xlane.f32.xlu1 %v1442_v53  ;;  %v1229_v10 = vpop.permute.xlu1 %1228 }
 0x157   : > { %9865 = vst [vmem:[#allocation10_spill] sm:$0xff] %v5570_v39  ;;  %9866 = vst [vmem:[#allocation11_spill] sm:$0xff] %v5574_v29  ;;  %v1290_v63 = vsub.f32 %v1219_v6, %v1146_v38  ;;  %v1062_v58 = vpop.f32.mrb[20].mxu1  ;;  %v1147_v2 = vmul.f32 2.0, %v949_v57  ;;  %v951_v5 = vpop.f32.mrb[21].mxu0  ;;  %v1447_v8 = vmin.f32 %v1446_v46, %v5567_v51 }
 0x158   : > { %9867 = vst [vmem:[#allocation12_spill] sm:$0xff] %v5577_v56  ;;  %9868 = vst [vmem:[#allocation13_spill] sm:$0xff] %v5583_v48  ;;  %v1149_v7 = vmul.f32 2.0, %v1062_v58  ;;  %v1148_v11 = vmul.f32 2.0, %v951_v5  ;;  %v1064_v12 = vpop.f32.mrb[21].mxu1  ;;  %v953_v31 = vpop.f32.mrb[22].mxu0  ;;  %v1451_v1 = vmin.f32 %v1450_v61, %v5574_v29  ;;  %v1455_v6 = vmin.f32 %v5570_v39, %v5577_v56 }
 0x159   : > { %v1291_v50 = vsub.f32 %v1224_v54, %v1147_v2  ;;  %v1150_v25 = vmul.f32 2.0, %v1064_v12  ;;  %v1151_v49 = vmul.f32 2.0, %v953_v31  ;;  %v1066_v17 = vpop.f32.mrb[22].mxu1  ;;  %v955_v23 = vpop.f32.mrb[23].mxu0  ;;  %1448 = vmin.xlane.f32.xlu0 %v1447_v8  ;;  %v5593_v12 = vadd.f32 %v5428_v40, %v1289_v62 }
 0x15a   : > { %v1293_v38 = vsub.f32 %v1224_v54, %v1149_v7  ;;  %v1292_v53 = vsub.f32 %v1224_v54, %v1148_v11  ;;  %v1153_v57 = vmul.f32 2.0, %v1066_v17  ;;  %v1152_v58 = vmul.f32 2.0, %v955_v23  ;;  %v1068_v46 = vpop.f32.mrb[23].mxu1  ;;  %v1234_v11 = vpop.permute.xlu0 %1233 }
 0x15b   : > { %v5590_v5 = vadd.f32 %v5426_v36, %v1291_v50  ;;  %v1294_v51 = vsub.f32 %v1224_v54, %v1150_v25  ;;  %v1295_v61 = vsub.f32 %v1229_v10, %v1151_v49  ;;  %v1154_v2 = vmul.f32 2.0, %v1068_v46  ;;  %9870 = vst [vmem:[#allocation15_spill] sm:$0xff] %v5593_v12 }
 0x15c   : > { %v5596_v31 = vadd.f32 %v5430_v42, %v1292_v53  ;;  %v1296_v56 = vsub.f32 %v1229_v10, %v1152_v58  ;;  %v5599_v7 = vadd.f32 %v5432_v52, %v1290_v63  ;;  %v1452_v8 = vmin.f32 %v1451_v1, %v5583_v48 }
 0x15d   : > { %9869 = vst [vmem:[#allocation14_spill] sm:$0xff] %v5590_v5  ;;  %v5602_v17 = vadd.f32 %v5426_v36, %v1295_v61  ;;  %v5606_v25 = vadd.f32 %v5428_v40, %v1293_v38  ;;  %v1456_v54 = vmin.f32 %v1455_v6, %v5593_v12  ;;  %v5615_v63 = vadd.f32 %v5432_v52, %v1294_v51 }
 0x15e   : > { %9871 = vst [vmem:[#allocation16_spill] sm:$0xff] %v5596_v31  ;;  %9872 = vst [vmem:[#allocation17_spill] sm:$0xff] %v5599_v7  ;;  %v5609_v49 = vadd.f32 %v5430_v42, %v1296_v56  ;;  %v959_v62 = vpop.f32.mrb[24].mxu0  ;;  %v1460_v50 = vmin.f32 %v5590_v5, %v5596_v31  ;;  %v1297_v23 = vsub.f32 %v1229_v10, %v1153_v57  ;;  %1453 = vmin.xlane.f32.xlu1 %v1452_v8  ;;  %v1239_v57 = vpop.permute.xlu1 %1238 }
 0x15f   : > { %9873 = vst [vmem:[#allocation18_spill] sm:$0xff] %v5602_v17  ;;  %9874 = vst [vmem:[#allocation19_spill] sm:$0xff] %v5606_v25  ;;  %v1298_v53 = vsub.f32 %v1229_v10, %v1154_v2  ;;  %v1072_v1 = vpop.f32.mrb[24].mxu1  ;;  %v1155_v58 = vmul.f32 2.0, %v959_v62  ;;  %v961_v46 = vpop.f32.mrb[25].mxu0  ;;  %v1457_v61 = vmin.f32 %v1456_v54, %v5599_v7 }
 0x160   : > { %9875 = vst [vmem:[#allocation20_spill] sm:$0xff] %v5609_v49  ;;  %9876 = vst [vmem:[#allocation21_spill] sm:$0xff] %v5615_v63  ;;  %v1157_v38 = vmul.f32 2.0, %v1072_v1  ;;  %v1156_v56 = vmul.f32 2.0, %v961_v46  ;;  %v1074_v39 = vpop.f32.mrb[25].mxu1  ;;  %v963_v48 = vpop.f32.mrb[26].mxu0  ;;  %v1461_v6 = vmin.f32 %v1460_v50, %v5606_v25  ;;  %v1465_v10 = vmin.f32 %v5602_v17, %v5609_v49 }
 0x161   : > { %v1299_v12 = vsub.f32 %v1234_v11, %v1155_v58  ;;  %v1158_v29 = vmul.f32 2.0, %v1074_v39  ;;  %v1159_v31 = vmul.f32 2.0, %v963_v48  ;;  %v1076_v5 = vpop.f32.mrb[26].mxu1  ;;  %v965_v51 = vpop.f32.mrb[27].mxu0  ;;  %1458 = vmin.xlane.f32.xlu0 %v1457_v61  ;;  %v5625_v39 = vadd.f32 %v5428_v40, %v1297_v23 }
 0x162   : > { %v1301_v2 = vsub.f32 %v1234_v11, %v1157_v38  ;;  %v1300_v8 = vsub.f32 %v1234_v11, %v1156_v56  ;;  %v1161_v62 = vmul.f32 2.0, %v1076_v5  ;;  %v1160_v1 = vmul.f32 2.0, %v965_v51  ;;  %v1078_v54 = vpop.f32.mrb[27].mxu1 }
 0x163   : > { %v5622_v46 = vadd.f32 %v5426_v36, %v1299_v12  ;;  %v1302_v7 = vsub.f32 %v1234_v11, %v1158_v29  ;;  %v1303_v50 = vsub.f32 %v1239_v57, %v1159_v31  ;;  %v1162_v58 = vmul.f32 2.0, %v1078_v54  ;;  %9878 = vst [vmem:[#allocation23_spill] sm:$0xff] %v5625_v39  ;;  %v1244_v12 = vpop.permute.xlu0 %1243 }
 0x164   : > { %v5628_v48 = vadd.f32 %v5430_v42, %v1300_v8  ;;  %v1304_v49 = vsub.f32 %v1239_v57, %v1160_v1  ;;  %v5631_v38 = vadd.f32 %v5432_v52, %v1298_v53  ;;  %v1462_v61 = vmin.f32 %v1461_v6, %v5615_v63 }
 0x165   : > { %9877 = vst [vmem:[#allocation22_spill] sm:$0xff] %v5622_v46  ;;  %v5634_v5 = vadd.f32 %v5426_v36, %v1303_v50  ;;  %v5638_v29 = vadd.f32 %v5428_v40, %v1301_v2  ;;  %v1466_v11 = vmin.f32 %v1465_v10, %v5625_v39  ;;  %v5647_v53 = vadd.f32 %v5432_v52, %v1302_v7 }
 0x166   : > { %9879 = vst [vmem:[#allocation24_spill] sm:$0xff] %v5628_v48  ;;  %9880 = vst [vmem:[#allocation25_spill] sm:$0xff] %v5631_v38  ;;  %v5641_v31 = vadd.f32 %v5430_v42, %v1304_v49  ;;  %v969_v23 = vpop.f32.mrb[28].mxu0  ;;  %v1470_v56 = vmin.f32 %v5622_v46, %v5628_v48  ;;  %v1305_v51 = vsub.f32 %v1239_v57, %v1161_v62  ;;  %1463 = vmin.xlane.f32.xlu1 %v1462_v61  ;;  %v1249_v62 = vpop.permute.xlu1 %1248 }
 0x167   : > { %9881 = vst [vmem:[#allocation26_spill] sm:$0xff] %v5634_v5  ;;  %9883 = vst [vmem:[#allocation28_spill] sm:$0xff] %v5647_v53  ;;  %v1306_v8 = vsub.f32 %v1239_v57, %v1162_v58  ;;  %v1082_v6 = vpop.f32.mrb[28].mxu1  ;;  %v1163_v1 = vmul.f32 2.0, %v969_v23  ;;  %v971_v54 = vpop.f32.mrb[29].mxu0  ;;  %v1467_v50 = vmin.f32 %v1466_v11, %v5631_v38 }
 0x168   : > { %9882 = vst [vmem:[#allocation27_spill] sm:$0xff] %v5641_v31  ;;  %v1165_v2 = vmul.f32 2.0, %v1082_v6  ;;  %v1164_v49 = vmul.f32 2.0, %v971_v54  ;;  %v1084_v17 = vpop.f32.mrb[29].mxu1  ;;  %v973_v63 = vpop.f32.mrb[30].mxu0  ;;  %v1471_v10 = vmin.f32 %v1470_v56, %v5638_v29  ;;  %v1475_v57 = vmin.f32 %v5634_v5, %v5641_v31 }
 0x169   : > { %v1307_v39 = vsub.f32 %v1244_v12, %v1163_v1  ;;  %v1166_v25 = vmul.f32 2.0, %v1084_v17  ;;  %v1167_v48 = vmul.f32 2.0, %v973_v63  ;;  %v1086_v46 = vpop.f32.mrb[30].mxu1  ;;  %v975_v7 = vpop.f32.mrb[31].mxu0  ;;  %1468 = vmin.xlane.f32.xlu0 %v1467_v50  ;;  %v5657_v17 = vadd.f32 %v5428_v40, %v1305_v51 }
 0x16a   : > { %v1309_v58 = vsub.f32 %v1244_v12, %v1165_v2  ;;  %v1308_v61 = vsub.f32 %v1244_v12, %v1164_v49  ;;  %v1169_v23 = vmul.f32 2.0, %v1086_v46  ;;  %v1168_v6 = vmul.f32 2.0, %v975_v7  ;;  %v1088_v11 = vpop.f32.mrb[31].mxu1 }
 0x16b   : > { %v5654_v54 = vadd.f32 %v5426_v36, %v1307_v39  ;;  %v1310_v38 = vsub.f32 %v1244_v12, %v1166_v25  ;;  %v1311_v56 = vsub.f32 %v1249_v62, %v1167_v48  ;;  %v1170_v1 = vmul.f32 2.0, %v1088_v11 }
 0x16c   : > { %v5660_v63 = vadd.f32 %v5430_v42, %v1308_v61  ;;  %v1313_v31 = vsub.f32 %v1249_v62, %v1169_v23  ;;  %v1312_v5 = vsub.f32 %v1249_v62, %v1168_v6  ;;  %v5663_v2 = vadd.f32 %v5432_v52, %v1306_v8  ;;  %v4002_v61 = vld [vmem:[%s5707_s27] sm:$0xff]  ;;  %v4003_v6 = vld [vmem:[%s5707_s27 + $0x8] sm:$0xff] }
 0x16d   : > { %v5666_v46 = vadd.f32 %v5428_v40, %v1309_v58  ;;  %v5669_v39 = vadd.f32 %v5426_v36, %v1311_v56  ;;  %v1472_v25 = vmin.f32 %v1471_v10, %v5647_v53  ;;  %v1314_v12 = vsub.f32 %v1249_v62, %v1170_v1  ;;  %v4021_v58 = vld [vmem:[%s9543_s7 + $0x18] sm:$0xff]  ;;  %4856 = vmatprep.mubr.msk.f32.mxu0 %vm744_vm0, %v4002_v61 }
 0x16e   : > { %9884 = vst [vmem:[#allocation29_spill] sm:$0xff] %v5663_v2  ;;  %v5673_v48 = vadd.f32 %v5430_v42, %v1312_v5  ;;  %v1476_v51 = vmin.f32 %v1475_v57, %v5657_v17  ;;  %v1480_v50 = vmin.f32 %v5654_v54, %v5660_v63  ;;  %v5679_v8 = vadd.f32 %v5432_v52, %v1310_v38 }
 0x16f   : > { %1473 = vmin.xlane.f32.xlu1 %v1472_v25  ;;  %v5682_v49 = vadd.f32 %v5428_v40, %v1313_v31  ;;  %v5689_v5 = vadd.f32 %v5432_v52, %v1314_v12  ;;  %v4018_v40 = vld [vmem:[%s9543_s7] sm:$0xff]  ;;  %v4019_v31 = vld [vmem:[%s9543_s7 + $0x8] sm:$0xff]  ;;  %v4020_v52 = vld [vmem:[%s9543_s7 + $0x10] sm:$0xff]  ;;  %v9888_v11 = vlaneseq }
 0x170   : > { %9885 = vst [vmem:[#allocation30_spill] sm:$0xff] %v5673_v48  ;;  %9886 = vst [vmem:[#allocation31_spill] sm:$0xff] %v5679_v8  ;;  %v1477_v36 = vmin.f32 %v1476_v51, %v5663_v2  ;;  %v1481_v10 = vmin.f32 %v1480_v50, %v5666_v46  ;;  %v1485_v42 = vmin.f32 %v5669_v39, %v5673_v48 }
 0x171   : > { %9887 = vst [vmem:[#allocation32_spill] sm:$0xff] %v5682_v49  ;;  %v4880_v62 = vpack.c.bf16 %v4019_v31, %v4018_v40  ;;  %v4884_v23 = vpack.c.bf16 %v4021_v58, %v4020_v52  ;;  %v1402_v56 = vand.u32 127, %v9888_v11 }
 0x172   : > { %1478 = vmin.xlane.f32.xlu0 %v1477_v36  ;;  %v1482_v7 = vmin.f32 %v1481_v10, %v5679_v8  ;;  %v1486_v38 = vmin.f32 %v1485_v42, %v5682_v49 }
 0x173   : > { %4881 = vmatprep.subr.bf16.mxu0 %v4880_v62  ;;  %4888 = vmatprep.subr.bf16.mxu1 %v4880_v62  ;;  %v1403_v1 = vadd.s32 128, %v1402_v56  ;;  %v1404_v25 = vadd.s32 256, %v1402_v56  ;;  %v1405_v12 = vadd.s32 384, %v1402_v56  ;;  %v5717_v51 = vcvt.s32.f32 %v1402_v56 }
 0x174   : > { %1483 = vmin.xlane.f32.xlu1 %v1482_v7  ;;  %v1487_v57 = vmin.f32 %v1486_v38, %v5689_v5  ;;  %4883 = vmatpush3.bf16.msra.mxu0 %v4880_v62 }
 0x175   : > { %4890 = vmatpush3.bf16.msra.mxu1 %v4880_v62  ;;  %4885 = vmatprep.subr.bf16.mxu0 %v4884_v23  ;;  %v5719_v50 = vcvt.s32.f32 %v1403_v1  ;;  %v5721_v36 = vcvt.s32.f32 %v1404_v25  ;;  %v5726_v42 = vcvt.s32.f32 %v1405_v12 }
 0x176   : > { %1488 = vmin.xlane.f32.xlu0 %v1487_v57  ;;  %4889 = vmatprep.subr.bf16.mxu1 %v4884_v23 }
 0x178   : > { %4887 = vmatpush3.bf16.msra.mxu0 %v4884_v23 }
 0x179   : > { %4891 = vmatpush3.bf16.msra.mxu1 %v4884_v23 }
 0x17b   : > { %4857 = vmatmul.mubr.msk.f32.vlgmr.msra.gmra.mrb[32].mxu0 %vm744_vm0, %v4003_v6 }
 0x1cb   : > { %v1414_v10 = vpop.xlane.xlu0 %1413 }
 0x1cc   : > { %vm1490_vm1 = vcmp.eq.f32.partialorder %v5435_v55, %v1414_v10  ;;  %vm1491_vm2 = vcmp.eq.f32.partialorder %v5442_v60, %v1414_v10  ;;  %vm1492_vm3 = vcmp.eq.f32.partialorder %v5439_v59, %v1414_v10  ;;  %vm1493_vm4 = vcmp.eq.f32.partialorder %v5454_v4, %v1414_v10 }
 0x1cd   : > { %v1554_v7 = vsel %vm1490_vm1, %v5717_v51, 512.0  ;;  %v1555_v38 = vsel %vm1491_vm2, %v5719_v50, 512.0  ;;  %v1556_v31 = vsel %vm1492_vm3, %v5721_v36, 512.0  ;;  %v1557_v61 = vsel %vm1493_vm4, %v5726_v42, 512.0 }
 0x1ce   : > { %v1419_v57 = vpop.xlane.xlu1 %1418  ;;  %v1618_v40 = vmin.f32 %v1554_v7, %v1555_v38 }
 0x1cf   : > { %vm1494_vm5 = vcmp.eq.f32.partialorder %v5446_v0, %v1419_v57  ;;  %vm1495_vm6 = vcmp.eq.f32.partialorder %v5451_v3, %v1419_v57  ;;  %vm1496_vm7 = vcmp.eq.f32.partialorder %v5471_v35, %v1419_v57  ;;  %vm1497_vm8 = vcmp.eq.f32.partialorder %v5481_v43, %v1419_v57 }
 0x1d0   : > { %v1619_v52 = vmin.f32 %v1618_v40, %v1556_v31  ;;  %v1558_v62 = vsel %vm1494_vm5, %v5717_v51, 512.0  ;;  %v1559_v58 = vsel %vm1495_vm6, %v5719_v50, 512.0  ;;  %v1560_v11 = vsel %vm1496_vm7, %v5721_v36, 512.0 }
 0x1d1   : > { %v1623_v23 = vmin.f32 %v1558_v62, %v1559_v58  ;;  %v1561_v25 = vsel %vm1497_vm8, %v5726_v42, 512.0 }
 0x1d2   : > { %v1620_v6 = vmin.f32 %v1619_v52, %v1557_v61 }
 0x1d3   : > { %v1424_v56 = vpop.xlane.xlu0 %1423  ;;  %v1624_v1 = vmin.f32 %v1623_v23, %v1560_v11 }
 0x1d4   : > { %1621 = vmin.xlane.f32.xlu1 %v1620_v6  ;;  %vm1498_vm9 = vcmp.eq.f32.partialorder %v5462_v28, %v1424_v56  ;;  %vm1499_vm10 = vcmp.eq.f32.partialorder %v5468_v33, %v1424_v56  ;;  %vm1500_vm11 = vcmp.eq.f32.partialorder %v5465_v32, %v1424_v56  ;;  %vm1501_vm12 = vcmp.eq.f32.partialorder %v5487_v47, %v1424_v56 }
 0x1d5   : > { %v1625_v12 = vmin.f32 %v1624_v1, %v1561_v25  ;;  %v1562_v10 = vsel %vm1498_vm9, %v5717_v51, 512.0  ;;  %v1563_v7 = vsel %vm1499_vm10, %v5719_v50, 512.0  ;;  %v1564_v40 = vsel %vm1500_vm11, %v5721_v36, 512.0 }
 0x1d6   : > { %v1628_v38 = vmin.f32 %v1562_v10, %v1563_v7  ;;  %v1565_v52 = vsel %vm1501_vm12, %v5726_v42, 512.0 }
 0x1d7   : > { %1626 = vmin.xlane.f32.xlu0 %v1625_v12  ;;  %v1429_v57 = vpop.xlane.xlu0 %1428 }
 0x1d8   : > { %v1629_v31 = vmin.f32 %v1628_v38, %v1564_v40  ;;  %vm1502_vm13 = vcmp.eq.f32.partialorder %v5474_v37, %v1429_v57  ;;  %vm1503_vm14 = vcmp.eq.f32.partialorder %v5478_v41, %v1429_v57  ;;  %vm1504_vm15 = vcmp.eq.f32.partialorder %v5497_v18, %v1429_v57 }
 0x1d9   : > { %v1566_v62 = vsel %vm1502_vm13, %v5717_v51, 512.0  ;;  %v1567_v58 = vsel %vm1503_vm14, %v5719_v50, 512.0  ;;  %vm1505_vm1 = vcmp.eq.f32.partialorder %v5510_v24, %v1429_v57  ;;  %v1568_v11 = vsel %vm1504_vm15, %v5721_v36, 512.0 }
 0x1da   : > { %v1630_v61 = vmin.f32 %v1629_v31, %v1565_v52  ;;  %v1633_v23 = vmin.f32 %v1566_v62, %v1567_v58  ;;  %v1569_v1 = vsel %vm1505_vm1, %v5726_v42, 512.0 }
 0x1db   : > { %v1434_v6 = vpop.xlane.xlu1 %1433 }
 0x1dc   : > { %1631 = vmin.xlane.f32.xlu1 %v1630_v61  ;;  %v1634_v56 = vmin.f32 %v1633_v23, %v1568_v11  ;;  %vm1506_vm2 = vcmp.eq.f32.partialorder %v5494_v14, %v1434_v6  ;;  %vm1507_vm3 = vcmp.eq.f32.partialorder %v5503_v20, %v1434_v6  ;;  %vm1508_vm4 = vcmp.eq.f32.partialorder %v5500_v19, %v1434_v6 }
 0x1dd   : > { %v1570_v25 = vsel %vm1506_vm2, %v5717_v51, 512.0  ;;  %v1571_v12 = vsel %vm1507_vm3, %v5719_v50, 512.0  ;;  %vm1509_vm5 = vcmp.eq.f32.partialorder %v5519_v34, %v1434_v6  ;;  %v1572_v57 = vsel %vm1508_vm4, %v5721_v36, 512.0 }
 0x1de   : > { %v1439_v10 = vpop.xlane.xlu0 %1438  ;;  %v1635_v7 = vmin.f32 %v1634_v56, %v1569_v1  ;;  %v1638_v38 = vmin.f32 %v1570_v25, %v1571_v12  ;;  %v1573_v62 = vsel %vm1509_vm5, %v5726_v42, 512.0 }
 0x1df   : > { %vm1510_vm6 = vcmp.eq.f32.partialorder %v5506_v22, %v1439_v10  ;;  %vm1511_vm7 = vcmp.eq.f32.partialorder %v5513_v27, %v1439_v10  ;;  %vm1512_vm8 = vcmp.eq.f32.partialorder %v5529_v13, %v1439_v10  ;;  %vm1513_vm9 = vcmp.eq.f32.partialorder %v5542_v26, %v1439_v10 }
 0x1e0   : > { %1636 = vmin.xlane.f32.xlu0 %v1635_v7  ;;  %v1639_v40 = vmin.f32 %v1638_v38, %v1572_v57  ;;  %v1574_v31 = vsel %vm1510_vm6, %v5717_v51, 512.0  ;;  %v1575_v52 = vsel %vm1511_vm7, %v5719_v50, 512.0  ;;  %v1576_v23 = vsel %vm1512_vm8, %v5721_v36, 512.0 }
 0x1e1   : > { %v1643_v58 = vmin.f32 %v1574_v31, %v1575_v52  ;;  %v1577_v56 = vsel %vm1513_vm9, %v5726_v42, 512.0 }
 0x1e2   : > { %v1640_v61 = vmin.f32 %v1639_v40, %v1573_v62  ;;  %v9889_v62 = vld [vmem:[#allocation9_spill] sm:$0xff] }
 0x1e3   : > { %v1444_v6 = vpop.xlane.xlu1 %1443  ;;  %v1644_v11 = vmin.f32 %v1643_v58, %v1576_v23 }
 0x1e4   : > { %1641 = vmin.xlane.f32.xlu1 %v1640_v61  ;;  %vm1514_vm10 = vcmp.eq.f32.partialorder %v5526_v9, %v1444_v6  ;;  %vm1515_vm11 = vcmp.eq.f32.partialorder %v5535_v16, %v1444_v6  ;;  %vm1516_vm12 = vcmp.eq.f32.partialorder %v5532_v15, %v1444_v6  ;;  %vm1517_vm13 = vcmp.eq.f32.partialorder %v5551_v45, %v1444_v6 }
 0x1e5   : > { %v1645_v1 = vmin.f32 %v1644_v11, %v1577_v56  ;;  %v1578_v25 = vsel %vm1514_vm10, %v5717_v51, 512.0  ;;  %v1579_v12 = vsel %vm1515_vm11, %v5719_v50, 512.0  ;;  %v1580_v38 = vsel %vm1516_vm12, %v5721_v36, 512.0 }
 0x1e6   : > { %v1449_v10 = vpop.xlane.xlu0 %1448  ;;  %v1648_v7 = vmin.f32 %v1578_v25, %v1579_v12  ;;  %v1581_v52 = vsel %vm1517_vm13, %v5726_v42, 512.0  ;;  %v9891_v25 = vld [vmem:[#allocation8_spill] sm:$0xff]  ;;  %v9892_v12 = vld [vmem:[#allocation11_spill] sm:$0xff] }
 0x1e7   : > { %1646 = vmin.xlane.f32.xlu0 %v1645_v1  ;;  %vm1518_vm14 = vcmp.eq.f32.partialorder %v5538_v21, %v1449_v10  ;;  %vm1519_vm15 = vcmp.eq.f32.partialorder %v5545_v30, %v1449_v10  ;;  %vm1520_vm1 = vcmp.eq.f32.partialorder %v5561_v44, %v1449_v10  ;;  %vm1521_vm2 = vcmp.eq.f32.partialorder %v9889_v62, %v1449_v10  ;;  %v9890_v1 = vld [vmem:[#allocation7_spill] sm:$0xff] }
 0x1e8   : > { %v1649_v57 = vmin.f32 %v1648_v7, %v1580_v38  ;;  %v1582_v40 = vsel %vm1518_vm14, %v5717_v51, 512.0  ;;  %v1583_v31 = vsel %vm1519_vm15, %v5719_v50, 512.0  ;;  %v1584_v23 = vsel %vm1520_vm1, %v5721_v36, 512.0 }
 0x1e9   : > { %v1653_v58 = vmin.f32 %v1582_v40, %v1583_v31  ;;  %v1585_v56 = vsel %vm1521_vm2, %v5726_v42, 512.0 }
 0x1ea   : > { %v1650_v61 = vmin.f32 %v1649_v57, %v1581_v52  ;;  %v9893_v57 = vld [vmem:[#allocation13_spill] sm:$0xff] }
 0x1eb   : > { %v1454_v6 = vpop.xlane.xlu1 %1453  ;;  %v1654_v11 = vmin.f32 %v1653_v58, %v1584_v23  ;;  %v9894_v58 = vld [vmem:[#allocation10_spill] sm:$0xff]  ;;  %v9896_v23 = vld [vmem:[#allocation15_spill] sm:$0xff] }
 0x1ec   : > { %1651 = vmin.xlane.f32.xlu1 %v1650_v61  ;;  %vm1522_vm3 = vcmp.eq.f32.partialorder %v9890_v1, %v1454_v6  ;;  %vm1523_vm4 = vcmp.eq.f32.partialorder %v9891_v25, %v1454_v6  ;;  %vm1524_vm5 = vcmp.eq.f32.partialorder %v9892_v12, %v1454_v6  ;;  %vm1525_vm6 = vcmp.eq.f32.partialorder %v9893_v57, %v1454_v6  ;;  %v9895_v61 = vld [vmem:[#allocation12_spill] sm:$0xff]  ;;  %v9897_v1 = vld [vmem:[#allocation17_spill] sm:$0xff] }
 0x1ed   : > { %v1655_v7 = vmin.f32 %v1654_v11, %v1585_v56  ;;  %v1586_v38 = vsel %vm1522_vm3, %v5717_v51, 512.0  ;;  %v1587_v10 = vsel %vm1523_vm4, %v5719_v50, 512.0  ;;  %v1588_v52 = vsel %vm1524_vm5, %v5721_v36, 512.0 }
 0x1ee   : > { %v1459_v40 = vpop.xlane.xlu0 %1458  ;;  %v1658_v31 = vmin.f32 %v1586_v38, %v1587_v10  ;;  %v1589_v12 = vsel %vm1525_vm6, %v5726_v42, 512.0 }
 0x1ef   : > { %1656 = vmin.xlane.f32.xlu0 %v1655_v7  ;;  %vm1526_vm7 = vcmp.eq.f32.partialorder %v9894_v58, %v1459_v40  ;;  %vm1527_vm8 = vcmp.eq.f32.partialorder %v9895_v61, %v1459_v40  ;;  %vm1528_vm9 = vcmp.eq.f32.partialorder %v9896_v23, %v1459_v40  ;;  %vm1529_vm10 = vcmp.eq.f32.partialorder %v9897_v1, %v1459_v40  ;;  %v9898_v58 = vld [vmem:[#allocation14_spill] sm:$0xff] }
 0x1f0   : > { %v1659_v25 = vmin.f32 %v1658_v31, %v1588_v52  ;;  %v1590_v11 = vsel %vm1526_vm7, %v5717_v51, 512.0  ;;  %v1591_v56 = vsel %vm1527_vm8, %v5719_v50, 512.0  ;;  %v1592_v7 = vsel %vm1528_vm9, %v5721_v36, 512.0  ;;  %v9899_v31 = vld [vmem:[#allocation16_spill] sm:$0xff]  ;;  %v9900_v52 = vld [vmem:[#allocation19_spill] sm:$0xff] }
 0x1f1   : > { %v1663_v6 = vmin.f32 %v1590_v11, %v1591_v56  ;;  %v1593_v61 = vsel %vm1529_vm10, %v5726_v42, 512.0 }
 0x1f2   : > { %v1660_v38 = vmin.f32 %v1659_v25, %v1589_v12  ;;  %v9901_v25 = vld [vmem:[#allocation21_spill] sm:$0xff] }
 0x1f3   : > { %v1464_v10 = vpop.xlane.xlu1 %1463  ;;  %v1664_v57 = vmin.f32 %v1663_v6, %v1592_v7  ;;  %v9902_v6 = vld [vmem:[#allocation18_spill] sm:$0xff]  ;;  %v9904_v7 = vld [vmem:[#allocation23_spill] sm:$0xff] }
 0x1f4   : > { %1661 = vmin.xlane.f32.xlu1 %v1660_v38  ;;  %vm1530_vm11 = vcmp.eq.f32.partialorder %v9898_v58, %v1464_v10  ;;  %vm1531_vm12 = vcmp.eq.f32.partialorder %v9899_v31, %v1464_v10  ;;  %vm1532_vm13 = vcmp.eq.f32.partialorder %v9900_v52, %v1464_v10  ;;  %vm1533_vm14 = vcmp.eq.f32.partialorder %v9901_v25, %v1464_v10  ;;  %v9903_v38 = vld [vmem:[#allocation20_spill] sm:$0xff]  ;;  %v9905_v58 = vld [vmem:[#allocation25_spill] sm:$0xff] }
 0x1f5   : > { %v1665_v23 = vmin.f32 %v1664_v57, %v1593_v61  ;;  %v1594_v62 = vsel %vm1530_vm11, %v5717_v51, 512.0  ;;  %v1595_v40 = vsel %vm1531_vm12, %v5719_v50, 512.0  ;;  %v1596_v56 = vsel %vm1532_vm13, %v5721_v36, 512.0 }
 0x1f6   : > { %v1469_v11 = vpop.xlane.xlu0 %1468  ;;  %v1668_v12 = vmin.f32 %v1594_v62, %v1595_v40  ;;  %v1597_v52 = vsel %vm1533_vm14, %v5726_v42, 512.0 }
 0x1f7   : > { %1666 = vmin.xlane.f32.xlu0 %v1665_v23  ;;  %vm1534_vm15 = vcmp.eq.f32.partialorder %v9902_v6, %v1469_v11  ;;  %vm1535_vm1 = vcmp.eq.f32.partialorder %v9903_v38, %v1469_v11  ;;  %vm1536_vm2 = vcmp.eq.f32.partialorder %v9904_v7, %v1469_v11  ;;  %vm1537_vm3 = vcmp.eq.f32.partialorder %v9905_v58, %v1469_v11  ;;  %v9906_v6 = vld [vmem:[#allocation22_spill] sm:$0xff] }
 0x1f8   : > { %v1669_v31 = vmin.f32 %v1668_v12, %v1596_v56  ;;  %v1598_v57 = vsel %vm1534_vm15, %v5717_v51, 512.0  ;;  %v1599_v61 = vsel %vm1535_vm1, %v5719_v50, 512.0  ;;  %v1600_v23 = vsel %vm1536_vm2, %v5721_v36, 512.0  ;;  %v9907_v12 = vld [vmem:[#allocation24_spill] sm:$0xff] }
 0x1f9   : > { %v1673_v10 = vmin.f32 %v1598_v57, %v1599_v61  ;;  %v1601_v38 = vsel %vm1537_vm3, %v5726_v42, 512.0  ;;  %v9908_v61 = vld [vmem:[#allocation26_spill] sm:$0xff] }
 0x1fa   : > { %v1670_v62 = vmin.f32 %v1669_v31, %v1597_v52 }
 0x1fb   : > { %v1674_v25 = vmin.f32 %v1673_v10, %v1600_v23  ;;  %v9909_v10 = vld [vmem:[#allocation27_spill] sm:$0xff] }
 0x1fc   : > { %v1474_v40 = vpop.xlane.xlu1 %1473  ;;  %1671 = vmin.xlane.f32.xlu1 %v1670_v62 }
 0x1fd   : > { %vm1538_vm4 = vcmp.eq.f32.partialorder %v9906_v6, %v1474_v40  ;;  %vm1539_vm5 = vcmp.eq.f32.partialorder %v9907_v12, %v1474_v40  ;;  %vm1540_vm6 = vcmp.eq.f32.partialorder %v5638_v29, %v1474_v40  ;;  %v1675_v56 = vmin.f32 %v1674_v25, %v1601_v38 }
 0x1fe   : > { %v1602_v7 = vsel %vm1538_vm4, %v5717_v51, 512.0  ;;  %v1603_v11 = vsel %vm1539_vm5, %v5719_v50, 512.0  ;;  %vm1541_vm7 = vcmp.eq.f32.partialorder %v5647_v53, %v1474_v40  ;;  %v1604_v52 = vsel %vm1540_vm6, %v5721_v36, 512.0 }
 0x1ff   : > { %v1479_v57 = vpop.xlane.xlu0 %1478  ;;  %v1678_v31 = vmin.f32 %v1602_v7, %v1603_v11  ;;  %1676 = vmin.xlane.f32.xlu0 %v1675_v56  ;;  %v1605_v40 = vsel %vm1541_vm7, %v5726_v42, 512.0 }
 0x200   : > { %vm1542_vm8 = vcmp.eq.f32.partialorder %v9908_v61, %v1479_v57  ;;  %vm1543_vm9 = vcmp.eq.f32.partialorder %v9909_v10, %v1479_v57  ;;  %vm1544_vm10 = vcmp.eq.f32.partialorder %v5657_v17, %v1479_v57  ;;  %vm1545_vm11 = vcmp.eq.f32.partialorder %v5663_v2, %v1479_v57 }
 0x201   : > { %v1484_v62 = vpop.xlane.xlu1 %1483  ;;  %v1679_v23 = vmin.f32 %v1678_v31, %v1604_v52  ;;  %v1606_v25 = vsel %vm1542_vm8, %v5717_v51, 512.0  ;;  %v1607_v38 = vsel %vm1543_vm9, %v5719_v50, 512.0  ;;  %v1608_v53 = vsel %vm1544_vm10, %v5721_v36, 512.0 }
 0x202   : > { %v1683_v7 = vmin.f32 %v1606_v25, %v1607_v38  ;;  %vm1546_vm12 = vcmp.eq.f32.partialorder %v5654_v54, %v1484_v62  ;;  %vm1547_vm13 = vcmp.eq.f32.partialorder %v5660_v63, %v1484_v62  ;;  %vm1548_vm14 = vcmp.eq.f32.partialorder %v5666_v46, %v1484_v62 }
 0x203   : > { %v1680_v56 = vmin.f32 %v1679_v23, %v1605_v40  ;;  %v1489_v11 = vpop.xlane.xlu0 %1488  ;;  %v1610_v31 = vsel %vm1546_vm12, %v5717_v51, 512.0  ;;  %v1609_v57 = vsel %vm1545_vm11, %v5726_v42, 512.0  ;;  %vm1549_vm15 = vcmp.eq.f32.partialorder %v5679_v8, %v1484_v62  ;;  %v4004_v8 = vld [vmem:[%s5707_s27 + $0x10] sm:$0xff] }
 0x204   : > { %v1684_v52 = vmin.f32 %v1683_v7, %v1608_v53  ;;  %v1611_v2 = vsel %vm1547_vm13, %v5719_v50, 512.0  ;;  %vm1550_vm1 = vcmp.eq.f32.partialorder %v5669_v39, %v1489_v11  ;;  %vm1551_vm2 = vcmp.eq.f32.partialorder %v5673_v48, %v1489_v11  ;;  %v4005_v48 = vld [vmem:[%s5707_s27 + $0x18] sm:$0xff]  ;;  %4859 = vmatprep.mubr.msk.f32.mxu0 %vm744_vm0, %v4004_v8 }
 0x205   : > { %1681 = vmin.xlane.f32.xlu1 %v1680_v56  ;;  %v1688_v25 = vmin.f32 %v1610_v31, %v1611_v2  ;;  %vm1552_vm3 = vcmp.eq.f32.partialorder %v5682_v49, %v1489_v11  ;;  %v1612_v38 = vsel %vm1548_vm14, %v5721_v36, 512.0  ;;  %v1614_v40 = vsel %vm1550_vm1, %v5717_v51, 512.0  ;;  %4860 = vmatmul.mubr.msk.f32.gmra.mrb[34].mxu0 %vm744_vm0, %v4005_v48 }
 0x206   : > { %v1685_v23 = vmin.f32 %v1684_v52, %v1609_v57  ;;  %v1615_v53 = vsel %vm1551_vm2, %v5719_v50, 512.0  ;;  %vm1553_vm4 = vcmp.eq.f32.partialorder %v5689_v5, %v1489_v11  ;;  %v1613_v2 = vsel %vm1549_vm15, %v5726_v42, 512.0 }
 0x207   : > { %v1689_v62 = vmin.f32 %v1688_v25, %v1612_v38  ;;  %v1693_v7 = vmin.f32 %v1614_v40, %v1615_v53  ;;  %v1616_v56 = vsel %vm1552_vm3, %v5721_v36, 512.0  ;;  %v1617_v57 = vsel %vm1553_vm4, %v5726_v42, 512.0 }
 0x208   : > { %1686 = vmin.xlane.f32.xlu0 %v1685_v23 }
 0x209   : > { %v1690_v31 = vmin.f32 %v1689_v62, %v1613_v2  ;;  %v1694_v49 = vmin.f32 %v1693_v7, %v1616_v56 }
 0x20b   : > { %1691 = vmin.xlane.f32.xlu1 %v1690_v31  ;;  %v1695_v52 = vmin.f32 %v1694_v49, %v1617_v57 }
 0x20d   : > { %1696 = vmin.xlane.f32.xlu0 %v1695_v52 }
 0x261   : > { %v5857_v11 = vpop.xlane.xlu1 %1621 }
 0x262   : > { %9910 = vst [vmem:[#allocation17_spill] sm:$0xff] %v5857_v11  ;;  %vm9696_vm5 = vcmp.eq.f32.partialorder %v5717_v51, %v5857_v11  ;;  %vm9690_vm6 = vcmp.eq.f32.partialorder %v5719_v50, %v5857_v11  ;;  %vm1700_vm7 = vcmp.eq.f32.partialorder %v5721_v36, %v5857_v11  ;;  %vm1701_vm8 = vcmp.eq.f32.partialorder %v5726_v42, %v5857_v11 }
 0x263   : > { %v5869_v49 = vsel %vm9696_vm5, 1e+30, %v5435_v55  ;;  %v5875_v48 = vsel %vm9690_vm6, 1e+30, %v5442_v60  ;;  %v5891_v55 = vsel %vm1700_vm7, 1e+30, %v5439_v59 }
 0x264   : > { %9911 = vst [vmem:[#allocation25_spill] sm:$0xff] %v5875_v48  ;;  %v5877_v8 = vpop.xlane.xlu0 %1626  ;;  %v1890_v25 = vmin.f32 %v5869_v49, %v5875_v48  ;;  %9913 = vst [vmem:[#allocation24_spill] sm:$0xff] %v5891_v55  ;;  %v5906_v38 = vsel %vm1701_vm8, 1e+30, %v5454_v4 }
 0x265   : > { %9912 = vst [vmem:[#allocation22_spill] sm:$0xff] %v5877_v8  ;;  %vm9687_vm9 = vcmp.eq.f32.partialorder %v5717_v51, %v5877_v8  ;;  %vm9685_vm10 = vcmp.eq.f32.partialorder %v5719_v50, %v5877_v8  ;;  %vm1704_vm11 = vcmp.eq.f32.partialorder %v5721_v36, %v5877_v8  ;;  %vm1705_vm12 = vcmp.eq.f32.partialorder %v5726_v42, %v5877_v8 }
 0x266   : > { %v1891_v60 = vmin.f32 %v1890_v25, %v5891_v55  ;;  %v5900_v23 = vsel %vm9687_vm9, 1e+30, %v5446_v0  ;;  %v5912_v59 = vsel %vm9685_vm10, 1e+30, %v5451_v3  ;;  %v5925_v4 = vsel %vm1704_vm11, 1e+30, %v5471_v35 }
 0x267   : > { %9914 = vst [vmem:[#allocation26_spill] sm:$0xff] %v5912_v59  ;;  %v1895_v0 = vmin.f32 %v5900_v23, %v5912_v59  ;;  %9916 = vst [vmem:[#allocation33_spill] sm:$0xff] %v5925_v4  ;;  %v5936_v62 = vsel %vm1705_vm12, 1e+30, %v5481_v43 }
 0x268   : > { %v1892_v40 = vmin.f32 %v1891_v60, %v5906_v38 }
 0x269   : > { %v5919_v53 = vpop.xlane.xlu1 %1631  ;;  %v1896_v3 = vmin.f32 %v1895_v0, %v5925_v4 }
 0x26a   : > { %9915 = vst [vmem:[#allocation27_spill] sm:$0xff] %v5919_v53  ;;  %vm9599_vm13 = vcmp.eq.f32.partialorder %v5717_v51, %v5919_v53  ;;  %vm9598_vm14 = vcmp.eq.f32.partialorder %v5719_v50, %v5919_v53  ;;  %1893 = vmin.xlane.f32.xlu1 %v1892_v40  ;;  %vm9695_vm15 = vcmp.eq.f32.partialorder %v5721_v36, %v5919_v53 }
 0x26b   : > { %v5944_v35 = vsel %vm9599_vm13, 1e+30, %v5462_v28  ;;  %v5950_v7 = vsel %vm9598_vm14, 1e+30, %v5468_v33  ;;  %v1897_v2 = vmin.f32 %v1896_v3, %v5936_v62  ;;  %vm9603_vm1 = vcmp.eq.f32.partialorder %v5726_v42, %v5919_v53  ;;  %v9941_v53 = vld [vmem:[#allocation13_spill] sm:$0xff] }
 0x26c   : > { %v1900_v43 = vmin.f32 %v5944_v35, %v5950_v7  ;;  %v5967_v28 = vsel %vm9695_vm15, 1e+30, %v5465_v32  ;;  %v5982_v57 = vsel %vm9603_vm1, 1e+30, %v5487_v47 }
 0x26d   : > { %v5953_v56 = vpop.xlane.xlu0 %1636  ;;  %1898 = vmin.xlane.f32.xlu0 %v1897_v2 }
 0x26e   : > { %9917 = vst [vmem:[#allocation34_spill] sm:$0xff] %v5953_v56  ;;  %vm9597_vm2 = vcmp.eq.f32.partialorder %v5717_v51, %v5953_v56  ;;  %vm9600_vm3 = vcmp.eq.f32.partialorder %v5719_v50, %v5953_v56  ;;  %v1901_v33 = vmin.f32 %v1900_v43, %v5967_v28  ;;  %vm9601_vm4 = vcmp.eq.f32.partialorder %v5721_v36, %v5953_v56 }
 0x26f   : > { %v5976_v31 = vsel %vm9597_vm2, 1e+30, %v5474_v37  ;;  %v5988_v32 = vsel %vm9600_vm3, 1e+30, %v5478_v41  ;;  %vm9673_vm2 = vcmp.eq.f32.partialorder %v5726_v42, %v5953_v56  ;;  %v6005_v41 = vsel %vm9601_vm4, 1e+30, %v5497_v18 }
 0x270   : > { %v1902_v25 = vmin.f32 %v1901_v33, %v5982_v57  ;;  %v1905_v37 = vmin.f32 %v5976_v31, %v5988_v32  ;;  %v6022_v18 = vsel %vm9673_vm2, 1e+30, %v5510_v24 }
 0x271   : > { %v5990_v52 = vpop.xlane.xlu1 %1641 }
 0x272   : > { %9918 = vst [vmem:[#allocation35_spill] sm:$0xff] %v5990_v52  ;;  %vm9602_vm14 = vcmp.eq.f32.partialorder %v5717_v51, %v5990_v52  ;;  %vm9604_vm13 = vcmp.eq.f32.partialorder %v5719_v50, %v5990_v52  ;;  %1903 = vmin.xlane.f32.xlu1 %v1902_v25  ;;  %v1906_v47 = vmin.f32 %v1905_v37, %v6005_v41 }
 0x273   : > { %vm9605_vm3 = vcmp.eq.f32.partialorder %v5721_v36, %v5990_v52  ;;  %v6014_v60 = vsel %vm9602_vm14, 1e+30, %v5494_v14  ;;  %vm9608_vm4 = vcmp.eq.f32.partialorder %v5726_v42, %v5990_v52  ;;  %v6030_v0 = vsel %vm9604_vm13, 1e+30, %v5503_v20  ;;  %v9939_v52 = vld [vmem:[#allocation12_spill] sm:$0xff] }
 0x274   : > { %v6016_v40 = vpop.xlane.xlu0 %1646  ;;  %v1907_v14 = vmin.f32 %v1906_v47, %v6022_v18  ;;  %v1910_v24 = vmin.f32 %v6014_v60, %v6030_v0  ;;  %v6043_v3 = vsel %vm9605_vm3, 1e+30, %v5500_v19  ;;  %v6064_v19 = vsel %vm9608_vm4, 1e+30, %v5519_v34 }
 0x275   : > { %9919 = vst [vmem:[#allocation36_spill] sm:$0xff] %v6016_v40  ;;  %vm9607_vm14 = vcmp.eq.f32.partialorder %v5717_v51, %v6016_v40  ;;  %vm9606_vm1 = vcmp.eq.f32.partialorder %v5719_v50, %v6016_v40  ;;  %vm9610_vm13 = vcmp.eq.f32.partialorder %v5721_v36, %v6016_v40  ;;  %9920 = vst [vmem:[#allocation37_spill] sm:$0xff] %v6064_v19 }
 0x276   : > { %v6051_v20 = vsel %vm9607_vm14, 1e+30, %v5506_v22  ;;  %v6057_v2 = vsel %vm9606_vm1, 1e+30, %v5513_v27  ;;  %1908 = vmin.xlane.f32.xlu0 %v1907_v14  ;;  %v1911_v43 = vmin.f32 %v1910_v24, %v6043_v3  ;;  %vm9609_vm3 = vcmp.eq.f32.partialorder %v5726_v42, %v6016_v40 }
 0x277   : > { %v1915_v22 = vmin.f32 %v6051_v20, %v6057_v2  ;;  %v6077_v25 = vsel %vm9610_vm13, 1e+30, %v5529_v13  ;;  %v6088_v37 = vsel %vm9609_vm3, 1e+30, %v5542_v26 }
 0x278   : > { %v1912_v27 = vmin.f32 %v1911_v43, %v6064_v19 }
 0x279   : > { %v6070_v33 = vpop.xlane.xlu1 %1651  ;;  %v1916_v34 = vmin.f32 %v1915_v22, %v6077_v25 }
 0x27a   : > { %9921 = vst [vmem:[#allocation38_spill] sm:$0xff] %v6070_v33  ;;  %vm9611_vm1 = vcmp.eq.f32.partialorder %v5717_v51, %v6070_v33  ;;  %vm9612_vm14 = vcmp.eq.f32.partialorder %v5719_v50, %v6070_v33  ;;  %1913 = vmin.xlane.f32.xlu1 %v1912_v27  ;;  %vm9613_vm4 = vcmp.eq.f32.partialorder %v5721_v36, %v6070_v33 }
 0x27b   : > { %v6096_v13 = vsel %vm9611_vm1, 1e+30, %v5526_v9  ;;  %v6102_v47 = vsel %vm9612_vm14, 1e+30, %v5535_v16  ;;  %v1917_v26 = vmin.f32 %v1916_v34, %v6088_v37  ;;  %vm9616_vm1 = vcmp.eq.f32.partialorder %v5726_v42, %v6070_v33  ;;  %v9932_v33 = vld [vmem:[#allocation8_spill] sm:$0xff] }
 0x27c   : > { %v6104_v14 = vpop.xlane.xlu0 %1656  ;;  %v1920_v9 = vmin.f32 %v6096_v13, %v6102_v47  ;;  %v6119_v16 = vsel %vm9613_vm4, 1e+30, %v5532_v15  ;;  %v6140_v15 = vsel %vm9616_vm1, 1e+30, %v5551_v45 }
 0x27d   : > { %9922 = vst [vmem:[#allocation39_spill] sm:$0xff] %v6104_v14  ;;  %vm9615_vm3 = vcmp.eq.f32.partialorder %v5717_v51, %v6104_v14  ;;  %vm9614_vm13 = vcmp.eq.f32.partialorder %v5719_v50, %v6104_v14  ;;  %1918 = vmin.xlane.f32.xlu0 %v1917_v26  ;;  %vm9620_vm14 = vcmp.eq.f32.partialorder %v5721_v36, %v6104_v14  ;;  %9925 = vst [vmem:[#allocation42_spill] sm:$0xff] %v6140_v15  ;;  %v9928_v26 = vld [vmem:[#allocation9_spill] sm:$0xff] }
 0x27e   : > { %v6127_v24 = vsel %vm9615_vm3, 1e+30, %v5538_v21  ;;  %v6133_v43 = vsel %vm9614_vm13, 1e+30, %v5545_v30  ;;  %v1921_v22 = vmin.f32 %v1920_v9, %v6119_v16  ;;  %vm9619_vm4 = vcmp.eq.f32.partialorder %v5726_v42, %v6104_v14  ;;  %v9935_v14 = vld [vmem:[#allocation11_spill] sm:$0xff] }
 0x27f   : > { %9923 = vst [vmem:[#allocation40_spill] sm:$0xff] %v6127_v24  ;;  %9924 = vst [vmem:[#allocation41_spill] sm:$0xff] %v6133_v43  ;;  %v1925_v21 = vmin.f32 %v6127_v24, %v6133_v43  ;;  %v6153_v30 = vsel %vm9620_vm14, 1e+30, %v5561_v44  ;;  %v6164_v9 = vsel %vm9619_vm4, 1e+30, %v9928_v26 }
 0x280   : > { %v1922_v34 = vmin.f32 %v1921_v22, %v6140_v15  ;;  %9927 = vst [vmem:[#allocation44_spill] sm:$0xff] %v6153_v30  ;;  %9929 = vst [vmem:[#allocation9_spill] sm:$0xff] %v6164_v9  ;;  %v9930_v44 = vld [vmem:[#allocation7_spill] sm:$0xff] }
 0x281   : > { %v6146_v27 = vpop.xlane.xlu1 %1661  ;;  %v1926_v45 = vmin.f32 %v1925_v21, %v6153_v30 }
 0x282   : > { %9926 = vst [vmem:[#allocation43_spill] sm:$0xff] %v6146_v27  ;;  %vm9621_vm13 = vcmp.eq.f32.partialorder %v5717_v51, %v6146_v27  ;;  %vm9624_vm3 = vcmp.eq.f32.partialorder %v5719_v50, %v6146_v27  ;;  %1923 = vmin.xlane.f32.xlu1 %v1922_v34  ;;  %vm9633_vm1 = vcmp.eq.f32.partialorder %v5721_v36, %v6146_v27 }
 0x283   : > { %v6172_v22 = vsel %vm9621_vm13, 1e+30, %v9930_v44  ;;  %v6178_v21 = vsel %vm9624_vm3, 1e+30, %v9932_v33  ;;  %v1927_v26 = vmin.f32 %v1926_v45, %v6164_v9  ;;  %vm9640_vm13 = vcmp.eq.f32.partialorder %v5726_v42, %v6146_v27  ;;  %v9937_v45 = vld [vmem:[#allocation10_spill] sm:$0xff] }
 0x284   : > { %9931 = vst [vmem:[#allocation7_spill] sm:$0xff] %v6172_v22  ;;  %9933 = vst [vmem:[#allocation8_spill] sm:$0xff] %v6178_v21  ;;  %v6180_v34 = vpop.xlane.xlu0 %1666  ;;  %v1930_v44 = vmin.f32 %v6172_v22, %v6178_v21  ;;  %v6195_v33 = vsel %vm9633_vm1, 1e+30, %v9935_v14  ;;  %v6216_v14 = vsel %vm9640_vm13, 1e+30, %v9941_v53 }
 0x285   : > { %9934 = vst [vmem:[#allocation45_spill] sm:$0xff] %v6180_v34  ;;  %vm9639_vm4 = vcmp.eq.f32.partialorder %v5717_v51, %v6180_v34  ;;  %vm9638_vm14 = vcmp.eq.f32.partialorder %v5719_v50, %v6180_v34  ;;  %1928 = vmin.xlane.f32.xlu0 %v1927_v26  ;;  %9936 = vst [vmem:[#allocation11_spill] sm:$0xff] %v6195_v33  ;;  %vm9646_vm3 = vcmp.eq.f32.partialorder %v5721_v36, %v6180_v34 }
 0x286   : > { %v6203_v40 = vsel %vm9639_vm4, 1e+30, %v9937_v45  ;;  %v6209_v26 = vsel %vm9638_vm14, 1e+30, %v9939_v52  ;;  %v1931_v56 = vmin.f32 %v1930_v44, %v6195_v33  ;;  %9942 = vst [vmem:[#allocation13_spill] sm:$0xff] %v6216_v14  ;;  %vm9645_vm1 = vcmp.eq.f32.partialorder %v5726_v42, %v6180_v34  ;;  %v9944_v52 = vld [vmem:[#allocation15_spill] sm:$0xff] }
 0x287   : > { %9938 = vst [vmem:[#allocation10_spill] sm:$0xff] %v6203_v40  ;;  %9940 = vst [vmem:[#allocation12_spill] sm:$0xff] %v6209_v26  ;;  %v1935_v45 = vmin.f32 %v6203_v40, %v6209_v26  ;;  %v6229_v44 = vsel %vm9646_vm3, 1e+30, %v9944_v52  ;;  %v9947_v52 = vld [vmem:[#allocation14_spill] sm:$0xff]  ;;  %v9949_v26 = vld [vmem:[#allocation16_spill] sm:$0xff] }
 0x288   : > { %v1932_v11 = vmin.f32 %v1931_v56, %v6216_v14  ;;  %9945 = vst [vmem:[#allocation15_spill] sm:$0xff] %v6229_v44  ;;  %v6240_v56 = vsel %vm9645_vm1, 1e+30, %v9897_v1  ;;  %v9952_v34 = vld [vmem:[#allocation19_spill] sm:$0xff] }
 0x289   : > { %v6222_v8 = vpop.xlane.xlu1 %1671  ;;  %v1936_v53 = vmin.f32 %v1935_v45, %v6229_v44  ;;  %9946 = vst [vmem:[#allocation47_spill] sm:$0xff] %v6240_v56  ;;  %v9956_v44 = vld [vmem:[#allocation20_spill] sm:$0xff] }
 0x28a   : > { %9943 = vst [vmem:[#allocation46_spill] sm:$0xff] %v6222_v8  ;;  %vm9647_vm14 = vcmp.eq.f32.partialorder %v5717_v51, %v6222_v8  ;;  %vm9650_vm4 = vcmp.eq.f32.partialorder %v5719_v50, %v6222_v8  ;;  %1933 = vmin.xlane.f32.xlu1 %v1932_v11  ;;  %vm9659_vm13 = vcmp.eq.f32.partialorder %v5721_v36, %v6222_v8 }
 0x28b   : > { %v6248_v27 = vsel %vm9647_vm14, 1e+30, %v9947_v52  ;;  %v6254_v11 = vsel %vm9650_vm4, 1e+30, %v9949_v26  ;;  %v1937_v1 = vmin.f32 %v1936_v53, %v6240_v56  ;;  %vm9666_vm14 = vcmp.eq.f32.partialorder %v5726_v42, %v6222_v8  ;;  %v9954_v53 = vld [vmem:[#allocation18_spill] sm:$0xff] }
 0x28c   : > { %9948 = vst [vmem:[#allocation14_spill] sm:$0xff] %v6248_v27  ;;  %9950 = vst [vmem:[#allocation16_spill] sm:$0xff] %v6254_v11  ;;  %v6256_v45 = vpop.xlane.xlu0 %1676  ;;  %v1940_v52 = vmin.f32 %v6248_v27, %v6254_v11  ;;  %v6271_v26 = vsel %vm9659_vm13, 1e+30, %v9952_v34  ;;  %v9958_v27 = vld [vmem:[#allocation21_spill] sm:$0xff] }
 0x28d   : > { %9951 = vst [vmem:[#allocation48_spill] sm:$0xff] %v6256_v45  ;;  %vm9665_vm1 = vcmp.eq.f32.partialorder %v5717_v51, %v6256_v45  ;;  %vm9664_vm3 = vcmp.eq.f32.partialorder %v5719_v50, %v6256_v45  ;;  %1938 = vmin.xlane.f32.xlu0 %v1937_v1  ;;  %9953 = vst [vmem:[#allocation19_spill] sm:$0xff] %v6271_v26  ;;  %vm9669_vm4 = vcmp.eq.f32.partialorder %v5721_v36, %v6256_v45 }
 0x28e   : > { %v6279_v56 = vsel %vm9665_vm1, 1e+30, %v9954_v53  ;;  %v6285_v1 = vsel %vm9664_vm3, 1e+30, %v9956_v44  ;;  %v1941_v11 = vmin.f32 %v1940_v52, %v6271_v26  ;;  %v6292_v34 = vsel %vm9666_vm14, 1e+30, %v9958_v27 }
 0x28f   : > { %9955 = vst [vmem:[#allocation18_spill] sm:$0xff] %v6279_v56  ;;  %9957 = vst [vmem:[#allocation20_spill] sm:$0xff] %v6285_v1  ;;  %vm9671_vm13 = vcmp.eq.f32.partialorder %v5726_v42, %v6256_v45  ;;  %v1945_v53 = vmin.f32 %v6279_v56, %v6285_v1  ;;  %v9961_v44 = vld [vmem:[#allocation23_spill] sm:$0xff] }
 0x290   : > { %9959 = vst [vmem:[#allocation21_spill] sm:$0xff] %v6292_v34  ;;  %v1942_v14 = vmin.f32 %v1941_v11, %v6292_v34  ;;  %v6305_v52 = vsel %vm9669_vm4, 1e+30, %v9961_v44  ;;  %v6318_v11 = vsel %vm9671_vm13, 1e+30, %v9905_v58 }
 0x291   : > { %9962 = vst [vmem:[#allocation23_spill] sm:$0xff] %v6305_v52  ;;  %v1946_v27 = vmin.f32 %v1945_v53, %v6305_v52  ;;  %9963 = vst [vmem:[#allocation50_spill] sm:$0xff] %v6318_v11 }
 0x292   : > { %v6298_v40 = vpop.xlane.xlu1 %1681  ;;  %1943 = vmin.xlane.f32.xlu1 %v1942_v14 }
 0x293   : > { %9960 = vst [vmem:[#allocation49_spill] sm:$0xff] %v6298_v40  ;;  %vm9670_vm3 = vcmp.eq.f32.partialorder %v5717_v51, %v6298_v40  ;;  %vm9672_vm1 = vcmp.eq.f32.partialorder %v5719_v50, %v6298_v40  ;;  %vm9684_vm14 = vcmp.eq.f32.partialorder %v5721_v36, %v6298_v40  ;;  %v1947_v14 = vmin.f32 %v1946_v27, %v6318_v11 }
 0x294   : > { %v6324_v44 = vsel %vm9670_vm3, 1e+30, %v9906_v6  ;;  %v6330_v53 = vsel %vm9672_vm1, 1e+30, %v9907_v12  ;;  %vm9686_vm4 = vcmp.eq.f32.partialorder %v5726_v42, %v6298_v40  ;;  %v6339_v58 = vsel %vm9684_vm14, 1e+30, %v5638_v29 }
 0x295   : > { %9964 = vst [vmem:[#allocation51_spill] sm:$0xff] %v6324_v44  ;;  %9965 = vst [vmem:[#allocation52_spill] sm:$0xff] %v6330_v53  ;;  %v1687_v8 = vpop.xlane.xlu0 %1686  ;;  %v1950_v6 = vmin.f32 %v6324_v44, %v6330_v53  ;;  %1948 = vmin.xlane.f32.xlu0 %v1947_v14  ;;  %v9680_v12 = vmov 0.0   ;;  %v9970_v44 = vld [vmem:[#allocation28_spill] sm:$0xff] }
 0x296   : > { %9966 = vst [vmem:[#allocation53_spill] sm:$0xff] %v6339_v58  ;;  %vm1750_vm3 = vcmp.eq.f32.partialorder %v5717_v51, %v1687_v8  ;;  %vm1751_vm13 = vcmp.eq.f32.partialorder %v5719_v50, %v1687_v8  ;;  %vm1752_vm1 = vcmp.eq.f32.partialorder %v5721_v36, %v1687_v8  ;;  %vm1753_vm2 = vcmp.eq.f32.partialorder %v5726_v42, %v1687_v8 }
 0x297   : > { %v6348_v27 = vsel %vm1752_vm1, 1.0, %v9680_v12  ;;  %v6353_v29 = vsel %vm1750_vm3, 1e+30, %v9908_v61  ;;  %v6358_v45 = vsel %vm1751_vm13, 1e+30, %v9909_v10  ;;  %v1951_v12 = vmin.f32 %v1950_v6, %v6339_v58 }
 0x298   : > { %9967 = vst [vmem:[#allocation54_spill] sm:$0xff] %v6348_v27  ;;  %9968 = vst [vmem:[#allocation55_spill] sm:$0xff] %v6353_v29  ;;  %v1692_v53 = vpop.xlane.xlu1 %1691  ;;  %v6364_v14 = vsel %vm9686_vm4, 1e+30, %v9970_v44  ;;  %v9972_v27 = vmov 0.0   ;;  %v1955_v10 = vmin.f32 %v6353_v29, %v6358_v45 }
 0x299   : > { %9969 = vst [vmem:[#allocation56_spill] sm:$0xff] %v6358_v45  ;;  %9971 = vst [vmem:[#allocation28_spill] sm:$0xff] %v6364_v14  ;;  %v6370_v11 = vsel %vm1753_vm2, 1.0, %v9972_v27  ;;  %v6373_v61 = vsel %vm1752_vm1, 1e+30, %v5657_v17  ;;  %vm1754_vm14 = vcmp.eq.f32.partialorder %v5717_v51, %v1692_v53  ;;  %vm1755_vm10 = vcmp.eq.f32.partialorder %v5719_v50, %v1692_v53  ;;  %v9978_v45 = vld [vmem:[#allocation29_spill] sm:$0xff] }
 0x29a   : > { %9973 = vst [vmem:[#allocation57_spill] sm:$0xff] %v6370_v11  ;;  %9974 = vst [vmem:[#allocation58_spill] sm:$0xff] %v6373_v61  ;;  %vm1756_vm4 = vcmp.eq.f32.partialorder %v5721_v36, %v1692_v53  ;;  %v1952_v44 = vmin.f32 %v1951_v12, %v6364_v14  ;;  %v1697_v6 = vpop.xlane.xlu0 %1696  ;;  %vm1757_vm9 = vcmp.eq.f32.partialorder %v5726_v42, %v1692_v53  ;;  %v6388_v17 = vsel %vm1754_vm14, 1e+30, %v5654_v54 }
 0x29b   : > { %v6383_v40 = vsel %vm1756_vm4, 1.0, %v9972_v27  ;;  %9976 = vst [vmem:[#allocation60_spill] sm:$0xff] %v6388_v17  ;;  %vm1758_vm1 = vcmp.eq.f32.partialorder %v5717_v51, %v1697_v6  ;;  %vm1759_vm6 = vcmp.eq.f32.partialorder %v5719_v50, %v1697_v6  ;;  %v1956_v11 = vmin.f32 %v1955_v10, %v6373_v61 }
 0x29c   : > { %9975 = vst [vmem:[#allocation59_spill] sm:$0xff] %v6383_v40  ;;  %v6396_v12 = vsel %vm1757_vm9, 1.0, %v9972_v27  ;;  %1953 = vmin.xlane.f32.xlu1 %v1952_v44  ;;  %v6401_v40 = vsel %vm1753_vm2, 1e+30, %v9978_v45  ;;  %v6406_v54 = vsel %vm1755_vm10, 1e+30, %v5660_v63  ;;  %vm1760_vm15 = vcmp.eq.f32.partialorder %v5721_v36, %v1697_v6 }
 0x29d   : > { %9977 = vst [vmem:[#allocation61_spill] sm:$0xff] %v6396_v12  ;;  %9979 = vst [vmem:[#allocation29_spill] sm:$0xff] %v6401_v40  ;;  %v6409_v29 = vsel %vm1756_vm4, 1e+30, %v5666_v46  ;;  %v1957_v10 = vmin.f32 %v1956_v11, %v6401_v40  ;;  %v1960_v44 = vmin.f32 %v6388_v17, %v6406_v54  ;;  %vm1761_vm5 = vcmp.eq.f32.partialorder %v5726_v42, %v1697_v6  ;;  %v9985_v12 = vld [vmem:[#allocation30_spill] sm:$0xff]  ;;  %v9989_v40 = vld [vmem:[#allocation32_spill] sm:$0xff] }
 0x29e   : > { %9980 = vst [vmem:[#allocation62_spill] sm:$0xff] %v6406_v54  ;;  %9981 = vst [vmem:[#allocation63_spill] sm:$0xff] %v6409_v29  ;;  %v6417_v45 = vsel %vm1760_vm15, 1.0, %v9972_v27  ;;  %v6422_v63 = vsel %vm1761_vm5, 1.0, %v9972_v27  ;;  %v6427_v46 = vsel %vm1758_vm1, 1e+30, %v5669_v39 }
 0x29f   : > { %9982 = vst [vmem:[#allocation64_spill] sm:$0xff] %v6417_v45  ;;  %9983 = vst [vmem:[#allocation65_spill] sm:$0xff] %v6422_v63  ;;  %v6432_v11 = vsel %vm1759_vm6, 1e+30, %v9985_v12  ;;  %1958 = vmin.xlane.f32.xlu0 %v1957_v10  ;;  %v9987_v54 = vld [vmem:[#allocation31_spill] sm:$0xff]  ;;  %v1961_v17 = vmin.f32 %v1960_v44, %v6409_v29  ;;  %v6448_v12 = vsel %vm1750_vm3, 1.0, %v9972_v27 }
 0x2a0   : > { %9984 = vst [vmem:[#allocation66_spill] sm:$0xff] %v6427_v46  ;;  %9986 = vst [vmem:[#allocation30_spill] sm:$0xff] %v6432_v11  ;;  %v6437_v45 = vsel %vm1757_vm9, 1e+30, %v9987_v54  ;;  %v1965_v63 = vmin.f32 %v6427_v46, %v6432_v11  ;;  %v6443_v39 = vsel %vm1760_vm15, 1e+30, %v9989_v40 }
 0x2a1   : > { %9988 = vst [vmem:[#allocation31_spill] sm:$0xff] %v6437_v45  ;;  %9990 = vst [vmem:[#allocation32_spill] sm:$0xff] %v6443_v39  ;;  %v6453_v10 = vsel %vm1751_vm13, 1.0, %v9972_v27  ;;  %v6458_v54 = vsel %vm1754_vm14, 1.0, %v9972_v27  ;;  %v1962_v40 = vmin.f32 %v1961_v17, %v6437_v45  ;;  %v6470_v8 = vsel %vm1758_vm1, 1.0, %v9972_v27  ;;  %v4007_v6 = vld [vmem:[%s5707_s27 + $0x28] sm:$0xff] }
 0x2a2   : > { %9991 = vst [vmem:[#allocation67_spill] sm:$0xff] %v6448_v12  ;;  %9992 = vst [vmem:[#allocation68_spill] sm:$0xff] %v6453_v10  ;;  %v1966_v44 = vmin.f32 %v1965_v63, %v6443_v39  ;;  %v6465_v12 = vsel %vm1755_vm10, 1.0, %v9972_v27  ;;  %v6475_v10 = vsel %vm1761_vm5, 1e+30, %v5689_v5  ;;  %v6480_v17 = vsel %vm1759_vm6, 1.0, %v9972_v27 }
 0x2a3   : > { %9993 = vst [vmem:[#allocation69_spill] sm:$0xff] %v6458_v54  ;;  %9994 = vst [vmem:[#allocation70_spill] sm:$0xff] %v6465_v12  ;;  %1963 = vmin.xlane.f32.xlu1 %v1962_v40  ;;  %v4222_v63 = vld [vmem:[%s6487_s21] sm:$0xff] }
 0x2a4   : > { %9995 = vst [vmem:[#allocation71_spill] sm:$0xff] %v6470_v8  ;;  %9996 = vst [vmem:[#allocation72_spill] sm:$0xff] %v6475_v10  ;;  %v1967_v53 = vmin.f32 %v1966_v44, %v6475_v10  ;;  %v6490_v8 = vpop.f32.mrb[32].mxu0  ;;  %v4006_v12 = vld [vmem:[%s5707_s27 + $0x20] sm:$0xff] }
 0x2a5   : > { %9997 = vst [vmem:[#allocation73_spill] sm:$0xff] %v6480_v17  ;;  %9998 = vst [vmem:[#allocation74_spill] sm:$0xff] %v6490_v8  ;;  %v6492_v5 = vpop.f32.mrb[33].mxu0  ;;  %4862 = vmatprep.mubr.msk.f32.mxu0 %vm744_vm0, %v4006_v12 }
 0x2a6   : > { %1968 = vmin.xlane.f32.xlu0 %v1967_v53  ;;  %4863 = vmatmul.mubr.msk.f32.gmra.mrb[36].mxu0 %vm744_vm0, %v4007_v6 }
 0x2b4   : > { %4240 = vperm.xlu1 %4954, %v4222_v63  }
 0x2f7   : > { %v1894_v40 = vpop.xlane.xlu1 %1893 }
 0x2f8   : > { %vm1970_vm5 = vcmp.eq.f32.partialorder %v5869_v49, %v1894_v40  ;;  %vm1971_vm6 = vcmp.eq.f32.partialorder %v5875_v48, %v1894_v40  ;;  %vm1972_vm9 = vcmp.eq.f32.partialorder %v5891_v55, %v1894_v40  ;;  %vm1973_vm10 = vcmp.eq.f32.partialorder %v5906_v38, %v1894_v40 }
 0x2f9   : > { %v2034_v44 = vsel %vm1970_vm5, %v5717_v51, 512.0  ;;  %v2035_v53 = vsel %vm1971_vm6, %v5719_v50, 512.0  ;;  %v2036_v54 = vsel %vm1972_vm9, %v5721_v36, 512.0  ;;  %v2037_v6 = vsel %vm1973_vm10, %v5726_v42, 512.0 }
 0x2fa   : > { %v2098_v63 = vmin.f32 %v2034_v44, %v2035_v53  ;;  %v1899_v17 = vpop.xlane.xlu0 %1898 }
 0x2fb   : > { %vm1974_vm13 = vcmp.eq.f32.partialorder %v5900_v23, %v1899_v17  ;;  %vm1975_vm14 = vcmp.eq.f32.partialorder %v5912_v59, %v1899_v17  ;;  %vm1976_vm15 = vcmp.eq.f32.partialorder %v5925_v4, %v1899_v17  ;;  %vm1977_vm2 = vcmp.eq.f32.partialorder %v5936_v62, %v1899_v17 }
 0x2fc   : > { %v2099_v12 = vmin.f32 %v2098_v63, %v2036_v54  ;;  %v2038_v8 = vsel %vm1974_vm13, %v5717_v51, 512.0  ;;  %v2039_v55 = vsel %vm1975_vm14, %v5719_v50, 512.0  ;;  %v2040_v44 = vsel %vm1976_vm15, %v5721_v36, 512.0 }
 0x2fd   : > { %v2103_v40 = vmin.f32 %v2038_v8, %v2039_v55  ;;  %v2041_v63 = vsel %vm1977_vm2, %v5726_v42, 512.0 }
 0x2fe   : > { %v2100_v48 = vmin.f32 %v2099_v12, %v2037_v6 }
 0x2ff   : > { %v1904_v53 = vpop.xlane.xlu1 %1903  ;;  %v2104_v54 = vmin.f32 %v2103_v40, %v2040_v44 }
 0x300   : > { %2101 = vmin.xlane.f32.xlu1 %v2100_v48  ;;  %vm1978_vm3 = vcmp.eq.f32.partialorder %v5944_v35, %v1904_v53  ;;  %vm1979_vm4 = vcmp.eq.f32.partialorder %v5950_v7, %v1904_v53  ;;  %vm1980_vm1 = vcmp.eq.f32.partialorder %v5967_v28, %v1904_v53  ;;  %vm1981_vm5 = vcmp.eq.f32.partialorder %v5982_v57, %v1904_v53 }
 0x301   : > { %v2105_v4 = vmin.f32 %v2104_v54, %v2041_v63  ;;  %v2042_v59 = vsel %vm1978_vm3, %v5717_v51, 512.0  ;;  %v2043_v12 = vsel %vm1979_vm4, %v5719_v50, 512.0  ;;  %v2044_v48 = vsel %vm1980_vm1, %v5721_v36, 512.0 }
 0x302   : > { %v2108_v55 = vmin.f32 %v2042_v59, %v2043_v12  ;;  %v2045_v6 = vsel %vm1981_vm5, %v5726_v42, 512.0 }
 0x303   : > { %2106 = vmin.xlane.f32.xlu0 %v2105_v4  ;;  %v1909_v8 = vpop.xlane.xlu0 %1908 }
 0x304   : > { %v2109_v17 = vmin.f32 %v2108_v55, %v2044_v48  ;;  %vm1982_vm6 = vcmp.eq.f32.partialorder %v5976_v31, %v1909_v8  ;;  %vm1983_vm9 = vcmp.eq.f32.partialorder %v5988_v32, %v1909_v8  ;;  %vm1984_vm10 = vcmp.eq.f32.partialorder %v6005_v41, %v1909_v8 }
 0x305   : > { %v2046_v40 = vsel %vm1982_vm6, %v5717_v51, 512.0  ;;  %v2047_v44 = vsel %vm1983_vm9, %v5719_v50, 512.0  ;;  %vm1985_vm13 = vcmp.eq.f32.partialorder %v6022_v18, %v1909_v8  ;;  %v2048_v53 = vsel %vm1984_vm10, %v5721_v36, 512.0 }
 0x306   : > { %v2110_v54 = vmin.f32 %v2109_v17, %v2045_v6  ;;  %v2113_v59 = vmin.f32 %v2046_v40, %v2047_v44  ;;  %v2049_v12 = vsel %vm1985_vm13, %v5726_v42, 512.0 }
 0x307   : > { %v1914_v4 = vpop.xlane.xlu1 %1913 }
 0x308   : > { %2111 = vmin.xlane.f32.xlu1 %v2110_v54  ;;  %v2114_v63 = vmin.f32 %v2113_v59, %v2048_v53  ;;  %vm1986_vm14 = vcmp.eq.f32.partialorder %v6014_v60, %v1914_v4  ;;  %vm1987_vm15 = vcmp.eq.f32.partialorder %v6030_v0, %v1914_v4  ;;  %vm1988_vm2 = vcmp.eq.f32.partialorder %v6043_v3, %v1914_v4 }
 0x309   : > { %v2050_v55 = vsel %vm1986_vm14, %v5717_v51, 512.0  ;;  %v2051_v48 = vsel %vm1987_vm15, %v5719_v50, 512.0  ;;  %vm1989_vm3 = vcmp.eq.f32.partialorder %v6064_v19, %v1914_v4  ;;  %v2052_v40 = vsel %vm1988_vm2, %v5721_v36, 512.0 }
 0x30a   : > { %v1919_v17 = vpop.xlane.xlu0 %1918  ;;  %v2115_v8 = vmin.f32 %v2114_v63, %v2049_v12  ;;  %v2118_v6 = vmin.f32 %v2050_v55, %v2051_v48  ;;  %v2053_v53 = vsel %vm1989_vm3, %v5726_v42, 512.0 }
 0x30b   : > { %vm1990_vm4 = vcmp.eq.f32.partialorder %v6051_v20, %v1919_v17  ;;  %vm1991_vm1 = vcmp.eq.f32.partialorder %v6057_v2, %v1919_v17  ;;  %vm1992_vm5 = vcmp.eq.f32.partialorder %v6077_v25, %v1919_v17  ;;  %vm1993_vm6 = vcmp.eq.f32.partialorder %v6088_v37, %v1919_v17 }
 0x30c   : > { %2116 = vmin.xlane.f32.xlu0 %v2115_v8  ;;  %v2119_v44 = vmin.f32 %v2118_v6, %v2052_v40  ;;  %v2054_v54 = vsel %vm1990_vm4, %v5717_v51, 512.0  ;;  %v2055_v59 = vsel %vm1991_vm1, %v5719_v50, 512.0  ;;  %v2056_v12 = vsel %vm1992_vm5, %v5721_v36, 512.0 }
 0x30d   : > { %v2123_v4 = vmin.f32 %v2054_v54, %v2055_v59  ;;  %v2057_v19 = vsel %vm1993_vm6, %v5726_v42, 512.0 }
 0x30e   : > { %v2120_v63 = vmin.f32 %v2119_v44, %v2053_v53 }
 0x30f   : > { %v1924_v55 = vpop.xlane.xlu1 %1923  ;;  %v2124_v48 = vmin.f32 %v2123_v4, %v2056_v12 }
 0x310   : > { %2121 = vmin.xlane.f32.xlu1 %v2120_v63  ;;  %vm1994_vm9 = vcmp.eq.f32.partialorder %v6096_v13, %v1924_v55  ;;  %vm1995_vm10 = vcmp.eq.f32.partialorder %v6102_v47, %v1924_v55  ;;  %vm1996_vm13 = vcmp.eq.f32.partialorder %v6119_v16, %v1924_v55  ;;  %vm1997_vm14 = vcmp.eq.f32.partialorder %v6140_v15, %v1924_v55 }
 0x311   : > { %v2125_v8 = vmin.f32 %v2124_v48, %v2057_v19  ;;  %v2058_v6 = vsel %vm1994_vm9, %v5717_v51, 512.0  ;;  %v2059_v17 = vsel %vm1995_vm10, %v5719_v50, 512.0  ;;  %v2060_v54 = vsel %vm1996_vm13, %v5721_v36, 512.0 }
 0x312   : > { %v1929_v40 = vpop.xlane.xlu0 %1928  ;;  %v2128_v44 = vmin.f32 %v2058_v6, %v2059_v17  ;;  %v2061_v4 = vsel %vm1997_vm14, %v5726_v42, 512.0 }
 0x313   : > { %2126 = vmin.xlane.f32.xlu0 %v2125_v8  ;;  %vm1998_vm15 = vcmp.eq.f32.partialorder %v6127_v24, %v1929_v40  ;;  %vm1999_vm2 = vcmp.eq.f32.partialorder %v6133_v43, %v1929_v40  ;;  %vm2000_vm3 = vcmp.eq.f32.partialorder %v6153_v30, %v1929_v40  ;;  %vm2001_vm4 = vcmp.eq.f32.partialorder %v6164_v9, %v1929_v40 }
 0x314   : > { %v2129_v59 = vmin.f32 %v2128_v44, %v2060_v54  ;;  %v2062_v19 = vsel %vm1998_vm15, %v5717_v51, 512.0  ;;  %v2063_v53 = vsel %vm1999_vm2, %v5719_v50, 512.0  ;;  %v2064_v55 = vsel %vm2000_vm3, %v5721_v36, 512.0 }
 0x315   : > { %v2133_v63 = vmin.f32 %v2062_v19, %v2063_v53  ;;  %v2065_v6 = vsel %vm2001_vm4, %v5726_v42, 512.0 }
 0x316   : > { %v2130_v12 = vmin.f32 %v2129_v59, %v2061_v4  ;;  %v9999_v59 = vld [vmem:[#allocation13_spill] sm:$0xff]  ;;  %v10000_v4 = vld [vmem:[#allocation10_spill] sm:$0xff] }
 0x317   : > { %v1934_v48 = vpop.xlane.xlu1 %1933  ;;  %v2134_v8 = vmin.f32 %v2133_v63, %v2064_v55  ;;  %v10001_v63 = vld [vmem:[#allocation12_spill] sm:$0xff] }
 0x318   : > { %2131 = vmin.xlane.f32.xlu1 %v2130_v12  ;;  %vm2002_vm1 = vcmp.eq.f32.partialorder %v6172_v22, %v1934_v48  ;;  %vm2003_vm5 = vcmp.eq.f32.partialorder %v6178_v21, %v1934_v48  ;;  %vm2004_vm6 = vcmp.eq.f32.partialorder %v6195_v33, %v1934_v48  ;;  %vm2005_vm9 = vcmp.eq.f32.partialorder %v9999_v59, %v1934_v48  ;;  %v10002_v12 = vld [vmem:[#allocation15_spill] sm:$0xff] }
 0x319   : > { %v2135_v17 = vmin.f32 %v2134_v8, %v2065_v6  ;;  %v2066_v44 = vsel %vm2002_vm1, %v5717_v51, 512.0  ;;  %v2067_v40 = vsel %vm2003_vm5, %v5719_v50, 512.0  ;;  %v2068_v53 = vsel %vm2004_vm6, %v5721_v36, 512.0  ;;  %v10003_v21 = vld [vmem:[#allocation47_spill] sm:$0xff] }
 0x31a   : > { %v1939_v54 = vpop.xlane.xlu0 %1938  ;;  %v2138_v19 = vmin.f32 %v2066_v44, %v2067_v40  ;;  %v2069_v33 = vsel %vm2005_vm9, %v5726_v42, 512.0  ;;  %v10053_v22 = vld [vmem:[#allocation43_spill] sm:$0xff] }
 0x31b   : > { %2136 = vmin.xlane.f32.xlu0 %v2135_v17  ;;  %vm2006_vm10 = vcmp.eq.f32.partialorder %v10000_v4, %v1939_v54  ;;  %vm2007_vm13 = vcmp.eq.f32.partialorder %v10001_v63, %v1939_v54  ;;  %vm2008_vm14 = vcmp.eq.f32.partialorder %v10002_v12, %v1939_v54  ;;  %vm2009_vm15 = vcmp.eq.f32.partialorder %v10003_v21, %v1939_v54  ;;  %v10004_v4 = vld [vmem:[#allocation14_spill] sm:$0xff] }
 0x31c   : > { %v2139_v55 = vmin.f32 %v2138_v19, %v2068_v53  ;;  %v2070_v8 = vsel %vm2006_vm10, %v5717_v51, 512.0  ;;  %v2071_v6 = vsel %vm2007_vm13, %v5719_v50, 512.0  ;;  %v2072_v17 = vsel %vm2008_vm14, %v5721_v36, 512.0  ;;  %v10005_v19 = vld [vmem:[#allocation16_spill] sm:$0xff] }
 0x31d   : > { %v2143_v48 = vmin.f32 %v2070_v8, %v2071_v6  ;;  %v2073_v63 = vsel %vm2009_vm15, %v5726_v42, 512.0 }
 0x31e   : > { %v2140_v44 = vmin.f32 %v2139_v55, %v2069_v33 }
 0x31f   : > { %v1944_v40 = vpop.xlane.xlu1 %1943  ;;  %v2144_v59 = vmin.f32 %v2143_v48, %v2072_v17 }
 0x320   : > { %2141 = vmin.xlane.f32.xlu1 %v2140_v44  ;;  %vm2010_vm2 = vcmp.eq.f32.partialorder %v10004_v4, %v1944_v40  ;;  %vm2011_vm3 = vcmp.eq.f32.partialorder %v10005_v19, %v1944_v40  ;;  %vm2012_vm4 = vcmp.eq.f32.partialorder %v6271_v26, %v1944_v40  ;;  %vm2013_vm1 = vcmp.eq.f32.partialorder %v6292_v34, %v1944_v40  ;;  %v10006_v44 = vld [vmem:[#allocation50_spill] sm:$0xff] }
 0x321   : > { %v2145_v53 = vmin.f32 %v2144_v59, %v2073_v63  ;;  %v2074_v12 = vsel %vm2010_vm2, %v5717_v51, 512.0  ;;  %v2075_v54 = vsel %vm2011_vm3, %v5719_v50, 512.0  ;;  %v2076_v55 = vsel %vm2012_vm4, %v5721_v36, 512.0 }
 0x322   : > { %v1949_v8 = vpop.xlane.xlu0 %1948  ;;  %v2148_v33 = vmin.f32 %v2074_v12, %v2075_v54  ;;  %v2077_v48 = vsel %vm2013_vm1, %v5726_v42, 512.0 }
 0x323   : > { %2146 = vmin.xlane.f32.xlu0 %v2145_v53  ;;  %vm2014_vm5 = vcmp.eq.f32.partialorder %v6279_v56, %v1949_v8  ;;  %vm2015_vm6 = vcmp.eq.f32.partialorder %v6285_v1, %v1949_v8  ;;  %vm2016_vm9 = vcmp.eq.f32.partialorder %v6305_v52, %v1949_v8  ;;  %vm2017_vm10 = vcmp.eq.f32.partialorder %v10006_v44, %v1949_v8  ;;  %v10007_v1 = vld [vmem:[#allocation51_spill] sm:$0xff] }
 0x324   : > { %v2149_v6 = vmin.f32 %v2148_v33, %v2076_v55  ;;  %v2078_v59 = vsel %vm2014_vm5, %v5717_v51, 512.0  ;;  %v2079_v63 = vsel %vm2015_vm6, %v5719_v50, 512.0  ;;  %v2080_v40 = vsel %vm2016_vm9, %v5721_v36, 512.0  ;;  %v10008_v33 = vld [vmem:[#allocation52_spill] sm:$0xff] }
 0x325   : > { %v2153_v17 = vmin.f32 %v2078_v59, %v2079_v63  ;;  %v2081_v34 = vsel %vm2017_vm10, %v5726_v42, 512.0 }
 0x326   : > { %v2150_v12 = vmin.f32 %v2149_v6, %v2077_v48  ;;  %v6604_v48 = vld [vmem:[%s9544_s8] ss:$0 sm:$0xff] }
 0x327   : > { %v2154_v54 = vmin.f32 %v2153_v17, %v2080_v40  ;;  %10009 = vst [vmem:[#allocation75_spill] sm:$0xff] %v6604_v48  ;;  %v10010_v17 = vld [vmem:[#allocation55_spill] sm:$0xff] }
 0x328   : > { %2151 = vmin.xlane.f32.xlu1 %v2150_v12  ;;  %v10011_v12 = vld [vmem:[#allocation56_spill] sm:$0xff] }
 0x329   : > { %v1954_v53 = vpop.xlane.xlu1 %1953  ;;  %v2155_v55 = vmin.f32 %v2154_v54, %v2081_v34  ;;  %v10012_v54 = vld [vmem:[#allocation29_spill] sm:$0xff] }
 0x32a   : > { %vm2018_vm13 = vcmp.eq.f32.partialorder %v10007_v1, %v1954_v53  ;;  %vm2019_vm14 = vcmp.eq.f32.partialorder %v10008_v33, %v1954_v53  ;;  %vm2020_vm15 = vcmp.eq.f32.partialorder %v6339_v58, %v1954_v53  ;;  %vm2021_vm2 = vcmp.eq.f32.partialorder %v6364_v14, %v1954_v53  ;;  %v10013_v33 = vld [vmem:[#allocation60_spill] sm:$0xff] }
 0x32b   : > { %v2082_v52 = vsel %vm2018_vm13, %v5717_v51, 512.0  ;;  %v2083_v8 = vsel %vm2019_vm14, %v5719_v50, 512.0  ;;  %2156 = vmin.xlane.f32.xlu0 %v2155_v55  ;;  %v2084_v63 = vsel %vm2020_vm15, %v5721_v36, 512.0  ;;  %v4144_v58 = vadd.f32 %v6604_v48, %v6492_v5 }
 0x32c   : > { %v1959_v59 = vpop.xlane.xlu0 %1958  ;;  %v2158_v6 = vmin.f32 %v2082_v52, %v2083_v8  ;;  %v2085_v52 = vsel %vm2021_vm2, %v5726_v42, 512.0 }
 0x32d   : > { %vm2022_vm3 = vcmp.eq.f32.partialorder %v10010_v17, %v1959_v59  ;;  %vm2023_vm4 = vcmp.eq.f32.partialorder %v10011_v12, %v1959_v59  ;;  %vm2024_vm1 = vcmp.eq.f32.partialorder %v6373_v61, %v1959_v59  ;;  %vm2025_vm5 = vcmp.eq.f32.partialorder %v10012_v54, %v1959_v59 }
 0x32e   : > { %v2159_v34 = vmin.f32 %v2158_v6, %v2084_v63  ;;  %v2086_v40 = vsel %vm2022_vm3, %v5717_v51, 512.0  ;;  %v2087_v53 = vsel %vm2023_vm4, %v5719_v50, 512.0  ;;  %v2088_v17 = vsel %vm2024_vm1, %v5721_v36, 512.0  ;;  %v10014_v6 = vld [vmem:[#allocation62_spill] sm:$0xff] }
 0x32f   : > { %v2163_v55 = vmin.f32 %v2086_v40, %v2087_v53  ;;  %v2089_v61 = vsel %vm2025_vm5, %v5726_v42, 512.0  ;;  %vm4398_vm3 = vcmask 257024  }
 0x330   : > { %v1964_v8 = vpop.xlane.xlu1 %1963  ;;  %v2160_v14 = vmin.f32 %v2159_v34, %v2085_v52 }
 0x331   : > { %v2164_v12 = vmin.f32 %v2163_v55, %v2088_v17  ;;  %vm2026_vm6 = vcmp.eq.f32.partialorder %v10013_v33, %v1964_v8  ;;  %vm2027_vm9 = vcmp.eq.f32.partialorder %v10014_v6, %v1964_v8  ;;  %vm2028_vm10 = vcmp.eq.f32.partialorder %v6409_v29, %v1964_v8  ;;  %v10036_v33 = vld [vmem:[#allocation36_spill] sm:$0xff] }
 0x332   : > { %2161 = vmin.xlane.f32.xlu1 %v2160_v14  ;;  %v2090_v59 = vsel %vm2026_vm6, %v5717_v51, 512.0  ;;  %v2091_v34 = vsel %vm2027_vm9, %v5719_v50, 512.0  ;;  %vm2029_vm13 = vcmp.eq.f32.partialorder %v6437_v45, %v1964_v8  ;;  %v2092_v53 = vsel %vm2028_vm10, %v5721_v36, 512.0  ;;  %v10031_v45 = vld [vmem:[#allocation35_spill] sm:$0xff] }
 0x333   : > { %v1969_v63 = vpop.xlane.xlu0 %1968  ;;  %v2165_v40 = vmin.f32 %v2164_v12, %v2089_v61  ;;  %v2168_v5 = vmin.f32 %v2090_v59, %v2091_v34  ;;  %v2093_v12 = vsel %vm2029_vm13, %v5726_v42, 512.0 }
 0x334   : > { %vm2030_vm14 = vcmp.eq.f32.partialorder %v6427_v46, %v1969_v63  ;;  %v4241_v17 = vpop.permute.xlu1 %4240  ;;  %vm2031_vm15 = vcmp.eq.f32.partialorder %v6432_v11, %v1969_v63  ;;  %vm2032_vm2 = vcmp.eq.f32.partialorder %v6443_v39, %v1969_v63  ;;  %vm2033_vm4 = vcmp.eq.f32.partialorder %v6475_v10, %v1969_v63  ;;  %v6642_v39 = vpop.f32.mrb[34].mxu0 }
 0x335   : > { %v2094_v14 = vsel %vm2030_vm14, %v5717_v51, 512.0  ;;  %2166 = vmin.xlane.f32.xlu0 %v2165_v40  ;;  %v4318_v52 = vmul.f32 %v4241_v17, %v4144_v58  ;;  %v2169_v55 = vmin.f32 %v2168_v5, %v2092_v53  ;;  %v2095_v61 = vsel %vm2031_vm15, %v5719_v50, 512.0  ;;  %v4224_v53 = vld [vmem:[%s6487_s21 + $0x10] sm:$0xff]  ;;  %10015 = vst [vmem:[#allocation76_spill] sm:$0xff] %v6642_v39  ;;  %v6644_v63 = vpop.f32.mrb[35].mxu0  ;;  %v10040_v39 = vld [vmem:[#allocation38_spill] sm:$0xff] }
 0x336   : > { %v2173_v8 = vmin.f32 %v2094_v14, %v2095_v61  ;;  %v2096_v34 = vsel %vm2032_vm2, %v5721_v36, 512.0  ;;  %v2097_v5 = vsel %vm2033_vm4, %v5726_v42, 512.0  ;;  %10016 = vst [vmem:[#allocation77_spill] sm:$0xff] %v6644_v63  ;;  %v4225_v14 = vld [vmem:[%s6487_s21 + $0x18] sm:$0xff]  ;;  %vm10032_vm14 = vcmp.eq.f32.partialorder %v5721_v36, %v10031_v45 }
 0x337   : > { %v4748_v59 = vpack.c.bf16 %v4318_v52, %v4318_v52  ;;  %v2170_v58 = vmin.f32 %v2169_v55, %v2093_v12  ;;  %v4223_v52 = vld [vmem:[%s6487_s21 + $0x8] sm:$0xff]  ;;  %v4008_v55 = vld [vmem:[%s5707_s27 + $0x30] sm:$0xff]  ;;  %v4009_v61 = vld [vmem:[%s5707_s27 + $0x38] sm:$0xff]  ;;  %v6726_v29 = vsel %vm10032_vm14, 1.0, %v9972_v27  ;;  %vm10035_vm4 = vcmp.eq.f32.partialorder %v5726_v42, %v10031_v45 }
 0x338   : > { %v2174_v40 = vmin.f32 %v2173_v8, %v2096_v34  ;;  %4865 = vmatprep.mubr.msk.f32.mxu0 %vm744_vm0, %v4008_v55  ;;  %v10017_v12 = vld [vmem:[#allocation17_spill] sm:$0xff]  ;;  %v1764_v8 = vsel %vm1700_vm7, 1.0, %v9972_v27  ;;  %v6664_v34 = vsel %vm1704_vm11, 1.0, %v9972_v27  ;;  %v6744_v6 = vsel %vm10035_vm4, 1.0, %v9972_v27 }
 0x339   : > { %4399 = vst.msk [vmem:[%s6633_s11] sm:$0xf] %vm4398_vm3, %v4748_v59  ;;  %2171 = vmin.xlane.f32.xlu1 %v2170_v58  ;;  %4866 = vmatmul.mubr.msk.f32.gmra.mrb[38].mxu0 %vm744_vm0, %v4009_v61  ;;  %v1765_v59 = vsel %vm1701_vm8, 1.0, %v9972_v27  ;;  %v10018_v58 = vld [vmem:[#allocation22_spill] sm:$0xff]  ;;  %vm10019_vm7 = vcmp.eq.f32.partialorder %v5717_v51, %v10017_v12  ;;  %vm10022_vm11 = vcmp.eq.f32.partialorder %v5719_v50, %v10017_v12 }
 0x33a   : > { %v2175_v17 = vmin.f32 %v2174_v40, %v2097_v5  ;;  %v1769_v40 = vsel %vm1705_vm12, 1.0, %v9972_v27  ;;  %v1762_v5 = vsel %vm10019_vm7, 1.0, %v9972_v27  ;;  %vm10023_vm12 = vcmp.eq.f32.partialorder %v5717_v51, %v10018_v58  ;;  %v10026_v12 = vld [vmem:[#allocation34_spill] sm:$0xff] }
 0x33b   : > { %vm10024_vm1 = vcmp.eq.f32.partialorder %v5719_v50, %v10018_v58  ;;  %vm10027_vm6 = vcmp.eq.f32.partialorder %v5721_v36, %v10026_v12  ;;  %vm10030_vm13 = vcmp.eq.f32.partialorder %v5726_v42, %v10026_v12  ;;  %vm10033_vm15 = vcmp.eq.f32.partialorder %v5717_v51, %v10026_v12 }
 0x33c   : > { %2176 = vmin.xlane.f32.xlu0 %v2175_v17  ;;  %v10020_v17 = vld [vmem:[#allocation27_spill] sm:$0xff]  ;;  %v1767_v55 = vsel %vm10024_vm1, 1.0, %v9972_v27  ;;  %v6702_v10 = vsel %vm10027_vm6, 1.0, %v9972_v27  ;;  %v6720_v46 = vsel %vm10030_vm13, 1.0, %v9972_v27  ;;  %v6732_v54 = vsel %vm10033_vm15, 1.0, %v9972_v27 }
 0x33d   : > { %vm10021_vm8 = vcmp.eq.f32.partialorder %v5721_v36, %v10020_v17  ;;  %vm10025_vm5 = vcmp.eq.f32.partialorder %v5726_v42, %v10020_v17  ;;  %vm10028_vm9 = vcmp.eq.f32.partialorder %v5717_v51, %v10020_v17  ;;  %vm10029_vm10 = vcmp.eq.f32.partialorder %v5719_v50, %v10020_v17 }
 0x33e   : > { %v6696_v61 = vsel %vm10025_vm5, 1.0, %v9972_v27  ;;  %v6708_v11 = vsel %vm10028_vm9, 1.0, %v9972_v27  ;;  %v6714_v58 = vsel %vm10029_vm10, 1.0, %v9972_v27  ;;  %vm10034_vm2 = vcmp.eq.f32.partialorder %v5719_v50, %v10026_v12 }
 0x33f   : > { %v6738_v17 = vsel %vm10034_vm2, 1.0, %v9972_v27  ;;  %vm10037_vm7 = vcmp.eq.f32.partialorder %v5721_v36, %v10036_v33  ;;  %vm10043_vm1 = vcmp.eq.f32.partialorder %v5719_v50, %v10031_v45  ;;  %vm10044_vm5 = vcmp.eq.f32.partialorder %v5717_v51, %v10036_v33 }
 0x340   : > { %v6750_v63 = vsel %vm10037_vm7, 1.0, %v9972_v27  ;;  %v6774_v56 = vsel %vm10043_vm1, 1.0, %v9972_v27  ;;  %v6780_v26 = vsel %vm10044_vm5, 1.0, %v9972_v27  ;;  %vm10045_vm6 = vcmp.eq.f32.partialorder %v5719_v50, %v10036_v33 }
 0x341   : > { %v6786_v48 = vsel %vm10045_vm6, 1.0, %v9972_v27  ;;  %vm10046_vm9 = vcmp.eq.f32.partialorder %v5726_v42, %v10040_v39  ;;  %vm10052_vm14 = vcmp.eq.f32.partialorder %v5717_v51, %v10040_v39  ;;  %vm10054_vm15 = vcmp.eq.f32.partialorder %v5721_v36, %v10053_v22 }
 0x342   : > { %v6792_v19 = vsel %vm10046_vm9, 1.0, %v9972_v27  ;;  %v6816_v9 = vsel %vm10054_vm15, 1.0, %v9972_v27  ;;  %vm10056_vm2 = vcmp.eq.f32.partialorder %v5719_v50, %v10040_v39  ;;  %vm10069_vm1 = vcmp.eq.f32.partialorder %v5717_v51, %v10053_v22 }
 0x343   : > { %10055 = vst [vmem:[#allocation34_spill] sm:$0xff] %v6816_v9 }
 0x34a   : > { %4250 = vperm.xlu1 %4954, %v4224_v53   ;;  %v6678_v53 = vsel %vm10021_vm8, 1.0, %v9972_v27  ;;  %vm10038_vm8 = vcmp.eq.f32.partialorder %v5726_v42, %v10036_v33  ;;  %v6810_v33 = vsel %vm10052_vm14, 1.0, %v9972_v27 }
 0x34b   : > { %v6756_v1 = vsel %vm10038_vm8, 1.0, %v9972_v27  ;;  %vm10062_vm8 = vcmp.eq.f32.partialorder %v5726_v42, %v10053_v22 }
 0x34c   : > { %v6840_v9 = vsel %vm10062_vm8, 1.0, %v9972_v27 }
 0x34e   : > { %4255 = vperm.xlu1 %4954, %v4225_v14   ;;  %v1763_v14 = vsel %vm10022_vm11, 1.0, %v9972_v27  ;;  %vm10039_vm11 = vcmp.eq.f32.partialorder %v5717_v51, %v10031_v45  ;;  %v10047_v45 = vld [vmem:[#allocation39_spill] sm:$0xff] }
 0x34f   : > { %v6762_v12 = vsel %vm10039_vm11, 1.0, %v9972_v27  ;;  %vm10048_vm10 = vcmp.eq.f32.partialorder %v5721_v36, %v10047_v45  ;;  %vm10050_vm13 = vcmp.eq.f32.partialorder %v5726_v42, %v10047_v45  ;;  %vm10058_vm4 = vcmp.eq.f32.partialorder %v5717_v51, %v10047_v45  ;;  %10063 = vst [vmem:[#allocation39_spill] sm:$0xff] %v6840_v9  ;;  %v10073_v9 = vld [vmem:[#allocation25_spill] sm:$0xff] }
 0x350   : > { %v6798_v4 = vsel %vm10048_vm10, 1.0, %v9972_v27  ;;  %v6804_v21 = vsel %vm10050_vm13, 1.0, %v9972_v27  ;;  %vm10060_vm7 = vcmp.eq.f32.partialorder %v5719_v50, %v10047_v45  ;;  %vm10077_vm13 = vcmp.eq.f32.partialorder %v5719_v50, %v10053_v22 }
 0x351   : > { %10049 = vst [vmem:[#allocation22_spill] sm:$0xff] %v6798_v4  ;;  %10051 = vst [vmem:[#allocation27_spill] sm:$0xff] %v6804_v21  ;;  %v6822_v4 = vsel %vm10056_vm2, 1.0, %v9972_v27  ;;  %v6834_v30 = vsel %vm10060_vm7, 1.0, %v9972_v27  ;;  %v6884_v21 = vsel %vm10077_vm13, 1.0, %v9972_v27 }
 0x352   : > { %4245 = vperm.xlu0 %4953, %v4223_v52   ;;  %v1766_v52 = vsel %vm10023_vm12, 1.0, %v9972_v27  ;;  %vm10041_vm12 = vcmp.eq.f32.partialorder %v5721_v36, %v10040_v39  ;;  %10057 = vst [vmem:[#allocation35_spill] sm:$0xff] %v6822_v4  ;;  %10061 = vst [vmem:[#allocation38_spill] sm:$0xff] %v6834_v30  ;;  %v10064_v39 = vld [vmem:[#allocation45_spill] sm:$0xff]  ;;  %v6858_v30 = vsel %vm10069_vm1, 1.0, %v9972_v27 }
 0x353   : > { %v6768_v44 = vsel %vm10041_vm12, 1.0, %v9972_v27  ;;  %vm10065_vm11 = vcmp.eq.f32.partialorder %v5721_v36, %v10064_v39  ;;  %vm10067_vm12 = vcmp.eq.f32.partialorder %v5726_v42, %v10064_v39  ;;  %10070 = vst [vmem:[#allocation78_spill] sm:$0xff] %v6858_v30  ;;  %vm10078_vm14 = vcmp.eq.f32.partialorder %v5717_v51, %v10064_v39 }
 0x354   : > { %10042 = vst [vmem:[#allocation17_spill] sm:$0xff] %v6768_v44  ;;  %v6828_v44 = vsel %vm10058_vm4, 1.0, %v9972_v27  ;;  %v6846_v4 = vsel %vm10065_vm11, 1.0, %v9972_v27  ;;  %vm10085_vm2 = vcmp.eq.f32.partialorder %v5719_v50, %v10064_v39  ;;  %v10086_v39 = vld [vmem:[#allocation26_spill] sm:$0xff] }
 0x355   : > { %10059 = vst [vmem:[#allocation36_spill] sm:$0xff] %v6828_v44  ;;  %10066 = vst [vmem:[#allocation43_spill] sm:$0xff] %v6846_v4  ;;  %v6852_v44 = vsel %vm10067_vm12, 1.0, %v9972_v27  ;;  %v6907_v22 = vsel %vm10085_vm2, 1.0, %v9972_v27 }
 0x356   : > { %10068 = vst [vmem:[#allocation45_spill] sm:$0xff] %v6852_v44 }
 0x38d   : > { %v2102_v45 = vpop.xlane.xlu1 %2101 }
 0x38e   : > { %vm2178_vm5 = vcmp.eq.f32.partialorder %v5717_v51, %v2102_v45  ;;  %vm2179_vm6 = vcmp.eq.f32.partialorder %v5719_v50, %v2102_v45  ;;  %vm2180_vm9 = vcmp.eq.f32.partialorder %v5721_v36, %v2102_v45  ;;  %vm2181_vm10 = vcmp.eq.f32.partialorder %v5726_v42, %v2102_v45  ;;  %v10089_v45 = vld [vmem:[#allocation33_spill] sm:$0xff] }
 0x38f   : > { %v6866_v4 = vsel %vm2181_vm10, 1.0, %v1765_v59  ;;  %v6869_v44 = vsel %vm2178_vm5, 1e+30, %v5869_v49  ;;  %v6872_v15 = vsel %vm2179_vm6, 1e+30, %v10073_v9  ;;  %v6874_v43 = vsel %vm2178_vm5, 1.0, %v1762_v5 }
 0x390   : > { %10071 = vst [vmem:[#allocation79_spill] sm:$0xff] %v6866_v4  ;;  %10072 = vst [vmem:[#allocation80_spill] sm:$0xff] %v6869_v44  ;;  %v2370_v30 = vmin.f32 %v6869_v44, %v6872_v15  ;;  %v6878_v24 = vsel %vm2179_vm6, 1.0, %v1763_v14  ;;  %v6890_v49 = vsel %vm10078_vm14, 1.0, %v9972_v27  ;;  %v10079_v9 = vld [vmem:[#allocation46_spill] sm:$0xff]  ;;  %v2107_v5 = vpop.xlane.xlu0 %2106  ;;  %v10082_v14 = vld [vmem:[#allocation24_spill] sm:$0xff] }
 0x391   : > { %10074 = vst [vmem:[#allocation25_spill] sm:$0xff] %v6872_v15  ;;  %10075 = vst [vmem:[#allocation81_spill] sm:$0xff] %v6874_v43  ;;  %vm10080_vm15 = vcmp.eq.f32.partialorder %v5721_v36, %v10079_v9  ;;  %v6899_v4 = vsel %vm2180_vm9, 1e+30, %v10082_v14  ;;  %vm2182_vm4 = vcmp.eq.f32.partialorder %v5717_v51, %v2107_v5  ;;  %vm2183_vm7 = vcmp.eq.f32.partialorder %v5719_v50, %v2107_v5 }
 0x392   : > { %10076 = vst [vmem:[#allocation82_spill] sm:$0xff] %v6878_v24  ;;  %v6896_v59 = vsel %vm10080_vm15, 1.0, %v9972_v27  ;;  %10083 = vst [vmem:[#allocation24_spill] sm:$0xff] %v6899_v4  ;;  %v6901_v24 = vsel %vm2180_vm9, 1.0, %v1764_v8  ;;  %v2371_v43 = vmin.f32 %v2370_v30, %v6899_v4  ;;  %vm2184_vm8 = vcmp.eq.f32.partialorder %v5721_v36, %v2107_v5 }
 0x393   : > { %10081 = vst [vmem:[#allocation46_spill] sm:$0xff] %v6896_v59  ;;  %10084 = vst [vmem:[#allocation83_spill] sm:$0xff] %v6901_v24  ;;  %v6916_v14 = vsel %vm2181_vm10, 1e+30, %v5906_v38  ;;  %vm2185_vm11 = vcmp.eq.f32.partialorder %v5726_v42, %v2107_v5  ;;  %v6920_v8 = vsel %vm2182_vm4, 1e+30, %v5900_v23  ;;  %vm10087_vm12 = vcmp.eq.f32.partialorder %v5726_v42, %v10079_v9 }
 0x394   : > { %v6923_v24 = vsel %vm2183_vm7, 1e+30, %v10086_v39  ;;  %v6929_v30 = vsel %vm10087_vm12, 1.0, %v9972_v27  ;;  %v2372_v4 = vmin.f32 %v2371_v43, %v6916_v14  ;;  %v6932_v15 = vsel %vm2185_vm11, 1.0, %v1769_v40  ;;  %v10094_v59 = vld [vmem:[#allocation48_spill] sm:$0xff] }
 0x395   : > { %10088 = vst [vmem:[#allocation26_spill] sm:$0xff] %v6932_v15  ;;  %v2375_v38 = vmin.f32 %v6920_v8, %v6923_v24  ;;  %v6937_v5 = vsel %vm2184_vm8, 1e+30, %v10089_v45  ;;  %v6939_v23 = vsel %vm2182_vm4, 1.0, %v1766_v52  ;;  %v6941_v39 = vsel %vm2183_vm7, 1.0, %v1767_v55  ;;  %v2112_v45 = vpop.xlane.xlu1 %2111 }
 0x396   : > { %10090 = vst [vmem:[#allocation33_spill] sm:$0xff] %v6937_v5  ;;  %10091 = vst [vmem:[#allocation84_spill] sm:$0xff] %v6939_v23  ;;  %v6944_v44 = vsel %vm2184_vm8, 1.0, %v6664_v34  ;;  %vm10095_vm1 = vcmp.eq.f32.partialorder %v5721_v36, %v10094_v59  ;;  %vm10096_vm5 = vcmp.eq.f32.partialorder %v5726_v42, %v10094_v59  ;;  %2373 = vmin.xlane.f32.xlu1 %v2372_v4  ;;  %v6959_v52 = vsel %vm2185_vm11, 1e+30, %v5936_v62 }
 0x397   : > { %10092 = vst [vmem:[#allocation85_spill] sm:$0xff] %v6941_v39  ;;  %10093 = vst [vmem:[#allocation86_spill] sm:$0xff] %v6944_v44  ;;  %v6950_v43 = vsel %vm10095_vm1, 1.0, %v9972_v27  ;;  %v6956_v40 = vsel %vm10096_vm5, 1.0, %v9972_v27  ;;  %v2376_v34 = vmin.f32 %v2375_v38, %v6937_v5  ;;  %vm2186_vm6 = vcmp.eq.f32.partialorder %v5717_v51, %v2112_v45  ;;  %v10158_v39 = vld [vmem:[#allocation13_spill] sm:$0xff] }
 0x398   : > { %vm2187_vm9 = vcmp.eq.f32.partialorder %v5719_v50, %v2112_v45  ;;  %vm2188_vm10 = vcmp.eq.f32.partialorder %v5721_v36, %v2112_v45  ;;  %vm2189_vm13 = vcmp.eq.f32.partialorder %v5726_v42, %v2112_v45  ;;  %v6973_v62 = vsel %vm2186_vm6, 1e+30, %v5944_v35 }
 0x399   : > { %v2377_v55 = vmin.f32 %v2376_v34, %v6959_v52  ;;  %v6970_v15 = vsel %vm2189_vm13, 1.0, %v6696_v61  ;;  %v6976_v4 = vsel %vm2187_vm9, 1e+30, %v5950_v7  ;;  %v6981_v44 = vsel %vm2186_vm6, 1.0, %v6708_v11  ;;  %v2117_v7 = vpop.xlane.xlu0 %2116 }
 0x39a   : > { %10097 = vst [vmem:[#allocation48_spill] sm:$0xff] %v6970_v15  ;;  %v2380_v38 = vmin.f32 %v6973_v62, %v6976_v4  ;;  %10098 = vst [vmem:[#allocation87_spill] sm:$0xff] %v6981_v44  ;;  %vm10099_vm14 = vcmp.eq.f32.partialorder %v5717_v51, %v10079_v9  ;;  %vm10100_vm15 = vcmp.eq.f32.partialorder %v5719_v50, %v10079_v9  ;;  %v6996_v61 = vsel %vm2188_vm10, 1e+30, %v5967_v28 }
 0x39b   : > { %v6987_v34 = vsel %vm10099_vm14, 1.0, %v9972_v27  ;;  %v6993_v35 = vsel %vm10100_vm15, 1.0, %v9972_v27  ;;  %2378 = vmin.xlane.f32.xlu0 %v2377_v55  ;;  %v6999_v11 = vsel %vm2187_vm9, 1.0, %v6714_v58  ;;  %v7002_v15 = vsel %vm2188_vm10, 1.0, %v6678_v53 }
 0x39c   : > { %10101 = vst [vmem:[#allocation88_spill] sm:$0xff] %v6999_v11  ;;  %10102 = vst [vmem:[#allocation89_spill] sm:$0xff] %v7002_v15  ;;  %vm10103_vm2 = vcmp.eq.f32.partialorder %v5717_v51, %v10094_v59  ;;  %vm2190_vm4 = vcmp.eq.f32.partialorder %v5717_v51, %v2117_v7  ;;  %vm2191_vm7 = vcmp.eq.f32.partialorder %v5719_v50, %v2117_v7  ;;  %v7017_v28 = vsel %vm2189_vm13, 1e+30, %v5982_v57 }
 0x39d   : > { %v7008_v44 = vsel %vm10103_vm2, 1.0, %v9972_v27  ;;  %v2381_v9 = vmin.f32 %v2380_v38, %v6996_v61  ;;  %vm2192_vm8 = vcmp.eq.f32.partialorder %v5721_v36, %v2117_v7  ;;  %vm2193_vm11 = vcmp.eq.f32.partialorder %v5726_v42, %v2117_v7 }
 0x39e   : > { %v7021_v53 = vsel %vm2190_vm4, 1e+30, %v5976_v31  ;;  %v7024_v58 = vsel %vm2191_vm7, 1e+30, %v5988_v32  ;;  %v7030_v38 = vsel %vm2193_vm11, 1.0, %v6720_v46  ;;  %vm10105_vm12 = vcmp.eq.f32.partialorder %v5719_v50, %v10094_v59  ;;  %v2122_v31 = vpop.xlane.xlu1 %2121 }
 0x39f   : > { %v2382_v55 = vmin.f32 %v2381_v9, %v7017_v28  ;;  %10104 = vst [vmem:[#allocation90_spill] sm:$0xff] %v7030_v38  ;;  %v2385_v45 = vmin.f32 %v7021_v53, %v7024_v58  ;;  %v7038_v57 = vsel %vm10105_vm12, 1.0, %v9972_v27  ;;  %v7041_v32 = vsel %vm2192_vm8, 1e+30, %v6005_v41 }
 0x3a0   : > { %v7044_v9 = vsel %vm2190_vm4, 1.0, %v6732_v54  ;;  %v7047_v15 = vsel %vm2191_vm7, 1.0, %v6738_v17  ;;  %v7050_v46 = vsel %vm2192_vm8, 1.0, %v6702_v10  ;;  %vm2194_vm1 = vcmp.eq.f32.partialorder %v5717_v51, %v2122_v31  ;;  %v2127_v17 = vpop.xlane.xlu0 %2126 }
 0x3a1   : > { %10106 = vst [vmem:[#allocation91_spill] sm:$0xff] %v7044_v9  ;;  %10107 = vst [vmem:[#allocation92_spill] sm:$0xff] %v7047_v15  ;;  %vm2195_vm5 = vcmp.eq.f32.partialorder %v5719_v50, %v2122_v31  ;;  %2383 = vmin.xlane.f32.xlu1 %v2382_v55  ;;  %v2386_v59 = vmin.f32 %v2385_v45, %v7041_v32  ;;  %vm2196_vm6 = vcmp.eq.f32.partialorder %v5721_v36, %v2122_v31  ;;  %v10149_v15 = vld [vmem:[#allocation78_spill] sm:$0xff]  ;;  %v10156_v9 = vld [vmem:[#allocation12_spill] sm:$0xff] }
 0x3a2   : > { %10108 = vst [vmem:[#allocation93_spill] sm:$0xff] %v7050_v46  ;;  %v7059_v41 = vsel %vm2193_vm11, 1e+30, %v6022_v18  ;;  %vm2197_vm9 = vcmp.eq.f32.partialorder %v5726_v42, %v2122_v31  ;;  %v7065_v10 = vsel %vm2194_vm1, 1e+30, %v6014_v60  ;;  %vm2198_vm10 = vcmp.eq.f32.partialorder %v5717_v51, %v2127_v17  ;;  %v10119_v31 = vld [vmem:[#allocation49_spill] sm:$0xff] }
 0x3a3   : > { %v7070_v54 = vsel %vm2195_vm5, 1e+30, %v6030_v0  ;;  %v2387_v55 = vmin.f32 %v2386_v59, %v7059_v41  ;;  %v7076_v18 = vsel %vm2197_vm9, 1.0, %v6744_v6  ;;  %v7081_v7 = vsel %vm2196_vm6, 1e+30, %v6043_v3  ;;  %v10111_v59 = vld [vmem:[#allocation37_spill] sm:$0xff] }
 0x3a4   : > { %10109 = vst [vmem:[#allocation94_spill] sm:$0xff] %v7076_v18  ;;  %v2390_v60 = vmin.f32 %v7065_v10, %v7070_v54  ;;  %vm2199_vm13 = vcmp.eq.f32.partialorder %v5719_v50, %v2127_v17  ;;  %vm2200_vm14 = vcmp.eq.f32.partialorder %v5721_v36, %v2127_v17  ;;  %vm2201_vm15 = vcmp.eq.f32.partialorder %v5726_v42, %v2127_v17 }
 0x3a5   : > { %2388 = vmin.xlane.f32.xlu0 %v2387_v55  ;;  %v7091_v6 = vsel %vm2201_vm15, 1.0, %v6756_v1  ;;  %v7096_v3 = vsel %vm2198_vm10, 1e+30, %v6051_v20  ;;  %v7101_v45 = vsel %vm2199_vm13, 1e+30, %v6057_v2  ;;  %v7118_v20 = vsel %vm2194_vm1, 1.0, %v6762_v12 }
 0x3a6   : > { %v2391_v0 = vmin.f32 %v2390_v60, %v7081_v7  ;;  %10110 = vst [vmem:[#allocation95_spill] sm:$0xff] %v7091_v6  ;;  %v7106_v18 = vsel %vm2197_vm9, 1e+30, %v10111_v59  ;;  %v7111_v1 = vsel %vm2200_vm14, 1e+30, %v6077_v25  ;;  %v2395_v55 = vmin.f32 %v7096_v3, %v7101_v45  ;;  %10112 = vst [vmem:[#allocation37_spill] sm:$0xff] %v7118_v20  ;;  %v2132_v6 = vpop.xlane.xlu1 %2131 }
 0x3a7   : > { %v7124_v60 = vsel %vm2195_vm5, 1.0, %v6774_v56  ;;  %v7129_v25 = vsel %vm2196_vm6, 1.0, %v6726_v29  ;;  %v7134_v59 = vsel %vm2198_vm10, 1.0, %v6780_v26  ;;  %v7137_v12 = vsel %vm2201_vm15, 1e+30, %v6088_v37 }
 0x3a8   : > { %v2392_v2 = vmin.f32 %v2391_v0, %v7106_v18  ;;  %10113 = vst [vmem:[#allocation96_spill] sm:$0xff] %v7124_v60  ;;  %10114 = vst [vmem:[#allocation97_spill] sm:$0xff] %v7129_v25  ;;  %v2396_v0 = vmin.f32 %v2395_v55, %v7111_v1  ;;  %v7143_v56 = vsel %vm2199_vm13, 1.0, %v6786_v48  ;;  %v7148_v29 = vsel %vm2200_vm14, 1.0, %v6750_v63  ;;  %v2137_v55 = vpop.xlane.xlu0 %2136  ;;  %v10134_v60 = vld [vmem:[#allocation36_spill] sm:$0xff] }
 0x3a9   : > { %10115 = vst [vmem:[#allocation98_spill] sm:$0xff] %v7134_v59  ;;  %10116 = vst [vmem:[#allocation99_spill] sm:$0xff] %v7143_v56  ;;  %vm2202_vm2 = vcmp.eq.f32.partialorder %v5717_v51, %v2132_v6  ;;  %vm2203_vm4 = vcmp.eq.f32.partialorder %v5719_v50, %v2132_v6  ;;  %vm2204_vm7 = vcmp.eq.f32.partialorder %v5721_v36, %v2132_v6  ;;  %v10125_v56 = vld [vmem:[#allocation41_spill] sm:$0xff] }
 0x3aa   : > { %10117 = vst [vmem:[#allocation100_spill] sm:$0xff] %v7148_v29  ;;  %2393 = vmin.xlane.f32.xlu1 %v2392_v2  ;;  %vm2205_vm8 = vcmp.eq.f32.partialorder %v5726_v42, %v2132_v6  ;;  %v2397_v37 = vmin.f32 %v2396_v0, %v7137_v12  ;;  %v7161_v48 = vsel %vm2202_vm2, 1e+30, %v6096_v13  ;;  %v7166_v63 = vsel %vm2203_vm4, 1e+30, %v6102_v47  ;;  %v10122_v0 = vld [vmem:[#allocation27_spill] sm:$0xff] }
 0x3ab   : > { %v7158_v26 = vsel %vm2205_vm8, 1.0, %v6792_v19  ;;  %vm10120_vm11 = vcmp.eq.f32.partialorder %v5721_v36, %v10119_v31  ;;  %v7177_v19 = vsel %vm2204_vm7, 1e+30, %v6119_v16  ;;  %v2400_v13 = vmin.f32 %v7161_v48, %v7166_v63 }
 0x3ac   : > { %10118 = vst [vmem:[#allocation101_spill] sm:$0xff] %v7158_v26  ;;  %v7172_v17 = vsel %vm10120_vm11, 1.0, %v9972_v27  ;;  %v7182_v2 = vsel %vm2202_vm2, 1.0, %v6810_v33  ;;  %vm2206_vm12 = vcmp.eq.f32.partialorder %v5717_v51, %v2137_v55  ;;  %vm2207_vm1 = vcmp.eq.f32.partialorder %v5719_v50, %v2137_v55  ;;  %2398 = vmin.xlane.f32.xlu0 %v2397_v37  ;;  %v10124_v26 = vld [vmem:[#allocation40_spill] sm:$0xff] }
 0x3ad   : > { %10121 = vst [vmem:[#allocation49_spill] sm:$0xff] %v7182_v2  ;;  %vm2208_vm5 = vcmp.eq.f32.partialorder %v5721_v36, %v2137_v55  ;;  %vm2209_vm6 = vcmp.eq.f32.partialorder %v5726_v42, %v2137_v55  ;;  %v2401_v47 = vmin.f32 %v2400_v13, %v7177_v19  ;;  %v7193_v29 = vsel %vm2206_vm12, 1e+30, %v10124_v26  ;;  %v10126_v2 = vld [vmem:[#allocation42_spill] sm:$0xff]  ;;  %v10128_v37 = vld [vmem:[#allocation44_spill] sm:$0xff] }
 0x3ae   : > { %v7190_v16 = vsel %vm2209_vm6, 1.0, %v10122_v0  ;;  %v7196_v33 = vsel %vm2207_vm1, 1e+30, %v10125_v56  ;;  %v7201_v59 = vsel %vm2205_vm8, 1e+30, %v10126_v2  ;;  %v10130_v0 = vld [vmem:[#allocation35_spill] sm:$0xff]  ;;  %vm10138_vm9 = vcmp.eq.f32.partialorder %v5726_v42, %v10119_v31 }
 0x3af   : > { %10123 = vst [vmem:[#allocation27_spill] sm:$0xff] %v7190_v16  ;;  %10127 = vst [vmem:[#allocation40_spill] sm:$0xff] %v7201_v59  ;;  %v7206_v25 = vsel %vm2208_vm5, 1e+30, %v10128_v37  ;;  %v2405_v13 = vmin.f32 %v7193_v29, %v7196_v33  ;;  %v7213_v26 = vsel %vm2203_vm4, 1.0, %v10130_v0  ;;  %v2402_v56 = vmin.f32 %v2401_v47, %v7201_v59  ;;  %v10132_v16 = vld [vmem:[#allocation17_spill] sm:$0xff]  ;;  %v2142_v0 = vpop.xlane.xlu1 %2141 }
 0x3b0   : > { %10129 = vst [vmem:[#allocation41_spill] sm:$0xff] %v7206_v25  ;;  %10131 = vst [vmem:[#allocation42_spill] sm:$0xff] %v7213_v26  ;;  %v7219_v2 = vsel %vm2204_vm7, 1.0, %v10132_v16  ;;  %v7222_v20 = vsel %vm2206_vm12, 1.0, %v10134_v60  ;;  %v10136_v37 = vld [vmem:[#allocation38_spill] sm:$0xff]  ;;  %v7231_v46 = vsel %vm10138_vm9, 1.0, %v9972_v27  ;;  %vm2210_vm10 = vcmp.eq.f32.partialorder %v5717_v51, %v2142_v0 }
 0x3b1   : > { %10133 = vst [vmem:[#allocation44_spill] sm:$0xff] %v7219_v2  ;;  %10135 = vst [vmem:[#allocation35_spill] sm:$0xff] %v7222_v20  ;;  %v7225_v38 = vsel %vm2207_vm1, 1.0, %v10136_v37  ;;  %v10139_v26 = vld [vmem:[#allocation9_spill] sm:$0xff]  ;;  %v2406_v6 = vmin.f32 %v2405_v13, %v7206_v25  ;;  %v10140_v16 = vld [vmem:[#allocation22_spill] sm:$0xff]  ;;  %vm2211_vm13 = vcmp.eq.f32.partialorder %v5719_v50, %v2142_v0  ;;  %2403 = vmin.xlane.f32.xlu1 %v2402_v56  ;;  %v2147_v56 = vpop.xlane.xlu0 %2146 }
 0x3b2   : > { %10137 = vst [vmem:[#allocation17_spill] sm:$0xff] %v7225_v38  ;;  %v7234_v47 = vsel %vm2209_vm6, 1e+30, %v10139_v26  ;;  %v7240_v60 = vsel %vm2208_vm5, 1.0, %v10140_v16  ;;  %vm2212_vm14 = vcmp.eq.f32.partialorder %v5721_v36, %v2142_v0  ;;  %vm2213_vm15 = vcmp.eq.f32.partialorder %v5726_v42, %v2142_v0  ;;  %v10142_v26 = vld [vmem:[#allocation39_spill] sm:$0xff]  ;;  %v10145_v16 = vld [vmem:[#allocation8_spill] sm:$0xff] }
 0x3b3   : > { %10141 = vst [vmem:[#allocation36_spill] sm:$0xff] %v7240_v60  ;;  %v2407_v37 = vmin.f32 %v2406_v6, %v7234_v47  ;;  %v7250_v13 = vsel %vm2213_vm15, 1.0, %v10142_v26  ;;  %v10144_v38 = vld [vmem:[#allocation7_spill] sm:$0xff]  ;;  %v7258_v60 = vsel %vm2211_vm13, 1e+30, %v10145_v16  ;;  %v7268_v26 = vsel %vm2210_vm10, 1.0, %v10149_v15 }
 0x3b4   : > { %10143 = vst [vmem:[#allocation38_spill] sm:$0xff] %v7250_v13  ;;  %v7253_v55 = vsel %vm2210_vm10, 1e+30, %v10144_v38  ;;  %10146 = vst [vmem:[#allocation9_spill] sm:$0xff] %v7258_v60  ;;  %v10147_v20 = vld [vmem:[#allocation11_spill] sm:$0xff]  ;;  %vm10151_vm2 = vcmp.eq.f32.partialorder %v5717_v51, %v10119_v31  ;;  %vm2214_vm4 = vcmp.eq.f32.partialorder %v5717_v51, %v2147_v56  ;;  %vm2215_vm7 = vcmp.eq.f32.partialorder %v5719_v50, %v2147_v56  ;;  %v10152_v16 = vld [vmem:[#allocation45_spill] sm:$0xff] }
 0x3b5   : > { %v7263_v2 = vsel %vm2212_vm14, 1e+30, %v10147_v20  ;;  %v2410_v6 = vmin.f32 %v7253_v55, %v7258_v60  ;;  %10150 = vst [vmem:[#allocation39_spill] sm:$0xff] %v7268_v26  ;;  %v7274_v38 = vsel %vm10151_vm2, 1.0, %v9972_v27  ;;  %2408 = vmin.xlane.f32.xlu0 %v2407_v37  ;;  %vm2216_vm8 = vcmp.eq.f32.partialorder %v5721_v36, %v2147_v56  ;;  %v10154_v13 = vld [vmem:[#allocation10_spill] sm:$0xff]  ;;  %v10160_v37 = vld [vmem:[#allocation15_spill] sm:$0xff] }
 0x3b6   : > { %10148 = vst [vmem:[#allocation22_spill] sm:$0xff] %v7263_v2  ;;  %vm2217_vm11 = vcmp.eq.f32.partialorder %v5726_v42, %v2147_v56  ;;  %v7285_v26 = vsel %vm2214_vm4, 1e+30, %v10154_v13  ;;  %v7288_v11 = vsel %vm2215_vm7, 1e+30, %v10156_v9  ;;  %v7305_v13 = vsel %vm2211_vm13, 1.0, %v6884_v21 }
 0x3b7   : > { %v2411_v20 = vmin.f32 %v2410_v6, %v7263_v2  ;;  %v7282_v15 = vsel %vm2217_vm11, 1.0, %v10152_v16  ;;  %10155 = vst [vmem:[#allocation8_spill] sm:$0xff] %v7285_v26  ;;  %10157 = vst [vmem:[#allocation11_spill] sm:$0xff] %v7288_v11  ;;  %v7293_v23 = vsel %vm2213_vm15, 1e+30, %v10158_v39  ;;  %v2415_v6 = vmin.f32 %v7285_v26, %v7288_v11  ;;  %v10163_v16 = vld [vmem:[#allocation34_spill] sm:$0xff]  ;;  %v2152_v2 = vpop.xlane.xlu1 %2151 }
 0x3b8   : > { %10153 = vst [vmem:[#allocation7_spill] sm:$0xff] %v7282_v15  ;;  %10159 = vst [vmem:[#allocation78_spill] sm:$0xff] %v7293_v23  ;;  %v7298_v60 = vsel %vm2216_vm8, 1e+30, %v10160_v37  ;;  %v7311_v39 = vsel %vm2212_vm14, 1.0, %v10163_v16  ;;  %v7314_v15 = vsel %vm2214_vm4, 1.0, %v6890_v49  ;;  %vm10170_vm12 = vcmp.eq.f32.partialorder %v5719_v50, %v10119_v31  ;;  %v2157_v16 = vpop.xlane.xlu0 %2156 }
 0x3b9   : > { %10161 = vst [vmem:[#allocation45_spill] sm:$0xff] %v7298_v60  ;;  %10162 = vst [vmem:[#allocation10_spill] sm:$0xff] %v7305_v13  ;;  %v2412_v9 = vmin.f32 %v2411_v20, %v7293_v23  ;;  %v7317_v37 = vsel %vm2215_vm7, 1.0, %v6907_v22  ;;  %v10167_v11 = vld [vmem:[#allocation47_spill] sm:$0xff]  ;;  %v2416_v21 = vmin.f32 %v2415_v6, %v7298_v60  ;;  %v7332_v49 = vsel %vm10170_vm12, 1.0, %v9972_v27  ;;  %v10172_v0 = vld [vmem:[#allocation14_spill] sm:$0xff] }
 0x3ba   : > { %10164 = vst [vmem:[#allocation12_spill] sm:$0xff] %v7311_v39  ;;  %10165 = vst [vmem:[#allocation13_spill] sm:$0xff] %v7314_v15  ;;  %v7320_v26 = vsel %vm2217_vm11, 1e+30, %v10167_v11  ;;  %v10168_v13 = vld [vmem:[#allocation43_spill] sm:$0xff]  ;;  %vm2218_vm1 = vcmp.eq.f32.partialorder %v5717_v51, %v2152_v2  ;;  %vm2219_vm5 = vcmp.eq.f32.partialorder %v5719_v50, %v2152_v2  ;;  %vm2220_vm6 = vcmp.eq.f32.partialorder %v5721_v36, %v2152_v2  ;;  %v10173_v27 = vld [vmem:[#allocation16_spill] sm:$0xff] }
 0x3bb   : > { %10166 = vst [vmem:[#allocation15_spill] sm:$0xff] %v7317_v37  ;;  %v7326_v20 = vsel %vm2216_vm8, 1.0, %v10168_v13  ;;  %2413 = vmin.xlane.f32.xlu1 %v2412_v9  ;;  %vm2221_vm9 = vcmp.eq.f32.partialorder %v5726_v42, %v2152_v2  ;;  %v2417_v22 = vmin.f32 %v2416_v21, %v7320_v26  ;;  %v7345_v31 = vsel %vm2218_vm1, 1e+30, %v10172_v0  ;;  %v10174_v6 = vld [vmem:[#allocation75_spill] sm:$0xff]  ;;  %v10175_v13 = vld [vmem:[#allocation74_spill] sm:$0xff] }
 0x3bc   : > { %10169 = vst [vmem:[#allocation34_spill] sm:$0xff] %v7326_v20  ;;  %v7342_v11 = vsel %vm2221_vm9, 1.0, %v6929_v30  ;;  %v7350_v56 = vsel %vm2219_vm5, 1e+30, %v10173_v27  ;;  %v7354_v9 = vadd.f32 %v10175_v13, %v10174_v6  ;;  %v10176_v20 = vld [vmem:[#allocation19_spill] sm:$0xff]  ;;  %v7364_v0 = vsel %vm2218_vm1, 1.0, %v6987_v34 }
 0x3bd   : > { %10171 = vst [vmem:[#allocation47_spill] sm:$0xff] %v7342_v11  ;;  %v7359_v21 = vsel %vm2220_vm6, 1e+30, %v10176_v20  ;;  %v2420_v30 = vmin.f32 %v7345_v31, %v7350_v56  ;;  %10178 = vst [vmem:[#allocation14_spill] sm:$0xff] %v7364_v0  ;;  %vm2222_vm10 = vcmp.eq.f32.partialorder %v5717_v51, %v2157_v16  ;;  %vm2223_vm13 = vcmp.eq.f32.partialorder %v5719_v50, %v2157_v16  ;;  %v10180_v13 = vld [vmem:[#allocation18_spill] sm:$0xff]  ;;  %v10182_v37 = vld [vmem:[#allocation20_spill] sm:$0xff] }
 0x3be   : > { %10177 = vst [vmem:[#allocation43_spill] sm:$0xff] %v7359_v21  ;;  %2418 = vmin.xlane.f32.xlu0 %v2417_v22  ;;  %vm2224_vm14 = vcmp.eq.f32.partialorder %v5721_v36, %v2157_v16  ;;  %vm2225_vm15 = vcmp.eq.f32.partialorder %v5726_v42, %v2157_v16  ;;  %v7375_v11 = vsel %vm2222_vm10, 1e+30, %v10180_v13  ;;  %v7378_v34 = vsel %vm2223_vm13, 1e+30, %v10182_v37  ;;  %v10184_v0 = vld [vmem:[#allocation21_spill] sm:$0xff] }
 0x3bf   : > { %v2421_v27 = vmin.f32 %v2420_v30, %v7359_v21  ;;  %v7372_v20 = vsel %vm2225_vm15, 1.0, %v6956_v40  ;;  %10181 = vst [vmem:[#allocation75_spill] sm:$0xff] %v7375_v11  ;;  %10183 = vst [vmem:[#allocation74_spill] sm:$0xff] %v7378_v34  ;;  %v7383_v15 = vsel %vm2221_vm9, 1e+30, %v10184_v0  ;;  %v10186_v22 = vld [vmem:[#allocation23_spill] sm:$0xff]  ;;  %v2425_v40 = vmin.f32 %v7375_v11, %v7378_v34  ;;  %v2162_v21 = vpop.xlane.xlu1 %2161 }
 0x3c0   : > { %10179 = vst [vmem:[#allocation16_spill] sm:$0xff] %v7372_v20  ;;  %10185 = vst [vmem:[#allocation19_spill] sm:$0xff] %v7383_v15  ;;  %v7388_v39 = vsel %vm2224_vm14, 1e+30, %v10186_v22  ;;  %v7395_v30 = vsel %vm2219_vm5, 1.0, %v6993_v35  ;;  %v10189_v13 = vld [vmem:[#allocation46_spill] sm:$0xff]  ;;  %vm2226_vm2 = vcmp.eq.f32.partialorder %v5717_v51, %v2162_v21  ;;  %vm2227_vm4 = vcmp.eq.f32.partialorder %v5719_v50, %v2162_v21 }
 0x3c1   : > { %10187 = vst [vmem:[#allocation18_spill] sm:$0xff] %v7388_v39  ;;  %10188 = vst [vmem:[#allocation20_spill] sm:$0xff] %v7395_v30  ;;  %v2422_v37 = vmin.f32 %v2421_v27, %v7383_v15  ;;  %v7401_v0 = vsel %vm2220_vm6, 1.0, %v10189_v13  ;;  %v7404_v20 = vsel %vm2222_vm10, 1.0, %v7008_v44  ;;  %v7407_v22 = vsel %vm2223_vm13, 1.0, %v7038_v57  ;;  %v10193_v34 = vld [vmem:[#allocation50_spill] sm:$0xff] }
 0x3c2   : > { %10190 = vst [vmem:[#allocation21_spill] sm:$0xff] %v7401_v0  ;;  %10191 = vst [vmem:[#allocation23_spill] sm:$0xff] %v7404_v20  ;;  %v7410_v11 = vsel %vm2225_vm15, 1e+30, %v10193_v34  ;;  %v2426_v35 = vmin.f32 %v2425_v40, %v7388_v39  ;;  %v10195_v30 = vld [vmem:[#allocation76_spill] sm:$0xff]  ;;  %v7420_v2 = vsel %vm2224_vm14, 1.0, %v6950_v43  ;;  %vm2228_vm7 = vcmp.eq.f32.partialorder %v5721_v36, %v2162_v21 }
 0x3c3   : > { %10192 = vst [vmem:[#allocation46_spill] sm:$0xff] %v7407_v22  ;;  %10194 = vst [vmem:[#allocation50_spill] sm:$0xff] %v7410_v11  ;;  %v7415_v27 = vadd.f32 %v10195_v30, %v10174_v6  ;;  %2423 = vmin.xlane.f32.xlu1 %v2422_v37  ;;  %vm2229_vm8 = vcmp.eq.f32.partialorder %v5726_v42, %v2162_v21  ;;  %v10198_v34 = vld [vmem:[#allocation51_spill] sm:$0xff]  ;;  %v10200_v43 = vld [vmem:[#allocation52_spill] sm:$0xff]  ;;  %v2167_v30 = vpop.xlane.xlu0 %2166 }
 0x3c4   : > { %10196 = vst [vmem:[#allocation76_spill] sm:$0xff] %v7420_v2  ;;  %v2427_v44 = vmin.f32 %v2426_v35, %v7410_v11  ;;  %v7430_v57 = vsel %vm2229_vm8, 1.0, %v7231_v46  ;;  %v7433_v16 = vsel %vm2226_vm2, 1e+30, %v10198_v34  ;;  %v7438_v40 = vsel %vm2227_vm4, 1e+30, %v10200_v43 }
 0x3c5   : > { %10197 = vst [vmem:[#allocation102_spill] sm:$0xff] %v7430_v57  ;;  %10199 = vst [vmem:[#allocation51_spill] sm:$0xff] %v7433_v16  ;;  %v10202_v37 = vld [vmem:[#allocation53_spill] sm:$0xff]  ;;  %v2430_v35 = vmin.f32 %v7433_v16, %v7438_v40  ;;  %v7450_v34 = vsel %vm2226_vm2, 1.0, %v7274_v38  ;;  %vm2230_vm11 = vcmp.eq.f32.partialorder %v5717_v51, %v2167_v30  ;;  %vm2231_vm12 = vcmp.eq.f32.partialorder %v5719_v50, %v2167_v30  ;;  %v10218_v0 = vld [vmem:[#allocation67_spill] sm:$0xff] }
 0x3c6   : > { %10201 = vst [vmem:[#allocation52_spill] sm:$0xff] %v7438_v40  ;;  %v7443_v13 = vsel %vm2228_vm7, 1e+30, %v10202_v37  ;;  %v10204_v2 = vld [vmem:[#allocation77_spill] sm:$0xff]  ;;  %2428 = vmin.xlane.f32.xlu0 %v2427_v44  ;;  %vm2232_vm1 = vcmp.eq.f32.partialorder %v5721_v36, %v2167_v30  ;;  %vm2233_vm5 = vcmp.eq.f32.partialorder %v5726_v42, %v2167_v30  ;;  %v10236_v30 = vld [vmem:[#allocation30_spill] sm:$0xff] }
 0x3c7   : > { %10203 = vst [vmem:[#allocation53_spill] sm:$0xff] %v7443_v13  ;;  %v4154_v46 = vadd.f32 %v10174_v6, %v10204_v2  ;;  %10205 = vst [vmem:[#allocation77_spill] sm:$0xff] %v7450_v34  ;;  %v2431_v43 = vmin.f32 %v2430_v35, %v7443_v13  ;;  %v10206_v37 = vld [vmem:[#allocation57_spill] sm:$0xff]  ;;  %v10208_v6 = vld [vmem:[#allocation55_spill] sm:$0xff] }
 0x3c8   : > { %v7460_v57 = vsel %vm2233_vm5, 1.0, %v10206_v37  ;;  %v7465_v38 = vsel %vm2230_vm11, 1e+30, %v10208_v6  ;;  %v10210_v2 = vld [vmem:[#allocation56_spill] sm:$0xff]  ;;  %v10214_v35 = vld [vmem:[#allocation58_spill] sm:$0xff]  ;;  %v7487_v6 = vsel %vm2227_vm4, 1.0, %v7332_v49 }
 0x3c9   : > { %10207 = vst [vmem:[#allocation57_spill] sm:$0xff] %v7460_v57  ;;  %10209 = vst [vmem:[#allocation55_spill] sm:$0xff] %v7465_v38  ;;  %v7470_v44 = vsel %vm2231_vm12, 1e+30, %v10210_v2  ;;  %v10212_v34 = vld [vmem:[#allocation28_spill] sm:$0xff]  ;;  %v2172_v2 = vpop.xlane.xlu1 %2171 }
 0x3ca   : > { %10211 = vst [vmem:[#allocation56_spill] sm:$0xff] %v7470_v44  ;;  %v7475_v22 = vsel %vm2229_vm8, 1e+30, %v10212_v34  ;;  %v7480_v37 = vsel %vm2232_vm1, 1e+30, %v10214_v35  ;;  %v2435_v57 = vmin.f32 %v7465_v38, %v7470_v44  ;;  %10216 = vst [vmem:[#allocation103_spill] sm:$0xff] %v7487_v6  ;;  %vm2234_vm6 = vcmp.eq.f32.partialorder %v5717_v51, %v2172_v2 }
 0x3cb   : > { %10213 = vst [vmem:[#allocation28_spill] sm:$0xff] %v7475_v22  ;;  %10215 = vst [vmem:[#allocation58_spill] sm:$0xff] %v7480_v37  ;;  %v2432_v20 = vmin.f32 %v2431_v43, %v7475_v22  ;;  %v7493_v34 = vsel %vm2228_vm7, 1.0, %v7172_v17  ;;  %v7498_v35 = vsel %vm2230_vm11, 1.0, %v10218_v0  ;;  %v10220_v13 = vld [vmem:[#allocation68_spill] sm:$0xff]  ;;  %vm2235_vm9 = vcmp.eq.f32.partialorder %v5719_v50, %v2172_v2  ;;  %v10224_v0 = vld [vmem:[#allocation62_spill] sm:$0xff] }
 0x3cc   : > { %10217 = vst [vmem:[#allocation104_spill] sm:$0xff] %v7493_v34  ;;  %10219 = vst [vmem:[#allocation67_spill] sm:$0xff] %v7498_v35  ;;  %v7503_v44 = vsel %vm2231_vm12, 1.0, %v10220_v13  ;;  %vm2236_vm10 = vcmp.eq.f32.partialorder %v5721_v36, %v2172_v2  ;;  %v2436_v49 = vmin.f32 %v2435_v57, %v7480_v37  ;;  %v10222_v17 = vld [vmem:[#allocation60_spill] sm:$0xff]  ;;  %v7517_v43 = vsel %vm2235_vm9, 1e+30, %v10224_v0  ;;  %v2177_v35 = vpop.xlane.xlu0 %2176 }
 0x3cd   : > { %10221 = vst [vmem:[#allocation68_spill] sm:$0xff] %v7503_v44  ;;  %v7512_v21 = vsel %vm2234_vm6, 1e+30, %v10222_v17  ;;  %10225 = vst [vmem:[#allocation62_spill] sm:$0xff] %v7517_v43  ;;  %2433 = vmin.xlane.f32.xlu1 %v2432_v20  ;;  %v10226_v13 = vld [vmem:[#allocation29_spill] sm:$0xff]  ;;  %vm2237_vm13 = vcmp.eq.f32.partialorder %v5726_v42, %v2172_v2  ;;  %v10228_v34 = vld [vmem:[#allocation63_spill] sm:$0xff]  ;;  %vm2238_vm14 = vcmp.eq.f32.partialorder %v5717_v51, %v2177_v35 }
 0x3ce   : > { %10223 = vst [vmem:[#allocation60_spill] sm:$0xff] %v7512_v21  ;;  %v7522_v44 = vsel %vm2233_vm5, 1e+30, %v10226_v13  ;;  %v7529_v17 = vsel %vm2236_vm10, 1e+30, %v10228_v34  ;;  %v2440_v0 = vmin.f32 %v7512_v21, %v7517_v43  ;;  %v10230_v6 = vld [vmem:[#allocation54_spill] sm:$0xff]  ;;  %vm2239_vm15 = vcmp.eq.f32.partialorder %v5719_v50, %v2177_v35 }
 0x3cf   : > { %10227 = vst [vmem:[#allocation29_spill] sm:$0xff] %v7522_v44  ;;  %v2437_v57 = vmin.f32 %v2436_v49, %v7522_v44  ;;  %10229 = vst [vmem:[#allocation63_spill] sm:$0xff] %v7529_v17  ;;  %v7536_v20 = vsel %vm2232_vm1, 1.0, %v10230_v6  ;;  %vm2240_vm2 = vcmp.eq.f32.partialorder %v5721_v36, %v2177_v35  ;;  %v4251_v49 = vpop.permute.xlu1 %4250  ;;  %v10232_v13 = vld [vmem:[#allocation31_spill] sm:$0xff]  ;;  %v10234_v44 = vld [vmem:[#allocation66_spill] sm:$0xff]  ;;  %vm2241_vm4 = vcmp.eq.f32.partialorder %v5726_v42, %v2177_v35 }
 0x3d0   : > { %10231 = vst [vmem:[#allocation54_spill] sm:$0xff] %v7536_v20  ;;  %v7544_v34 = vsel %vm2237_vm13, 1e+30, %v10232_v13  ;;  %v7549_v43 = vsel %vm2238_vm14, 1e+30, %v10234_v44  ;;  %v4320_v20 = vmul.f32 %v4251_v49, %v4154_v46  ;;  %v2441_v21 = vmin.f32 %v2440_v0, %v7529_v17  ;;  %v10238_v37 = vld [vmem:[#allocation32_spill] sm:$0xff] }
 0x3d1   : > { %10233 = vst [vmem:[#allocation31_spill] sm:$0xff] %v7544_v34  ;;  %10235 = vst [vmem:[#allocation66_spill] sm:$0xff] %v7549_v43  ;;  %v7554_v6 = vsel %vm2239_vm15, 1e+30, %v10236_v30  ;;  %2438 = vmin.xlane.f32.xlu0 %v2437_v57  ;;  %v7561_v13 = vsel %vm2240_vm2, 1e+30, %v10238_v37 }
 0x3d2   : > { %10237 = vst [vmem:[#allocation30_spill] sm:$0xff] %v7554_v6  ;;  %10239 = vst [vmem:[#allocation32_spill] sm:$0xff] %v7561_v13  ;;  %v2445_v44 = vmin.f32 %v7549_v43, %v7554_v6  ;;  %v10240_v38 = vld [vmem:[#allocation69_spill] sm:$0xff]  ;;  %v4750_v57 = vpack.c.bf16 %v4320_v20, %v4320_v20  ;;  %v2442_v46 = vmin.f32 %v2441_v21, %v7544_v34  ;;  %v10242_v49 = vld [vmem:[#allocation70_spill] sm:$0xff] }
 0x3d3   : > { %v7568_v30 = vsel %vm2234_vm6, 1.0, %v10240_v38  ;;  %v7574_v0 = vsel %vm2235_vm9, 1.0, %v10242_v49  ;;  %v10244_v17 = vld [vmem:[#allocation59_spill] sm:$0xff]  ;;  %v4256_v22 = vpop.permute.xlu1 %4255  ;;  %v10246_v43 = vld [vmem:[#allocation61_spill] sm:$0xff]  ;;  %v10252_v2 = vld [vmem:[#allocation72_spill] sm:$0xff] }
 0x3d4   : > { %10241 = vst [vmem:[#allocation69_spill] sm:$0xff] %v7568_v30  ;;  %10243 = vst [vmem:[#allocation70_spill] sm:$0xff] %v7574_v0  ;;  %v7579_v37 = vsel %vm2236_vm10, 1.0, %v10244_v17  ;;  %v2446_v6 = vmin.f32 %v2445_v44, %v7561_v13  ;;  %v7585_v38 = vsel %vm2237_vm13, 1.0, %v10246_v43  ;;  %v10248_v21 = vld [vmem:[#allocation71_spill] sm:$0xff]  ;;  %v10250_v49 = vld [vmem:[#allocation73_spill] sm:$0xff]  ;;  %v4321_v44 = vmul.f32 %v4256_v22, %v7415_v27  ;;  %2443 = vmin.xlane.f32.xlu1 %v2442_v46 }
 0x3d5   : > { %10245 = vst [vmem:[#allocation59_spill] sm:$0xff] %v7579_v37  ;;  %10247 = vst [vmem:[#allocation61_spill] sm:$0xff] %v7585_v38  ;;  %v7590_v20 = vsel %vm2238_vm14, 1.0, %v10248_v21  ;;  %v7595_v17 = vsel %vm2239_vm15, 1.0, %v10250_v49  ;;  %v7603_v43 = vsel %vm2241_vm4, 1e+30, %v10252_v2 }
 0x3d6   : > { %10249 = vst [vmem:[#allocation71_spill] sm:$0xff] %v7590_v20  ;;  %10251 = vst [vmem:[#allocation73_spill] sm:$0xff] %v7595_v17  ;;  %v10253_v38 = vld [vmem:[#allocation64_spill] sm:$0xff]  ;;  %v10255_v20 = vld [vmem:[#allocation65_spill] sm:$0xff]  ;;  %v2447_v22 = vmin.f32 %v2446_v6, %v7603_v43  ;;  %v4751_v27 = vpack.c.bf16 %v4321_v44, %v4321_v44 }
 0x3d7   : > { %4401 = vst.msk [vmem:[%s6633_s11 + $0x8] sm:$0xf] %vm4398_vm3, %v4750_v57  ;;  %v7608_v21 = vsel %vm2240_vm2, 1.0, %v10253_v38  ;;  %v7613_v49 = vsel %vm2241_vm4, 1.0, %v10255_v20  ;;  %v4246_v57 = vpop.permute.xlu0 %4245  ;;  %v4227_v38 = vld [vmem:[%s6487_s21 + $0x28] sm:$0xff]  ;;  %v4226_v35 = vld [vmem:[%s6487_s21 + $0x20] sm:$0xff] }
 0x3d8   : > { %10254 = vst [vmem:[#allocation72_spill] sm:$0xff] %v7608_v21  ;;  %10256 = vst [vmem:[#allocation64_spill] sm:$0xff] %v7613_v49  ;;  %v4319_v46 = vmul.f32 %v4246_v57, %v7354_v9  ;;  %2448 = vmin.xlane.f32.xlu0 %v2447_v22  ;;  %v7622_v21 = vpop.f32.mrb[36].mxu0  ;;  %v4010_v49 = vld [vmem:[%s5707_s27 + $0x40] sm:$0xff]  ;;  %v4011_v6 = vld [vmem:[%s5707_s27 + $0x48] sm:$0xff] }
 0x3d9   : > { %4402 = vst.msk [vmem:[%s6633_s11 + $0xc] sm:$0xf] %vm4398_vm3, %v4751_v27  ;;  %v7625_v20 = vpop.f32.mrb[37].mxu0  ;;  %4868 = vmatprep.mubr.msk.f32.mxu1 %vm744_vm0, %v4010_v49  ;;  %v10257_v44 = vld [vmem:[#allocation80_spill] sm:$0xff]  ;;  %v10258_v22 = vld [vmem:[#allocation25_spill] sm:$0xff] }
 0x3da   : > { %v4749_v2 = vpack.c.bf16 %v4319_v46, %v4319_v46  ;;  %4869 = vmatmul.mubr.msk.f32.vlgmr.msra.gmra.mrb[32].mxu1 %vm744_vm0, %v4011_v6  ;;  %v10259_v27 = vld [vmem:[#allocation24_spill] sm:$0xff] }
 0x3dc   : > { %4400 = vst.msk [vmem:[%s6633_s11 + $0x4] sm:$0xf] %vm4398_vm3, %v4749_v2 }
 0x3e5   : > { %4265 = vperm.xlu1 %4954, %v4227_v38  }
 0x3ee   : > { %4260 = vperm.xlu0 %4953, %v4226_v35  }
 0x423   : > { %v2374_v9 = vpop.xlane.xlu1 %2373 }
 0x424   : > { %vm2450_vm7 = vcmp.eq.f32.partialorder %v10257_v44, %v2374_v9  ;;  %vm2451_vm8 = vcmp.eq.f32.partialorder %v10258_v22, %v2374_v9  ;;  %vm2452_vm11 = vcmp.eq.f32.partialorder %v10259_v27, %v2374_v9  ;;  %vm2453_vm12 = vcmp.eq.f32.partialorder %v6916_v14, %v2374_v9 }
 0x425   : > { %v2514_v57 = vsel %vm2450_vm7, %v5717_v51, 512.0  ;;  %v2515_v46 = vsel %vm2451_vm8, %v5719_v50, 512.0  ;;  %v2516_v35 = vsel %vm2452_vm11, %v5721_v36, 512.0  ;;  %v2517_v6 = vsel %vm2453_vm12, %v5726_v42, 512.0 }
 0x426   : > { %v2578_v2 = vmin.f32 %v2514_v57, %v2515_v46 }
 0x428   : > { %v2379_v38 = vpop.xlane.xlu0 %2378  ;;  %v2579_v49 = vmin.f32 %v2578_v2, %v2516_v35 }
 0x429   : > { %vm2454_vm1 = vcmp.eq.f32.partialorder %v6920_v8, %v2379_v38  ;;  %vm2455_vm5 = vcmp.eq.f32.partialorder %v6923_v24, %v2379_v38  ;;  %vm2456_vm6 = vcmp.eq.f32.partialorder %v6937_v5, %v2379_v38  ;;  %vm2457_vm9 = vcmp.eq.f32.partialorder %v6959_v52, %v2379_v38 }
 0x42a   : > { %v2518_v17 = vsel %vm2454_vm1, %v5717_v51, 512.0  ;;  %v2519_v37 = vsel %vm2455_vm5, %v5719_v50, 512.0  ;;  %v2580_v0 = vmin.f32 %v2579_v49, %v2517_v6  ;;  %v2520_v57 = vsel %vm2456_vm6, %v5721_v36, 512.0 }
 0x42b   : > { %v2583_v9 = vmin.f32 %v2518_v17, %v2519_v37  ;;  %v2521_v2 = vsel %vm2457_vm9, %v5726_v42, 512.0 }
 0x42c   : > { %2581 = vmin.xlane.f32.xlu1 %v2580_v0 }
 0x42d   : > { %v2584_v30 = vmin.f32 %v2583_v9, %v2520_v57 }
 0x42e   : > { %v2384_v46 = vpop.xlane.xlu1 %2383 }
 0x42f   : > { %vm2458_vm10 = vcmp.eq.f32.partialorder %v6973_v62, %v2384_v46  ;;  %vm2459_vm13 = vcmp.eq.f32.partialorder %v6976_v4, %v2384_v46  ;;  %vm2460_vm14 = vcmp.eq.f32.partialorder %v6996_v61, %v2384_v46  ;;  %v2585_v35 = vmin.f32 %v2584_v30, %v2521_v2 }
 0x430   : > { %v2522_v5 = vsel %vm2458_vm10, %v5717_v51, 512.0  ;;  %v2523_v49 = vsel %vm2459_vm13, %v5719_v50, 512.0  ;;  %vm2461_vm15 = vcmp.eq.f32.partialorder %v7017_v28, %v2384_v46  ;;  %v2524_v0 = vsel %vm2460_vm14, %v5721_v36, 512.0 }
 0x431   : > { %v2588_v37 = vmin.f32 %v2522_v5, %v2523_v49  ;;  %2586 = vmin.xlane.f32.xlu0 %v2585_v35  ;;  %v2525_v30 = vsel %vm2461_vm15, %v5726_v42, 512.0 }
 0x432   : > { %v2389_v17 = vpop.xlane.xlu0 %2388 }
 0x433   : > { %vm2462_vm2 = vcmp.eq.f32.partialorder %v7021_v53, %v2389_v17  ;;  %vm2463_vm4 = vcmp.eq.f32.partialorder %v7024_v58, %v2389_v17  ;;  %v2589_v38 = vmin.f32 %v2588_v37, %v2524_v0  ;;  %vm2464_vm7 = vcmp.eq.f32.partialorder %v7041_v32, %v2389_v17 }
 0x434   : > { %v2526_v6 = vsel %vm2462_vm2, %v5717_v51, 512.0  ;;  %v2527_v9 = vsel %vm2463_vm4, %v5719_v50, 512.0  ;;  %vm2465_vm8 = vcmp.eq.f32.partialorder %v7059_v41, %v2389_v17  ;;  %v2528_v2 = vsel %vm2464_vm7, %v5721_v36, 512.0 }
 0x435   : > { %v2590_v57 = vmin.f32 %v2589_v38, %v2525_v30  ;;  %v2593_v5 = vmin.f32 %v2526_v6, %v2527_v9  ;;  %v2529_v49 = vsel %vm2465_vm8, %v5726_v42, 512.0 }
 0x437   : > { %v2394_v46 = vpop.xlane.xlu1 %2393  ;;  %2591 = vmin.xlane.f32.xlu1 %v2590_v57  ;;  %v2594_v35 = vmin.f32 %v2593_v5, %v2528_v2 }
 0x438   : > { %vm2466_vm11 = vcmp.eq.f32.partialorder %v7065_v10, %v2394_v46  ;;  %vm2467_vm12 = vcmp.eq.f32.partialorder %v7070_v54, %v2394_v46  ;;  %vm2468_vm1 = vcmp.eq.f32.partialorder %v7081_v7, %v2394_v46  ;;  %vm2469_vm5 = vcmp.eq.f32.partialorder %v7106_v18, %v2394_v46 }
 0x439   : > { %v2530_v37 = vsel %vm2466_vm11, %v5717_v51, 512.0  ;;  %v2531_v0 = vsel %vm2467_vm12, %v5719_v50, 512.0  ;;  %v2399_v38 = vpop.xlane.xlu0 %2398  ;;  %v2595_v17 = vmin.f32 %v2594_v35, %v2529_v49  ;;  %v2532_v6 = vsel %vm2468_vm1, %v5721_v36, 512.0 }
 0x43a   : > { %v2598_v30 = vmin.f32 %v2530_v37, %v2531_v0  ;;  %vm2470_vm6 = vcmp.eq.f32.partialorder %v7096_v3, %v2399_v38  ;;  %vm2471_vm9 = vcmp.eq.f32.partialorder %v7101_v45, %v2399_v38  ;;  %vm2472_vm10 = vcmp.eq.f32.partialorder %v7111_v1, %v2399_v38 }
 0x43b   : > { %2596 = vmin.xlane.f32.xlu0 %v2595_v17  ;;  %v2534_v57 = vsel %vm2470_vm6, %v5717_v51, 512.0  ;;  %v2535_v5 = vsel %vm2471_vm9, %v5719_v50, 512.0  ;;  %v2533_v2 = vsel %vm2469_vm5, %v5726_v42, 512.0  ;;  %vm2473_vm13 = vcmp.eq.f32.partialorder %v7137_v12, %v2399_v38 }
 0x43c   : > { %v2599_v9 = vmin.f32 %v2598_v30, %v2532_v6  ;;  %v2603_v46 = vmin.f32 %v2534_v57, %v2535_v5  ;;  %v2536_v49 = vsel %vm2472_vm10, %v5721_v36, 512.0  ;;  %v2537_v17 = vsel %vm2473_vm13, %v5726_v42, 512.0 }
 0x43e   : > { %v2600_v35 = vmin.f32 %v2599_v9, %v2533_v2  ;;  %v2404_v37 = vpop.xlane.xlu1 %2403  ;;  %v2604_v0 = vmin.f32 %v2603_v46, %v2536_v49 }
 0x43f   : > { %vm2474_vm14 = vcmp.eq.f32.partialorder %v7161_v48, %v2404_v37  ;;  %vm2475_vm15 = vcmp.eq.f32.partialorder %v7166_v63, %v2404_v37  ;;  %vm2476_vm2 = vcmp.eq.f32.partialorder %v7177_v19, %v2404_v37  ;;  %vm2477_vm4 = vcmp.eq.f32.partialorder %v7201_v59, %v2404_v37 }
 0x440   : > { %2601 = vmin.xlane.f32.xlu1 %v2600_v35  ;;  %v2605_v30 = vmin.f32 %v2604_v0, %v2537_v17  ;;  %v2538_v6 = vsel %vm2474_vm14, %v5717_v51, 512.0  ;;  %v2539_v38 = vsel %vm2475_vm15, %v5719_v50, 512.0  ;;  %v2540_v5 = vsel %vm2476_vm2, %v5721_v36, 512.0 }
 0x441   : > { %v2608_v9 = vmin.f32 %v2538_v6, %v2539_v38  ;;  %v2541_v49 = vsel %vm2477_vm4, %v5726_v42, 512.0 }
 0x442   : > { %v2409_v57 = vpop.xlane.xlu0 %2408  ;;  %2606 = vmin.xlane.f32.xlu0 %v2605_v30  ;;  %v10260_v30 = vld [vmem:[#allocation9_spill] sm:$0xff] }
 0x443   : > { %vm2478_vm7 = vcmp.eq.f32.partialorder %v7193_v29, %v2409_v57  ;;  %vm2479_vm8 = vcmp.eq.f32.partialorder %v7196_v33, %v2409_v57  ;;  %vm2480_vm11 = vcmp.eq.f32.partialorder %v7206_v25, %v2409_v57  ;;  %v2609_v2 = vmin.f32 %v2608_v9, %v2540_v5  ;;  %v10261_v5 = vld [vmem:[#allocation22_spill] sm:$0xff] }
 0x444   : > { %v2542_v46 = vsel %vm2478_vm7, %v5717_v51, 512.0  ;;  %v2543_v35 = vsel %vm2479_vm8, %v5719_v50, 512.0  ;;  %vm2481_vm12 = vcmp.eq.f32.partialorder %v7234_v47, %v2409_v57  ;;  %v2544_v17 = vsel %vm2480_vm11, %v5721_v36, 512.0 }
 0x445   : > { %v2613_v37 = vmin.f32 %v2542_v46, %v2543_v35  ;;  %v2610_v0 = vmin.f32 %v2609_v2, %v2541_v49  ;;  %v2545_v9 = vsel %vm2481_vm12, %v5726_v42, 512.0  ;;  %v10262_v35 = vld [vmem:[#allocation8_spill] sm:$0xff]  ;;  %v10263_v49 = vld [vmem:[#allocation11_spill] sm:$0xff] }
 0x447   : > { %v2614_v38 = vmin.f32 %v2613_v37, %v2544_v17  ;;  %2611 = vmin.xlane.f32.xlu1 %v2610_v0 }
 0x448   : > { %v2414_v6 = vpop.xlane.xlu1 %2413 }
 0x449   : > { %vm2482_vm1 = vcmp.eq.f32.partialorder %v7253_v55, %v2414_v6  ;;  %vm2483_vm5 = vcmp.eq.f32.partialorder %v10260_v30, %v2414_v6  ;;  %vm2484_vm6 = vcmp.eq.f32.partialorder %v10261_v5, %v2414_v6  ;;  %v2615_v59 = vmin.f32 %v2614_v38, %v2545_v9 }
 0x44a   : > { %v2546_v25 = vsel %vm2482_vm1, %v5717_v51, 512.0  ;;  %v2547_v57 = vsel %vm2483_vm5, %v5719_v50, 512.0  ;;  %vm2485_vm9 = vcmp.eq.f32.partialorder %v7293_v23, %v2414_v6  ;;  %v2548_v37 = vsel %vm2484_vm6, %v5721_v36, 512.0 }
 0x44b   : > { %v2419_v46 = vpop.xlane.xlu0 %2418  ;;  %v2618_v2 = vmin.f32 %v2546_v25, %v2547_v57  ;;  %2616 = vmin.xlane.f32.xlu0 %v2615_v59  ;;  %v2549_v9 = vsel %vm2485_vm9, %v5726_v42, 512.0  ;;  %v10264_v59 = vld [vmem:[#allocation43_spill] sm:$0xff] }
 0x44c   : > { %vm2486_vm10 = vcmp.eq.f32.partialorder %v10262_v35, %v2419_v46  ;;  %vm2487_vm13 = vcmp.eq.f32.partialorder %v10263_v49, %v2419_v46  ;;  %vm2488_vm14 = vcmp.eq.f32.partialorder %v7298_v60, %v2419_v46  ;;  %vm2489_vm15 = vcmp.eq.f32.partialorder %v7320_v26, %v2419_v46 }
 0x44d   : > { %v2619_v0 = vmin.f32 %v2618_v2, %v2548_v37  ;;  %v2550_v17 = vsel %vm2486_vm10, %v5717_v51, 512.0  ;;  %v2551_v38 = vsel %vm2487_vm13, %v5719_v50, 512.0  ;;  %v2552_v57 = vsel %vm2488_vm14, %v5721_v36, 512.0 }
 0x44e   : > { %v2623_v6 = vmin.f32 %v2550_v17, %v2551_v38  ;;  %v2553_v2 = vsel %vm2489_vm15, %v5726_v42, 512.0 }
 0x44f   : > { %v2620_v25 = vmin.f32 %v2619_v0, %v2549_v9  ;;  %v10265_v9 = vld [vmem:[#allocation75_spill] sm:$0xff] }
 0x450   : > { %v2424_v23 = vpop.xlane.xlu1 %2423  ;;  %v2624_v5 = vmin.f32 %v2623_v6, %v2552_v57  ;;  %v10266_v6 = vld [vmem:[#allocation74_spill] sm:$0xff] }
 0x451   : > { %vm2490_vm2 = vcmp.eq.f32.partialorder %v7345_v31, %v2424_v23  ;;  %vm2491_vm4 = vcmp.eq.f32.partialorder %v7350_v56, %v2424_v23  ;;  %vm2492_vm7 = vcmp.eq.f32.partialorder %v10264_v59, %v2424_v23  ;;  %2621 = vmin.xlane.f32.xlu1 %v2620_v25  ;;  %vm2493_vm8 = vcmp.eq.f32.partialorder %v7383_v15, %v2424_v23 }
 0x452   : > { %v2554_v37 = vsel %vm2490_vm2, %v5717_v51, 512.0  ;;  %v2555_v60 = vsel %vm2491_vm4, %v5719_v50, 512.0  ;;  %v2625_v46 = vmin.f32 %v2624_v5, %v2553_v2  ;;  %v2556_v38 = vsel %vm2492_vm7, %v5721_v36, 512.0 }
 0x453   : > { %v2628_v0 = vmin.f32 %v2554_v37, %v2555_v60  ;;  %v2429_v17 = vpop.xlane.xlu0 %2428  ;;  %v2557_v23 = vsel %vm2493_vm8, %v5726_v42, 512.0 }
 0x454   : > { %vm2494_vm11 = vcmp.eq.f32.partialorder %v10265_v9, %v2429_v17  ;;  %vm2495_vm12 = vcmp.eq.f32.partialorder %v10266_v6, %v2429_v17  ;;  %vm2496_vm1 = vcmp.eq.f32.partialorder %v7388_v39, %v2429_v17  ;;  %2626 = vmin.xlane.f32.xlu0 %v2625_v46  ;;  %vm2497_vm5 = vcmp.eq.f32.partialorder %v7410_v11, %v2429_v17  ;;  %v10267_v46 = vld [vmem:[#allocation53_spill] sm:$0xff] }
 0x455   : > { %v2558_v25 = vsel %vm2494_vm11, %v5717_v51, 512.0  ;;  %v2559_v57 = vsel %vm2495_vm12, %v5719_v50, 512.0  ;;  %v2629_v59 = vmin.f32 %v2628_v0, %v2556_v38  ;;  %v2560_v60 = vsel %vm2496_vm1, %v5721_v36, 512.0 }
 0x456   : > { %v2633_v5 = vmin.f32 %v2558_v25, %v2559_v57  ;;  %v2561_v39 = vsel %vm2497_vm5, %v5726_v42, 512.0  ;;  %v10268_v25 = vld [vmem:[#allocation28_spill] sm:$0xff] }
 0x457   : > { %v2630_v2 = vmin.f32 %v2629_v59, %v2557_v23  ;;  %v10269_v23 = vld [vmem:[#allocation55_spill] sm:$0xff] }
 0x458   : > { %v2634_v15 = vmin.f32 %v2633_v5, %v2560_v60  ;;  %v10270_v60 = vld [vmem:[#allocation56_spill] sm:$0xff] }
 0x459   : > { %2631 = vmin.xlane.f32.xlu1 %v2630_v2 }
 0x45a   : > { %v2434_v37 = vpop.xlane.xlu1 %2433  ;;  %v2635_v38 = vmin.f32 %v2634_v15, %v2561_v39  ;;  %v10272_v39 = vld [vmem:[#allocation29_spill] sm:$0xff] }
 0x45b   : > { %vm2498_vm6 = vcmp.eq.f32.partialorder %v7433_v16, %v2434_v37  ;;  %vm2499_vm9 = vcmp.eq.f32.partialorder %v7438_v40, %v2434_v37  ;;  %vm2500_vm10 = vcmp.eq.f32.partialorder %v10267_v46, %v2434_v37  ;;  %vm2501_vm13 = vcmp.eq.f32.partialorder %v10268_v25, %v2434_v37  ;;  %v10271_v46 = vld [vmem:[#allocation58_spill] sm:$0xff]  ;;  %v10273_v25 = vld [vmem:[#allocation60_spill] sm:$0xff] }
 0x45c   : > { %v2562_v0 = vsel %vm2498_vm6, %v5717_v51, 512.0  ;;  %v2563_v17 = vsel %vm2499_vm9, %v5719_v50, 512.0  ;;  %v2564_v5 = vsel %vm2500_vm10, %v5721_v36, 512.0  ;;  %2636 = vmin.xlane.f32.xlu0 %v2635_v38  ;;  %v2565_v15 = vsel %vm2501_vm13, %v5726_v42, 512.0  ;;  %v7747_v38 = vld [vmem:[%s9544_s8] ss:$0 sm:$0xff] }
 0x45d   : > { %v2638_v57 = vmin.f32 %v2562_v0, %v2563_v17 }
 0x45e   : > { %v2439_v59 = vpop.xlane.xlu0 %2438 }
 0x45f   : > { %vm2502_vm14 = vcmp.eq.f32.partialorder %v10269_v23, %v2439_v59  ;;  %vm2503_vm15 = vcmp.eq.f32.partialorder %v10270_v60, %v2439_v59  ;;  %vm2504_vm2 = vcmp.eq.f32.partialorder %v10271_v46, %v2439_v59  ;;  %v2639_v40 = vmin.f32 %v2638_v57, %v2564_v5  ;;  %v10274_v60 = vld [vmem:[#allocation62_spill] sm:$0xff]  ;;  %v10275_v57 = vld [vmem:[#allocation63_spill] sm:$0xff] }
 0x460   : > { %v2566_v2 = vsel %vm2502_vm14, %v5717_v51, 512.0  ;;  %v2567_v11 = vsel %vm2503_vm15, %v5719_v50, 512.0  ;;  %vm2505_vm4 = vcmp.eq.f32.partialorder %v10272_v39, %v2439_v59  ;;  %v2568_v17 = vsel %vm2504_vm2, %v5721_v36, 512.0  ;;  %v10276_v46 = vld [vmem:[#allocation66_spill] sm:$0xff] }
 0x461   : > { %v2643_v16 = vmin.f32 %v2566_v2, %v2567_v11  ;;  %v2444_v37 = vpop.xlane.xlu1 %2443  ;;  %v2640_v0 = vmin.f32 %v2639_v40, %v2565_v15  ;;  %v4169_v11 = vadd.f32 %v7747_v38, %v7622_v21  ;;  %v2569_v39 = vsel %vm2505_vm4, %v5726_v42, 512.0 }
 0x462   : > { %vm2506_vm7 = vcmp.eq.f32.partialorder %v10273_v25, %v2444_v37  ;;  %vm2507_vm8 = vcmp.eq.f32.partialorder %v10274_v60, %v2444_v37  ;;  %vm2508_vm11 = vcmp.eq.f32.partialorder %v10275_v57, %v2444_v37  ;;  %vm2509_vm12 = vcmp.eq.f32.partialorder %v7544_v34, %v2444_v37  ;;  %v10277_v60 = vld [vmem:[#allocation30_spill] sm:$0xff] }
 0x463   : > { %v2570_v59 = vsel %vm2506_vm7, %v5717_v51, 512.0  ;;  %v2571_v40 = vsel %vm2507_vm8, %v5719_v50, 512.0  ;;  %2641 = vmin.xlane.f32.xlu1 %v2640_v0  ;;  %v2644_v5 = vmin.f32 %v2643_v16, %v2568_v17  ;;  %v2572_v57 = vsel %vm2508_vm11, %v5721_v36, 512.0 }
 0x464   : > { %v2648_v2 = vmin.f32 %v2570_v59, %v2571_v40  ;;  %v2573_v34 = vsel %vm2509_vm12, %v5726_v42, 512.0 }
 0x465   : > { %v2449_v15 = vpop.xlane.xlu0 %2448  ;;  %v4266_v21 = vpop.permute.xlu1 %4265  ;;  %v2645_v0 = vmin.f32 %v2644_v5, %v2569_v39 }
 0x466   : > { %vm2510_vm1 = vcmp.eq.f32.partialorder %v10276_v46, %v2449_v15  ;;  %vm2511_vm5 = vcmp.eq.f32.partialorder %v10277_v60, %v2449_v15  ;;  %vm2512_vm6 = vcmp.eq.f32.partialorder %v7561_v13, %v2449_v15  ;;  %vm2513_vm9 = vcmp.eq.f32.partialorder %v7603_v43, %v2449_v15  ;;  %v7773_v15 = vpop.f32.mrb[38].mxu0 }
 0x467   : > { %v2574_v25 = vsel %vm2510_vm1, %v5717_v51, 512.0  ;;  %v2575_v16 = vsel %vm2511_vm5, %v5719_v50, 512.0  ;;  %v4323_v59 = vmul.f32 %v4266_v21, %v4169_v11  ;;  %v2649_v37 = vmin.f32 %v2648_v2, %v2572_v57  ;;  %2646 = vmin.xlane.f32.xlu0 %v2645_v0  ;;  %v4229_v2 = vld [vmem:[%s6487_s21 + $0x38] sm:$0xff]  ;;  %v4012_v21 = vld [vmem:[%s5707_s27 + $0x50] sm:$0xff] }
 0x468   : > { %v2653_v17 = vmin.f32 %v2574_v25, %v2575_v16  ;;  %v2576_v40 = vsel %vm2512_vm6, %v5721_v36, 512.0  ;;  %v4164_v60 = vadd.f32 %v7747_v38, %v7625_v20  ;;  %v2577_v39 = vsel %vm2513_vm9, %v5726_v42, 512.0  ;;  %v7776_v20 = vpop.f32.mrb[39].mxu0  ;;  %v4013_v16 = vld [vmem:[%s5707_s27 + $0x58] sm:$0xff]  ;;  %4871 = vmatprep.mubr.msk.f32.mxu1 %vm744_vm0, %v4012_v21 }
 0x469   : > { %v4753_v13 = vpack.c.bf16 %v4323_v59, %v4323_v59  ;;  %v2650_v46 = vmin.f32 %v2649_v37, %v2573_v34  ;;  %v4228_v34 = vld [vmem:[%s6487_s21 + $0x30] sm:$0xff]  ;;  %4872 = vmatmul.mubr.msk.f32.gmra.mrb[34].mxu1 %vm744_vm0, %v4013_v16  ;;  %v10284_v37 = vld [vmem:[#allocation79_spill] sm:$0xff]  ;;  %v10292_v16 = vld [vmem:[#allocation26_spill] sm:$0xff] }
 0x46a   : > { %v2654_v23 = vmin.f32 %v2653_v17, %v2576_v40  ;;  %v10282_v17 = vld [vmem:[#allocation83_spill] sm:$0xff] }
 0x46b   : > { %4404 = vst.msk [vmem:[%s6633_s11 + $0x14] sm:$0xf] %vm4398_vm3, %v4753_v13  ;;  %2651 = vmin.xlane.f32.xlu1 %v2650_v46  ;;  %v10278_v46 = vld [vmem:[#allocation81_spill] sm:$0xff] }
 0x46c   : > { %v2655_v25 = vmin.f32 %v2654_v23, %v2577_v39 }
 0x46d   : > { %v4261_v11 = vpop.permute.xlu0 %4260 }
 0x46e   : > { %v4322_v57 = vmul.f32 %v4261_v11, %v4164_v60  ;;  %2656 = vmin.xlane.f32.xlu0 %v2655_v25  ;;  %v10280_v60 = vld [vmem:[#allocation82_spill] sm:$0xff] }
 0x470   : > { %v4752_v5 = vpack.c.bf16 %v4322_v57, %v4322_v57 }
 0x472   : > { %4403 = vst.msk [vmem:[%s6633_s11 + $0x10] sm:$0xf] %vm4398_vm3, %v4752_v5 }
 0x47c   : > { %4275 = vperm.xlu1 %4954, %v4229_v2  }
 0x484   : > { %4270 = vperm.xlu0 %4953, %v4228_v34  }
 0x4b9   : > { %v2582_v13 = vpop.xlane.xlu1 %2581 }
 0x4ba   : > { %vm2658_vm10 = vcmp.eq.f32.partialorder %v5717_v51, %v2582_v13  ;;  %vm2659_vm13 = vcmp.eq.f32.partialorder %v5719_v50, %v2582_v13  ;;  %vm2660_vm14 = vcmp.eq.f32.partialorder %v5721_v36, %v2582_v13  ;;  %vm2661_vm15 = vcmp.eq.f32.partialorder %v5726_v42, %v2582_v13  ;;  %v10297_v13 = vld [vmem:[#allocation88_spill] sm:$0xff] }
 0x4bb   : > { %v7787_v23 = vsel %vm2658_vm10, 1.0, %v10278_v46  ;;  %v7790_v0 = vsel %vm2659_vm13, 1.0, %v10280_v60  ;;  %v7793_v59 = vsel %vm2660_vm14, 1.0, %v10282_v17  ;;  %v7798_v40 = vsel %vm2661_vm15, 1.0, %v10284_v37 }
 0x4bc   : > { %10279 = vst [vmem:[#allocation65_spill] sm:$0xff] %v7787_v23  ;;  %10281 = vst [vmem:[#allocation80_spill] sm:$0xff] %v7790_v0  ;;  %v7801_v39 = vsel %vm2658_vm10, 1e+30, %v10257_v44  ;;  %v7804_v25 = vsel %vm2659_vm13, 1e+30, %v10258_v22 }
 0x4bd   : > { %10283 = vst [vmem:[#allocation25_spill] sm:$0xff] %v7793_v59  ;;  %10285 = vst [vmem:[#allocation24_spill] sm:$0xff] %v7798_v40  ;;  %v7807_v11 = vsel %vm2660_vm14, 1e+30, %v10259_v27  ;;  %v2850_v5 = vmin.f32 %v7801_v39, %v7804_v25  ;;  %v10286_v44 = vld [vmem:[#allocation84_spill] sm:$0xff]  ;;  %v10288_v22 = vld [vmem:[#allocation85_spill] sm:$0xff] }
 0x4be   : > { %v2587_v57 = vpop.xlane.xlu0 %2586  ;;  %v10290_v27 = vld [vmem:[#allocation86_spill] sm:$0xff] }
 0x4bf   : > { %vm2662_vm2 = vcmp.eq.f32.partialorder %v5717_v51, %v2587_v57  ;;  %vm2663_vm4 = vcmp.eq.f32.partialorder %v5719_v50, %v2587_v57  ;;  %vm2664_vm7 = vcmp.eq.f32.partialorder %v5721_v36, %v2587_v57  ;;  %vm2665_vm8 = vcmp.eq.f32.partialorder %v5726_v42, %v2587_v57  ;;  %v10305_v57 = vld [vmem:[#allocation92_spill] sm:$0xff] }
 0x4c0   : > { %v7816_v2 = vsel %vm2662_vm2, 1.0, %v10286_v44  ;;  %v7819_v34 = vsel %vm2663_vm4, 1.0, %v10288_v22  ;;  %v7822_v21 = vsel %vm2664_vm7, 1.0, %v10290_v27  ;;  %v7827_v46 = vsel %vm2665_vm8, 1.0, %v10292_v16  ;;  %v10294_v27 = vld [vmem:[#allocation33_spill] sm:$0xff] }
 0x4c1   : > { %10287 = vst [vmem:[#allocation9_spill] sm:$0xff] %v7816_v2  ;;  %10289 = vst [vmem:[#allocation8_spill] sm:$0xff] %v7819_v34  ;;  %v7830_v60 = vsel %vm2662_vm2, 1e+30, %v6920_v8  ;;  %v7833_v17 = vsel %vm2663_vm4, 1e+30, %v6923_v24  ;;  %v2851_v37 = vmin.f32 %v2850_v5, %v7807_v11 }
 0x4c2   : > { %10291 = vst [vmem:[#allocation11_spill] sm:$0xff] %v7822_v21  ;;  %10293 = vst [vmem:[#allocation75_spill] sm:$0xff] %v7827_v46  ;;  %v7839_v44 = vsel %vm2661_vm15, 1e+30, %v6916_v14  ;;  %v2855_v22 = vmin.f32 %v7830_v60, %v7833_v17  ;;  %v7844_v21 = vsel %vm2664_vm7, 1e+30, %v10294_v27 }
 0x4c3   : > { %v2852_v8 = vmin.f32 %v2851_v37, %v7839_v44  ;;  %v10295_v24 = vld [vmem:[#allocation87_spill] sm:$0xff]  ;;  %v10299_v46 = vld [vmem:[#allocation89_spill] sm:$0xff]  ;;  %v10301_v34 = vld [vmem:[#allocation48_spill] sm:$0xff] }
 0x4c4   : > { %v2592_v16 = vpop.xlane.xlu1 %2591 }
 0x4c5   : > { %vm2666_vm11 = vcmp.eq.f32.partialorder %v5717_v51, %v2592_v16  ;;  %vm2667_vm12 = vcmp.eq.f32.partialorder %v5719_v50, %v2592_v16  ;;  %vm2668_vm1 = vcmp.eq.f32.partialorder %v5721_v36, %v2592_v16  ;;  %vm2669_vm5 = vcmp.eq.f32.partialorder %v5726_v42, %v2592_v16  ;;  %2853 = vmin.xlane.f32.xlu1 %v2852_v8  ;;  %v10315_v16 = vld [vmem:[#allocation97_spill] sm:$0xff] }
 0x4c6   : > { %v7852_v14 = vsel %vm2666_vm11, 1.0, %v10295_v24  ;;  %v7855_v5 = vsel %vm2667_vm12, 1.0, %v10297_v13  ;;  %v7858_v27 = vsel %vm2668_vm1, 1.0, %v10299_v46  ;;  %v7863_v37 = vsel %vm2669_vm5, 1.0, %v10301_v34 }
 0x4c7   : > { %10296 = vst [vmem:[#allocation74_spill] sm:$0xff] %v7852_v14  ;;  %10298 = vst [vmem:[#allocation81_spill] sm:$0xff] %v7855_v5  ;;  %v7866_v2 = vsel %vm2666_vm11, 1e+30, %v6973_v62  ;;  %v7869_v40 = vsel %vm2667_vm12, 1e+30, %v6976_v4  ;;  %v2856_v24 = vmin.f32 %v2855_v22, %v7844_v21 }
 0x4c8   : > { %10300 = vst [vmem:[#allocation82_spill] sm:$0xff] %v7858_v27  ;;  %10302 = vst [vmem:[#allocation83_spill] sm:$0xff] %v7863_v37  ;;  %v7873_v13 = vsel %vm2668_vm1, 1e+30, %v6996_v61  ;;  %v7878_v46 = vsel %vm2665_vm8, 1e+30, %v6959_v52  ;;  %v2597_v27 = vpop.xlane.xlu0 %2596  ;;  %v2860_v34 = vmin.f32 %v7866_v2, %v7869_v40 }
 0x4c9   : > { %v2857_v62 = vmin.f32 %v2856_v24, %v7878_v46  ;;  %vm2670_vm6 = vcmp.eq.f32.partialorder %v5717_v51, %v2597_v27  ;;  %vm2671_vm9 = vcmp.eq.f32.partialorder %v5719_v50, %v2597_v27  ;;  %vm2672_vm10 = vcmp.eq.f32.partialorder %v5721_v36, %v2597_v27  ;;  %v10303_v4 = vld [vmem:[#allocation91_spill] sm:$0xff]  ;;  %v10307_v22 = vld [vmem:[#allocation93_spill] sm:$0xff]  ;;  %v10309_v24 = vld [vmem:[#allocation90_spill] sm:$0xff] }
 0x4ca   : > { %vm2673_vm13 = vcmp.eq.f32.partialorder %v5726_v42, %v2597_v27  ;;  %v7888_v61 = vsel %vm2670_vm6, 1.0, %v10303_v4  ;;  %v7891_v52 = vsel %vm2671_vm9, 1.0, %v10305_v57  ;;  %v7896_v8 = vsel %vm2672_vm10, 1.0, %v10307_v22 }
 0x4cb   : > { %10304 = vst [vmem:[#allocation79_spill] sm:$0xff] %v7888_v61  ;;  %10306 = vst [vmem:[#allocation84_spill] sm:$0xff] %v7891_v52  ;;  %2858 = vmin.xlane.f32.xlu0 %v2857_v62  ;;  %v7901_v37 = vsel %vm2673_vm13, 1.0, %v10309_v24  ;;  %v7904_v5 = vsel %vm2670_vm6, 1e+30, %v7021_v53  ;;  %v2861_v57 = vmin.f32 %v2860_v34, %v7873_v13  ;;  %v10311_v53 = vld [vmem:[#allocation37_spill] sm:$0xff] }
 0x4cc   : > { %10308 = vst [vmem:[#allocation85_spill] sm:$0xff] %v7896_v8  ;;  %10310 = vst [vmem:[#allocation86_spill] sm:$0xff] %v7901_v37  ;;  %v7907_v4 = vsel %vm2671_vm9, 1e+30, %v7024_v58  ;;  %v7913_v22 = vsel %vm2669_vm5, 1e+30, %v7017_v28 }
 0x4cd   : > { %v2602_v52 = vpop.xlane.xlu1 %2601  ;;  %v2865_v62 = vmin.f32 %v7904_v5, %v7907_v4  ;;  %v10313_v34 = vld [vmem:[#allocation96_spill] sm:$0xff]  ;;  %v10317_v37 = vld [vmem:[#allocation94_spill] sm:$0xff]  ;;  %v7940_v61 = vsel %vm2672_vm10, 1e+30, %v7041_v32 }
 0x4ce   : > { %vm2674_vm14 = vcmp.eq.f32.partialorder %v5717_v51, %v2602_v52  ;;  %vm2675_vm15 = vcmp.eq.f32.partialorder %v5719_v50, %v2602_v52  ;;  %vm2676_vm2 = vcmp.eq.f32.partialorder %v5721_v36, %v2602_v52  ;;  %vm2677_vm4 = vcmp.eq.f32.partialorder %v5726_v42, %v2602_v52  ;;  %v10319_v32 = vld [vmem:[#allocation98_spill] sm:$0xff] }
 0x4cf   : > { %v7922_v58 = vsel %vm2674_vm14, 1.0, %v10311_v53  ;;  %v7925_v24 = vsel %vm2675_vm15, 1.0, %v10313_v34  ;;  %v7930_v28 = vsel %vm2676_vm2, 1.0, %v10315_v16  ;;  %v7935_v8 = vsel %vm2677_vm4, 1.0, %v10317_v37  ;;  %v2607_v16 = vpop.xlane.xlu0 %2606 }
 0x4d0   : > { %10312 = vst [vmem:[#allocation26_spill] sm:$0xff] %v7922_v58  ;;  %10314 = vst [vmem:[#allocation33_spill] sm:$0xff] %v7925_v24  ;;  %v7943_v53 = vsel %vm2674_vm14, 1e+30, %v7065_v10  ;;  %v7946_v34 = vsel %vm2675_vm15, 1e+30, %v7070_v54  ;;  %v2862_v24 = vmin.f32 %v2861_v57, %v7913_v22  ;;  %vm2678_vm7 = vcmp.eq.f32.partialorder %v5717_v51, %v2607_v16 }
 0x4d1   : > { %10316 = vst [vmem:[#allocation87_spill] sm:$0xff] %v7930_v28  ;;  %10318 = vst [vmem:[#allocation88_spill] sm:$0xff] %v7935_v8  ;;  %vm2679_vm8 = vcmp.eq.f32.partialorder %v5719_v50, %v2607_v16  ;;  %vm2680_vm11 = vcmp.eq.f32.partialorder %v5721_v36, %v2607_v16  ;;  %vm2681_vm12 = vcmp.eq.f32.partialorder %v5726_v42, %v2607_v16  ;;  %v7954_v37 = vsel %vm2678_vm7, 1.0, %v10319_v32  ;;  %v10321_v10 = vld [vmem:[#allocation99_spill] sm:$0xff]  ;;  %v10323_v54 = vld [vmem:[#allocation100_spill] sm:$0xff] }
 0x4d2   : > { %2863 = vmin.xlane.f32.xlu1 %v2862_v24  ;;  %10320 = vst [vmem:[#allocation89_spill] sm:$0xff] %v7954_v37  ;;  %v7957_v8 = vsel %vm2679_vm8, 1.0, %v10321_v10  ;;  %v7960_v28 = vsel %vm2680_vm11, 1.0, %v10323_v54  ;;  %v10325_v57 = vld [vmem:[#allocation95_spill] sm:$0xff]  ;;  %v7968_v14 = vsel %vm2678_vm7, 1e+30, %v7096_v3  ;;  %v2866_v24 = vmin.f32 %v2865_v62, %v7940_v61 }
 0x4d3   : > { %10322 = vst [vmem:[#allocation48_spill] sm:$0xff] %v7957_v8  ;;  %10324 = vst [vmem:[#allocation91_spill] sm:$0xff] %v7960_v28  ;;  %v7965_v58 = vsel %vm2681_vm12, 1.0, %v10325_v57  ;;  %v7971_v59 = vsel %vm2679_vm8, 1e+30, %v7101_v45  ;;  %v2870_v10 = vmin.f32 %v7943_v53, %v7946_v34  ;;  %v10333_v28 = vld [vmem:[#allocation101_spill] sm:$0xff] }
 0x4d4   : > { %10326 = vst [vmem:[#allocation92_spill] sm:$0xff] %v7965_v58  ;;  %v7977_v32 = vsel %vm2673_vm13, 1e+30, %v7059_v41  ;;  %v7984_v54 = vsel %vm2676_vm2, 1e+30, %v7081_v7  ;;  %v2612_v57 = vpop.xlane.xlu1 %2611  ;;  %v2875_v62 = vmin.f32 %v7968_v14, %v7971_v59  ;;  %v10327_v41 = vld [vmem:[#allocation49_spill] sm:$0xff] }
 0x4d5   : > { %v7987_v3 = vsel %vm2680_vm11, 1e+30, %v7111_v1  ;;  %v2867_v45 = vmin.f32 %v2866_v24, %v7977_v32  ;;  %vm2682_vm1 = vcmp.eq.f32.partialorder %v5717_v51, %v2612_v57  ;;  %vm2683_vm5 = vcmp.eq.f32.partialorder %v5719_v50, %v2612_v57  ;;  %v10329_v1 = vld [vmem:[#allocation42_spill] sm:$0xff]  ;;  %v10331_v24 = vld [vmem:[#allocation44_spill] sm:$0xff] }
 0x4d6   : > { %vm2684_vm6 = vcmp.eq.f32.partialorder %v5721_v36, %v2612_v57  ;;  %vm2685_vm9 = vcmp.eq.f32.partialorder %v5726_v42, %v2612_v57  ;;  %v7997_v7 = vsel %vm2682_vm1, 1.0, %v10327_v41  ;;  %v8000_v27 = vsel %vm2683_vm5, 1.0, %v10329_v1  ;;  %v10347_v16 = vld [vmem:[#allocation10_spill] sm:$0xff] }
 0x4d7   : > { %2868 = vmin.xlane.f32.xlu0 %v2867_v45  ;;  %10328 = vst [vmem:[#allocation93_spill] sm:$0xff] %v7997_v7  ;;  %10330 = vst [vmem:[#allocation90_spill] sm:$0xff] %v8000_v27  ;;  %v8005_v58 = vsel %vm2684_vm6, 1.0, %v10331_v24  ;;  %v8010_v8 = vsel %vm2685_vm9, 1.0, %v10333_v28  ;;  %v8013_v37 = vsel %vm2682_vm1, 1e+30, %v7161_v48  ;;  %v2871_v1 = vmin.f32 %v2870_v10, %v7984_v54 }
 0x4d8   : > { %10332 = vst [vmem:[#allocation37_spill] sm:$0xff] %v8005_v58  ;;  %10334 = vst [vmem:[#allocation96_spill] sm:$0xff] %v8010_v8  ;;  %v8016_v45 = vsel %vm2683_vm5, 1e+30, %v7166_v63  ;;  %v8021_v41 = vsel %vm2677_vm4, 1e+30, %v7106_v18  ;;  %v2617_v24 = vpop.xlane.xlu0 %2616 }
 0x4d9   : > { %vm2686_vm10 = vcmp.eq.f32.partialorder %v5717_v51, %v2617_v24  ;;  %vm2687_vm13 = vcmp.eq.f32.partialorder %v5719_v50, %v2617_v24  ;;  %vm2688_vm14 = vcmp.eq.f32.partialorder %v5721_v36, %v2617_v24  ;;  %vm2689_vm15 = vcmp.eq.f32.partialorder %v5726_v42, %v2617_v24  ;;  %v10335_v63 = vld [vmem:[#allocation35_spill] sm:$0xff]  ;;  %v10337_v8 = vld [vmem:[#allocation17_spill] sm:$0xff]  ;;  %v10339_v18 = vld [vmem:[#allocation36_spill] sm:$0xff] }
 0x4da   : > { %v2872_v48 = vmin.f32 %v2871_v1, %v8021_v41  ;;  %v8030_v28 = vsel %vm2686_vm10, 1.0, %v10335_v63  ;;  %v8033_v52 = vsel %vm2687_vm13, 1.0, %v10337_v8  ;;  %v8036_v58 = vsel %vm2688_vm14, 1.0, %v10339_v18  ;;  %v10341_v10 = vld [vmem:[#allocation27_spill] sm:$0xff] }
 0x4db   : > { %10336 = vst [vmem:[#allocation97_spill] sm:$0xff] %v8030_v28  ;;  %10338 = vst [vmem:[#allocation94_spill] sm:$0xff] %v8033_v52  ;;  %v8041_v27 = vsel %vm2689_vm15, 1.0, %v10341_v10  ;;  %v8044_v7 = vsel %vm2686_vm10, 1e+30, %v7193_v29  ;;  %v2876_v1 = vmin.f32 %v2875_v62, %v7987_v3  ;;  %v2880_v63 = vmin.f32 %v8013_v37, %v8016_v45  ;;  %v10344_v29 = vld [vmem:[#allocation41_spill] sm:$0xff] }
 0x4dc   : > { %10340 = vst [vmem:[#allocation98_spill] sm:$0xff] %v8036_v58  ;;  %10342 = vst [vmem:[#allocation99_spill] sm:$0xff] %v8041_v27  ;;  %v8047_v0 = vsel %vm2687_vm13, 1e+30, %v7196_v33  ;;  %2873 = vmin.xlane.f32.xlu1 %v2872_v48  ;;  %v8053_v8 = vsel %vm2681_vm12, 1e+30, %v7137_v12 }
 0x4dd   : > { %10343 = vst [vmem:[#allocation100_spill] sm:$0xff] %v8047_v0  ;;  %v8060_v18 = vsel %vm2684_vm6, 1e+30, %v7177_v19  ;;  %v8063_v10 = vsel %vm2688_vm14, 1e+30, %v10344_v29  ;;  %v2877_v33 = vmin.f32 %v2876_v1, %v8053_v8  ;;  %v2885_v48 = vmin.f32 %v8044_v7, %v8047_v0  ;;  %v10345_v12 = vld [vmem:[#allocation39_spill] sm:$0xff] }
 0x4de   : > { %v2622_v62 = vpop.xlane.xlu1 %2621  ;;  %v10349_v1 = vld [vmem:[#allocation12_spill] sm:$0xff]  ;;  %v10351_v58 = vld [vmem:[#allocation38_spill] sm:$0xff] }
 0x4df   : > { %vm2690_vm2 = vcmp.eq.f32.partialorder %v5717_v51, %v2622_v62  ;;  %vm2691_vm4 = vcmp.eq.f32.partialorder %v5719_v50, %v2622_v62  ;;  %vm2692_vm7 = vcmp.eq.f32.partialorder %v5721_v36, %v2622_v62  ;;  %vm2693_vm8 = vcmp.eq.f32.partialorder %v5726_v42, %v2622_v62  ;;  %2878 = vmin.xlane.f32.xlu0 %v2877_v33 }
 0x4e0   : > { %v8073_v19 = vsel %vm2690_vm2, 1.0, %v10345_v12  ;;  %v8076_v29 = vsel %vm2691_vm4, 1.0, %v10347_v16  ;;  %v8081_v27 = vsel %vm2692_vm7, 1.0, %v10349_v1  ;;  %v8086_v52 = vsel %vm2693_vm8, 1.0, %v10351_v58  ;;  %v10354_v12 = vld [vmem:[#allocation40_spill] sm:$0xff] }
 0x4e1   : > { %10346 = vst [vmem:[#allocation95_spill] sm:$0xff] %v8073_v19  ;;  %10348 = vst [vmem:[#allocation49_spill] sm:$0xff] %v8076_v29  ;;  %v8089_v28 = vsel %vm2690_vm2, 1e+30, %v7253_v55  ;;  %v8092_v33 = vsel %vm2691_vm4, 1e+30, %v10260_v30  ;;  %v2881_v29 = vmin.f32 %v2880_v63, %v8060_v18  ;;  %v2627_v1 = vpop.xlane.xlu0 %2626 }
 0x4e2   : > { %10350 = vst [vmem:[#allocation42_spill] sm:$0xff] %v8081_v27  ;;  %10352 = vst [vmem:[#allocation44_spill] sm:$0xff] %v8086_v52  ;;  %v8097_v16 = vsel %vm2685_vm9, 1e+30, %v10354_v12  ;;  %vm2694_vm11 = vcmp.eq.f32.partialorder %v5717_v51, %v2627_v1  ;;  %vm2695_vm12 = vcmp.eq.f32.partialorder %v5719_v50, %v2627_v1  ;;  %vm2696_vm1 = vcmp.eq.f32.partialorder %v5721_v36, %v2627_v1  ;;  %v10356_v30 = vld [vmem:[#allocation13_spill] sm:$0xff]  ;;  %v10358_v52 = vld [vmem:[#allocation15_spill] sm:$0xff] }
 0x4e3   : > { %10353 = vst [vmem:[#allocation101_spill] sm:$0xff] %v8092_v33  ;;  %10355 = vst [vmem:[#allocation35_spill] sm:$0xff] %v8097_v16  ;;  %vm2697_vm5 = vcmp.eq.f32.partialorder %v5726_v42, %v2627_v1  ;;  %v2882_v55 = vmin.f32 %v2881_v29, %v8097_v16  ;;  %v8106_v58 = vsel %vm2694_vm11, 1.0, %v10356_v30  ;;  %v8109_v57 = vsel %vm2695_vm12, 1.0, %v10358_v52  ;;  %v10360_v12 = vld [vmem:[#allocation34_spill] sm:$0xff]  ;;  %v10362_v63 = vld [vmem:[#allocation7_spill] sm:$0xff] }
 0x4e4   : > { %10357 = vst [vmem:[#allocation17_spill] sm:$0xff] %v8106_v58  ;;  %10359 = vst [vmem:[#allocation36_spill] sm:$0xff] %v8109_v57  ;;  %v8112_v27 = vsel %vm2696_vm1, 1.0, %v10360_v12  ;;  %v8117_v19 = vsel %vm2697_vm5, 1.0, %v10362_v63  ;;  %v8120_v23 = vsel %vm2694_vm11, 1e+30, %v10262_v35  ;;  %v2886_v29 = vmin.f32 %v2885_v48, %v8063_v10 }
 0x4e5   : > { %10361 = vst [vmem:[#allocation27_spill] sm:$0xff] %v8112_v27  ;;  %10363 = vst [vmem:[#allocation41_spill] sm:$0xff] %v8117_v19  ;;  %v8123_v0 = vsel %vm2695_vm12, 1e+30, %v10263_v49  ;;  %2883 = vmin.xlane.f32.xlu1 %v2882_v55  ;;  %v8129_v52 = vsel %vm2689_vm15, 1e+30, %v7234_v47  ;;  %v2890_v30 = vmin.f32 %v8089_v28, %v8092_v33 }
 0x4e6   : > { %10364 = vst [vmem:[#allocation39_spill] sm:$0xff] %v8120_v23  ;;  %10365 = vst [vmem:[#allocation10_spill] sm:$0xff] %v8123_v0  ;;  %v10367_v12 = vld [vmem:[#allocation22_spill] sm:$0xff]  ;;  %v10369_v35 = vld [vmem:[#allocation45_spill] sm:$0xff]  ;;  %v2887_v49 = vmin.f32 %v2886_v29, %v8129_v52  ;;  %v2632_v48 = vpop.xlane.xlu1 %2631  ;;  %v2895_v55 = vmin.f32 %v8120_v23, %v8123_v0 }
 0x4e7   : > { %10366 = vst [vmem:[#allocation12_spill] sm:$0xff] %v8129_v52  ;;  %v8136_v63 = vsel %vm2692_vm7, 1e+30, %v10367_v12  ;;  %v8139_v19 = vsel %vm2696_vm1, 1e+30, %v10369_v35  ;;  %vm2698_vm6 = vcmp.eq.f32.partialorder %v5717_v51, %v2632_v48  ;;  %vm2699_vm9 = vcmp.eq.f32.partialorder %v5719_v50, %v2632_v48  ;;  %v10371_v47 = vld [vmem:[#allocation14_spill] sm:$0xff] }
 0x4e8   : > { %10368 = vst [vmem:[#allocation38_spill] sm:$0xff] %v8136_v63  ;;  %10370 = vst [vmem:[#allocation40_spill] sm:$0xff] %v8139_v19  ;;  %vm2700_vm10 = vcmp.eq.f32.partialorder %v5721_v36, %v2632_v48  ;;  %vm2701_vm13 = vcmp.eq.f32.partialorder %v5726_v42, %v2632_v48  ;;  %2888 = vmin.xlane.f32.xlu0 %v2887_v49  ;;  %v8149_v24 = vsel %vm2698_vm6, 1.0, %v10371_v47  ;;  %v10373_v12 = vld [vmem:[#allocation20_spill] sm:$0xff]  ;;  %v10375_v29 = vld [vmem:[#allocation21_spill] sm:$0xff] }
 0x4e9   : > { %10372 = vst [vmem:[#allocation13_spill] sm:$0xff] %v8149_v24  ;;  %v8152_v35 = vsel %vm2699_vm9, 1.0, %v10373_v12  ;;  %v8157_v27 = vsel %vm2700_vm10, 1.0, %v10375_v29  ;;  %v10377_v57 = vld [vmem:[#allocation47_spill] sm:$0xff]  ;;  %v8165_v0 = vsel %vm2698_vm6, 1e+30, %v7345_v31  ;;  %v2637_v29 = vpop.xlane.xlu0 %2636 }
 0x4ea   : > { %10374 = vst [vmem:[#allocation15_spill] sm:$0xff] %v8152_v35  ;;  %10376 = vst [vmem:[#allocation34_spill] sm:$0xff] %v8157_v27  ;;  %v8162_v58 = vsel %vm2701_vm13, 1.0, %v10377_v57  ;;  %v8168_v49 = vsel %vm2699_vm9, 1e+30, %v7350_v56  ;;  %v10381_v47 = vld [vmem:[#allocation78_spill] sm:$0xff]  ;;  %v2891_v35 = vmin.f32 %v2890_v30, %v8136_v63  ;;  %vm2702_vm14 = vcmp.eq.f32.partialorder %v5717_v51, %v2637_v29 }
 0x4eb   : > { %10378 = vst [vmem:[#allocation7_spill] sm:$0xff] %v8162_v58  ;;  %10379 = vst [vmem:[#allocation22_spill] sm:$0xff] %v8165_v0  ;;  %v8173_v12 = vsel %vm2693_vm8, 1e+30, %v10381_v47  ;;  %vm2703_vm15 = vcmp.eq.f32.partialorder %v5719_v50, %v2637_v29  ;;  %vm2704_vm2 = vcmp.eq.f32.partialorder %v5721_v36, %v2637_v29  ;;  %vm2705_vm4 = vcmp.eq.f32.partialorder %v5726_v42, %v2637_v29  ;;  %v10383_v56 = vld [vmem:[#allocation23_spill] sm:$0xff]  ;;  %v10385_v58 = vld [vmem:[#allocation46_spill] sm:$0xff] }
 0x4ec   : > { %10380 = vst [vmem:[#allocation45_spill] sm:$0xff] %v8168_v49  ;;  %10382 = vst [vmem:[#allocation14_spill] sm:$0xff] %v8173_v12  ;;  %v2892_v31 = vmin.f32 %v2891_v35, %v8173_v12  ;;  %v8182_v57 = vsel %vm2702_vm14, 1.0, %v10383_v56  ;;  %v8185_v62 = vsel %vm2703_vm15, 1.0, %v10385_v58  ;;  %v10387_v47 = vld [vmem:[#allocation76_spill] sm:$0xff]  ;;  %v2896_v56 = vmin.f32 %v2895_v55, %v8139_v19 }
 0x4ed   : > { %10384 = vst [vmem:[#allocation20_spill] sm:$0xff] %v8182_v57  ;;  %10386 = vst [vmem:[#allocation21_spill] sm:$0xff] %v8185_v62  ;;  %v8190_v30 = vsel %vm2704_vm2, 1.0, %v10387_v47  ;;  %v10389_v27 = vld [vmem:[#allocation16_spill] sm:$0xff]  ;;  %v8198_v23 = vsel %vm2702_vm14, 1e+30, %v10265_v9  ;;  %v2900_v47 = vmin.f32 %v8165_v0, %v8168_v49 }
 0x4ee   : > { %10388 = vst [vmem:[#allocation47_spill] sm:$0xff] %v8190_v30  ;;  %v8195_v24 = vsel %vm2705_vm4, 1.0, %v10389_v27  ;;  %10391 = vst [vmem:[#allocation23_spill] sm:$0xff] %v8198_v23  ;;  %v8201_v35 = vsel %vm2703_vm15, 1e+30, %v10266_v6  ;;  %2893 = vmin.xlane.f32.xlu1 %v2892_v31  ;;  %v10394_v30 = vld [vmem:[#allocation43_spill] sm:$0xff] }
 0x4ef   : > { %10390 = vst [vmem:[#allocation78_spill] sm:$0xff] %v8195_v24  ;;  %10392 = vst [vmem:[#allocation46_spill] sm:$0xff] %v8201_v35  ;;  %v8207_v58 = vsel %vm2697_vm5, 1e+30, %v7320_v26  ;;  %v8214_v27 = vsel %vm2700_vm10, 1e+30, %v10394_v30  ;;  %v2905_v55 = vmin.f32 %v8198_v23, %v8201_v35 }
 0x4f0   : > { %10393 = vst [vmem:[#allocation76_spill] sm:$0xff] %v8207_v58  ;;  %10395 = vst [vmem:[#allocation16_spill] sm:$0xff] %v8214_v27  ;;  %v2897_v9 = vmin.f32 %v2896_v56, %v8207_v58  ;;  %v2642_v6 = vpop.xlane.xlu1 %2641  ;;  %v10396_v26 = vld [vmem:[#allocation77_spill] sm:$0xff]  ;;  %v10398_v31 = vld [vmem:[#allocation103_spill] sm:$0xff]  ;;  %v2901_v23 = vmin.f32 %v2900_v47, %v8214_v27  ;;  %v4179_v47 = vadd.f32 %v7747_v38, %v7773_v15 }
 0x4f1   : > { %vm2706_vm7 = vcmp.eq.f32.partialorder %v5717_v51, %v2642_v6  ;;  %vm2707_vm8 = vcmp.eq.f32.partialorder %v5719_v50, %v2642_v6  ;;  %vm2708_vm11 = vcmp.eq.f32.partialorder %v5721_v36, %v2642_v6  ;;  %vm2709_vm12 = vcmp.eq.f32.partialorder %v5726_v42, %v2642_v6  ;;  %v10400_v56 = vld [vmem:[#allocation104_spill] sm:$0xff]  ;;  %v10402_v62 = vld [vmem:[#allocation102_spill] sm:$0xff] }
 0x4f2   : > { %2898 = vmin.xlane.f32.xlu0 %v2897_v9  ;;  %v8224_v1 = vsel %vm2706_vm7, 1.0, %v10396_v26  ;;  %v8227_v30 = vsel %vm2707_vm8, 1.0, %v10398_v31  ;;  %v8232_v24 = vsel %vm2708_vm11, 1.0, %v10400_v56  ;;  %v8237_v57 = vsel %vm2709_vm12, 1.0, %v10402_v62  ;;  %v10404_v35 = vld [vmem:[#allocation18_spill] sm:$0xff]  ;;  %v10406_v26 = vld [vmem:[#allocation51_spill] sm:$0xff] }
 0x4f3   : > { %10397 = vst [vmem:[#allocation43_spill] sm:$0xff] %v8224_v1  ;;  %10399 = vst [vmem:[#allocation77_spill] sm:$0xff] %v8227_v30  ;;  %v8242_v9 = vsel %vm2704_vm2, 1e+30, %v10404_v35  ;;  %v8245_v1 = vsel %vm2706_vm7, 1e+30, %v10406_v26 }
 0x4f4   : > { %10401 = vst [vmem:[#allocation103_spill] sm:$0xff] %v8232_v24  ;;  %10403 = vst [vmem:[#allocation104_spill] sm:$0xff] %v8237_v57  ;;  %v10408_v31 = vld [vmem:[#allocation52_spill] sm:$0xff]  ;;  %v10410_v56 = vld [vmem:[#allocation19_spill] sm:$0xff]  ;;  %v2906_v62 = vmin.f32 %v2905_v55, %v8242_v9  ;;  %v2647_v49 = vpop.xlane.xlu0 %2646 }
 0x4f5   : > { %10405 = vst [vmem:[#allocation102_spill] sm:$0xff] %v8242_v9  ;;  %10407 = vst [vmem:[#allocation18_spill] sm:$0xff] %v8245_v1  ;;  %v8248_v30 = vsel %vm2707_vm8, 1e+30, %v10408_v31  ;;  %v8254_v24 = vsel %vm2701_vm13, 1e+30, %v10410_v56  ;;  %vm2710_vm1 = vcmp.eq.f32.partialorder %v5717_v51, %v2647_v49  ;;  %vm2711_vm5 = vcmp.eq.f32.partialorder %v5719_v50, %v2647_v49 }
 0x4f6   : > { %10409 = vst [vmem:[#allocation51_spill] sm:$0xff] %v8248_v30  ;;  %10411 = vst [vmem:[#allocation52_spill] sm:$0xff] %v8254_v24  ;;  %v2902_v57 = vmin.f32 %v2901_v23, %v8254_v24  ;;  %v10412_v35 = vld [vmem:[#allocation50_spill] sm:$0xff]  ;;  %v2910_v31 = vmin.f32 %v8245_v1, %v8248_v30  ;;  %vm2712_vm6 = vcmp.eq.f32.partialorder %v5721_v36, %v2647_v49  ;;  %v10414_v23 = vld [vmem:[#allocation67_spill] sm:$0xff] }
 0x4f7   : > { %v8261_v26 = vsel %vm2705_vm4, 1e+30, %v10412_v35  ;;  %vm2713_vm9 = vcmp.eq.f32.partialorder %v5726_v42, %v2647_v49  ;;  %v8272_v48 = vsel %vm2710_vm1, 1.0, %v10414_v23  ;;  %v10416_v29 = vld [vmem:[#allocation68_spill] sm:$0xff]  ;;  %v10418_v56 = vld [vmem:[#allocation54_spill] sm:$0xff]  ;;  %v10420_v35 = vld [vmem:[#allocation57_spill] sm:$0xff] }
 0x4f8   : > { %10413 = vst [vmem:[#allocation19_spill] sm:$0xff] %v8261_v26  ;;  %2903 = vmin.xlane.f32.xlu1 %v2902_v57  ;;  %10415 = vst [vmem:[#allocation50_spill] sm:$0xff] %v8272_v48  ;;  %v8277_v55 = vsel %vm2711_vm5, 1.0, %v10416_v29  ;;  %v8282_v15 = vsel %vm2712_vm6, 1.0, %v10418_v56  ;;  %v8287_v30 = vsel %vm2713_vm9, 1.0, %v10420_v35  ;;  %v10422_v1 = vld [vmem:[#allocation53_spill] sm:$0xff]  ;;  %v2907_v29 = vmin.f32 %v2906_v62, %v8261_v26 }
 0x4f9   : > { %10417 = vst [vmem:[#allocation67_spill] sm:$0xff] %v8277_v55  ;;  %10419 = vst [vmem:[#allocation68_spill] sm:$0xff] %v8282_v15  ;;  %v8292_v57 = vsel %vm2708_vm11, 1e+30, %v10422_v1  ;;  %v10424_v23 = vld [vmem:[#allocation55_spill] sm:$0xff]  ;;  %v2652_v55 = vpop.xlane.xlu1 %2651  ;;  %v10425_v9 = vld [vmem:[#allocation28_spill] sm:$0xff] }
 0x4fa   : > { %10421 = vst [vmem:[#allocation54_spill] sm:$0xff] %v8287_v30  ;;  %10423 = vst [vmem:[#allocation57_spill] sm:$0xff] %v8292_v57  ;;  %v8295_v48 = vsel %vm2710_vm1, 1e+30, %v10424_v23  ;;  %v8301_v56 = vsel %vm2709_vm12, 1e+30, %v10425_v9  ;;  %vm2714_vm10 = vcmp.eq.f32.partialorder %v5717_v51, %v2652_v55  ;;  %vm2715_vm13 = vcmp.eq.f32.partialorder %v5719_v50, %v2652_v55  ;;  %2908 = vmin.xlane.f32.xlu0 %v2907_v29 }
 0x4fb   : > { %10426 = vst [vmem:[#allocation53_spill] sm:$0xff] %v8301_v56  ;;  %vm2716_vm14 = vcmp.eq.f32.partialorder %v5721_v36, %v2652_v55  ;;  %vm2717_vm15 = vcmp.eq.f32.partialorder %v5726_v42, %v2652_v55  ;;  %v10427_v1 = vld [vmem:[#allocation69_spill] sm:$0xff]  ;;  %v10429_v23 = vld [vmem:[#allocation70_spill] sm:$0xff]  ;;  %v10431_v30 = vld [vmem:[#allocation59_spill] sm:$0xff]  ;;  %v2657_v26 = vpop.xlane.xlu0 %2656 }
 0x4fc   : > { %v8308_v35 = vsel %vm2714_vm10, 1.0, %v10427_v1  ;;  %v8311_v62 = vsel %vm2715_vm13, 1.0, %v10429_v23  ;;  %v8316_v6 = vsel %vm2716_vm14, 1.0, %v10431_v30  ;;  %v10433_v9 = vld [vmem:[#allocation61_spill] sm:$0xff]  ;;  %v10435_v24 = vld [vmem:[#allocation56_spill] sm:$0xff]  ;;  %v10439_v23 = vld [vmem:[#allocation62_spill] sm:$0xff]  ;;  %v2911_v30 = vmin.f32 %v2910_v31, %v8292_v57 }
 0x4fd   : > { %10428 = vst [vmem:[#allocation55_spill] sm:$0xff] %v8308_v35  ;;  %10430 = vst [vmem:[#allocation28_spill] sm:$0xff] %v8311_v62  ;;  %v8321_v15 = vsel %vm2717_vm15, 1.0, %v10433_v9  ;;  %v8326_v29 = vsel %vm2711_vm5, 1e+30, %v10435_v24  ;;  %v10437_v1 = vld [vmem:[#allocation60_spill] sm:$0xff]  ;;  %vm2718_vm2 = vcmp.eq.f32.partialorder %v5717_v51, %v2657_v26  ;;  %vm2719_vm4 = vcmp.eq.f32.partialorder %v5719_v50, %v2657_v26  ;;  %v4276_v9 = vpop.permute.xlu1 %4275 }
 0x4fe   : > { %10432 = vst [vmem:[#allocation69_spill] sm:$0xff] %v8316_v6  ;;  %10434 = vst [vmem:[#allocation70_spill] sm:$0xff] %v8321_v15  ;;  %v8329_v35 = vsel %vm2714_vm10, 1e+30, %v10437_v1  ;;  %v8332_v62 = vsel %vm2715_vm13, 1e+30, %v10439_v23  ;;  %vm2720_vm7 = vcmp.eq.f32.partialorder %v5721_v36, %v2657_v26  ;;  %vm2721_vm8 = vcmp.eq.f32.partialorder %v5726_v42, %v2657_v26 }
 0x4ff   : > { %10436 = vst [vmem:[#allocation59_spill] sm:$0xff] %v8326_v29  ;;  %10438 = vst [vmem:[#allocation61_spill] sm:$0xff] %v8329_v35  ;;  %v2912_v24 = vmin.f32 %v2911_v30, %v8301_v56  ;;  %v10441_v15 = vld [vmem:[#allocation71_spill] sm:$0xff]  ;;  %v10443_v1 = vld [vmem:[#allocation73_spill] sm:$0xff] }
 0x500   : > { %10440 = vst [vmem:[#allocation56_spill] sm:$0xff] %v8332_v62  ;;  %v8341_v6 = vsel %vm2718_vm2, 1.0, %v10441_v15  ;;  %v8344_v27 = vsel %vm2719_vm4, 1.0, %v10443_v1  ;;  %v10445_v23 = vld [vmem:[#allocation72_spill] sm:$0xff]  ;;  %v10449_v58 = vld [vmem:[#allocation66_spill] sm:$0xff]  ;;  %v2915_v15 = vmin.f32 %v8295_v48, %v8326_v29 }
 0x501   : > { %10442 = vst [vmem:[#allocation60_spill] sm:$0xff] %v8341_v6  ;;  %10444 = vst [vmem:[#allocation62_spill] sm:$0xff] %v8344_v27  ;;  %v8349_v31 = vsel %vm2720_vm7, 1.0, %v10445_v23  ;;  %v10447_v57 = vld [vmem:[#allocation64_spill] sm:$0xff]  ;;  %v8357_v19 = vsel %vm2718_vm2, 1e+30, %v10449_v58  ;;  %2913 = vmin.xlane.f32.xlu1 %v2912_v24 }
 0x502   : > { %10446 = vst [vmem:[#allocation71_spill] sm:$0xff] %v8349_v31  ;;  %v8354_v0 = vsel %vm2721_vm8, 1.0, %v10447_v57  ;;  %10450 = vst [vmem:[#allocation72_spill] sm:$0xff] %v8357_v19  ;;  %v10451_v30 = vld [vmem:[#allocation30_spill] sm:$0xff]  ;;  %v4325_v31 = vmul.f32 %v4276_v9, %v4179_v47  ;;  %v4174_v57 = vadd.f32 %v7747_v38, %v7776_v20  ;;  %v10455_v27 = vld [vmem:[#allocation63_spill] sm:$0xff] }
 0x503   : > { %10448 = vst [vmem:[#allocation73_spill] sm:$0xff] %v8354_v0  ;;  %v8360_v56 = vsel %vm2719_vm4, 1e+30, %v10451_v30  ;;  %v10453_v1 = vld [vmem:[#allocation58_spill] sm:$0xff]  ;;  %v2920_v30 = vmin.f32 %v8329_v35, %v8332_v62  ;;  %v8379_v6 = vsel %vm2716_vm14, 1e+30, %v10455_v27 }
 0x504   : > { %10452 = vst [vmem:[#allocation64_spill] sm:$0xff] %v8360_v56  ;;  %v8367_v23 = vsel %vm2712_vm6, 1e+30, %v10453_v1  ;;  %v2925_v0 = vmin.f32 %v8357_v19, %v8360_v56  ;;  %10456 = vst [vmem:[#allocation30_spill] sm:$0xff] %v8379_v6  ;;  %v10457_v1 = vld [vmem:[#allocation32_spill] sm:$0xff]  ;;  %v10459_v9 = vld [vmem:[#allocation29_spill] sm:$0xff]  ;;  %v4755_v20 = vpack.c.bf16 %v4325_v31, %v4325_v31  ;;  %v4271_v56 = vpop.permute.xlu0 %4270 }
 0x505   : > { %10454 = vst [vmem:[#allocation66_spill] sm:$0xff] %v8367_v23  ;;  %v2916_v58 = vmin.f32 %v2915_v15, %v8367_v23  ;;  %v8384_v47 = vsel %vm2720_vm7, 1e+30, %v10457_v1  ;;  %v8389_v38 = vsel %vm2713_vm9, 1e+30, %v10459_v9  ;;  %v2921_v15 = vmin.f32 %v2920_v30, %v8379_v6  ;;  %v10460_v1 = vld [vmem:[#allocation31_spill] sm:$0xff] }
 0x506   : > { %10458 = vst [vmem:[#allocation58_spill] sm:$0xff] %v8384_v47  ;;  %v2926_v27 = vmin.f32 %v2925_v0, %v8384_v47  ;;  %4406 = vst.msk [vmem:[%s6633_s11 + $0x1c] sm:$0xf] %vm4398_vm3, %v4755_v20  ;;  %v8399_v19 = vsel %vm2717_vm15, 1e+30, %v10460_v1  ;;  %v4324_v49 = vmul.f32 %v4271_v56, %v4174_v57  ;;  %v4231_v55 = vld [vmem:[%s6487_s21 + $0x48] sm:$0xff] }
 0x507   : > { %v2917_v24 = vmin.f32 %v2916_v58, %v8389_v38  ;;  %10461 = vst [vmem:[#allocation63_spill] sm:$0xff] %v8399_v19  ;;  %v8404_v31 = vsel %vm2721_vm8, 1e+30, %v7603_v43  ;;  %v2922_v58 = vmin.f32 %v2921_v15, %v8399_v19  ;;  %v8411_v9 = vpop.f32.mrb[32].mxu1  ;;  %v4230_v56 = vld [vmem:[%s6487_s21 + $0x40] sm:$0xff]  ;;  %v4015_v26 = vld [vmem:[%s5707_s27 + $0x68] sm:$0xff] }
 0x508   : > { %v2927_v0 = vmin.f32 %v2926_v27, %v8404_v31  ;;  %v4754_v30 = vpack.c.bf16 %v4324_v49, %v4324_v49  ;;  %v8414_v57 = vpop.f32.mrb[33].mxu1  ;;  %v4014_v43 = vld [vmem:[%s5707_s27 + $0x60] sm:$0xff] }
 0x509   : > { %2918 = vmin.xlane.f32.xlu0 %v2917_v24  ;;  %2923 = vmin.xlane.f32.xlu1 %v2922_v58 }
 0x50a   : > { %4405 = vst.msk [vmem:[%s6633_s11 + $0x18] sm:$0xf] %vm4398_vm3, %v4754_v30  ;;  %4874 = vmatprep.mubr.msk.f32.mxu1 %vm744_vm0, %v4014_v43 }
 0x50b   : > { %4875 = vmatmul.mubr.msk.f32.gmra.mrb[36].mxu1 %vm744_vm0, %v4015_v26 }
 0x50d   : > { %2928 = vmin.xlane.f32.xlu0 %v2927_v0 }
 0x51a   : > { %4285 = vperm.xlu1 %4954, %v4231_v55  }
 0x523   : > { %4280 = vperm.xlu0 %4953, %v4230_v56  }
 0x552   : > { %v2854_v20 = vpop.xlane.xlu1 %2853 }
 0x553   : > { %vm2930_vm11 = vcmp.eq.f32.partialorder %v7801_v39, %v2854_v20  ;;  %vm2931_vm12 = vcmp.eq.f32.partialorder %v7804_v25, %v2854_v20  ;;  %vm2932_vm1 = vcmp.eq.f32.partialorder %v7807_v11, %v2854_v20  ;;  %vm2933_vm5 = vcmp.eq.f32.partialorder %v7839_v44, %v2854_v20 }
 0x554   : > { %v2994_v24 = vsel %vm2930_vm11, %v5717_v51, 512.0  ;;  %v2995_v15 = vsel %vm2931_vm12, %v5719_v50, 512.0  ;;  %v2996_v1 = vsel %vm2932_vm1, %v5721_v36, 512.0  ;;  %v2997_v0 = vsel %vm2933_vm5, %v5726_v42, 512.0 }
 0x555   : > { %v3058_v27 = vmin.f32 %v2994_v24, %v2995_v15 }
 0x557   : > { %v3059_v58 = vmin.f32 %v3058_v27, %v2996_v1 }
 0x558   : > { %v2859_v49 = vpop.xlane.xlu0 %2858 }
 0x559   : > { %vm2934_vm6 = vcmp.eq.f32.partialorder %v7830_v60, %v2859_v49  ;;  %vm2935_vm9 = vcmp.eq.f32.partialorder %v7833_v17, %v2859_v49  ;;  %vm2936_vm10 = vcmp.eq.f32.partialorder %v7844_v21, %v2859_v49  ;;  %v3060_v56 = vmin.f32 %v3059_v58, %v2997_v0 }
 0x55a   : > { %v2998_v30 = vsel %vm2934_vm6, %v5717_v51, 512.0  ;;  %v2999_v55 = vsel %vm2935_vm9, %v5719_v50, 512.0  ;;  %vm2937_vm13 = vcmp.eq.f32.partialorder %v7878_v46, %v2859_v49  ;;  %v3000_v26 = vsel %vm2936_vm10, %v5721_v36, 512.0 }
 0x55b   : > { %v3063_v43 = vmin.f32 %v2998_v30, %v2999_v55  ;;  %3061 = vmin.xlane.f32.xlu1 %v3060_v56  ;;  %v3001_v15 = vsel %vm2937_vm13, %v5726_v42, 512.0 }
 0x55d   : > { %v3064_v20 = vmin.f32 %v3063_v43, %v3000_v26 }
 0x55f   : > { %v2864_v24 = vpop.xlane.xlu1 %2863  ;;  %v3065_v58 = vmin.f32 %v3064_v20, %v3001_v15 }
 0x560   : > { %vm2938_vm14 = vcmp.eq.f32.partialorder %v7866_v2, %v2864_v24  ;;  %vm2939_vm15 = vcmp.eq.f32.partialorder %v7869_v40, %v2864_v24  ;;  %vm2940_vm2 = vcmp.eq.f32.partialorder %v7873_v13, %v2864_v24  ;;  %vm2941_vm4 = vcmp.eq.f32.partialorder %v7913_v22, %v2864_v24 }
 0x561   : > { %v3002_v27 = vsel %vm2938_vm14, %v5717_v51, 512.0  ;;  %v3003_v1 = vsel %vm2939_vm15, %v5719_v50, 512.0  ;;  %v3004_v0 = vsel %vm2940_vm2, %v5721_v36, 512.0  ;;  %3066 = vmin.xlane.f32.xlu0 %v3065_v58  ;;  %v3005_v56 = vsel %vm2941_vm4, %v5726_v42, 512.0 }
 0x562   : > { %v3068_v49 = vmin.f32 %v3002_v27, %v3003_v1 }
 0x564   : > { %v2869_v30 = vpop.xlane.xlu0 %2868  ;;  %v3069_v55 = vmin.f32 %v3068_v49, %v3004_v0 }
 0x565   : > { %vm2942_vm7 = vcmp.eq.f32.partialorder %v7904_v5, %v2869_v30  ;;  %vm2943_vm8 = vcmp.eq.f32.partialorder %v7907_v4, %v2869_v30  ;;  %vm2944_vm11 = vcmp.eq.f32.partialorder %v7940_v61, %v2869_v30  ;;  %vm2945_vm12 = vcmp.eq.f32.partialorder %v7977_v32, %v2869_v30 }
 0x566   : > { %v3006_v43 = vsel %vm2942_vm7, %v5717_v51, 512.0  ;;  %v3007_v26 = vsel %vm2943_vm8, %v5719_v50, 512.0  ;;  %v3070_v20 = vmin.f32 %v3069_v55, %v3005_v56  ;;  %v3008_v15 = vsel %vm2944_vm11, %v5721_v36, 512.0 }
 0x567   : > { %v3073_v24 = vmin.f32 %v3006_v43, %v3007_v26  ;;  %v3009_v58 = vsel %vm2945_vm12, %v5726_v42, 512.0 }
 0x568   : > { %3071 = vmin.xlane.f32.xlu1 %v3070_v20 }
 0x569   : > { %v2874_v27 = vpop.xlane.xlu1 %2873  ;;  %v3074_v1 = vmin.f32 %v3073_v24, %v3008_v15 }
 0x56a   : > { %vm2946_vm1 = vcmp.eq.f32.partialorder %v7943_v53, %v2874_v27  ;;  %vm2947_vm5 = vcmp.eq.f32.partialorder %v7946_v34, %v2874_v27  ;;  %vm2948_vm6 = vcmp.eq.f32.partialorder %v7984_v54, %v2874_v27  ;;  %vm2949_vm9 = vcmp.eq.f32.partialorder %v8021_v41, %v2874_v27 }
 0x56b   : > { %v3010_v49 = vsel %vm2946_vm1, %v5717_v51, 512.0  ;;  %v3011_v0 = vsel %vm2947_vm5, %v5719_v50, 512.0  ;;  %v3075_v55 = vmin.f32 %v3074_v1, %v3009_v58  ;;  %v3012_v43 = vsel %vm2948_vm6, %v5721_v36, 512.0 }
 0x56c   : > { %v3078_v30 = vmin.f32 %v3010_v49, %v3011_v0  ;;  %v2879_v56 = vpop.xlane.xlu0 %2878  ;;  %v3013_v27 = vsel %vm2949_vm9, %v5726_v42, 512.0 }
 0x56d   : > { %vm2950_vm10 = vcmp.eq.f32.partialorder %v7968_v14, %v2879_v56  ;;  %vm2951_vm13 = vcmp.eq.f32.partialorder %v7971_v59, %v2879_v56  ;;  %vm2952_vm14 = vcmp.eq.f32.partialorder %v7987_v3, %v2879_v56  ;;  %3076 = vmin.xlane.f32.xlu0 %v3075_v55  ;;  %vm2953_vm15 = vcmp.eq.f32.partialorder %v8053_v8, %v2879_v56 }
 0x56e   : > { %v3014_v26 = vsel %vm2950_vm10, %v5717_v51, 512.0  ;;  %v3015_v20 = vsel %vm2951_vm13, %v5719_v50, 512.0  ;;  %v3079_v24 = vmin.f32 %v3078_v30, %v3012_v43  ;;  %v3016_v1 = vsel %vm2952_vm14, %v5721_v36, 512.0 }
 0x56f   : > { %v3083_v15 = vmin.f32 %v3014_v26, %v3015_v20  ;;  %v3017_v55 = vsel %vm2953_vm15, %v5726_v42, 512.0 }
 0x570   : > { %v3080_v58 = vmin.f32 %v3079_v24, %v3013_v27 }
 0x571   : > { %v3084_v0 = vmin.f32 %v3083_v15, %v3016_v1  ;;  %v10462_v15 = vld [vmem:[#allocation100_spill] sm:$0xff] }
 0x572   : > { %v2884_v49 = vpop.xlane.xlu1 %2883  ;;  %3081 = vmin.xlane.f32.xlu1 %v3080_v58 }
 0x573   : > { %vm2954_vm2 = vcmp.eq.f32.partialorder %v8013_v37, %v2884_v49  ;;  %vm2955_vm4 = vcmp.eq.f32.partialorder %v8016_v45, %v2884_v49  ;;  %vm2956_vm7 = vcmp.eq.f32.partialorder %v8060_v18, %v2884_v49  ;;  %v3085_v43 = vmin.f32 %v3084_v0, %v3017_v55 }
 0x574   : > { %v3018_v30 = vsel %vm2954_vm2, %v5717_v51, 512.0  ;;  %v3019_v56 = vsel %vm2955_vm4, %v5719_v50, 512.0  ;;  %vm2957_vm8 = vcmp.eq.f32.partialorder %v8097_v16, %v2884_v49  ;;  %v3020_v24 = vsel %vm2956_vm7, %v5721_v36, 512.0 }
 0x575   : > { %v3088_v26 = vmin.f32 %v3018_v30, %v3019_v56  ;;  %v2889_v20 = vpop.xlane.xlu0 %2888  ;;  %3086 = vmin.xlane.f32.xlu0 %v3085_v43  ;;  %v3021_v49 = vsel %vm2957_vm8, %v5726_v42, 512.0 }
 0x576   : > { %vm2958_vm11 = vcmp.eq.f32.partialorder %v8044_v7, %v2889_v20  ;;  %vm2959_vm12 = vcmp.eq.f32.partialorder %v10462_v15, %v2889_v20  ;;  %vm2960_vm1 = vcmp.eq.f32.partialorder %v8063_v10, %v2889_v20  ;;  %vm2961_vm5 = vcmp.eq.f32.partialorder %v8129_v52, %v2889_v20 }
 0x577   : > { %v3022_v27 = vsel %vm2958_vm11, %v5717_v51, 512.0  ;;  %v3023_v1 = vsel %vm2959_vm12, %v5719_v50, 512.0  ;;  %v3089_v58 = vmin.f32 %v3088_v26, %v3020_v24  ;;  %v3024_v55 = vsel %vm2960_vm1, %v5721_v36, 512.0 }
 0x578   : > { %v3093_v0 = vmin.f32 %v3022_v27, %v3023_v1  ;;  %v3025_v43 = vsel %vm2961_vm5, %v5726_v42, 512.0 }
 0x579   : > { %v3090_v30 = vmin.f32 %v3089_v58, %v3021_v49  ;;  %v10464_v49 = vld [vmem:[#allocation10_spill] sm:$0xff] }
 0x57a   : > { %v3094_v16 = vmin.f32 %v3093_v0, %v3024_v55  ;;  %v10463_v0 = vld [vmem:[#allocation39_spill] sm:$0xff]  ;;  %v10465_v55 = vld [vmem:[#allocation40_spill] sm:$0xff] }
 0x57b   : > { %v2894_v56 = vpop.xlane.xlu1 %2893  ;;  %3091 = vmin.xlane.f32.xlu1 %v3090_v30 }
 0x57c   : > { %vm2962_vm6 = vcmp.eq.f32.partialorder %v8089_v28, %v2894_v56  ;;  %vm2963_vm9 = vcmp.eq.f32.partialorder %v8092_v33, %v2894_v56  ;;  %vm2964_vm10 = vcmp.eq.f32.partialorder %v8136_v63, %v2894_v56  ;;  %v3095_v24 = vmin.f32 %v3094_v16, %v3025_v43  ;;  %v10466_v33 = vld [vmem:[#allocation76_spill] sm:$0xff] }
 0x57d   : > { %v3026_v26 = vsel %vm2962_vm6, %v5717_v51, 512.0  ;;  %v3027_v20 = vsel %vm2963_vm9, %v5719_v50, 512.0  ;;  %vm2965_vm13 = vcmp.eq.f32.partialorder %v8173_v12, %v2894_v56  ;;  %v3028_v58 = vsel %vm2964_vm10, %v5721_v36, 512.0 }
 0x57e   : > { %v3098_v27 = vmin.f32 %v3026_v26, %v3027_v20  ;;  %3096 = vmin.xlane.f32.xlu0 %v3095_v24  ;;  %v3029_v56 = vsel %vm2965_vm13, %v5726_v42, 512.0  ;;  %v10469_v24 = vld [vmem:[#allocation16_spill] sm:$0xff] }
 0x57f   : > { %v2899_v1 = vpop.xlane.xlu0 %2898 }
 0x580   : > { %vm2966_vm14 = vcmp.eq.f32.partialorder %v10463_v0, %v2899_v1  ;;  %vm2967_vm15 = vcmp.eq.f32.partialorder %v10464_v49, %v2899_v1  ;;  %vm2968_vm2 = vcmp.eq.f32.partialorder %v10465_v55, %v2899_v1  ;;  %v3099_v63 = vmin.f32 %v3098_v27, %v3028_v58  ;;  %v10467_v0 = vld [vmem:[#allocation22_spill] sm:$0xff]  ;;  %v10468_v49 = vld [vmem:[#allocation45_spill] sm:$0xff]  ;;  %v10470_v58 = vld [vmem:[#allocation52_spill] sm:$0xff] }
 0x581   : > { %v3030_v30 = vsel %vm2966_vm14, %v5717_v51, 512.0  ;;  %v3031_v52 = vsel %vm2967_vm15, %v5719_v50, 512.0  ;;  %vm2969_vm4 = vcmp.eq.f32.partialorder %v10466_v33, %v2899_v1  ;;  %v3032_v43 = vsel %vm2968_vm2, %v5721_v36, 512.0  ;;  %v10473_v33 = vld [vmem:[#allocation102_spill] sm:$0xff] }
 0x582   : > { %v3103_v16 = vmin.f32 %v3030_v30, %v3031_v52  ;;  %v3100_v26 = vmin.f32 %v3099_v63, %v3029_v56  ;;  %v3033_v55 = vsel %vm2969_vm4, %v5726_v42, 512.0  ;;  %v10471_v56 = vld [vmem:[#allocation23_spill] sm:$0xff] }
 0x584   : > { %v3104_v12 = vmin.f32 %v3103_v16, %v3032_v43  ;;  %3101 = vmin.xlane.f32.xlu1 %v3100_v26  ;;  %v10472_v43 = vld [vmem:[#allocation46_spill] sm:$0xff] }
 0x585   : > { %v2904_v20 = vpop.xlane.xlu1 %2903 }
 0x586   : > { %vm2970_vm7 = vcmp.eq.f32.partialorder %v10467_v0, %v2904_v20  ;;  %vm2971_vm8 = vcmp.eq.f32.partialorder %v10468_v49, %v2904_v20  ;;  %vm2972_vm11 = vcmp.eq.f32.partialorder %v10469_v24, %v2904_v20  ;;  %v3105_v1 = vmin.f32 %v3104_v12, %v3033_v55  ;;  %v10474_v0 = vld [vmem:[#allocation19_spill] sm:$0xff] }
 0x587   : > { %v3034_v27 = vsel %vm2970_vm7, %v5717_v51, 512.0  ;;  %v3035_v52 = vsel %vm2971_vm8, %v5719_v50, 512.0  ;;  %vm2973_vm12 = vcmp.eq.f32.partialorder %v10470_v58, %v2904_v20  ;;  %v2909_v63 = vpop.xlane.xlu0 %2908  ;;  %v3036_v16 = vsel %vm2972_vm11, %v5721_v36, 512.0 }
 0x588   : > { %v3108_v30 = vmin.f32 %v3034_v27, %v3035_v52  ;;  %vm2974_vm1 = vcmp.eq.f32.partialorder %v10471_v56, %v2909_v63  ;;  %vm2975_vm5 = vcmp.eq.f32.partialorder %v10472_v43, %v2909_v63  ;;  %vm2976_vm6 = vcmp.eq.f32.partialorder %v10473_v33, %v2909_v63  ;;  %3106 = vmin.xlane.f32.xlu0 %v3105_v1  ;;  %v10475_v56 = vld [vmem:[#allocation18_spill] sm:$0xff]  ;;  %v10476_v43 = vld [vmem:[#allocation51_spill] sm:$0xff]  ;;  %v10477_v1 = vld [vmem:[#allocation57_spill] sm:$0xff] }
 0x589   : > { %v3038_v26 = vsel %vm2974_vm1, %v5717_v51, 512.0  ;;  %v3039_v24 = vsel %vm2975_vm5, %v5719_v50, 512.0  ;;  %vm2977_vm9 = vcmp.eq.f32.partialorder %v10474_v0, %v2909_v63  ;;  %v3037_v55 = vsel %vm2973_vm12, %v5726_v42, 512.0 }
 0x58a   : > { %v3109_v49 = vmin.f32 %v3108_v30, %v3036_v16  ;;  %v3113_v12 = vmin.f32 %v3038_v26, %v3039_v24  ;;  %v3040_v20 = vsel %vm2976_vm6, %v5721_v36, 512.0  ;;  %v3041_v33 = vsel %vm2977_vm9, %v5726_v42, 512.0  ;;  %v10478_v16 = vld [vmem:[#allocation53_spill] sm:$0xff] }
 0x58c   : > { %v3110_v27 = vmin.f32 %v3109_v49, %v3037_v55  ;;  %v3114_v58 = vmin.f32 %v3113_v12, %v3040_v20 }
 0x58e   : > { %v2914_v52 = vpop.xlane.xlu1 %2913  ;;  %3111 = vmin.xlane.f32.xlu1 %v3110_v27  ;;  %v3115_v63 = vmin.f32 %v3114_v58, %v3041_v33 }
 0x58f   : > { %vm2978_vm10 = vcmp.eq.f32.partialorder %v10475_v56, %v2914_v52  ;;  %vm2979_vm13 = vcmp.eq.f32.partialorder %v10476_v43, %v2914_v52  ;;  %vm2980_vm14 = vcmp.eq.f32.partialorder %v10477_v1, %v2914_v52  ;;  %vm2981_vm15 = vcmp.eq.f32.partialorder %v10478_v16, %v2914_v52  ;;  %v10479_v16 = vld [vmem:[#allocation72_spill] sm:$0xff] }
 0x590   : > { %v3042_v30 = vsel %vm2978_vm10, %v5717_v51, 512.0  ;;  %v3043_v24 = vsel %vm2979_vm13, %v5719_v50, 512.0  ;;  %v3044_v49 = vsel %vm2980_vm14, %v5721_v36, 512.0  ;;  %3116 = vmin.xlane.f32.xlu0 %v3115_v63  ;;  %v3045_v20 = vsel %vm2981_vm15, %v5726_v42, 512.0 }
 0x591   : > { %v3118_v26 = vmin.f32 %v3042_v30, %v3043_v24  ;;  %v8532_v30 = vld [vmem:[%s9544_s8] ss:$0 sm:$0xff] }
 0x592   : > { %v4189_v24 = vadd.f32 %v8532_v30, %v8411_v9  ;;  %v10480_v9 = vld [vmem:[#allocation64_spill] sm:$0xff] }
 0x593   : > { %v3119_v55 = vmin.f32 %v3118_v26, %v3044_v49 }
 0x595   : > { %v3120_v52 = vmin.f32 %v3119_v55, %v3045_v20 }
 0x596   : > { %v2919_v12 = vpop.xlane.xlu0 %2918  ;;  %v2924_v58 = vpop.xlane.xlu1 %2923 }
 0x597   : > { %vm2982_vm2 = vcmp.eq.f32.partialorder %v8295_v48, %v2919_v12  ;;  %vm2983_vm4 = vcmp.eq.f32.partialorder %v8326_v29, %v2919_v12  ;;  %vm2984_vm7 = vcmp.eq.f32.partialorder %v8367_v23, %v2919_v12  ;;  %vm2986_vm8 = vcmp.eq.f32.partialorder %v8329_v35, %v2924_v58  ;;  %3121 = vmin.xlane.f32.xlu1 %v3120_v52 }
 0x598   : > { %v3046_v27 = vsel %vm2982_vm2, %v5717_v51, 512.0  ;;  %v3047_v33 = vsel %vm2983_vm4, %v5719_v50, 512.0  ;;  %vm2987_vm11 = vcmp.eq.f32.partialorder %v8332_v62, %v2924_v58  ;;  %vm2988_vm12 = vcmp.eq.f32.partialorder %v8379_v6, %v2924_v58 }
 0x599   : > { %v3123_v63 = vmin.f32 %v3046_v27, %v3047_v33  ;;  %vm2985_vm1 = vcmp.eq.f32.partialorder %v8389_v38, %v2919_v12  ;;  %v3048_v26 = vsel %vm2984_vm7, %v5721_v36, 512.0  ;;  %v3050_v49 = vsel %vm2986_vm8, %v5717_v51, 512.0 }
 0x59a   : > { %v3051_v55 = vsel %vm2987_vm11, %v5719_v50, 512.0  ;;  %v2929_v20 = vpop.xlane.xlu0 %2928  ;;  %vm2989_vm10 = vcmp.eq.f32.partialorder %v8399_v19, %v2924_v58  ;;  %v3052_v27 = vsel %vm2988_vm12, %v5721_v36, 512.0  ;;  %v4286_v62 = vpop.permute.xlu1 %4285  ;;  %v4184_v58 = vadd.f32 %v8532_v30, %v8414_v57 }
 0x59b   : > { %v3128_v23 = vmin.f32 %v3050_v49, %v3051_v55  ;;  %vm2990_vm5 = vcmp.eq.f32.partialorder %v10479_v16, %v2929_v20  ;;  %vm2991_vm6 = vcmp.eq.f32.partialorder %v10480_v9, %v2929_v20  ;;  %vm2992_vm9 = vcmp.eq.f32.partialorder %v8384_v47, %v2929_v20 }
 0x59c   : > { %v3054_v33 = vsel %vm2990_vm5, %v5717_v51, 512.0  ;;  %v3055_v6 = vsel %vm2991_vm6, %v5719_v50, 512.0  ;;  %vm2993_vm13 = vcmp.eq.f32.partialorder %v8404_v31, %v2929_v20  ;;  %v3124_v49 = vmin.f32 %v3123_v63, %v3048_v26  ;;  %v8564_v26 = vpop.f32.mrb[34].mxu1  ;;  %v4017_v20 = vld [vmem:[%s5707_s27 + $0x78] sm:$0xff] }
 0x59d   : > { %v3133_v52 = vmin.f32 %v3054_v33, %v3055_v6  ;;  %v4327_v55 = vmul.f32 %v4286_v62, %v4189_v24  ;;  %v3056_v16 = vsel %vm2992_vm9, %v5721_v36, 512.0  ;;  %v3049_v47 = vsel %vm2985_vm1, %v5726_v42, 512.0  ;;  %v10483_v33 = vld [vmem:[#allocation80_spill] sm:$0xff] }
 0x59e   : > { %v3129_v19 = vmin.f32 %v3128_v23, %v3052_v27  ;;  %v3125_v9 = vmin.f32 %v3124_v49, %v3049_v47  ;;  %v3053_v29 = vsel %vm2989_vm10, %v5726_v42, 512.0  ;;  %v3057_v62 = vsel %vm2993_vm13, %v5726_v42, 512.0  ;;  %v4233_v47 = vld [vmem:[%s6487_s21 + $0x58] sm:$0xff]  ;;  %v10485_v49 = vld [vmem:[#allocation25_spill] sm:$0xff] }
 0x59f   : > { %v4757_v35 = vpack.c.bf16 %v4327_v55, %v4327_v55  ;;  %v3134_v6 = vmin.f32 %v3133_v52, %v3056_v16  ;;  %v4016_v16 = vld [vmem:[%s5707_s27 + $0x70] sm:$0xff] }
 0x5a0   : > { %v3130_v63 = vmin.f32 %v3129_v19, %v3053_v29  ;;  %3126 = vmin.xlane.f32.xlu0 %v3125_v9  ;;  %v4232_v19 = vld [vmem:[%s6487_s21 + $0x50] sm:$0xff]  ;;  %v8567_v29 = vpop.f32.mrb[35].mxu1  ;;  %4877 = vmatprep.mubr.msk.f32.mxu1 %vm744_vm0, %v4016_v16  ;;  %v10493_v16 = vld [vmem:[#allocation11_spill] sm:$0xff] }
 0x5a1   : > { %4408 = vst.msk [vmem:[%s6633_s11 + $0x24] sm:$0xf] %vm4398_vm3, %v4757_v35  ;;  %v3135_v12 = vmin.f32 %v3134_v6, %v3057_v62  ;;  %4878 = vmatmul.mubr.msk.f32.gmra.mrb[38].mxu1 %vm744_vm0, %v4017_v20  ;;  %v10481_v9 = vld [vmem:[#allocation65_spill] sm:$0xff] }
 0x5a2   : > { %3131 = vmin.xlane.f32.xlu1 %v3130_v63  ;;  %v4281_v57 = vpop.permute.xlu0 %4280 }
 0x5a3   : > { %v4326_v24 = vmul.f32 %v4281_v57, %v4184_v58  ;;  %v10487_v58 = vld [vmem:[#allocation24_spill] sm:$0xff] }
 0x5a4   : > { %3136 = vmin.xlane.f32.xlu0 %v3135_v12 }
 0x5a5   : > { %v4756_v23 = vpack.c.bf16 %v4326_v24, %v4326_v24 }
 0x5a7   : > { %4407 = vst.msk [vmem:[%s6633_s11 + $0x20] sm:$0xf] %vm4398_vm3, %v4756_v23 }
 0x5b3   : > { %4295 = vperm.xlu1 %4954, %v4233_v47  }
 0x5ba   : > { %4290 = vperm.xlu0 %4953, %v4232_v19   ;;  %v10491_v19 = vld [vmem:[#allocation8_spill] sm:$0xff] }
 0x5e8   : > { %v3062_v35 = vpop.xlane.xlu1 %3061 }
 0x5e9   : > { %vm3138_vm14 = vcmp.eq.f32.partialorder %v5717_v51, %v3062_v35  ;;  %vm3139_vm15 = vcmp.eq.f32.partialorder %v5719_v50, %v3062_v35  ;;  %vm3140_vm2 = vcmp.eq.f32.partialorder %v5721_v36, %v3062_v35  ;;  %vm3141_vm4 = vcmp.eq.f32.partialorder %v5726_v42, %v3062_v35 }
 0x5ea   : > { %v8578_v27 = vsel %vm3138_vm14, 1.0, %v10481_v9  ;;  %v8581_v52 = vsel %vm3139_vm15, 1.0, %v10483_v33  ;;  %v8584_v55 = vsel %vm3140_vm2, 1.0, %v10485_v49  ;;  %v8587_v6 = vsel %vm3141_vm4, 1.0, %v10487_v58 }
 0x5eb   : > { %10482 = vst [vmem:[#allocation32_spill] sm:$0xff] %v8578_v27  ;;  %10484 = vst [vmem:[#allocation29_spill] sm:$0xff] %v8581_v52  ;;  %v8590_v63 = vsel %vm3138_vm14, 1e+30, %v7801_v39  ;;  %v8593_v62 = vsel %vm3139_vm15, 1e+30, %v7804_v25 }
 0x5ec   : > { %10486 = vst [vmem:[#allocation31_spill] sm:$0xff] %v8584_v55  ;;  %10488 = vst [vmem:[#allocation100_spill] sm:$0xff] %v8587_v6  ;;  %v3330_v12 = vmin.f32 %v8590_v63, %v8593_v62  ;;  %v8598_v57 = vsel %vm3140_vm2, 1e+30, %v7807_v11  ;;  %v8601_v23 = vsel %vm3141_vm4, 1e+30, %v7839_v44 }
 0x5ed   : > { %v10489_v39 = vld [vmem:[#allocation9_spill] sm:$0xff]  ;;  %v10495_v44 = vld [vmem:[#allocation75_spill] sm:$0xff] }
 0x5ee   : > { %v3067_v24 = vpop.xlane.xlu0 %3066  ;;  %v3331_v47 = vmin.f32 %v3330_v12, %v8598_v57  ;;  %v10555_v6 = vld [vmem:[#allocation101_spill] sm:$0xff]  ;;  %v10567_v52 = vld [vmem:[#allocation39_spill] sm:$0xff] }
 0x5ef   : > { %vm3142_vm0 = vcmp.eq.f32.partialorder %v5717_v51, %v3067_v24  ;;  %vm3143_vm7 = vcmp.eq.f32.partialorder %v5719_v50, %v3067_v24  ;;  %vm3144_vm8 = vcmp.eq.f32.partialorder %v5721_v36, %v3067_v24  ;;  %vm3145_vm11 = vcmp.eq.f32.partialorder %v5726_v42, %v3067_v24 }
 0x5f0   : > { %v8609_v25 = vsel %vm3142_vm0, 1.0, %v10489_v39  ;;  %v8612_v11 = vsel %vm3143_vm7, 1.0, %v10491_v19  ;;  %v8615_v20 = vsel %vm3144_vm8, 1.0, %v10493_v16  ;;  %v8620_v35 = vsel %vm3145_vm11, 1.0, %v10495_v44  ;;  %v10501_v16 = vld [vmem:[#allocation82_spill] sm:$0xff] }
 0x5f1   : > { %10490 = vst [vmem:[#allocation19_spill] sm:$0xff] %v8609_v25  ;;  %10492 = vst [vmem:[#allocation18_spill] sm:$0xff] %v8612_v11  ;;  %v8623_v9 = vsel %vm3142_vm0, 1e+30, %v7830_v60  ;;  %v8626_v33 = vsel %vm3143_vm7, 1e+30, %v7833_v17  ;;  %v3332_v49 = vmin.f32 %v3331_v47, %v8601_v23 }
 0x5f2   : > { %10494 = vst [vmem:[#allocation51_spill] sm:$0xff] %v8615_v20  ;;  %10496 = vst [vmem:[#allocation57_spill] sm:$0xff] %v8620_v35  ;;  %v3335_v58 = vmin.f32 %v8623_v9, %v8626_v33  ;;  %v8632_v12 = vsel %vm3144_vm8, 1e+30, %v7844_v21  ;;  %v10497_v60 = vld [vmem:[#allocation74_spill] sm:$0xff]  ;;  %v10499_v47 = vld [vmem:[#allocation81_spill] sm:$0xff] }
 0x5f3   : > { %3333 = vmin.xlane.f32.xlu1 %v3332_v49  ;;  %v10503_v21 = vld [vmem:[#allocation83_spill] sm:$0xff] }
 0x5f5   : > { %v3072_v39 = vpop.xlane.xlu1 %3071 }
 0x5f6   : > { %vm3146_vm12 = vcmp.eq.f32.partialorder %v5717_v51, %v3072_v39  ;;  %vm3147_vm1 = vcmp.eq.f32.partialorder %v5719_v50, %v3072_v39  ;;  %vm3148_vm5 = vcmp.eq.f32.partialorder %v5721_v36, %v3072_v39  ;;  %vm3149_vm6 = vcmp.eq.f32.partialorder %v5726_v42, %v3072_v39  ;;  %v10515_v39 = vld [vmem:[#allocation33_spill] sm:$0xff] }
 0x5f7   : > { %v8639_v17 = vsel %vm3146_vm12, 1.0, %v10497_v60  ;;  %v8642_v19 = vsel %vm3147_vm1, 1.0, %v10499_v47  ;;  %v8645_v44 = vsel %vm3148_vm5, 1.0, %v10501_v16  ;;  %v8650_v49 = vsel %vm3149_vm6, 1.0, %v10503_v21 }
 0x5f8   : > { %10498 = vst [vmem:[#allocation65_spill] sm:$0xff] %v8639_v17  ;;  %10500 = vst [vmem:[#allocation80_spill] sm:$0xff] %v8642_v19  ;;  %v8653_v35 = vsel %vm3146_vm12, 1e+30, %v7866_v2  ;;  %v8656_v20 = vsel %vm3147_vm1, 1e+30, %v7869_v40  ;;  %v3336_v60 = vmin.f32 %v3335_v58, %v8632_v12 }
 0x5f9   : > { %10502 = vst [vmem:[#allocation25_spill] sm:$0xff] %v8645_v44  ;;  %10504 = vst [vmem:[#allocation24_spill] sm:$0xff] %v8650_v49  ;;  %v3340_v47 = vmin.f32 %v8653_v35, %v8656_v20  ;;  %v8664_v16 = vsel %vm3145_vm11, 1e+30, %v7878_v46  ;;  %v8667_v44 = vsel %vm3148_vm5, 1e+30, %v7873_v13 }
 0x5fa   : > { %v3337_v21 = vmin.f32 %v3336_v60, %v8664_v16  ;;  %v3077_v2 = vpop.xlane.xlu0 %3076  ;;  %v10505_v40 = vld [vmem:[#allocation79_spill] sm:$0xff]  ;;  %v10507_v46 = vld [vmem:[#allocation84_spill] sm:$0xff]  ;;  %v10509_v13 = vld [vmem:[#allocation85_spill] sm:$0xff] }
 0x5fb   : > { %vm3150_vm9 = vcmp.eq.f32.partialorder %v5717_v51, %v3077_v2  ;;  %vm3151_vm10 = vcmp.eq.f32.partialorder %v5719_v50, %v3077_v2  ;;  %vm3152_vm13 = vcmp.eq.f32.partialorder %v5721_v36, %v3077_v2  ;;  %vm3153_vm14 = vcmp.eq.f32.partialorder %v5726_v42, %v3077_v2  ;;  %v10511_v60 = vld [vmem:[#allocation86_spill] sm:$0xff] }
 0x5fc   : > { %3338 = vmin.xlane.f32.xlu0 %v3337_v21  ;;  %v8675_v58 = vsel %vm3150_vm9, 1.0, %v10505_v40  ;;  %v8678_v24 = vsel %vm3151_vm10, 1.0, %v10507_v46  ;;  %v8681_v49 = vsel %vm3152_vm13, 1.0, %v10509_v13  ;;  %v8684_v19 = vsel %vm3153_vm14, 1.0, %v10511_v60 }
 0x5fd   : > { %10506 = vst [vmem:[#allocation9_spill] sm:$0xff] %v8675_v58  ;;  %10508 = vst [vmem:[#allocation8_spill] sm:$0xff] %v8678_v24  ;;  %v8687_v17 = vsel %vm3150_vm9, 1e+30, %v7904_v5  ;;  %v8690_v11 = vsel %vm3151_vm10, 1e+30, %v7907_v4  ;;  %v3341_v21 = vmin.f32 %v3340_v47, %v8667_v44 }
 0x5fe   : > { %10510 = vst [vmem:[#allocation11_spill] sm:$0xff] %v8681_v49  ;;  %10512 = vst [vmem:[#allocation75_spill] sm:$0xff] %v8684_v19  ;;  %v3345_v2 = vmin.f32 %v8687_v17, %v8690_v11  ;;  %v8698_v40 = vsel %vm3149_vm6, 1e+30, %v7913_v22  ;;  %v8701_v46 = vsel %vm3152_vm13, 1e+30, %v7940_v61 }
 0x5ff   : > { %v3082_v13 = vpop.xlane.xlu1 %3081  ;;  %v3342_v5 = vmin.f32 %v3341_v21, %v8698_v40  ;;  %v8705_v60 = vsel %vm3153_vm14, 1e+30, %v7977_v32  ;;  %v10513_v4 = vld [vmem:[#allocation26_spill] sm:$0xff]  ;;  %v10517_v47 = vld [vmem:[#allocation87_spill] sm:$0xff]  ;;  %v10519_v21 = vld [vmem:[#allocation88_spill] sm:$0xff] }
 0x600   : > { %vm3154_vm15 = vcmp.eq.f32.partialorder %v5717_v51, %v3082_v13  ;;  %vm3155_vm2 = vcmp.eq.f32.partialorder %v5719_v50, %v3082_v13  ;;  %vm3156_vm4 = vcmp.eq.f32.partialorder %v5721_v36, %v3082_v13  ;;  %vm3157_vm0 = vcmp.eq.f32.partialorder %v5726_v42, %v3082_v13  ;;  %v10535_v13 = vld [vmem:[#allocation96_spill] sm:$0xff] }
 0x601   : > { %v8712_v22 = vsel %vm3154_vm15, 1.0, %v10513_v4  ;;  %v8715_v61 = vsel %vm3155_vm2, 1.0, %v10515_v39  ;;  %v8718_v19 = vsel %vm3156_vm4, 1.0, %v10517_v47  ;;  %v8723_v32 = vsel %vm3157_vm0, 1.0, %v10519_v21  ;;  %3343 = vmin.xlane.f32.xlu1 %v3342_v5  ;;  %v10523_v5 = vld [vmem:[#allocation48_spill] sm:$0xff]  ;;  %v10525_v21 = vld [vmem:[#allocation91_spill] sm:$0xff] }
 0x602   : > { %10514 = vst [vmem:[#allocation74_spill] sm:$0xff] %v8712_v22  ;;  %10516 = vst [vmem:[#allocation81_spill] sm:$0xff] %v8715_v61  ;;  %v8726_v49 = vsel %vm3154_vm15, 1e+30, %v7943_v53  ;;  %v8729_v24 = vsel %vm3155_vm2, 1e+30, %v7946_v34  ;;  %v3087_v39 = vpop.xlane.xlu0 %3086  ;;  %v3346_v61 = vmin.f32 %v3345_v2, %v8701_v46 }
 0x603   : > { %10518 = vst [vmem:[#allocation82_spill] sm:$0xff] %v8718_v19  ;;  %10520 = vst [vmem:[#allocation83_spill] sm:$0xff] %v8723_v32  ;;  %v8732_v4 = vsel %vm3156_vm4, 1e+30, %v7984_v54  ;;  %v3350_v47 = vmin.f32 %v8726_v49, %v8729_v24  ;;  %vm3158_vm7 = vcmp.eq.f32.partialorder %v5717_v51, %v3087_v39  ;;  %vm3159_vm8 = vcmp.eq.f32.partialorder %v5719_v50, %v3087_v39  ;;  %v10521_v53 = vld [vmem:[#allocation89_spill] sm:$0xff]  ;;  %v10527_v2 = vld [vmem:[#allocation92_spill] sm:$0xff] }
 0x604   : > { %vm3160_vm11 = vcmp.eq.f32.partialorder %v5721_v36, %v3087_v39  ;;  %vm3161_vm12 = vcmp.eq.f32.partialorder %v5726_v42, %v3087_v39  ;;  %v8742_v34 = vsel %vm3158_vm7, 1.0, %v10521_v53  ;;  %v8745_v54 = vsel %vm3159_vm8, 1.0, %v10523_v5  ;;  %v10548_v39 = vld [vmem:[#allocation49_spill] sm:$0xff] }
 0x605   : > { %10522 = vst [vmem:[#allocation79_spill] sm:$0xff] %v8742_v34  ;;  %10524 = vst [vmem:[#allocation84_spill] sm:$0xff] %v8745_v54  ;;  %v8748_v32 = vsel %vm3160_vm11, 1.0, %v10525_v21  ;;  %v8753_v19 = vsel %vm3161_vm12, 1.0, %v10527_v2  ;;  %v8756_v22 = vsel %vm3158_vm7, 1e+30, %v7968_v14  ;;  %v3347_v53 = vmin.f32 %v3346_v61, %v8705_v60 }
 0x606   : > { %10526 = vst [vmem:[#allocation85_spill] sm:$0xff] %v8748_v32  ;;  %10528 = vst [vmem:[#allocation86_spill] sm:$0xff] %v8753_v19  ;;  %v8759_v58 = vsel %vm3159_vm8, 1e+30, %v7971_v59  ;;  %v3351_v34 = vmin.f32 %v3350_v47, %v8732_v4  ;;  %v8764_v5 = vsel %vm3160_vm11, 1e+30, %v7987_v3 }
 0x607   : > { %v3355_v21 = vmin.f32 %v8756_v22, %v8759_v58  ;;  %3348 = vmin.xlane.f32.xlu0 %v3347_v53  ;;  %v8771_v14 = vsel %vm3157_vm0, 1e+30, %v8021_v41  ;;  %v10529_v59 = vld [vmem:[#allocation93_spill] sm:$0xff]  ;;  %v10531_v61 = vld [vmem:[#allocation90_spill] sm:$0xff] }
 0x608   : > { %v3092_v32 = vpop.xlane.xlu1 %3091  ;;  %v10533_v2 = vld [vmem:[#allocation37_spill] sm:$0xff] }
 0x609   : > { %vm3162_vm1 = vcmp.eq.f32.partialorder %v5717_v51, %v3092_v32  ;;  %vm3163_vm5 = vcmp.eq.f32.partialorder %v5719_v50, %v3092_v32  ;;  %vm3164_vm6 = vcmp.eq.f32.partialorder %v5721_v36, %v3092_v32  ;;  %vm3165_vm9 = vcmp.eq.f32.partialorder %v5726_v42, %v3092_v32  ;;  %v10552_v32 = vld [vmem:[#allocation44_spill] sm:$0xff] }
 0x60a   : > { %v8778_v3 = vsel %vm3162_vm1, 1.0, %v10529_v59  ;;  %v8781_v47 = vsel %vm3163_vm5, 1.0, %v10531_v61  ;;  %v8784_v53 = vsel %vm3164_vm6, 1.0, %v10533_v2  ;;  %v8789_v41 = vsel %vm3165_vm9, 1.0, %v10535_v13 }
 0x60b   : > { %10530 = vst [vmem:[#allocation26_spill] sm:$0xff] %v8778_v3  ;;  %10532 = vst [vmem:[#allocation33_spill] sm:$0xff] %v8781_v47  ;;  %v8792_v19 = vsel %vm3162_vm1, 1e+30, %v8013_v37  ;;  %v8795_v54 = vsel %vm3163_vm5, 1e+30, %v8016_v45  ;;  %v3352_v61 = vmin.f32 %v3351_v34, %v8771_v14  ;;  %v3097_v47 = vpop.xlane.xlu0 %3096 }
 0x60c   : > { %10534 = vst [vmem:[#allocation87_spill] sm:$0xff] %v8784_v53  ;;  %10536 = vst [vmem:[#allocation88_spill] sm:$0xff] %v8789_v41  ;;  %v8798_v59 = vsel %vm3164_vm6, 1e+30, %v8060_v18  ;;  %v3360_v2 = vmin.f32 %v8792_v19, %v8795_v54  ;;  %vm3166_vm10 = vcmp.eq.f32.partialorder %v5717_v51, %v3097_v47  ;;  %vm3167_vm13 = vcmp.eq.f32.partialorder %v5719_v50, %v3097_v47  ;;  %v10537_v37 = vld [vmem:[#allocation97_spill] sm:$0xff]  ;;  %v10539_v18 = vld [vmem:[#allocation94_spill] sm:$0xff] }
 0x60d   : > { %vm3168_vm14 = vcmp.eq.f32.partialorder %v5721_v36, %v3097_v47  ;;  %3353 = vmin.xlane.f32.xlu1 %v3352_v61  ;;  %vm3169_vm15 = vcmp.eq.f32.partialorder %v5726_v42, %v3097_v47  ;;  %v8808_v45 = vsel %vm3166_vm10, 1.0, %v10537_v37  ;;  %v8811_v13 = vsel %vm3167_vm13, 1.0, %v10539_v18  ;;  %v10541_v34 = vld [vmem:[#allocation98_spill] sm:$0xff]  ;;  %v10543_v53 = vld [vmem:[#allocation99_spill] sm:$0xff]  ;;  %v10576_v47 = vld [vmem:[#allocation13_spill] sm:$0xff] }
 0x60e   : > { %10538 = vst [vmem:[#allocation89_spill] sm:$0xff] %v8808_v45  ;;  %10540 = vst [vmem:[#allocation48_spill] sm:$0xff] %v8811_v13  ;;  %v8814_v41 = vsel %vm3168_vm14, 1.0, %v10541_v34  ;;  %v8819_v3 = vsel %vm3169_vm15, 1.0, %v10543_v53  ;;  %v8822_v25 = vsel %vm3166_vm10, 1e+30, %v8044_v7  ;;  %v3356_v37 = vmin.f32 %v3355_v21, %v8764_v5 }
 0x60f   : > { %10542 = vst [vmem:[#allocation91_spill] sm:$0xff] %v8814_v41  ;;  %10544 = vst [vmem:[#allocation92_spill] sm:$0xff] %v8819_v3  ;;  %v8825_v61 = vsel %vm3167_vm13, 1e+30, %v10462_v15  ;;  %v8831_v18 = vsel %vm3161_vm12, 1e+30, %v8053_v8  ;;  %v3361_v34 = vmin.f32 %v3360_v2, %v8798_v59 }
 0x610   : > { %v8835_v41 = vsel %vm3168_vm14, 1e+30, %v8063_v10  ;;  %v3365_v53 = vmin.f32 %v8822_v25, %v8825_v61  ;;  %v3357_v7 = vmin.f32 %v3356_v37, %v8831_v18  ;;  %v10545_v15 = vld [vmem:[#allocation35_spill] sm:$0xff]  ;;  %v10550_v37 = vld [vmem:[#allocation42_spill] sm:$0xff] }
 0x611   : > { %v3102_v3 = vpop.xlane.xlu1 %3101  ;;  %v8843_v21 = vsel %vm3165_vm9, 1e+30, %v10545_v15  ;;  %v10546_v8 = vld [vmem:[#allocation95_spill] sm:$0xff] }
 0x612   : > { %vm3170_vm2 = vcmp.eq.f32.partialorder %v5717_v51, %v3102_v3  ;;  %vm3171_vm4 = vcmp.eq.f32.partialorder %v5719_v50, %v3102_v3  ;;  %vm3172_vm0 = vcmp.eq.f32.partialorder %v5721_v36, %v3102_v3  ;;  %vm3173_vm7 = vcmp.eq.f32.partialorder %v5726_v42, %v3102_v3  ;;  %3358 = vmin.xlane.f32.xlu0 %v3357_v7  ;;  %v10557_v7 = vld [vmem:[#allocation38_spill] sm:$0xff]  ;;  %v10582_v3 = vld [vmem:[#allocation7_spill] sm:$0xff] }
 0x613   : > { %v8850_v10 = vsel %vm3170_vm2, 1.0, %v10546_v8  ;;  %v8853_v2 = vsel %vm3171_vm4, 1.0, %v10548_v39  ;;  %v8856_v13 = vsel %vm3172_vm0, 1.0, %v10550_v37  ;;  %v8861_v15 = vsel %vm3173_vm7, 1.0, %v10552_v32  ;;  %v10561_v32 = vld [vmem:[#allocation36_spill] sm:$0xff] }
 0x614   : > { %10547 = vst [vmem:[#allocation93_spill] sm:$0xff] %v8850_v10  ;;  %10549 = vst [vmem:[#allocation90_spill] sm:$0xff] %v8853_v2  ;;  %v8864_v45 = vsel %vm3170_vm2, 1e+30, %v8089_v28  ;;  %v8867_v55 = vsel %vm3171_vm4, 1e+30, %v10555_v6  ;;  %v3362_v39 = vmin.f32 %v3361_v34, %v8843_v21 }
 0x615   : > { %10551 = vst [vmem:[#allocation37_spill] sm:$0xff] %v8856_v13  ;;  %10553 = vst [vmem:[#allocation96_spill] sm:$0xff] %v8861_v15  ;;  %v8870_v8 = vsel %vm3172_vm0, 1e+30, %v10557_v7  ;;  %v3107_v2 = vpop.xlane.xlu0 %3106  ;;  %v3370_v37 = vmin.f32 %v8864_v45, %v8867_v55  ;;  %v10559_v28 = vld [vmem:[#allocation17_spill] sm:$0xff]  ;;  %v10563_v34 = vld [vmem:[#allocation27_spill] sm:$0xff] }
 0x616   : > { %10554 = vst [vmem:[#allocation97_spill] sm:$0xff] %v8864_v45  ;;  %10556 = vst [vmem:[#allocation94_spill] sm:$0xff] %v8867_v55  ;;  %vm3174_vm8 = vcmp.eq.f32.partialorder %v5717_v51, %v3107_v2  ;;  %vm3175_vm11 = vcmp.eq.f32.partialorder %v5719_v50, %v3107_v2  ;;  %vm3176_vm12 = vcmp.eq.f32.partialorder %v5721_v36, %v3107_v2  ;;  %3363 = vmin.xlane.f32.xlu1 %v3362_v39  ;;  %v10565_v13 = vld [vmem:[#allocation41_spill] sm:$0xff]  ;;  %v10569_v39 = vld [vmem:[#allocation10_spill] sm:$0xff] }
 0x617   : > { %10558 = vst [vmem:[#allocation98_spill] sm:$0xff] %v8870_v8  ;;  %vm3177_vm1 = vcmp.eq.f32.partialorder %v5726_v42, %v3107_v2  ;;  %v8880_v6 = vsel %vm3174_vm8, 1.0, %v10559_v28  ;;  %v8883_v7 = vsel %vm3175_vm11, 1.0, %v10561_v32  ;;  %v8886_v15 = vsel %vm3176_vm12, 1.0, %v10563_v34  ;;  %v10586_v45 = vld [vmem:[#allocation45_spill] sm:$0xff]  ;;  %v10603_v2 = vld [vmem:[#allocation43_spill] sm:$0xff] }
 0x618   : > { %10560 = vst [vmem:[#allocation99_spill] sm:$0xff] %v8880_v6  ;;  %10562 = vst [vmem:[#allocation35_spill] sm:$0xff] %v8883_v7  ;;  %v8891_v10 = vsel %vm3177_vm1, 1.0, %v10565_v13  ;;  %v8894_v27 = vsel %vm3174_vm8, 1e+30, %v10567_v52  ;;  %v3366_v28 = vmin.f32 %v3365_v53, %v8835_v41  ;;  %v10571_v6 = vld [vmem:[#allocation12_spill] sm:$0xff]  ;;  %v3371_v34 = vmin.f32 %v3370_v37, %v8870_v8 }
 0x619   : > { %10564 = vst [vmem:[#allocation95_spill] sm:$0xff] %v8886_v15  ;;  %10566 = vst [vmem:[#allocation49_spill] sm:$0xff] %v8891_v10  ;;  %v8897_v55 = vsel %vm3175_vm11, 1e+30, %v10569_v39  ;;  %v8903_v32 = vsel %vm3169_vm15, 1e+30, %v10571_v6 }
 0x61a   : > { %10568 = vst [vmem:[#allocation42_spill] sm:$0xff] %v8894_v27  ;;  %10570 = vst [vmem:[#allocation44_spill] sm:$0xff] %v8897_v55  ;;  %v10573_v15 = vld [vmem:[#allocation40_spill] sm:$0xff]  ;;  %v3375_v13 = vmin.f32 %v8894_v27, %v8897_v55  ;;  %v3367_v52 = vmin.f32 %v3366_v28, %v8903_v32  ;;  %v10574_v39 = vld [vmem:[#allocation14_spill] sm:$0xff] }
 0x61b   : > { %10572 = vst [vmem:[#allocation101_spill] sm:$0xff] %v8903_v32  ;;  %v8907_v7 = vsel %vm3176_vm12, 1e+30, %v10573_v15  ;;  %v3112_v10 = vpop.xlane.xlu1 %3111  ;;  %v8915_v53 = vsel %vm3173_vm7, 1e+30, %v10574_v39  ;;  %v10578_v37 = vld [vmem:[#allocation15_spill] sm:$0xff] }
 0x61c   : > { %10575 = vst [vmem:[#allocation38_spill] sm:$0xff] %v8915_v53  ;;  %vm3178_vm5 = vcmp.eq.f32.partialorder %v5717_v51, %v3112_v10  ;;  %vm3179_vm6 = vcmp.eq.f32.partialorder %v5719_v50, %v3112_v10  ;;  %vm3180_vm9 = vcmp.eq.f32.partialorder %v5721_v36, %v3112_v10  ;;  %vm3181_vm10 = vcmp.eq.f32.partialorder %v5726_v42, %v3112_v10  ;;  %v10580_v28 = vld [vmem:[#allocation34_spill] sm:$0xff]  ;;  %v10609_v10 = vld [vmem:[#allocation104_spill] sm:$0xff] }
 0x61d   : > { %3368 = vmin.xlane.f32.xlu0 %v3367_v52  ;;  %v8922_v15 = vsel %vm3178_vm5, 1.0, %v10576_v47  ;;  %v8925_v6 = vsel %vm3179_vm6, 1.0, %v10578_v37  ;;  %v8928_v55 = vsel %vm3180_vm9, 1.0, %v10580_v28  ;;  %v8933_v39 = vsel %vm3181_vm10, 1.0, %v10582_v3  ;;  %v10584_v27 = vld [vmem:[#allocation22_spill] sm:$0xff]  ;;  %v10588_v52 = vld [vmem:[#allocation16_spill] sm:$0xff] }
 0x61e   : > { %10577 = vst [vmem:[#allocation17_spill] sm:$0xff] %v8922_v15  ;;  %10579 = vst [vmem:[#allocation36_spill] sm:$0xff] %v8925_v6  ;;  %v8936_v8 = vsel %vm3178_vm5, 1e+30, %v10584_v27  ;;  %v8939_v32 = vsel %vm3179_vm6, 1e+30, %v10586_v45  ;;  %v3372_v37 = vmin.f32 %v3371_v34, %v8915_v53  ;;  %v3117_v6 = vpop.xlane.xlu0 %3116 }
 0x61f   : > { %10581 = vst [vmem:[#allocation27_spill] sm:$0xff] %v8928_v55  ;;  %10583 = vst [vmem:[#allocation41_spill] sm:$0xff] %v8933_v39  ;;  %v8942_v47 = vsel %vm3180_vm9, 1e+30, %v10588_v52  ;;  %v3380_v28 = vmin.f32 %v8936_v8, %v8939_v32  ;;  %vm3182_vm13 = vcmp.eq.f32.partialorder %v5717_v51, %v3117_v6  ;;  %vm3183_vm14 = vcmp.eq.f32.partialorder %v5719_v50, %v3117_v6  ;;  %v10589_v27 = vld [vmem:[#allocation20_spill] sm:$0xff]  ;;  %v10591_v3 = vld [vmem:[#allocation21_spill] sm:$0xff] }
 0x620   : > { %10585 = vst [vmem:[#allocation39_spill] sm:$0xff] %v8936_v8  ;;  %10587 = vst [vmem:[#allocation10_spill] sm:$0xff] %v8939_v32  ;;  %vm3184_vm15 = vcmp.eq.f32.partialorder %v5721_v36, %v3117_v6  ;;  %3373 = vmin.xlane.f32.xlu1 %v3372_v37  ;;  %vm3185_vm2 = vcmp.eq.f32.partialorder %v5726_v42, %v3117_v6  ;;  %v8952_v45 = vsel %vm3182_vm13, 1.0, %v10589_v27  ;;  %v8955_v52 = vsel %vm3183_vm14, 1.0, %v10591_v3  ;;  %v10593_v34 = vld [vmem:[#allocation47_spill] sm:$0xff]  ;;  %v10595_v55 = vld [vmem:[#allocation78_spill] sm:$0xff] }
 0x621   : > { %10590 = vst [vmem:[#allocation12_spill] sm:$0xff] %v8952_v45  ;;  %10592 = vst [vmem:[#allocation40_spill] sm:$0xff] %v8955_v52  ;;  %v8960_v39 = vsel %vm3184_vm15, 1.0, %v10593_v34  ;;  %v8965_v15 = vsel %vm3185_vm2, 1.0, %v10595_v55  ;;  %v10597_v32 = vld [vmem:[#allocation23_spill] sm:$0xff]  ;;  %v10599_v8 = vld [vmem:[#allocation46_spill] sm:$0xff]  ;;  %v3376_v27 = vmin.f32 %v3375_v13, %v8907_v7  ;;  %v3381_v34 = vmin.f32 %v3380_v28, %v8942_v47 }
 0x622   : > { %10594 = vst [vmem:[#allocation14_spill] sm:$0xff] %v8960_v39  ;;  %10596 = vst [vmem:[#allocation13_spill] sm:$0xff] %v8965_v15  ;;  %v8968_v37 = vsel %vm3182_vm13, 1e+30, %v10597_v32  ;;  %v8971_v53 = vsel %vm3183_vm14, 1e+30, %v10599_v8 }
 0x623   : > { %10598 = vst [vmem:[#allocation15_spill] sm:$0xff] %v8968_v37  ;;  %10600 = vst [vmem:[#allocation34_spill] sm:$0xff] %v8971_v53  ;;  %v10601_v3 = vld [vmem:[#allocation76_spill] sm:$0xff]  ;;  %v3385_v39 = vmin.f32 %v8968_v37, %v8971_v53  ;;  %v10605_v28 = vld [vmem:[#allocation77_spill] sm:$0xff] }
 0x624   : > { %v8977_v52 = vsel %vm3177_vm1, 1e+30, %v10601_v3  ;;  %v3122_v15 = vpop.xlane.xlu1 %3121  ;;  %v10602_v32 = vld [vmem:[#allocation52_spill] sm:$0xff]  ;;  %v10607_v3 = vld [vmem:[#allocation103_spill] sm:$0xff]  ;;  %v10611_v53 = vld [vmem:[#allocation102_spill] sm:$0xff] }
 0x625   : > { %v3377_v55 = vmin.f32 %v3376_v27, %v8977_v52  ;;  %v8986_v8 = vsel %vm3181_vm10, 1e+30, %v10602_v32  ;;  %vm3186_vm4 = vcmp.eq.f32.partialorder %v5717_v51, %v3122_v15  ;;  %vm3187_vm0 = vcmp.eq.f32.partialorder %v5719_v50, %v3122_v15 }
 0x626   : > { %vm3188_vm7 = vcmp.eq.f32.partialorder %v5721_v36, %v3122_v15  ;;  %vm3189_vm8 = vcmp.eq.f32.partialorder %v5726_v42, %v3122_v15  ;;  %v8993_v13 = vsel %vm3186_vm4, 1.0, %v10603_v2  ;;  %v8996_v27 = vsel %vm3187_vm0, 1.0, %v10605_v28 }
 0x627   : > { %3378 = vmin.xlane.f32.xlu0 %v3377_v55  ;;  %10604 = vst [vmem:[#allocation7_spill] sm:$0xff] %v8993_v13  ;;  %10606 = vst [vmem:[#allocation22_spill] sm:$0xff] %v8996_v27  ;;  %v8999_v45 = vsel %vm3188_vm7, 1.0, %v10607_v3  ;;  %v9004_v32 = vsel %vm3189_vm8, 1.0, %v10609_v10  ;;  %v9009_v37 = vsel %vm3184_vm15, 1e+30, %v10611_v53  ;;  %v3382_v28 = vmin.f32 %v3381_v34, %v8986_v8 }
 0x628   : > { %10608 = vst [vmem:[#allocation45_spill] sm:$0xff] %v8999_v45  ;;  %10610 = vst [vmem:[#allocation16_spill] sm:$0xff] %v9004_v32  ;;  %v9012_v55 = vsel %vm3186_vm4, 1e+30, %v10475_v56  ;;  %v9015_v2 = vsel %vm3187_vm0, 1e+30, %v10476_v43  ;;  %v3386_v45 = vmin.f32 %v3385_v39, %v9009_v37  ;;  %v4199_v34 = vadd.f32 %v8532_v30, %v8564_v26 }
 0x629   : > { %10612 = vst [vmem:[#allocation20_spill] sm:$0xff] %v9012_v55  ;;  %10613 = vst [vmem:[#allocation21_spill] sm:$0xff] %v9015_v2  ;;  %v3390_v3 = vmin.f32 %v9012_v55, %v9015_v2  ;;  %3383 = vmin.xlane.f32.xlu1 %v3382_v28  ;;  %v9024_v10 = vsel %vm3185_vm2, 1e+30, %v10474_v0  ;;  %v9027_v53 = vsel %vm3188_vm7, 1e+30, %v10477_v1  ;;  %v4194_v39 = vadd.f32 %v8532_v30, %v8567_v29 }
 0x62a   : > { %10614 = vst [vmem:[#allocation47_spill] sm:$0xff] %v9027_v53  ;;  %v3387_v56 = vmin.f32 %v3386_v45, %v9024_v10  ;;  %v10615_v1 = vld [vmem:[#allocation50_spill] sm:$0xff]  ;;  %v10617_v45 = vld [vmem:[#allocation67_spill] sm:$0xff]  ;;  %v10619_v26 = vld [vmem:[#allocation68_spill] sm:$0xff] }
 0x62b   : > { %v3391_v32 = vmin.f32 %v3390_v3, %v9027_v53  ;;  %v10621_v29 = vld [vmem:[#allocation54_spill] sm:$0xff] }
 0x62c   : > { %3388 = vmin.xlane.f32.xlu0 %v3387_v56  ;;  %v10624_v56 = vld [vmem:[#allocation59_spill] sm:$0xff] }
 0x62d   : > { %v3127_v43 = vpop.xlane.xlu0 %3126 }
 0x62e   : > { %vm3190_vm11 = vcmp.eq.f32.partialorder %v5717_v51, %v3127_v43  ;;  %vm3191_vm12 = vcmp.eq.f32.partialorder %v5719_v50, %v3127_v43  ;;  %vm3192_vm1 = vcmp.eq.f32.partialorder %v5721_v36, %v3127_v43  ;;  %vm3193_vm5 = vcmp.eq.f32.partialorder %v5726_v42, %v3127_v43 }
 0x62f   : > { %v3132_v0 = vpop.xlane.xlu1 %3131  ;;  %v9040_v6 = vsel %vm3190_vm11, 1.0, %v10615_v1  ;;  %v9043_v28 = vsel %vm3191_vm12, 1.0, %v10617_v45  ;;  %v9048_v30 = vsel %vm3192_vm1, 1.0, %v10619_v26  ;;  %v9053_v3 = vsel %vm3193_vm5, 1.0, %v10621_v29  ;;  %v10626_v1 = vld [vmem:[#allocation53_spill] sm:$0xff]  ;;  %v10628_v29 = vld [vmem:[#allocation55_spill] sm:$0xff] }
 0x630   : > { %10616 = vst [vmem:[#allocation78_spill] sm:$0xff] %v9040_v6  ;;  %10618 = vst [vmem:[#allocation23_spill] sm:$0xff] %v9043_v28  ;;  %v9056_v27 = vsel %vm3190_vm11, 1e+30, %v8295_v48  ;;  %v9059_v13 = vsel %vm3191_vm12, 1e+30, %v10624_v56  ;;  %vm3194_vm6 = vcmp.eq.f32.partialorder %v5717_v51, %v3132_v0  ;;  %vm3195_vm9 = vcmp.eq.f32.partialorder %v5719_v50, %v3132_v0 }
 0x631   : > { %10620 = vst [vmem:[#allocation46_spill] sm:$0xff] %v9048_v30  ;;  %10622 = vst [vmem:[#allocation76_spill] sm:$0xff] %v9053_v3  ;;  %v9065_v45 = vsel %vm3189_vm8, 1e+30, %v10626_v1  ;;  %v3395_v26 = vmin.f32 %v9056_v27, %v9059_v13  ;;  %vm3196_vm10 = vcmp.eq.f32.partialorder %v5721_v36, %v3132_v0  ;;  %vm3197_vm13 = vcmp.eq.f32.partialorder %v5726_v42, %v3132_v0  ;;  %v3137_v48 = vpop.xlane.xlu0 %3136  ;;  %v10630_v3 = vld [vmem:[#allocation28_spill] sm:$0xff]  ;;  %v10632_v28 = vld [vmem:[#allocation69_spill] sm:$0xff] }
 0x632   : > { %10623 = vst [vmem:[#allocation52_spill] sm:$0xff] %v9056_v27  ;;  %10625 = vst [vmem:[#allocation43_spill] sm:$0xff] %v9059_v13  ;;  %v9073_v56 = vsel %vm3194_vm6, 1.0, %v10628_v29  ;;  %v9076_v30 = vsel %vm3195_vm9, 1.0, %v10630_v3  ;;  %v9081_v15 = vsel %vm3196_vm10, 1.0, %v10632_v28  ;;  %v10634_v1 = vld [vmem:[#allocation70_spill] sm:$0xff]  ;;  %v3392_v53 = vmin.f32 %v3391_v32, %v9065_v45 }
 0x633   : > { %10627 = vst [vmem:[#allocation77_spill] sm:$0xff] %v9065_v45  ;;  %10629 = vst [vmem:[#allocation103_spill] sm:$0xff] %v9073_v56  ;;  %v9086_v6 = vsel %vm3197_vm13, 1.0, %v10634_v1  ;;  %v10636_v13 = vld [vmem:[#allocation66_spill] sm:$0xff]  ;;  %v10637_v29 = vld [vmem:[#allocation61_spill] sm:$0xff]  ;;  %vm3198_vm14 = vcmp.eq.f32.partialorder %v5717_v51, %v3137_v48  ;;  %vm3199_vm15 = vcmp.eq.f32.partialorder %v5719_v50, %v3137_v48  ;;  %vm3200_vm2 = vcmp.eq.f32.partialorder %v5721_v36, %v3137_v48  ;;  %v4296_v1 = vpop.permute.xlu1 %4295 }
 0x634   : > { %10631 = vst [vmem:[#allocation104_spill] sm:$0xff] %v9076_v30  ;;  %10633 = vst [vmem:[#allocation102_spill] sm:$0xff] %v9081_v15  ;;  %v9091_v27 = vsel %vm3192_vm1, 1e+30, %v10636_v13  ;;  %v9094_v56 = vsel %vm3194_vm6, 1e+30, %v10637_v29  ;;  %3393 = vmin.xlane.f32.xlu1 %v3392_v53  ;;  %vm3201_vm4 = vcmp.eq.f32.partialorder %v5726_v42, %v3137_v48 }
 0x635   : > { %10635 = vst [vmem:[#allocation50_spill] sm:$0xff] %v9086_v6  ;;  %10638 = vst [vmem:[#allocation67_spill] sm:$0xff] %v9094_v56  ;;  %v10639_v3 = vld [vmem:[#allocation56_spill] sm:$0xff]  ;;  %v10645_v32 = vld [vmem:[#allocation71_spill] sm:$0xff] }
 0x636   : > { %v9097_v30 = vsel %vm3195_vm9, 1e+30, %v10639_v3  ;;  %v10641_v13 = vld [vmem:[#allocation60_spill] sm:$0xff]  ;;  %v10643_v3 = vld [vmem:[#allocation62_spill] sm:$0xff]  ;;  %v9113_v15 = vsel %vm3200_vm2, 1.0, %v10645_v32 }
 0x637   : > { %10640 = vst [vmem:[#allocation68_spill] sm:$0xff] %v9097_v30  ;;  %v3400_v28 = vmin.f32 %v9094_v56, %v9097_v30  ;;  %v9107_v29 = vsel %vm3198_vm14, 1.0, %v10641_v13  ;;  %v9110_v6 = vsel %vm3199_vm15, 1.0, %v10643_v3  ;;  %10646 = vst [vmem:[#allocation53_spill] sm:$0xff] %v9113_v15  ;;  %v10647_v30 = vld [vmem:[#allocation73_spill] sm:$0xff]  ;;  %v10649_v45 = vld [vmem:[#allocation72_spill] sm:$0xff]  ;;  %v3396_v13 = vmin.f32 %v3395_v26, %v9091_v27 }
 0x638   : > { %10642 = vst [vmem:[#allocation54_spill] sm:$0xff] %v9107_v29  ;;  %10644 = vst [vmem:[#allocation59_spill] sm:$0xff] %v9110_v6  ;;  %v9118_v56 = vsel %vm3201_vm4, 1.0, %v10647_v30  ;;  %v9121_v2 = vsel %vm3198_vm14, 1e+30, %v10649_v45  ;;  %v10650_v53 = vld [vmem:[#allocation64_spill] sm:$0xff]  ;;  %v4329_v45 = vmul.f32 %v4296_v1, %v4199_v34 }
 0x639   : > { %10648 = vst [vmem:[#allocation55_spill] sm:$0xff] %v9118_v56  ;;  %v9124_v55 = vsel %vm3199_vm15, 1e+30, %v10650_v53  ;;  %v10652_v29 = vld [vmem:[#allocation30_spill] sm:$0xff]  ;;  %v9137_v30 = vsel %vm3193_vm5, 1e+30, %v8389_v38  ;;  %v4291_v43 = vpop.permute.xlu0 %4290 }
 0x63a   : > { %10651 = vst [vmem:[#allocation28_spill] sm:$0xff] %v9124_v55  ;;  %v9130_v3 = vsel %vm3196_vm10, 1e+30, %v10652_v29  ;;  %v3405_v32 = vmin.f32 %v9121_v2, %v9124_v55  ;;  %v10653_v56 = vld [vmem:[#allocation58_spill] sm:$0xff]  ;;  %v3397_v26 = vmin.f32 %v3396_v13, %v9137_v30  ;;  %v4759_v29 = vpack.c.bf16 %v4329_v45, %v4329_v45  ;;  %v10654_v6 = vld [vmem:[#allocation63_spill] sm:$0xff]  ;;  %v9162_v13 = vpop.f32.mrb[36].mxu1 }
 0x63b   : > { %v9140_v53 = vsel %vm3200_vm2, 1e+30, %v10653_v56  ;;  %v3401_v15 = vmin.f32 %v3400_v28, %v9130_v3  ;;  %v9147_v55 = vsel %vm3197_vm13, 1e+30, %v10654_v6  ;;  %v4328_v56 = vmul.f32 %v4291_v43, %v4194_v39  ;;  %v4235_v6 = vld [vmem:[%s6487_s21 + $0x68] sm:$0xff]  ;;  %v9165_v39 = vpop.f32.mrb[37].mxu1 }
 0x63c   : > { %v3406_v38 = vmin.f32 %v3405_v32, %v9140_v53  ;;  %3398 = vmin.xlane.f32.xlu0 %v3397_v26  ;;  %v9154_v1 = vsel %vm3201_vm4, 1e+30, %v8404_v31  ;;  %4410 = vst.msk [vmem:[%s6633_s11 + $0x2c] sm:$0xf] %vm4398_vm3, %v4759_v29 }
 0x63d   : > { %v3402_v34 = vmin.f32 %v3401_v15, %v9147_v55  ;;  %v4758_v0 = vpack.c.bf16 %v4328_v56, %v4328_v56  ;;  %v4234_v15 = vld [vmem:[%s6487_s21 + $0x60] sm:$0xff] }
 0x63e   : > { %v3407_v28 = vmin.f32 %v3406_v38, %v9154_v1 }
 0x63f   : > { %3403 = vmin.xlane.f32.xlu1 %v3402_v34  ;;  %4409 = vst.msk [vmem:[%s6633_s11 + $0x28] sm:$0xf] %vm4398_vm3, %v4758_v0 }
 0x640   : > { %3408 = vmin.xlane.f32.xlu0 %v3407_v28 }
 0x650   : > { %4305 = vperm.xlu1 %4954, %v4235_v6  }
 0x656   : > { %4300 = vperm.xlu0 %4953, %v4234_v15  }
 0x680   : > { %v3334_v48 = vpop.xlane.xlu1 %3333 }
 0x681   : > { %vm3410_vm0 = vcmp.eq.f32.partialorder %v8590_v63, %v3334_v48  ;;  %vm3411_vm7 = vcmp.eq.f32.partialorder %v8593_v62, %v3334_v48  ;;  %vm3412_vm8 = vcmp.eq.f32.partialorder %v8598_v57, %v3334_v48  ;;  %vm3413_vm11 = vcmp.eq.f32.partialorder %v8601_v23, %v3334_v48 }
 0x682   : > { %v3474_v31 = vsel %vm3410_vm0, %v5717_v51, 512.0  ;;  %v3475_v32 = vsel %vm3411_vm7, %v5719_v50, 512.0  ;;  %v3476_v26 = vsel %vm3412_vm8, %v5721_v36, 512.0  ;;  %v3477_v43 = vsel %vm3413_vm11, %v5726_v42, 512.0 }
 0x683   : > { %v3538_v45 = vmin.f32 %v3474_v31, %v3475_v32 }
 0x685   : > { %v3539_v29 = vmin.f32 %v3538_v45, %v3476_v26 }
 0x687   : > { %v3540_v34 = vmin.f32 %v3539_v29, %v3477_v43 }
 0x689   : > { %v3339_v38 = vpop.xlane.xlu0 %3338  ;;  %3541 = vmin.xlane.f32.xlu1 %v3540_v34 }
 0x68a   : > { %vm3414_vm12 = vcmp.eq.f32.partialorder %v8623_v9, %v3339_v38  ;;  %vm3415_vm1 = vcmp.eq.f32.partialorder %v8626_v33, %v3339_v38  ;;  %vm3416_vm5 = vcmp.eq.f32.partialorder %v8632_v12, %v3339_v38  ;;  %vm3417_vm6 = vcmp.eq.f32.partialorder %v8664_v16, %v3339_v38 }
 0x68b   : > { %v3478_v63 = vsel %vm3414_vm12, %v5717_v51, 512.0  ;;  %v3479_v62 = vsel %vm3415_vm1, %v5719_v50, 512.0  ;;  %v3480_v23 = vsel %vm3416_vm5, %v5721_v36, 512.0  ;;  %v3481_v9 = vsel %vm3417_vm6, %v5726_v42, 512.0 }
 0x68c   : > { %v3543_v57 = vmin.f32 %v3478_v63, %v3479_v62 }
 0x68e   : > { %v3344_v56 = vpop.xlane.xlu1 %3343  ;;  %v3544_v28 = vmin.f32 %v3543_v57, %v3480_v23 }
 0x68f   : > { %vm3418_vm9 = vcmp.eq.f32.partialorder %v8653_v35, %v3344_v56  ;;  %vm3419_vm10 = vcmp.eq.f32.partialorder %v8656_v20, %v3344_v56  ;;  %vm3420_vm13 = vcmp.eq.f32.partialorder %v8667_v44, %v3344_v56  ;;  %vm3421_vm14 = vcmp.eq.f32.partialorder %v8698_v40, %v3344_v56 }
 0x690   : > { %v3482_v33 = vsel %vm3418_vm9, %v5717_v51, 512.0  ;;  %v3483_v12 = vsel %vm3419_vm10, %v5719_v50, 512.0  ;;  %v3545_v0 = vmin.f32 %v3544_v28, %v3481_v9  ;;  %v3484_v16 = vsel %vm3420_vm13, %v5721_v36, 512.0 }
 0x691   : > { %v3548_v6 = vmin.f32 %v3482_v33, %v3483_v12  ;;  %v3485_v20 = vsel %vm3421_vm14, %v5726_v42, 512.0  ;;  %v10655_v12 = vld [vmem:[#allocation101_spill] sm:$0xff] }
 0x692   : > { %3546 = vmin.xlane.f32.xlu0 %v3545_v0 }
 0x693   : > { %v3549_v15 = vmin.f32 %v3548_v6, %v3484_v16 }
 0x694   : > { %v3349_v48 = vpop.xlane.xlu0 %3348 }
 0x695   : > { %vm3422_vm15 = vcmp.eq.f32.partialorder %v8687_v17, %v3349_v48  ;;  %vm3423_vm2 = vcmp.eq.f32.partialorder %v8690_v11, %v3349_v48  ;;  %vm3424_vm4 = vcmp.eq.f32.partialorder %v8701_v46, %v3349_v48  ;;  %v3550_v31 = vmin.f32 %v3549_v15, %v3485_v20  ;;  %v10656_v15 = vld [vmem:[#allocation97_spill] sm:$0xff] }
 0x696   : > { %v3486_v35 = vsel %vm3422_vm15, %v5717_v51, 512.0  ;;  %v3487_v44 = vsel %vm3423_vm2, %v5719_v50, 512.0  ;;  %vm3425_vm0 = vcmp.eq.f32.partialorder %v8705_v60, %v3349_v48  ;;  %v3488_v32 = vsel %vm3424_vm4, %v5721_v36, 512.0 }
 0x697   : > { %v3553_v40 = vmin.f32 %v3486_v35, %v3487_v44  ;;  %3551 = vmin.xlane.f32.xlu1 %v3550_v31  ;;  %v3489_v11 = vsel %vm3425_vm0, %v5726_v42, 512.0  ;;  %v10659_v35 = vld [vmem:[#allocation38_spill] sm:$0xff] }
 0x699   : > { %v3554_v26 = vmin.f32 %v3553_v40, %v3488_v32 }
 0x69a   : > { %v3354_v45 = vpop.xlane.xlu1 %3353 }
 0x69b   : > { %vm3426_vm7 = vcmp.eq.f32.partialorder %v8726_v49, %v3354_v45  ;;  %vm3427_vm8 = vcmp.eq.f32.partialorder %v8729_v24, %v3354_v45  ;;  %vm3428_vm11 = vcmp.eq.f32.partialorder %v8732_v4, %v3354_v45  ;;  %v3555_v29 = vmin.f32 %v3554_v26, %v3489_v11  ;;  %v10660_v11 = vld [vmem:[#allocation42_spill] sm:$0xff] }
 0x69c   : > { %v3490_v17 = vsel %vm3426_vm7, %v5717_v51, 512.0  ;;  %v3491_v46 = vsel %vm3427_vm8, %v5719_v50, 512.0  ;;  %vm3429_vm12 = vcmp.eq.f32.partialorder %v8771_v14, %v3354_v45  ;;  %v3492_v43 = vsel %vm3428_vm11, %v5721_v36, 512.0 }
 0x69d   : > { %v3558_v60 = vmin.f32 %v3490_v17, %v3491_v46  ;;  %3556 = vmin.xlane.f32.xlu0 %v3555_v29  ;;  %v3493_v49 = vsel %vm3429_vm12, %v5726_v42, 512.0  ;;  %v10661_v17 = vld [vmem:[#allocation44_spill] sm:$0xff] }
 0x69f   : > { %v3359_v38 = vpop.xlane.xlu0 %3358  ;;  %v3559_v34 = vmin.f32 %v3558_v60, %v3492_v43 }
 0x6a0   : > { %vm3430_vm1 = vcmp.eq.f32.partialorder %v8756_v22, %v3359_v38  ;;  %vm3431_vm5 = vcmp.eq.f32.partialorder %v8759_v58, %v3359_v38  ;;  %vm3432_vm6 = vcmp.eq.f32.partialorder %v8764_v5, %v3359_v38  ;;  %vm3433_vm9 = vcmp.eq.f32.partialorder %v8831_v18, %v3359_v38 }
 0x6a1   : > { %v3494_v24 = vsel %vm3430_vm1, %v5717_v51, 512.0  ;;  %v3495_v4 = vsel %vm3431_vm5, %v5719_v50, 512.0  ;;  %v3560_v63 = vmin.f32 %v3559_v34, %v3493_v49  ;;  %v3496_v57 = vsel %vm3432_vm6, %v5721_v36, 512.0 }
 0x6a2   : > { %v3563_v14 = vmin.f32 %v3494_v24, %v3495_v4  ;;  %v3497_v18 = vsel %vm3433_vm9, %v5726_v42, 512.0  ;;  %v10662_v24 = vld [vmem:[#allocation39_spill] sm:$0xff]  ;;  %v10663_v4 = vld [vmem:[#allocation10_spill] sm:$0xff] }
 0x6a3   : > { %v3364_v62 = vpop.xlane.xlu1 %3363  ;;  %3561 = vmin.xlane.f32.xlu1 %v3560_v63 }
 0x6a4   : > { %vm3434_vm10 = vcmp.eq.f32.partialorder %v8792_v19, %v3364_v62  ;;  %vm3435_vm13 = vcmp.eq.f32.partialorder %v8795_v54, %v3364_v62  ;;  %vm3436_vm14 = vcmp.eq.f32.partialorder %v8798_v59, %v3364_v62  ;;  %v3564_v5 = vmin.f32 %v3563_v14, %v3496_v57 }
 0x6a5   : > { %v3498_v58 = vsel %vm3434_vm10, %v5717_v51, 512.0  ;;  %v3499_v22 = vsel %vm3435_vm13, %v5719_v50, 512.0  ;;  %vm3437_vm15 = vcmp.eq.f32.partialorder %v8843_v21, %v3364_v62  ;;  %v3500_v56 = vsel %vm3436_vm14, %v5721_v36, 512.0 }
 0x6a6   : > { %v3568_v23 = vmin.f32 %v3498_v58, %v3499_v22  ;;  %v3565_v28 = vmin.f32 %v3564_v5, %v3497_v18  ;;  %v3501_v54 = vsel %vm3437_vm15, %v5726_v42, 512.0  ;;  %v10664_v58 = vld [vmem:[#allocation15_spill] sm:$0xff]  ;;  %v10665_v22 = vld [vmem:[#allocation34_spill] sm:$0xff] }
 0x6a8   : > { %v3569_v19 = vmin.f32 %v3568_v23, %v3500_v56  ;;  %3566 = vmin.xlane.f32.xlu0 %v3565_v28 }
 0x6aa   : > { %v3369_v9 = vpop.xlane.xlu0 %3368  ;;  %v3570_v33 = vmin.f32 %v3569_v19, %v3501_v54 }
 0x6ab   : > { %vm3438_vm2 = vcmp.eq.f32.partialorder %v8822_v25, %v3369_v9  ;;  %vm3439_vm4 = vcmp.eq.f32.partialorder %v8825_v61, %v3369_v9  ;;  %vm3440_vm0 = vcmp.eq.f32.partialorder %v8835_v41, %v3369_v9  ;;  %vm3441_vm7 = vcmp.eq.f32.partialorder %v10655_v12, %v3369_v9  ;;  %v10657_v25 = vld [vmem:[#allocation94_spill] sm:$0xff]  ;;  %v10667_v12 = vld [vmem:[#allocation21_spill] sm:$0xff] }
 0x6ac   : > { %v3502_v59 = vsel %vm3438_vm2, %v5717_v51, 512.0  ;;  %v3503_v21 = vsel %vm3439_vm4, %v5719_v50, 512.0  ;;  %v3504_v16 = vsel %vm3440_vm0, %v5721_v36, 512.0  ;;  %v10658_v61 = vld [vmem:[#allocation98_spill] sm:$0xff]  ;;  %3571 = vmin.xlane.f32.xlu1 %v3570_v33  ;;  %v3505_v31 = vsel %vm3441_vm7, %v5726_v42, 512.0  ;;  %v10666_v33 = vld [vmem:[#allocation20_spill] sm:$0xff] }
 0x6ad   : > { %v3573_v0 = vmin.f32 %v3502_v59, %v3503_v21  ;;  %v3374_v6 = vpop.xlane.xlu1 %3373 }
 0x6ae   : > { %vm3442_vm8 = vcmp.eq.f32.partialorder %v10656_v15, %v3374_v6  ;;  %vm3443_vm11 = vcmp.eq.f32.partialorder %v10657_v25, %v3374_v6  ;;  %vm3444_vm12 = vcmp.eq.f32.partialorder %v10658_v61, %v3374_v6  ;;  %vm3445_vm1 = vcmp.eq.f32.partialorder %v10659_v35, %v3374_v6 }
 0x6af   : > { %v3506_v41 = vsel %vm3442_vm8, %v5717_v51, 512.0  ;;  %v3507_v48 = vsel %vm3443_vm11, %v5719_v50, 512.0  ;;  %v3574_v20 = vmin.f32 %v3573_v0, %v3504_v16  ;;  %v3508_v40 = vsel %vm3444_vm12, %v5721_v36, 512.0  ;;  %v10668_v0 = vld [vmem:[#allocation47_spill] sm:$0xff]  ;;  %v10669_v16 = vld [vmem:[#allocation77_spill] sm:$0xff] }
 0x6b0   : > { %v3578_v44 = vmin.f32 %v3506_v41, %v3507_v48  ;;  %v3509_v46 = vsel %vm3445_vm1, %v5726_v42, 512.0  ;;  %v10670_v48 = vld [vmem:[#allocation52_spill] sm:$0xff] }
 0x6b1   : > { %v3575_v32 = vmin.f32 %v3574_v20, %v3505_v31  ;;  %v10671_v20 = vld [vmem:[#allocation43_spill] sm:$0xff] }
 0x6b2   : > { %v3579_v26 = vmin.f32 %v3578_v44, %v3508_v40 }
 0x6b3   : > { %3576 = vmin.xlane.f32.xlu0 %v3575_v32 }
 0x6b4   : > { %v3379_v45 = vpop.xlane.xlu0 %3378  ;;  %v3580_v43 = vmin.f32 %v3579_v26, %v3509_v46 }
 0x6b5   : > { %vm3446_vm5 = vcmp.eq.f32.partialorder %v10660_v11, %v3379_v45  ;;  %vm3447_vm6 = vcmp.eq.f32.partialorder %v10661_v17, %v3379_v45  ;;  %vm3448_vm9 = vcmp.eq.f32.partialorder %v8907_v7, %v3379_v45  ;;  %vm3449_vm10 = vcmp.eq.f32.partialorder %v8977_v52, %v3379_v45  ;;  %v9279_v45 = vld [vmem:[%s9544_s8] ss:$0 sm:$0xff] }
 0x6b6   : > { %v3510_v29 = vsel %vm3446_vm5, %v5717_v51, 512.0  ;;  %v3511_v60 = vsel %vm3447_vm6, %v5719_v50, 512.0  ;;  %v3384_v34 = vpop.xlane.xlu1 %3383  ;;  %v3512_v49 = vsel %vm3448_vm9, %v5721_v36, 512.0  ;;  %3581 = vmin.xlane.f32.xlu1 %v3580_v43  ;;  %v3513_v52 = vsel %vm3449_vm10, %v5726_v42, 512.0  ;;  %v10672_v17 = vld [vmem:[#allocation67_spill] sm:$0xff] }
 0x6b7   : > { %v3583_v38 = vmin.f32 %v3510_v29, %v3511_v60  ;;  %vm3450_vm13 = vcmp.eq.f32.partialorder %v10662_v24, %v3384_v34  ;;  %vm3451_vm14 = vcmp.eq.f32.partialorder %v10663_v4, %v3384_v34  ;;  %vm3452_vm15 = vcmp.eq.f32.partialorder %v8942_v47, %v3384_v34 }
 0x6b8   : > { %v3514_v7 = vsel %vm3450_vm13, %v5717_v51, 512.0  ;;  %v3515_v63 = vsel %vm3451_vm14, %v5719_v50, 512.0  ;;  %vm3453_vm2 = vcmp.eq.f32.partialorder %v8986_v8, %v3384_v34  ;;  %v3516_v5 = vsel %vm3452_vm15, %v5721_v36, 512.0 }
 0x6b9   : > { %v3584_v14 = vmin.f32 %v3583_v38, %v3512_v49  ;;  %v3588_v62 = vmin.f32 %v3514_v7, %v3515_v63  ;;  %v3389_v57 = vpop.xlane.xlu0 %3388  ;;  %v3517_v8 = vsel %vm3453_vm2, %v5726_v42, 512.0  ;;  %v4209_v26 = vadd.f32 %v9279_v45, %v9162_v13  ;;  %v10674_v13 = vld [vmem:[#allocation28_spill] sm:$0xff] }
 0x6ba   : > { %vm3454_vm4 = vcmp.eq.f32.partialorder %v10664_v58, %v3389_v57  ;;  %vm3455_vm0 = vcmp.eq.f32.partialorder %v10665_v22, %v3389_v57  ;;  %vm3456_vm7 = vcmp.eq.f32.partialorder %v9009_v37, %v3389_v57  ;;  %vm3457_vm8 = vcmp.eq.f32.partialorder %v9024_v10, %v3389_v57 }
 0x6bb   : > { %v3518_v47 = vsel %vm3454_vm4, %v5717_v51, 512.0  ;;  %v3519_v23 = vsel %vm3455_vm0, %v5719_v50, 512.0  ;;  %v3585_v18 = vmin.f32 %v3584_v14, %v3513_v52  ;;  %v3589_v28 = vmin.f32 %v3588_v62, %v3516_v5 }
 0x6bc   : > { %v3593_v56 = vmin.f32 %v3518_v47, %v3519_v23  ;;  %v3520_v9 = vsel %vm3456_vm7, %v5721_v36, 512.0  ;;  %v3521_v37 = vsel %vm3457_vm8, %v5726_v42, 512.0  ;;  %v4237_v23 = vld [vmem:[%s6487_s21 + $0x78] sm:$0xff] }
 0x6bd   : > { %3586 = vmin.xlane.f32.xlu0 %v3585_v18  ;;  %v3590_v19 = vmin.f32 %v3589_v28, %v3517_v8  ;;  %v9311_v18 = vpop.f32.mrb[38].mxu1  ;;  %v10675_v8 = vld [vmem:[#allocation32_spill] sm:$0xff] }
 0x6be   : > { %v3594_v54 = vmin.f32 %v3593_v56, %v3520_v9  ;;  %v4236_v56 = vld [vmem:[%s6487_s21 + $0x70] sm:$0xff]  ;;  %v9314_v28 = vpop.f32.mrb[39].mxu1 }
 0x6bf   : > { %3591 = vmin.xlane.f32.xlu1 %v3590_v19 }
 0x6c0   : > { %v3595_v21 = vmin.f32 %v3594_v54, %v3521_v37  ;;  %v10676_v54 = vld [vmem:[#allocation29_spill] sm:$0xff] }
 0x6c1   : > { %v3394_v59 = vpop.xlane.xlu1 %3393 }
 0x6c2   : > { %vm3458_vm11 = vcmp.eq.f32.partialorder %v10666_v33, %v3394_v59  ;;  %vm3459_vm12 = vcmp.eq.f32.partialorder %v10667_v12, %v3394_v59  ;;  %vm3460_vm1 = vcmp.eq.f32.partialorder %v10668_v0, %v3394_v59  ;;  %3596 = vmin.xlane.f32.xlu0 %v3595_v21  ;;  %vm3461_vm5 = vcmp.eq.f32.partialorder %v10669_v16, %v3394_v59  ;;  %v10677_v59 = vld [vmem:[#allocation31_spill] sm:$0xff]  ;;  %v10678_v33 = vld [vmem:[#allocation100_spill] sm:$0xff] }
 0x6c3   : > { %v3522_v10 = vsel %vm3458_vm11, %v5717_v51, 512.0  ;;  %v3523_v6 = vsel %vm3459_vm12, %v5719_v50, 512.0  ;;  %v3524_v25 = vsel %vm3460_vm1, %v5721_v36, 512.0  ;;  %v3525_v35 = vsel %vm3461_vm5, %v5726_v42, 512.0  ;;  %v10679_v16 = vld [vmem:[#allocation19_spill] sm:$0xff] }
 0x6c4   : > { %v3598_v15 = vmin.f32 %v3522_v10, %v3523_v6 }
 0x6c6   : > { %v3599_v41 = vmin.f32 %v3598_v15, %v3524_v25  ;;  %v10680_v25 = vld [vmem:[#allocation18_spill] sm:$0xff] }
 0x6c8   : > { %v3600_v32 = vmin.f32 %v3599_v41, %v3525_v35  ;;  %v10681_v41 = vld [vmem:[#allocation51_spill] sm:$0xff] }
 0x6c9   : > { %v3399_v61 = vpop.xlane.xlu0 %3398 }
 0x6ca   : > { %vm3462_vm6 = vcmp.eq.f32.partialorder %v10670_v48, %v3399_v61  ;;  %vm3463_vm9 = vcmp.eq.f32.partialorder %v10671_v20, %v3399_v61  ;;  %vm3464_vm10 = vcmp.eq.f32.partialorder %v9091_v27, %v3399_v61  ;;  %v10673_v27 = vld [vmem:[#allocation68_spill] sm:$0xff]  ;;  %vm3465_vm2 = vcmp.eq.f32.partialorder %v9137_v30, %v3399_v61  ;;  %3601 = vmin.xlane.f32.xlu1 %v3600_v32  ;;  %v10682_v20 = vld [vmem:[#allocation57_spill] sm:$0xff] }
 0x6cb   : > { %v3526_v44 = vsel %vm3462_vm6, %v5717_v51, 512.0  ;;  %v3527_v31 = vsel %vm3463_vm9, %v5719_v50, 512.0  ;;  %v3528_v46 = vsel %vm3464_vm10, %v5721_v36, 512.0  ;;  %v10683_v32 = vld [vmem:[#allocation65_spill] sm:$0xff] }
 0x6cc   : > { %v3404_v40 = vpop.xlane.xlu1 %3403  ;;  %v3603_v11 = vmin.f32 %v3526_v44, %v3527_v31 }
 0x6cd   : > { %vm3466_vm13 = vcmp.eq.f32.partialorder %v10672_v17, %v3404_v40  ;;  %vm3467_vm14 = vcmp.eq.f32.partialorder %v10673_v27, %v3404_v40  ;;  %vm3468_vm15 = vcmp.eq.f32.partialorder %v9130_v3, %v3404_v40  ;;  %v3409_v43 = vpop.xlane.xlu0 %3408  ;;  %vm3469_vm8 = vcmp.eq.f32.partialorder %v9147_v55, %v3404_v40  ;;  %v10685_v27 = vld [vmem:[#allocation25_spill] sm:$0xff] }
 0x6ce   : > { %v3530_v29 = vsel %vm3466_vm13, %v5717_v51, 512.0  ;;  %v3531_v60 = vsel %vm3467_vm14, %v5719_v50, 512.0  ;;  %vm3470_vm4 = vcmp.eq.f32.partialorder %v9121_v2, %v3409_v43  ;;  %vm3471_vm0 = vcmp.eq.f32.partialorder %v10674_v13, %v3409_v43 }
 0x6cf   : > { %v3608_v38 = vmin.f32 %v3530_v29, %v3531_v60  ;;  %vm3472_vm7 = vcmp.eq.f32.partialorder %v9140_v53, %v3409_v43  ;;  %v3532_v3 = vsel %vm3468_vm15, %v5721_v36, 512.0  ;;  %v3534_v34 = vsel %vm3470_vm4, %v5717_v51, 512.0  ;;  %v10686_v29 = vld [vmem:[#allocation24_spill] sm:$0xff] }
 0x6d0   : > { %v3535_v49 = vsel %vm3471_vm0, %v5719_v50, 512.0  ;;  %v4306_v24 = vpop.permute.xlu1 %4305  ;;  %vm3473_vm11 = vcmp.eq.f32.partialorder %v9154_v1, %v3409_v43  ;;  %v3604_v7 = vmin.f32 %v3603_v11, %v3528_v46  ;;  %v3536_v2 = vsel %vm3472_vm7, %v5721_v36, 512.0  ;;  %v10684_v11 = vld [vmem:[#allocation80_spill] sm:$0xff] }
 0x6d1   : > { %v3613_v4 = vmin.f32 %v3534_v34, %v3535_v49  ;;  %v4331_v63 = vmul.f32 %v4306_v24, %v4209_v26  ;;  %v3529_v53 = vsel %vm3465_vm2, %v5726_v42, 512.0  ;;  %v4204_v55 = vadd.f32 %v9279_v45, %v9165_v39  ;;  %v10688_v49 = vld [vmem:[#allocation8_spill] sm:$0xff] }
 0x6d2   : > { %v3609_v14 = vmin.f32 %v3608_v38, %v3532_v3  ;;  %v3605_v62 = vmin.f32 %v3604_v7, %v3529_v53  ;;  %v3533_v52 = vsel %vm3469_vm8, %v5726_v42, 512.0  ;;  %v3537_v22 = vsel %vm3473_vm11, %v5726_v42, 512.0  ;;  %v10687_v3 = vld [vmem:[#allocation9_spill] sm:$0xff] }
 0x6d3   : > { %v4761_v57 = vpack.c.bf16 %v4331_v63, %v4331_v63  ;;  %v3614_v1 = vmin.f32 %v3613_v4, %v3536_v2  ;;  %v10689_v4 = vld [vmem:[#allocation11_spill] sm:$0xff] }
 0x6d4   : > { %v3610_v58 = vmin.f32 %v3609_v14, %v3533_v52  ;;  %3606 = vmin.xlane.f32.xlu0 %v3605_v62  ;;  %v10690_v63 = vld [vmem:[#allocation75_spill] sm:$0xff]  ;;  %v10691_v62 = vld [vmem:[#allocation74_spill] sm:$0xff]  ;;  %v10692_v52 = vld [vmem:[#allocation81_spill] sm:$0xff] }
 0x6d5   : > { %4412 = vst.msk [vmem:[%s6633_s11 + $0x34] sm:$0xf] %vm4398_vm3, %v4761_v57  ;;  %v3615_v30 = vmin.f32 %v3614_v1, %v3537_v22  ;;  %v4301_v5 = vpop.permute.xlu0 %4300 }
 0x6d6   : > { %3611 = vmin.xlane.f32.xlu1 %v3610_v58  ;;  %v4330_v47 = vmul.f32 %v4301_v5, %v4204_v55  ;;  %v10693_v58 = vld [vmem:[#allocation82_spill] sm:$0xff] }
 0x6d8   : > { %v4760_v39 = vpack.c.bf16 %v4330_v47, %v4330_v47  ;;  %3616 = vmin.xlane.f32.xlu0 %v3615_v30  ;;  %v10694_v30 = vld [vmem:[#allocation83_spill] sm:$0xff] }
 0x6da   : > { %4411 = vst.msk [vmem:[%s6633_s11 + $0x30] sm:$0xf] %vm4398_vm3, %v4760_v39 }
 0x6e7   : > { %4315 = vperm.xlu1 %4954, %v4237_v23  }
 0x6ee   : > { %4310 = vperm.xlu0 %4953, %v4236_v56   ;;  %v10695_v56 = vld [vmem:[#allocation79_spill] sm:$0xff] }
 0x716   : > { %v3542_v9 = vpop.xlane.xlu1 %3541 }
 0x717   : > { %vm3618_vm12 = vcmp.eq.f32.partialorder %v5717_v51, %v3542_v9  ;;  %vm3619_vm1 = vcmp.eq.f32.partialorder %v5719_v50, %v3542_v9  ;;  %vm3620_vm5 = vcmp.eq.f32.partialorder %v5721_v36, %v3542_v9  ;;  %vm3621_vm6 = vcmp.eq.f32.partialorder %v5726_v42, %v3542_v9 }
 0x718   : > { %v3682_v19 = vsel %vm3618_vm12, 1.0, %v10675_v8  ;;  %v3683_v37 = vsel %vm3619_vm1, 1.0, %v10676_v54  ;;  %v3684_v21 = vsel %vm3620_vm5, 1.0, %v10677_v59  ;;  %v3685_v12 = vsel %vm3621_vm6, 1.0, %v10678_v33  ;;  %v10696_v8 = vld [vmem:[#allocation84_spill] sm:$0xff]  ;;  %v10697_v54 = vld [vmem:[#allocation85_spill] sm:$0xff] }
 0x719   : > { %v4716_v0 = vpack.c.bf16 %v3683_v37, %v3682_v19  ;;  %v4717_v10 = vpack.c.bf16 %v3685_v12, %v3684_v21  ;;  %v10698_v59 = vld [vmem:[#allocation86_spill] sm:$0xff] }
 0x71b   : > { %3938 = vst [vmem:[%s5286_s25] sm:$0xff] %v4716_v0  ;;  %3939 = vst [vmem:[%s5286_s25 + $0x8] sm:$0xff] %v4717_v10  ;;  %v10699_v10 = vld [vmem:[#allocation26_spill] sm:$0xff] }
 0x71f   : > { %v3547_v6 = vpop.xlane.xlu0 %3546 }
 0x720   : > { %vm3622_vm9 = vcmp.eq.f32.partialorder %v5717_v51, %v3547_v6  ;;  %vm3623_vm10 = vcmp.eq.f32.partialorder %v5719_v50, %v3547_v6  ;;  %vm3624_vm13 = vcmp.eq.f32.partialorder %v5721_v36, %v3547_v6  ;;  %vm3625_vm14 = vcmp.eq.f32.partialorder %v5726_v42, %v3547_v6 }
 0x721   : > { %v3686_v15 = vsel %vm3622_vm9, 1.0, %v10679_v16  ;;  %v3687_v61 = vsel %vm3623_vm10, 1.0, %v10680_v25  ;;  %v3688_v48 = vsel %vm3624_vm13, 1.0, %v10681_v41  ;;  %v3689_v35 = vsel %vm3625_vm14, 1.0, %v10682_v20  ;;  %v10700_v16 = vld [vmem:[#allocation33_spill] sm:$0xff]  ;;  %v10701_v25 = vld [vmem:[#allocation87_spill] sm:$0xff] }
 0x722   : > { %v4718_v44 = vpack.c.bf16 %v3687_v61, %v3686_v15  ;;  %v4719_v31 = vpack.c.bf16 %v3689_v35, %v3688_v48  ;;  %v10702_v41 = vld [vmem:[#allocation88_spill] sm:$0xff] }
 0x724   : > { %3940 = vst [vmem:[%s5286_s25 + $0x14] sm:$0xff] %v4718_v44  ;;  %3941 = vst [vmem:[%s5286_s25 + $0x1c] sm:$0xff] %v4719_v31  ;;  %v3552_v40 = vpop.xlane.xlu1 %3551  ;;  %v10703_v31 = vld [vmem:[#allocation89_spill] sm:$0xff] }
 0x725   : > { %vm3626_vm15 = vcmp.eq.f32.partialorder %v5717_v51, %v3552_v40  ;;  %vm3627_vm2 = vcmp.eq.f32.partialorder %v5719_v50, %v3552_v40  ;;  %vm3628_vm4 = vcmp.eq.f32.partialorder %v5721_v36, %v3552_v40  ;;  %vm3629_vm0 = vcmp.eq.f32.partialorder %v5726_v42, %v3552_v40 }
 0x726   : > { %v3690_v26 = vsel %vm3626_vm15, 1.0, %v10683_v32  ;;  %v3691_v17 = vsel %vm3627_vm2, 1.0, %v10684_v11  ;;  %v3692_v46 = vsel %vm3628_vm4, 1.0, %v10685_v27  ;;  %v3693_v60 = vsel %vm3629_vm0, 1.0, %v10686_v29  ;;  %v10704_v32 = vld [vmem:[#allocation48_spill] sm:$0xff]  ;;  %v10705_v11 = vld [vmem:[#allocation91_spill] sm:$0xff] }
 0x727   : > { %v4720_v43 = vpack.c.bf16 %v3691_v17, %v3690_v26  ;;  %v4721_v38 = vpack.c.bf16 %v3693_v60, %v3692_v46  ;;  %v10706_v27 = vld [vmem:[#allocation92_spill] sm:$0xff] }
 0x729   : > { %3942 = vst [vmem:[%s5286_s25 + $0x28] sm:$0xff] %v4720_v43  ;;  %3943 = vst [vmem:[%s5286_s25 + $0x30] sm:$0xff] %v4721_v38  ;;  %v10707_v38 = vld [vmem:[#allocation93_spill] sm:$0xff] }
 0x72a   : > { %v3557_v13 = vpop.xlane.xlu0 %3556 }
 0x72b   : > { %vm3630_vm7 = vcmp.eq.f32.partialorder %v5717_v51, %v3557_v13  ;;  %vm3631_vm8 = vcmp.eq.f32.partialorder %v5719_v50, %v3557_v13  ;;  %vm3632_vm11 = vcmp.eq.f32.partialorder %v5721_v36, %v3557_v13  ;;  %vm3633_vm12 = vcmp.eq.f32.partialorder %v5726_v42, %v3557_v13 }
 0x72c   : > { %v3694_v34 = vsel %vm3630_vm7, 1.0, %v10687_v3  ;;  %v3695_v24 = vsel %vm3631_vm8, 1.0, %v10688_v49  ;;  %v3696_v7 = vsel %vm3632_vm11, 1.0, %v10689_v4  ;;  %v3697_v2 = vsel %vm3633_vm12, 1.0, %v10690_v63  ;;  %v10708_v3 = vld [vmem:[#allocation90_spill] sm:$0xff]  ;;  %v10709_v49 = vld [vmem:[#allocation37_spill] sm:$0xff] }
 0x72d   : > { %v4722_v53 = vpack.c.bf16 %v3695_v24, %v3694_v34  ;;  %v4723_v55 = vpack.c.bf16 %v3697_v2, %v3696_v7  ;;  %v10710_v4 = vld [vmem:[#allocation96_spill] sm:$0xff] }
 0x72f   : > { %3944 = vst [vmem:[%s5286_s25 + $0x3c] sm:$0xff] %v4722_v53  ;;  %3945 = vst [vmem:[%s5286_s25 + $0x44] sm:$0xff] %v4723_v55  ;;  %v10711_v55 = vld [vmem:[#allocation99_spill] sm:$0xff] }
 0x730   : > { %v3562_v14 = vpop.xlane.xlu1 %3561 }
 0x731   : > { %vm3634_vm1 = vcmp.eq.f32.partialorder %v5717_v51, %v3562_v14  ;;  %vm3635_vm5 = vcmp.eq.f32.partialorder %v5719_v50, %v3562_v14  ;;  %vm3636_vm6 = vcmp.eq.f32.partialorder %v5721_v36, %v3562_v14  ;;  %vm3637_vm9 = vcmp.eq.f32.partialorder %v5726_v42, %v3562_v14 }
 0x732   : > { %v3698_v57 = vsel %vm3634_vm1, 1.0, %v10691_v62  ;;  %v3699_v1 = vsel %vm3635_vm5, 1.0, %v10692_v52  ;;  %v3700_v22 = vsel %vm3636_vm6, 1.0, %v10693_v58  ;;  %v3701_v5 = vsel %vm3637_vm9, 1.0, %v10694_v30  ;;  %v10712_v62 = vld [vmem:[#allocation35_spill] sm:$0xff]  ;;  %v10714_v58 = vld [vmem:[#allocation49_spill] sm:$0xff] }
 0x733   : > { %v4724_v47 = vpack.c.bf16 %v3699_v1, %v3698_v57  ;;  %v4725_v39 = vpack.c.bf16 %v3701_v5, %v3700_v22  ;;  %v10713_v52 = vld [vmem:[#allocation95_spill] sm:$0xff] }
 0x735   : > { %3946 = vst [vmem:[%s5286_s25 + $0x50] sm:$0xff] %v4724_v47  ;;  %3947 = vst [vmem:[%s5286_s25 + $0x58] sm:$0xff] %v4725_v39  ;;  %v3567_v23 = vpop.xlane.xlu0 %3566  ;;  %v10715_v39 = vld [vmem:[#allocation17_spill] sm:$0xff] }
 0x736   : > { %vm3638_vm10 = vcmp.eq.f32.partialorder %v5717_v51, %v3567_v23  ;;  %vm3639_vm13 = vcmp.eq.f32.partialorder %v5719_v50, %v3567_v23  ;;  %vm3640_vm14 = vcmp.eq.f32.partialorder %v5721_v36, %v3567_v23  ;;  %vm3641_vm15 = vcmp.eq.f32.partialorder %v5726_v42, %v3567_v23 }
 0x737   : > { %v3702_v9 = vsel %vm3638_vm10, 1.0, %v10695_v56  ;;  %v3703_v19 = vsel %vm3639_vm13, 1.0, %v10696_v8  ;;  %v3704_v37 = vsel %vm3640_vm14, 1.0, %v10697_v54  ;;  %v3705_v21 = vsel %vm3641_vm15, 1.0, %v10698_v59  ;;  %v10716_v56 = vld [vmem:[#allocation36_spill] sm:$0xff]  ;;  %v10717_v8 = vld [vmem:[#allocation27_spill] sm:$0xff] }
 0x738   : > { %v4726_v33 = vpack.c.bf16 %v3703_v19, %v3702_v9  ;;  %v4727_v12 = vpack.c.bf16 %v3705_v21, %v3704_v37  ;;  %v10718_v54 = vld [vmem:[#allocation41_spill] sm:$0xff] }
 0x739   : > { %v3572_v0 = vpop.xlane.xlu1 %3571 }
 0x73a   : > { %vm3642_vm2 = vcmp.eq.f32.partialorder %v5717_v51, %v3572_v0  ;;  %vm3643_vm4 = vcmp.eq.f32.partialorder %v5719_v50, %v3572_v0  ;;  %vm3644_vm0 = vcmp.eq.f32.partialorder %v5721_v36, %v3572_v0  ;;  %vm3645_vm7 = vcmp.eq.f32.partialorder %v5726_v42, %v3572_v0  ;;  %3948 = vst [vmem:[%s5286_s25 + $0x64] sm:$0xff] %v4726_v33 }
 0x73b   : > { %3949 = vst [vmem:[%s5286_s25 + $0x6c] sm:$0xff] %v4727_v12  ;;  %v3706_v6 = vsel %vm3642_vm2, 1.0, %v10699_v10  ;;  %v3707_v15 = vsel %vm3643_vm4, 1.0, %v10700_v16  ;;  %v3708_v61 = vsel %vm3644_vm0, 1.0, %v10701_v25  ;;  %v3709_v48 = vsel %vm3645_vm7, 1.0, %v10702_v41  ;;  %v10719_v12 = vld [vmem:[#allocation12_spill] sm:$0xff] }
 0x73c   : > { %v4728_v20 = vpack.c.bf16 %v3707_v15, %v3706_v6  ;;  %v4729_v35 = vpack.c.bf16 %v3709_v48, %v3708_v61  ;;  %v10720_v10 = vld [vmem:[#allocation40_spill] sm:$0xff]  ;;  %v10721_v16 = vld [vmem:[#allocation14_spill] sm:$0xff]  ;;  %v10722_v25 = vld [vmem:[#allocation13_spill] sm:$0xff] }
 0x73e   : > { %3950 = vst [vmem:[%s5286_s25 + $0x78] sm:$0xff] %v4728_v20  ;;  %3951 = vst [vmem:[%s5286_s25 + $0x80] sm:$0xff] %v4729_v35  ;;  %v10723_v35 = vld [vmem:[#allocation7_spill] sm:$0xff] }
 0x740   : > { %v3577_v44 = vpop.xlane.xlu0 %3576 }
 0x741   : > { %vm3646_vm8 = vcmp.eq.f32.partialorder %v5717_v51, %v3577_v44  ;;  %vm3647_vm11 = vcmp.eq.f32.partialorder %v5719_v50, %v3577_v44  ;;  %vm3648_vm12 = vcmp.eq.f32.partialorder %v5721_v36, %v3577_v44  ;;  %vm3649_vm1 = vcmp.eq.f32.partialorder %v5726_v42, %v3577_v44 }
 0x742   : > { %v3710_v40 = vsel %vm3646_vm8, 1.0, %v10703_v31  ;;  %v3711_v26 = vsel %vm3647_vm11, 1.0, %v10704_v32  ;;  %v3712_v17 = vsel %vm3648_vm12, 1.0, %v10705_v11  ;;  %v3713_v46 = vsel %vm3649_vm1, 1.0, %v10706_v27  ;;  %v10724_v31 = vld [vmem:[#allocation22_spill] sm:$0xff]  ;;  %v10725_v32 = vld [vmem:[#allocation45_spill] sm:$0xff] }
 0x743   : > { %v4730_v29 = vpack.c.bf16 %v3711_v26, %v3710_v40  ;;  %v4731_v60 = vpack.c.bf16 %v3713_v46, %v3712_v17  ;;  %v3582_v43 = vpop.xlane.xlu1 %3581  ;;  %v10726_v11 = vld [vmem:[#allocation16_spill] sm:$0xff] }
 0x744   : > { %vm3650_vm5 = vcmp.eq.f32.partialorder %v5717_v51, %v3582_v43  ;;  %vm3651_vm6 = vcmp.eq.f32.partialorder %v5719_v50, %v3582_v43  ;;  %vm3652_vm9 = vcmp.eq.f32.partialorder %v5721_v36, %v3582_v43  ;;  %vm3653_vm10 = vcmp.eq.f32.partialorder %v5726_v42, %v3582_v43 }
 0x745   : > { %3952 = vst [vmem:[%s5286_s25 + $0x8c] sm:$0xff] %v4730_v29  ;;  %3953 = vst [vmem:[%s5286_s25 + $0x94] sm:$0xff] %v4731_v60  ;;  %v3714_v13 = vsel %vm3650_vm5, 1.0, %v10707_v38  ;;  %v3715_v34 = vsel %vm3651_vm6, 1.0, %v10708_v3  ;;  %v3716_v24 = vsel %vm3652_vm9, 1.0, %v10709_v49  ;;  %v3717_v7 = vsel %vm3653_vm10, 1.0, %v10710_v4 }
 0x746   : > { %v4732_v63 = vpack.c.bf16 %v3715_v34, %v3714_v13  ;;  %v4733_v2 = vpack.c.bf16 %v3717_v7, %v3716_v24  ;;  %v4219_v60 = vadd.f32 %v9279_v45, %v9311_v18  ;;  %v10727_v38 = vld [vmem:[#allocation78_spill] sm:$0xff]  ;;  %v10728_v3 = vld [vmem:[#allocation23_spill] sm:$0xff]  ;;  %v10730_v4 = vld [vmem:[#allocation76_spill] sm:$0xff] }
 0x747   : > { %v10729_v49 = vld [vmem:[#allocation46_spill] sm:$0xff] }
 0x748   : > { %3954 = vst [vmem:[%s5286_s25 + $0xa0] sm:$0xff] %v4732_v63  ;;  %3955 = vst [vmem:[%s5286_s25 + $0xa8] sm:$0xff] %v4733_v2  ;;  %v10731_v2 = vld [vmem:[#allocation103_spill] sm:$0xff] }
 0x74a   : > { %v3587_v53 = vpop.xlane.xlu0 %3586 }
 0x74b   : > { %vm3654_vm13 = vcmp.eq.f32.partialorder %v5717_v51, %v3587_v53  ;;  %vm3655_vm14 = vcmp.eq.f32.partialorder %v5719_v50, %v3587_v53  ;;  %vm3656_vm15 = vcmp.eq.f32.partialorder %v5721_v36, %v3587_v53  ;;  %vm3657_vm2 = vcmp.eq.f32.partialorder %v5726_v42, %v3587_v53 }
 0x74c   : > { %v3718_v14 = vsel %vm3654_vm13, 1.0, %v10711_v55  ;;  %v3719_v57 = vsel %vm3655_vm14, 1.0, %v10712_v62  ;;  %v3720_v1 = vsel %vm3656_vm15, 1.0, %v10713_v52  ;;  %v3721_v22 = vsel %vm3657_vm2, 1.0, %v10714_v58  ;;  %v3592_v47 = vpop.xlane.xlu1 %3591  ;;  %v10732_v55 = vld [vmem:[#allocation104_spill] sm:$0xff] }
 0x74d   : > { %v4734_v30 = vpack.c.bf16 %v3719_v57, %v3718_v14  ;;  %v4735_v5 = vpack.c.bf16 %v3721_v22, %v3720_v1  ;;  %vm3658_vm4 = vcmp.eq.f32.partialorder %v5717_v51, %v3592_v47  ;;  %vm3659_vm0 = vcmp.eq.f32.partialorder %v5719_v50, %v3592_v47  ;;  %v10733_v57 = vld [vmem:[#allocation102_spill] sm:$0xff] }
 0x74e   : > { %vm3660_vm7 = vcmp.eq.f32.partialorder %v5721_v36, %v3592_v47  ;;  %vm3661_vm8 = vcmp.eq.f32.partialorder %v5726_v42, %v3592_v47  ;;  %v3722_v23 = vsel %vm3658_vm4, 1.0, %v10715_v39  ;;  %v3723_v9 = vsel %vm3659_vm0, 1.0, %v10716_v56  ;;  %v10734_v1 = vld [vmem:[#allocation50_spill] sm:$0xff] }
 0x74f   : > { %3956 = vst [vmem:[%s5286_s25 + $0xb4] sm:$0xff] %v4734_v30  ;;  %3957 = vst [vmem:[%s5286_s25 + $0xbc] sm:$0xff] %v4735_v5  ;;  %v3724_v19 = vsel %vm3660_vm7, 1.0, %v10717_v8  ;;  %v3725_v37 = vsel %vm3661_vm8, 1.0, %v10718_v54  ;;  %v3597_v59 = vpop.xlane.xlu0 %3596  ;;  %v4736_v21 = vpack.c.bf16 %v3723_v9, %v3722_v23  ;;  %v10735_v47 = vld [vmem:[#allocation54_spill] sm:$0xff]  ;;  %v10736_v23 = vld [vmem:[#allocation59_spill] sm:$0xff]  ;;  %v4214_v54 = vadd.f32 %v9279_v45, %v9314_v28 }
 0x750   : > { %v4737_v33 = vpack.c.bf16 %v3725_v37, %v3724_v19  ;;  %vm3662_vm11 = vcmp.eq.f32.partialorder %v5717_v51, %v3597_v59  ;;  %vm3663_vm12 = vcmp.eq.f32.partialorder %v5719_v50, %v3597_v59  ;;  %vm3664_vm1 = vcmp.eq.f32.partialorder %v5721_v36, %v3597_v59  ;;  %v10737_v9 = vld [vmem:[#allocation53_spill] sm:$0xff]  ;;  %v10738_v8 = vld [vmem:[#allocation55_spill] sm:$0xff] }
 0x751   : > { %vm3665_vm5 = vcmp.eq.f32.partialorder %v5726_v42, %v3597_v59  ;;  %v3726_v0 = vsel %vm3662_vm11, 1.0, %v10719_v12  ;;  %v3727_v6 = vsel %vm3663_vm12, 1.0, %v10720_v10  ;;  %3958 = vst [vmem:[%s5286_s25 + $0xc8] sm:$0xff] %v4736_v21  ;;  %v3728_v15 = vsel %vm3664_vm1, 1.0, %v10721_v16 }
 0x752   : > { %3959 = vst [vmem:[%s5286_s25 + $0xd0] sm:$0xff] %v4737_v33  ;;  %v3729_v61 = vsel %vm3665_vm5, 1.0, %v10722_v25  ;;  %v4738_v41 = vpack.c.bf16 %v3727_v6, %v3726_v0 }
 0x753   : > { %v4739_v48 = vpack.c.bf16 %v3729_v61, %v3728_v15 }
 0x754   : > { %3960 = vst [vmem:[%s5286_s25 + $0xdc] sm:$0xff] %v4738_v41 }
 0x755   : > { %3961 = vst [vmem:[%s5286_s25 + $0xe4] sm:$0xff] %v4739_v48 }
 0x757   : > { %v3602_v20 = vpop.xlane.xlu1 %3601 }
 0x758   : > { %vm3666_vm6 = vcmp.eq.f32.partialorder %v5717_v51, %v3602_v20  ;;  %vm3667_vm9 = vcmp.eq.f32.partialorder %v5719_v50, %v3602_v20  ;;  %vm3668_vm10 = vcmp.eq.f32.partialorder %v5721_v36, %v3602_v20  ;;  %vm3669_vm13 = vcmp.eq.f32.partialorder %v5726_v42, %v3602_v20 }
 0x759   : > { %v3730_v44 = vsel %vm3666_vm6, 1.0, %v10723_v35  ;;  %v3731_v40 = vsel %vm3667_vm9, 1.0, %v10724_v31  ;;  %v3732_v26 = vsel %vm3668_vm10, 1.0, %v10725_v32  ;;  %v3733_v17 = vsel %vm3669_vm13, 1.0, %v10726_v11 }
 0x75a   : > { %v4740_v27 = vpack.c.bf16 %v3731_v40, %v3730_v44  ;;  %v4741_v46 = vpack.c.bf16 %v3733_v17, %v3732_v26 }
 0x75c   : > { %3962 = vst [vmem:[%s5286_s25 + $0xf0] sm:$0xff] %v4740_v27  ;;  %3963 = vst [vmem:[%s5286_s25 + $0xf8] sm:$0xff] %v4741_v46 }
 0x761   : > { %v3607_v29 = vpop.xlane.xlu0 %3606 }
 0x762   : > { %vm3670_vm14 = vcmp.eq.f32.partialorder %v5717_v51, %v3607_v29  ;;  %vm3671_vm15 = vcmp.eq.f32.partialorder %v5719_v50, %v3607_v29  ;;  %vm3672_vm2 = vcmp.eq.f32.partialorder %v5721_v36, %v3607_v29  ;;  %vm3673_vm4 = vcmp.eq.f32.partialorder %v5726_v42, %v3607_v29 }
 0x763   : > { %v3612_v43 = vpop.xlane.xlu1 %3611  ;;  %v3734_v13 = vsel %vm3670_vm14, 1.0, %v10727_v38  ;;  %v3735_v34 = vsel %vm3671_vm15, 1.0, %v10728_v3  ;;  %v3736_v24 = vsel %vm3672_vm2, 1.0, %v10729_v49  ;;  %v3737_v7 = vsel %vm3673_vm4, 1.0, %v10730_v4 }
 0x764   : > { %v4742_v18 = vpack.c.bf16 %v3735_v34, %v3734_v13  ;;  %v4743_v63 = vpack.c.bf16 %v3737_v7, %v3736_v24  ;;  %vm3674_vm0 = vcmp.eq.f32.partialorder %v5717_v51, %v3612_v43  ;;  %vm3675_vm7 = vcmp.eq.f32.partialorder %v5719_v50, %v3612_v43 }
 0x765   : > { %vm3676_vm8 = vcmp.eq.f32.partialorder %v5721_v36, %v3612_v43  ;;  %vm3677_vm11 = vcmp.eq.f32.partialorder %v5726_v42, %v3612_v43  ;;  %v3738_v53 = vsel %vm3674_vm0, 1.0, %v10731_v2  ;;  %v3739_v14 = vsel %vm3675_vm7, 1.0, %v10732_v55  ;;  %v3617_v62 = vpop.xlane.xlu0 %3616 }
 0x766   : > { %3964 = vst [vmem:[%s5286_s25 + $0x104] sm:$0xff] %v4742_v18  ;;  %3965 = vst [vmem:[%s5286_s25 + $0x10c] sm:$0xff] %v4743_v63  ;;  %v3740_v52 = vsel %vm3676_vm8, 1.0, %v10733_v57  ;;  %v3741_v58 = vsel %vm3677_vm11, 1.0, %v10734_v1  ;;  %v4744_v22 = vpack.c.bf16 %v3739_v14, %v3738_v53  ;;  %vm3678_vm12 = vcmp.eq.f32.partialorder %v5717_v51, %v3617_v62 }
 0x767   : > { %v4316_v30 = vpop.permute.xlu1 %4315  ;;  %v4745_v5 = vpack.c.bf16 %v3741_v58, %v3740_v52  ;;  %vm3679_vm1 = vcmp.eq.f32.partialorder %v5719_v50, %v3617_v62  ;;  %vm3680_vm5 = vcmp.eq.f32.partialorder %v5721_v36, %v3617_v62  ;;  %vm3681_vm6 = vcmp.eq.f32.partialorder %v5726_v42, %v3617_v62 }
 0x768   : > { %3966 = vst [vmem:[%s5286_s25 + $0x118] sm:$0xff] %v4744_v22  ;;  %v3742_v39 = vsel %vm3678_vm12, 1.0, %v10735_v47  ;;  %v3743_v56 = vsel %vm3679_vm1, 1.0, %v10736_v23  ;;  %v3744_v51 = vsel %vm3680_vm5, 1.0, %v10737_v9  ;;  %v3745_v19 = vsel %vm3681_vm6, 1.0, %v10738_v8 }
 0x769   : > { %3967 = vst [vmem:[%s5286_s25 + $0x120] sm:$0xff] %v4745_v5  ;;  %v4746_v50 = vpack.c.bf16 %v3743_v56, %v3742_v39  ;;  %v4747_v36 = vpack.c.bf16 %v3745_v19, %v3744_v51  ;;  %v4333_v42 = vmul.f32 %v4316_v30, %v4219_v60 }
 0x76b   : > { %3968 = vst [vmem:[%s5286_s25 + $0x12c] sm:$0xff] %v4746_v50  ;;  %3969 = vst [vmem:[%s5286_s25 + $0x134] sm:$0xff] %v4747_v36  ;;  %v4763_v37 = vpack.c.bf16 %v4333_v42, %v4333_v42 }
 0x76c   : > { %5011 = shalt.err (!%p5008_p3)
}
 0x76d   : > { %s5012_s25 = scalar_lea.hbm %s9480_s12, 5120  ;;  %s5016_s29 = scalar_lea.hbm %s9545_s9, 20480 }
 0x76e   : > { %p5013_p4 = scmp.ne.s32.totalorder %s9480_s12, %s5012_s25  ;;  %p5017_p9 = scmp.lt.u32.totalorder %s9480_s12, %s9545_s9 }
 0x76f   : > { %p5018_p10 = scmp.lt.u32.totalorder %s5016_s29, %s5012_s25  ;;  %p5020_p12 = scmp.lt.u32.totalorder %s5012_s25, %s9480_s12 }
 0x770   : > { %p5014_p7 = pnand %p5013_p4, %p5160_p5 }
 0x771   : > { %p5019_p11 = por %p5018_p10, %p5017_p9 }
 0x772   : > { %p5015_p8 = pneg %p5014_p7 }
 0x773   : > { %p5021_p13 = por %p5020_p12, %p5019_p11 }
 0x775   : > { %p5022_p0 = pnand %p5021_p13, %p5015_p8 }
 0x777   : > { %5025 = shalt.err (!%p5022_p0)
}
 0x778   : > { %s5065_s26 = smov 320   ;;  %s5066_s28 = smov 20   ;;  %4414 = vst.msk [vmem:[%s6633_s11 + $0x3c] sm:$0xf] %vm4398_vm3, %v4763_v37  ;;  %v4311_v45 = vpop.permute.xlu0 %4310 }
 0x779   : > { %4910 = dma.vmem_to_hbm [thread:$0]  (%p5160_p5), %s9483_s17, 5120, %s9480_s12, %s9491_s30, %s5065_s26, %s5065_s26, %s5066_s28   ;;  %v4332_v28 = vmul.f32 %v4311_v45, %v4214_v54 }
 0x77b   : > { %v4762_v59 = vpack.c.bf16 %v4332_v28, %v4332_v28 }
 0x77d   : > { %4413 = vst.msk [vmem:[%s6633_s11 + $0x38] sm:$0xf] %vm4398_vm3, %v4762_v59 }
 0x77e PF: > { %p4916_p1 = scmp.ge.s32.totalorder %s5060_s16, 2  ;;  %s4454_s15 = sand.u32 1, %s5048_s13  }
 0x77f   : > { %s4455_s22 = scalar_lea.sflag [#allocation3], %s4454_s15 }
 0x780   : > { %p4913_p2 = pnand %p4916_p1, %p5164_p6 }
 0x782   : > { %5043 = dma.done.wait (!%p4913_p2), %s4455_s22, 5120  }
 0x783   : > { %5045 = vsyncadd (!%p4913_p2), %s4455_s22, 4294962176  ;;  %s10740_s23 = sld [smem:[#allocation5_spill]]  ;;  %s10741_s15 = sld [smem:[#allocation6_spill]] }
 0x784   : > { %p21_p5 = scmp.ge.s32.totalorder %s5147_s19, 6   ;;  %s10742_s13 = smov %s5052_s14 }
 0x785   : > { %s10744_s16 = smov %s5147_s19 }
 0x786   :  { %23 = sbr.rel (!%p21_p5) target bundleno = 5 (0x5), region = 115 }
 0x789   : > { %s10743_s14 = smov %s10740_s23 }
 0x78d   :  { %4468 = vsyncpa [#allocation3], 1 }
 0x78e   :  { %4470 = vsyncpa [#allocation3 + $0x1], 1 }

</bundles_post_ra>
